<compile_context>
chip_gen: v5e
topology: v5e:2x2
jax: 0.10.0
libtpu: 0.0.40
codegen_flags: <defaults>
</compile_context>

<pallas_src>
import jax
import jax.numpy as jnp
import numpy as np
from jax import lax
from jax.experimental import pallas as pl
from jax.experimental.pallas import tpu as pltpu


# ------------------------------------------------------------------ in-kernel building blocks
def _conv3x3_fused(x2d, w_ref, h, w):
    """3x3 'same' conv (padding=1, no bias) on a single image.

    x2d   : (H*W, Cin) float32, rows in row-major (h, w) order.
    w_ref : (3, 3*Cin, Cout) bf16 VMEM ref; w_ref[dy] = concat over dx of the
            (Cin, Cout) tap weights (dx-major), matching the im2col channel order.
    Returns (H*W, Cout) float32.
    """
    hw, cin = x2d.shape
    cout = w_ref.shape[-1]

    xb = x2d.astype(jnp.bfloat16)
    zrow = jnp.zeros((1, cin), jnp.bfloat16)
    # dx taps: xl[h,w] = x[h,w-1], xr[h,w] = x[h,w+1] (zero outside the row).
    # Built with a +-1 shift along the flattened row axis; the wrapped element
    # belongs to the neighbouring image row, so mask the w==0 / w==W-1 columns.
    xl = jnp.concatenate([zrow, xb[:hw - 1, :]], axis=0)
    xr = jnp.concatenate([xb[1:, :], zrow], axis=0)
    col = lax.broadcasted_iota(jnp.int32, (hw, cin), 0) % w
    xl = jnp.where(col == 0, 0.0, xl)
    xr = jnp.where(col == w - 1, 0.0, xr)

    # im2col along dx only: K = 3*Cin per MXU contraction (3 dots instead of 9).
    a3 = jnp.concatenate([xl, xb, xr], axis=-1)                        # (HW, 3*Cin) bf16

    p0 = jnp.dot(a3, w_ref[0], preferred_element_type=jnp.float32)     # dy tap: row h-1
    p1 = jnp.dot(a3, w_ref[1], preferred_element_type=jnp.float32)     # dy tap: row h
    p2 = jnp.dot(a3, w_ref[2], preferred_element_type=jnp.float32)     # dy tap: row h+1

    zrows = jnp.zeros((w, cout), jnp.float32)
    out = p1
    out = out + jnp.concatenate([zrows, p0[:hw - w, :]], axis=0)       # out(h) += p0(h-1)
    out = out + jnp.concatenate([p2[w:, :], zrows], axis=0)            # out(h) += p2(h+1)
    return out


def _scse(x2d, w1, b1, w2, b2_row, ws_row, bs_11, inv_hw):
    """SCSE attention on one image.  x2d: (H*W, C) f32 -> (H*W, C) f32."""
    pooled = jnp.sum(x2d, axis=0, keepdims=True) * inv_hw                       # (1, C)
    hid = jnp.maximum(
        jnp.dot(pooled, w1, preferred_element_type=jnp.float32) + b1, 0.0)      # (1, Cr)
    cgate = jax.nn.sigmoid(
        jnp.dot(hid, w2, preferred_element_type=jnp.float32) + b2_row)          # (1, C)
    sgate = jax.nn.sigmoid(
        jnp.sum(x2d * ws_row, axis=-1, keepdims=True) + bs_11)                  # (HW, 1)
    return x2d * (cgate + sgate)          # == x * cSE(x) + x * sSE(x)


# ------------------------------------------------------------------------------------ kernel
def decoder_block_kernel(x_ref, c1w_ref, c2w_ref,
                         a1w1_ref, a1w2_ref, a1b1_ref,
                         a2w1_ref, a2w2_ref, a2b1_ref,
                         vin_ref, vout_ref, o_ref):
    h, w, cin = x_ref.shape
    cout = o_ref.shape[-1]
    hw = h * w
    inv_hw = 1.0 / float(hw)

    x = x_ref[...].reshape(hw, cin).astype(jnp.float32)

    # attention1 (SCSE over concatenated channels)
    x = _scse(x, a1w1_ref[...], a1b1_ref[...], a1w2_ref[...],
              vin_ref[0:1, :], vin_ref[1:2, :], vin_ref[2:3, 0:1], inv_hw)

    # conv1: 3x3 conv -> folded BN -> ReLU
    y = _conv3x3_fused(x, c1w_ref, h, w)
    y = jnp.maximum(y * vout_ref[0:1, :] + vout_ref[1:2, :], 0.0)

    # conv2: 3x3 conv -> folded BN -> ReLU
    y = _conv3x3_fused(y, c2w_ref, h, w)
    y = jnp.maximum(y * vout_ref[2:3, :] + vout_ref[3:4, :], 0.0)

    # attention2 (SCSE over output channels)
    y = _scse(y, a2w1_ref[...], a2b1_ref[...], a2w2_ref[...],
              vout_ref[4:5, :], vout_ref[5:6, :], vout_ref[6:7, 0:1], inv_hw)

    o_ref[...] = y.reshape(h, w, cout).astype(o_ref.dtype)


# ------------------------------------------------------------------------------ JAX-level glue
def _bilinear_resize_nhwc(x, out_h, out_w):
    """PyTorch F.interpolate(..., mode='bilinear', align_corners=False), NHWC layout."""
    n, h, w, c = x.shape
    scale_h = h / out_h
    scale_w = w / out_w
    ys = jnp.maximum((jnp.arange(out_h, dtype=jnp.float32) + 0.5) * scale_h - 0.5, 0.0)
    xs = jnp.maximum((jnp.arange(out_w, dtype=jnp.float32) + 0.5) * scale_w - 0.5, 0.0)
    y0 = jnp.minimum(jnp.floor(ys).astype(jnp.int32), h - 1)
    x0 = jnp.minimum(jnp.floor(xs).astype(jnp.int32), w - 1)
    y1 = jnp.minimum(y0 + 1, h - 1)
    x1 = jnp.minimum(x0 + 1, w - 1)
    wy = (ys - y0.astype(jnp.float32)).reshape(1, out_h, 1, 1)
    wx = (xs - x0.astype(jnp.float32)).reshape(1, 1, out_w, 1)
    ia = x[:, y0[:, None], x0[None, :], :]
    ib = x[:, y0[:, None], x1[None, :], :]
    ic = x[:, y1[:, None], x0[None, :], :]
    id_ = x[:, y1[:, None], x1[None, :], :]
    return (ia * (1 - wy) * (1 - wx) + ib * (1 - wy) * wx
            + ic * wy * (1 - wx) + id_ * wy * wx)


def _upsample_concat_nhwc(x_nchw, skip_nchw):
    """Upsample x to skip's spatial size and concat channels, built directly in NHWC."""
    _, _, h, w = skip_nchw.shape
    x_nhwc = jnp.transpose(x_nchw, (0, 2, 3, 1))
    skip_nhwc = jnp.transpose(skip_nchw, (0, 2, 3, 1))
    x_up = _bilinear_resize_nhwc(x_nhwc, h, w)
    return jnp.concatenate([x_up, skip_nhwc], axis=-1)


def _pack_params(p):
    """Pack raw parameters into the kernel layout: dx-fused bf16 conv weights and the
    per-channel vectors grouped into two small f32 arrays (fewer DMAs)."""
    cin, cout = p["c1_w"].shape[1], p["c1_w"].shape[2]
    c1 = p["c1_w"].reshape(3, 3 * cin, cout).astype(jnp.bfloat16)
    c2 = p["c2_w"].reshape(3, 3 * cout, cout).astype(jnp.bfloat16)
    row_bs1 = jnp.zeros((cin,), jnp.float32).at[0].set(p["a1_bs"].reshape(()))
    row_bs2 = jnp.zeros((cout,), jnp.float32).at[0].set(p["a2_bs"].reshape(()))
    vin = jnp.stack([p["a1_b2"].reshape(-1), p["a1_ws"].reshape(-1), row_bs1])
    vout = jnp.stack([p["bn1_s"].reshape(-1), p["bn1_b"].reshape(-1),
                      p["bn2_s"].reshape(-1), p["bn2_b"].reshape(-1),
                      p["a2_b2"].reshape(-1), p["a2_ws"].reshape(-1), row_bs2])
    return (c1, c2,
            p["a1_w1"], p["a1_w2"], p["a1_b1"],
            p["a2_w1"], p["a2_w2"], p["a2_b1"],
            vin, vout)


def decoder_block(x_nchw, skip_nchw, params):
    """DecoderBlock.forward(x, skip) — NCHW in, NCHW out, fused Pallas kernel inside."""
    x_nhwc = _upsample_concat_nhwc(x_nchw, skip_nchw)
    n, h, w, cin = x_nhwc.shape
    cout = params["c1_w"].shape[-1]
    packed = _pack_params(params)

    def full_spec(a):
        nd = a.ndim
        return pl.BlockSpec(a.shape, lambda b, _n=nd: (0,) * _n)   # resident across grid

    in_specs = ([pl.BlockSpec((None, h, w, cin), lambda b: (b, 0, 0, 0))]
                + [full_spec(a) for a in packed])

    out_nhwc = pl.pallas_call(
        decoder_block_kernel,
        grid=(n,),                                   # one image per grid step, pipelined
        out_shape=jax.ShapeDtypeStruct((n, h, w, cout), jnp.float32),
        in_specs=in_specs,
        out_specs=pl.BlockSpec((None, h, w, cout), lambda b: (b, 0, 0, 0)),
        compiler_params=pltpu.CompilerParams(
            dimension_semantics=("parallel",),       # lets v7x's 2 TCs split the batch
            vmem_limit_bytes=32 * 1024 * 1024),
    )(x_nhwc, *packed)
    return jnp.transpose(out_nhwc, (0, 3, 1, 2))


# ------------------------------------------------------------------------ pure-JAX reference
def decoder_block_reference(x_nchw, skip_nchw, p):
    x = _upsample_concat_nhwc(x_nchw, skip_nchw)     # (N, H, W, Cin) f32

    def scse(x4, w1, b1, w2, b2, ws, bs):
        pooled = jnp.mean(x4, axis=(1, 2))                                   # (N, C)
        hid = jnp.maximum(pooled @ w1 + b1, 0.0)
        cg = jax.nn.sigmoid(hid @ w2 + b2)
        sg = jax.nn.sigmoid(jnp.sum(x4 * ws.reshape(1, 1, 1, -1),
                                    axis=-1, keepdims=True) + bs.reshape(1, 1, 1, 1))
        return x4 * cg[:, None, None, :] + x4 * sg

    def conv3(x4, w9):
        n_, h_, w_, cin = x4.shape
        cout = w9.shape[-1]
        xp = jnp.pad(x4, ((0, 0), (1, 1), (1, 1), (0, 0)))
        out = jnp.zeros((n_, h_, w_, cout), jnp.float32)
        for dy in range(3):
            for dx in range(3):
                out = out + xp[:, dy:dy + h_, dx:dx + w_, :] @ w9[dy * 3 + dx]
        return out

    x = scse(x, p["a1_w1"], p["a1_b1"], p["a1_w2"], p["a1_b2"], p["a1_ws"], p["a1_bs"])
    x = jnp.maximum(conv3(x, p["c1_w"]) * p["bn1_s"].reshape(1, 1, 1, -1)
                    + p["bn1_b"].reshape(1, 1, 1, -1), 0.0)
    x = jnp.maximum(conv3(x, p["c2_w"]) * p["bn2_s"].reshape(1, 1, 1, -1)
                    + p["bn2_b"].reshape(1, 1, 1, -1), 0.0)
    x = scse(x, p["a2_w1"], p["a2_b1"], p["a2_w2"], p["a2_b2"], p["a2_ws"], p["a2_bs"])
    return jnp.transpose(x, (0, 3, 1, 2))


# ---------------------------------------------------------------------------------- params
def make_params(keys, cin, cout, reduction=16):
    cr_in = max(cin // reduction, 1)
    cr_out = max(cout // reduction, 1)
    kit = iter(keys)

    def nrm(shape, scale=0.1):
        return jax.random.normal(next(kit), shape, jnp.float32) * scale

    def bn_fold(c):
        gamma = 1.0 + nrm((1, c))
        beta = nrm((1, c))
        mean = nrm((1, c))
        var = jnp.abs(nrm((1, c))) + 1.0
        scale = gamma / jnp.sqrt(var + 1e-5)
        bias = beta - mean * scale
        return scale, bias

    bn1_s, bn1_b = bn_fold(cout)
    bn2_s, bn2_b = bn_fold(cout)
    return dict(
        a1_w1=nrm((cin, cr_in)), a1_b1=nrm((1, cr_in)),
        a1_w2=nrm((cr_in, cin)), a1_b2=nrm((1, cin)),
        a1_ws=nrm((1, cin)), a1_bs=nrm((1, 1)),
        c1_w=nrm((9, cin, cout)),            # (dy*3+dx, Cin, Cout)
        bn1_s=bn1_s, bn1_b=bn1_b,
        c2_w=nrm((9, cout, cout)),
        bn2_s=bn2_s, bn2_b=bn2_b,
        a2_w1=nrm((cout, cr_out)), a2_b1=nrm((1, cr_out)),
        a2_w2=nrm((cr_out, cout)), a2_b2=nrm((1, cout)),
        a2_ws=nrm((1, cout)), a2_bs=nrm((1, 1)),
    )


if __name__ == "__main__":
    key = jax.random.PRNGKey(0)
    keys = jax.random.split(key, 32)

    N = 2
    Cx, Cs = 16, 16             # decoder-path channels / skip channels
    Cin, Cout = Cx + Cs, 32     # DecoderBlock(in_channels=32, out_channels=32)
    H0, W0 = 8, 8               # decoder-path spatial size (upsampled x2 to skip)
    H, W = 16, 16               # skip spatial size

    x = jax.random.normal(keys[0], (N, Cx, H0, W0), jnp.float32)
    skip = jax.random.normal(keys[1], (N, Cs, H, W), jnp.float32)
    params = make_params(keys[2:], Cin, Cout, reduction=16)

    out = jax.block_until_ready(decoder_block(x, skip, params))
    assert out.shape == (N, Cout, H, W)

    ref = jax.block_until_ready(decoder_block_reference(x, skip, params))
    # bf16 MXU operands (f32 accumulation) vs. the pure-f32 reference.
    np.testing.assert_allclose(np.asarray(out), np.asarray(ref), atol=3e-2, rtol=3e-2)

    print("KERNEL_OK")
</pallas_src>

<mosaic_0001>
module attributes {stable_mosaic.version = 11 : i64} {
  func.func @decoder_block_kernel(%arg0: i32, %arg1: memref<1x16x16x32xf32, #tpu.memory_space<vmem>>, %arg2: memref<3x96x32xbf16, #tpu.memory_space<vmem>>, %arg3: memref<3x96x32xbf16, #tpu.memory_space<vmem>>, %arg4: memref<32x2xf32, #tpu.memory_space<vmem>>, %arg5: memref<2x32xf32, #tpu.memory_space<vmem>>, %arg6: memref<1x2xf32, #tpu.memory_space<vmem>>, %arg7: memref<32x2xf32, #tpu.memory_space<vmem>>, %arg8: memref<2x32xf32, #tpu.memory_space<vmem>>, %arg9: memref<1x2xf32, #tpu.memory_space<vmem>>, %arg10: memref<3x32xf32, #tpu.memory_space<vmem>>, %arg11: memref<7x32xf32, #tpu.memory_space<vmem>>, %arg12: memref<1x16x16x32xf32, #tpu.memory_space<vmem>>) attributes {dimension_semantics = [#tpu.dimension_semantics<parallel>], iteration_bounds = array<i64: 2>, scalar_prefetch = 0 : i64, scratch_operands = 0 : i64, tpu.core_type = #tpu.core_type<tc>, window_params = [{transform_indices = @transform_0, window_bounds = array<i64: 1, 16, 16, 32>}, {pipeline_mode = #tpu.pipeline_mode<synchronous>, transform_indices = @transform_1, window_bounds = array<i64: 3, 96, 32>}, {pipeline_mode = #tpu.pipeline_mode<synchronous>, transform_indices = @transform_2, window_bounds = array<i64: 3, 96, 32>}, {pipeline_mode = #tpu.pipeline_mode<synchronous>, transform_indices = @transform_3, window_bounds = array<i64: 32, 2>}, {pipeline_mode = #tpu.pipeline_mode<synchronous>, transform_indices = @transform_4, window_bounds = array<i64: 2, 32>}, {pipeline_mode = #tpu.pipeline_mode<synchronous>, transform_indices = @transform_5, window_bounds = array<i64: 1, 2>}, {pipeline_mode = #tpu.pipeline_mode<synchronous>, transform_indices = @transform_6, window_bounds = array<i64: 32, 2>}, {pipeline_mode = #tpu.pipeline_mode<synchronous>, transform_indices = @transform_7, window_bounds = array<i64: 2, 32>}, {pipeline_mode = #tpu.pipeline_mode<synchronous>, transform_indices = @transform_8, window_bounds = array<i64: 1, 2>}, {pipeline_mode = #tpu.pipeline_mode<synchronous>, transform_indices = @transform_9, window_bounds = array<i64: 3, 32>}, {pipeline_mode = #tpu.pipeline_mode<synchronous>, transform_indices = @transform_10, window_bounds = array<i64: 7, 32>}, {transform_indices = @transform_11, window_bounds = array<i64: 1, 16, 16, 32>}]} {
    %c0 = arith.constant 0 : index
    %c0_0 = arith.constant 0 : index
    %c0_1 = arith.constant 0 : index
    %c0_2 = arith.constant 0 : index
    %0 = vector.load %arg1[%c0, %c0_0, %c0_1, %c0_2] : memref<1x16x16x32xf32, #tpu.memory_space<vmem>>, vector<1x16x16x32xf32>
    %1 = vector.shape_cast %0 : vector<1x16x16x32xf32> to vector<16x16x32xf32>
    %2 = vector.shape_cast %1 : vector<16x16x32xf32> to vector<256x32xf32>
    %c0_3 = arith.constant 0 : index
    %c0_4 = arith.constant 0 : index
    %3 = vector.load %arg4[%c0_3, %c0_4] : memref<32x2xf32, #tpu.memory_space<vmem>>, vector<32x2xf32>
    %c0_5 = arith.constant 0 : index
    %c0_6 = arith.constant 0 : index
    %4 = vector.load %arg6[%c0_5, %c0_6] : memref<1x2xf32, #tpu.memory_space<vmem>>, vector<1x2xf32>
    %c0_7 = arith.constant 0 : index
    %c0_8 = arith.constant 0 : index
    %5 = vector.load %arg5[%c0_7, %c0_8] : memref<2x32xf32, #tpu.memory_space<vmem>>, vector<2x32xf32>
    %c0_9 = arith.constant 0 : index
    %c0_10 = arith.constant 0 : index
    %6 = vector.load %arg10[%c0_9, %c0_10] : memref<3x32xf32, #tpu.memory_space<vmem>>, vector<1x32xf32>
    %c1 = arith.constant 1 : index
    %c0_11 = arith.constant 0 : index
    %7 = vector.load %arg10[%c1, %c0_11] : memref<3x32xf32, #tpu.memory_space<vmem>>, vector<1x32xf32>
    %c2 = arith.constant 2 : index
    %c0_12 = arith.constant 0 : index
    %8 = vector.load %arg10[%c2, %c0_12] : memref<3x32xf32, #tpu.memory_space<vmem>>, vector<1x1xf32>
    %cst = arith.constant dense<0.000000e+00> : vector<32xf32>
    %9 = vector.multi_reduction <add>, %2, %cst [0] : vector<256x32xf32> to vector<32xf32>
    %10 = vector.shape_cast %9 : vector<32xf32> to vector<1x32xf32>
    %cst_13 = arith.constant 3.906250e-03 : f32
    %11 = vector.broadcast %cst_13 : f32 to vector<1x32xf32>
    %12 = arith.mulf %10, %11 : vector<1x32xf32>
    %cst_14 = arith.constant dense<0.000000e+00> : vector<1x2xf32>
    %13 = tpu.matmul %12, %3, %cst_14 {dimension_numbers = #tpu.dot_dimension_numbers<[1], [0], [0], [1], [0, 0, 1, 1], [], []>} : vector<1x32xf32>, vector<32x2xf32>, vector<1x2xf32> -> vector<1x2xf32>
    %14 = arith.addf %13, %4 : vector<1x2xf32>
    %cst_15 = arith.constant 0.000000e+00 : f32
    %15 = vector.broadcast %cst_15 : f32 to vector<1x2xf32>
    %16 = arith.maximumf %14, %15 : vector<1x2xf32>
    %cst_16 = arith.constant dense<0.000000e+00> : vector<1x32xf32>
    %17 = tpu.matmul %16, %5, %cst_16 {dimension_numbers = #tpu.dot_dimension_numbers<[1], [0], [0], [1], [0, 0, 1, 1], [], []>} : vector<1x2xf32>, vector<2x32xf32>, vector<1x32xf32> -> vector<1x32xf32>
    %18 = arith.addf %17, %6 : vector<1x32xf32>
    %19 = arith.negf %18 : vector<1x32xf32>
    %20 = math.exp %19 : vector<1x32xf32>
    %cst_17 = arith.constant 1.000000e+00 : f32
    %21 = vector.broadcast %cst_17 : f32 to vector<1x32xf32>
    %22 = arith.addf %21, %20 : vector<1x32xf32>
    %23 = arith.divf %21, %22 : vector<1x32xf32>
    %24 = vector.broadcast %7 : vector<1x32xf32> to vector<256x32xf32>
    %25 = arith.mulf %2, %24 : vector<256x32xf32>
    %cst_18 = arith.constant dense<0.000000e+00> : vector<256xf32>
    %26 = vector.multi_reduction <add>, %25, %cst_18 [1] : vector<256x32xf32> to vector<256xf32>
    %27 = vector.shape_cast %26 : vector<256xf32> to vector<256x1xf32>
    %28 = vector.broadcast %8 : vector<1x1xf32> to vector<256x1xf32>
    %29 = arith.addf %27, %28 : vector<256x1xf32>
    %30 = arith.negf %29 : vector<256x1xf32>
    %31 = math.exp %30 : vector<256x1xf32>
    %cst_19 = arith.constant 1.000000e+00 : f32
    %32 = vector.broadcast %cst_19 : f32 to vector<256x1xf32>
    %33 = arith.addf %32, %31 : vector<256x1xf32>
    %34 = arith.divf %32, %33 : vector<256x1xf32>
    %35 = vector.broadcast %23 : vector<1x32xf32> to vector<256x32xf32>
    %36 = vector.broadcast %34 : vector<256x1xf32> to vector<256x32xf32>
    %37 = arith.addf %35, %36 : vector<256x32xf32>
    %38 = arith.mulf %2, %37 : vector<256x32xf32>
    %39 = arith.truncf %38 : vector<256x32xf32> to vector<256x32xbf16>
    %cst_20 = arith.constant 0.000000e+00 : bf16
    %40 = vector.broadcast %cst_20 : bf16 to vector<1x32xbf16>
    %41 = vector.extract_strided_slice %39 {offsets = [0, 0], sizes = [255, 32], strides = [1, 1]} : vector<256x32xbf16> to vector<255x32xbf16>
    %42 = tpu.concatenate %40, %41 in 0 : vector<1x32xbf16>, vector<255x32xbf16> -> vector<256x32xbf16>
    %43 = vector.extract_strided_slice %39 {offsets = [1, 0], sizes = [255, 32], strides = [1, 1]} : vector<256x32xbf16> to vector<255x32xbf16>
    %44 = tpu.concatenate %43, %40 in 0 : vector<255x32xbf16>, vector<1x32xbf16> -> vector<256x32xbf16>
    %45 = tpu.iota {dimensions = array<i32: 0>} : vector<256x32xi32>
    %c16_i32 = arith.constant 16 : i32
    %c0_i32 = arith.constant 0 : i32
    %46 = arith.cmpi eq, %c16_i32, %c0_i32 : i32
    %c1_i32 = arith.constant 1 : i32
    %47 = arith.select %46, %c1_i32, %c16_i32 : i32
    %48 = vector.broadcast %47 : i32 to vector<256x32xi32>
    %49 = arith.remsi %45, %48 : vector<256x32xi32>
    %c0_i32_21 = arith.constant 0 : i32
    %50 = vector.broadcast %c0_i32_21 : i32 to vector<256x32xi32>
    %51 = arith.cmpi ne, %49, %50 : vector<256x32xi32>
    %c0_i32_22 = arith.constant 0 : i32
    %52 = vector.broadcast %c0_i32_22 : i32 to vector<256x32xi32>
    %53 = arith.cmpi slt, %49, %52 : vector<256x32xi32>
    %c0_i32_23 = arith.constant 0 : i32
    %54 = arith.cmpi slt, %47, %c0_i32_23 : i32
    %55 = vector.broadcast %54 : i1 to vector<256x32xi1>
    %56 = vector.broadcast %55 : vector<256x32xi1> to vector<256x32xi1>
    %57 = arith.xori %53, %56 : vector<256x32xi1>
    %58 = arith.andi %57, %51 : vector<256x32xi1>
    %59 = vector.broadcast %47 : i32 to vector<256x32xi32>
    %60 = arith.addi %49, %59 : vector<256x32xi32>
    %61 = arith.select %58, %60, %49 : vector<256x32xi1>, vector<256x32xi32>
    %c0_i32_24 = arith.constant 0 : i32
    %62 = vector.broadcast %c0_i32_24 : i32 to vector<256x32xi32>
    %63 = arith.cmpi eq, %61, %62 : vector<256x32xi32>
    %cst_25 = arith.constant 0.000000e+00 : f32
    %64 = arith.truncf %cst_25 : f32 to bf16
    %65 = vector.broadcast %64 : bf16 to vector<256x32xbf16>
    %66 = arith.select %63, %65, %42 : vector<256x32xi1>, vector<256x32xbf16>
    %c15_i32 = arith.constant 15 : i32
    %67 = vector.broadcast %c15_i32 : i32 to vector<256x32xi32>
    %68 = arith.cmpi eq, %61, %67 : vector<256x32xi32>
    %cst_26 = arith.constant 0.000000e+00 : f32
    %69 = arith.truncf %cst_26 : f32 to bf16
    %70 = vector.broadcast %69 : bf16 to vector<256x32xbf16>
    %71 = arith.select %68, %70, %44 : vector<256x32xi1>, vector<256x32xbf16>
    %72 = tpu.concatenate %66, %39, %71 in 1 : vector<256x32xbf16>, vector<256x32xbf16>, vector<256x32xbf16> -> vector<256x96xbf16>
    %c0_27 = arith.constant 0 : index
    %c0_28 = arith.constant 0 : index
    %c0_29 = arith.constant 0 : index
    %73 = vector.load %arg2[%c0_27, %c0_28, %c0_29] : memref<3x96x32xbf16, #tpu.memory_space<vmem>>, vector<1x96x32xbf16>
    %74 = vector.shape_cast %73 : vector<1x96x32xbf16> to vector<96x32xbf16>
    %cst_30 = arith.constant dense<0.000000e+00> : vector<256x32xf32>
    %75 = tpu.matmul %72, %74, %cst_30 {dimension_numbers = #tpu.dot_dimension_numbers<[1], [0], [0], [1], [0, 0, 1, 1], [], []>} : vector<256x96xbf16>, vector<96x32xbf16>, vector<256x32xf32> -> vector<256x32xf32>
    %c1_31 = arith.constant 1 : index
    %c0_32 = arith.constant 0 : index
    %c0_33 = arith.constant 0 : index
    %76 = vector.load %arg2[%c1_31, %c0_32, %c0_33] : memref<3x96x32xbf16, #tpu.memory_space<vmem>>, vector<1x96x32xbf16>
    %77 = vector.shape_cast %76 : vector<1x96x32xbf16> to vector<96x32xbf16>
    %cst_34 = arith.constant dense<0.000000e+00> : vector<256x32xf32>
    %78 = tpu.matmul %72, %77, %cst_34 {dimension_numbers = #tpu.dot_dimension_numbers<[1], [0], [0], [1], [0, 0, 1, 1], [], []>} : vector<256x96xbf16>, vector<96x32xbf16>, vector<256x32xf32> -> vector<256x32xf32>
    %c2_35 = arith.constant 2 : index
    %c0_36 = arith.constant 0 : index
    %c0_37 = arith.constant 0 : index
    %79 = vector.load %arg2[%c2_35, %c0_36, %c0_37] : memref<3x96x32xbf16, #tpu.memory_space<vmem>>, vector<1x96x32xbf16>
    %80 = vector.shape_cast %79 : vector<1x96x32xbf16> to vector<96x32xbf16>
    %cst_38 = arith.constant dense<0.000000e+00> : vector<256x32xf32>
    %81 = tpu.matmul %72, %80, %cst_38 {dimension_numbers = #tpu.dot_dimension_numbers<[1], [0], [0], [1], [0, 0, 1, 1], [], []>} : vector<256x96xbf16>, vector<96x32xbf16>, vector<256x32xf32> -> vector<256x32xf32>
    %cst_39 = arith.constant 0.000000e+00 : f32
    %82 = vector.broadcast %cst_39 : f32 to vector<16x32xf32>
    %83 = vector.extract_strided_slice %75 {offsets = [0, 0], sizes = [240, 32], strides = [1, 1]} : vector<256x32xf32> to vector<240x32xf32>
    %84 = tpu.concatenate %82, %83 in 0 : vector<16x32xf32>, vector<240x32xf32> -> vector<256x32xf32>
    %85 = arith.addf %78, %84 : vector<256x32xf32>
    %86 = vector.extract_strided_slice %81 {offsets = [16, 0], sizes = [240, 32], strides = [1, 1]} : vector<256x32xf32> to vector<240x32xf32>
    %87 = tpu.concatenate %86, %82 in 0 : vector<240x32xf32>, vector<16x32xf32> -> vector<256x32xf32>
    %88 = arith.addf %85, %87 : vector<256x32xf32>
    %c0_40 = arith.constant 0 : index
    %c0_41 = arith.constant 0 : index
    %89 = vector.load %arg11[%c0_40, %c0_41] : memref<7x32xf32, #tpu.memory_space<vmem>>, vector<1x32xf32>
    %90 = vector.broadcast %89 : vector<1x32xf32> to vector<256x32xf32>
    %91 = arith.mulf %88, %90 : vector<256x32xf32>
    %c1_42 = arith.constant 1 : index
    %c0_43 = arith.constant 0 : index
    %92 = vector.load %arg11[%c1_42, %c0_43] : memref<7x32xf32, #tpu.memory_space<vmem>>, vector<1x32xf32>
    %93 = vector.broadcast %92 : vector<1x32xf32> to vector<256x32xf32>
    %94 = arith.addf %91, %93 : vector<256x32xf32>
    %cst_44 = arith.constant 0.000000e+00 : f32
    %95 = vector.broadcast %cst_44 : f32 to vector<256x32xf32>
    %96 = arith.maximumf %94, %95 : vector<256x32xf32>
    %97 = arith.truncf %96 : vector<256x32xf32> to vector<256x32xbf16>
    %cst_45 = arith.constant 0.000000e+00 : bf16
    %98 = vector.broadcast %cst_45 : bf16 to vector<1x32xbf16>
    %99 = vector.extract_strided_slice %97 {offsets = [0, 0], sizes = [255, 32], strides = [1, 1]} : vector<256x32xbf16> to vector<255x32xbf16>
    %100 = tpu.concatenate %98, %99 in 0 : vector<1x32xbf16>, vector<255x32xbf16> -> vector<256x32xbf16>
    %101 = vector.extract_strided_slice %97 {offsets = [1, 0], sizes = [255, 32], strides = [1, 1]} : vector<256x32xbf16> to vector<255x32xbf16>
    %102 = tpu.concatenate %101, %98 in 0 : vector<255x32xbf16>, vector<1x32xbf16> -> vector<256x32xbf16>
    %103 = tpu.iota {dimensions = array<i32: 0>} : vector<256x32xi32>
    %c16_i32_46 = arith.constant 16 : i32
    %c0_i32_47 = arith.constant 0 : i32
    %104 = arith.cmpi eq, %c16_i32_46, %c0_i32_47 : i32
    %c1_i32_48 = arith.constant 1 : i32
    %105 = arith.select %104, %c1_i32_48, %c16_i32_46 : i32
    %106 = vector.broadcast %105 : i32 to vector<256x32xi32>
    %107 = arith.remsi %103, %106 : vector<256x32xi32>
    %c0_i32_49 = arith.constant 0 : i32
    %108 = vector.broadcast %c0_i32_49 : i32 to vector<256x32xi32>
    %109 = arith.cmpi ne, %107, %108 : vector<256x32xi32>
    %c0_i32_50 = arith.constant 0 : i32
    %110 = vector.broadcast %c0_i32_50 : i32 to vector<256x32xi32>
    %111 = arith.cmpi slt, %107, %110 : vector<256x32xi32>
    %c0_i32_51 = arith.constant 0 : i32
    %112 = arith.cmpi slt, %105, %c0_i32_51 : i32
    %113 = vector.broadcast %112 : i1 to vector<256x32xi1>
    %114 = vector.broadcast %113 : vector<256x32xi1> to vector<256x32xi1>
    %115 = arith.xori %111, %114 : vector<256x32xi1>
    %116 = arith.andi %115, %109 : vector<256x32xi1>
    %117 = vector.broadcast %105 : i32 to vector<256x32xi32>
    %118 = arith.addi %107, %117 : vector<256x32xi32>
    %119 = arith.select %116, %118, %107 : vector<256x32xi1>, vector<256x32xi32>
    %c0_i32_52 = arith.constant 0 : i32
    %120 = vector.broadcast %c0_i32_52 : i32 to vector<256x32xi32>
    %121 = arith.cmpi eq, %119, %120 : vector<256x32xi32>
    %cst_53 = arith.constant 0.000000e+00 : f32
    %122 = arith.truncf %cst_53 : f32 to bf16
    %123 = vector.broadcast %122 : bf16 to vector<256x32xbf16>
    %124 = arith.select %121, %123, %100 : vector<256x32xi1>, vector<256x32xbf16>
    %c15_i32_54 = arith.constant 15 : i32
    %125 = vector.broadcast %c15_i32_54 : i32 to vector<256x32xi32>
    %126 = arith.cmpi eq, %119, %125 : vector<256x32xi32>
    %cst_55 = arith.constant 0.000000e+00 : f32
    %127 = arith.truncf %cst_55 : f32 to bf16
    %128 = vector.broadcast %127 : bf16 to vector<256x32xbf16>
    %129 = arith.select %126, %128, %102 : vector<256x32xi1>, vector<256x32xbf16>
    %130 = tpu.concatenate %124, %97, %129 in 1 : vector<256x32xbf16>, vector<256x32xbf16>, vector<256x32xbf16> -> vector<256x96xbf16>
    %c0_56 = arith.constant 0 : index
    %c0_57 = arith.constant 0 : index
    %c0_58 = arith.constant 0 : index
    %131 = vector.load %arg3[%c0_56, %c0_57, %c0_58] : memref<3x96x32xbf16, #tpu.memory_space<vmem>>, vector<1x96x32xbf16>
    %132 = vector.shape_cast %131 : vector<1x96x32xbf16> to vector<96x32xbf16>
    %cst_59 = arith.constant dense<0.000000e+00> : vector<256x32xf32>
    %133 = tpu.matmul %130, %132, %cst_59 {dimension_numbers = #tpu.dot_dimension_numbers<[1], [0], [0], [1], [0, 0, 1, 1], [], []>} : vector<256x96xbf16>, vector<96x32xbf16>, vector<256x32xf32> -> vector<256x32xf32>
    %c1_60 = arith.constant 1 : index
    %c0_61 = arith.constant 0 : index
    %c0_62 = arith.constant 0 : index
    %134 = vector.load %arg3[%c1_60, %c0_61, %c0_62] : memref<3x96x32xbf16, #tpu.memory_space<vmem>>, vector<1x96x32xbf16>
    %135 = vector.shape_cast %134 : vector<1x96x32xbf16> to vector<96x32xbf16>
    %cst_63 = arith.constant dense<0.000000e+00> : vector<256x32xf32>
    %136 = tpu.matmul %130, %135, %cst_63 {dimension_numbers = #tpu.dot_dimension_numbers<[1], [0], [0], [1], [0, 0, 1, 1], [], []>} : vector<256x96xbf16>, vector<96x32xbf16>, vector<256x32xf32> -> vector<256x32xf32>
    %c2_64 = arith.constant 2 : index
    %c0_65 = arith.constant 0 : index
    %c0_66 = arith.constant 0 : index
    %137 = vector.load %arg3[%c2_64, %c0_65, %c0_66] : memref<3x96x32xbf16, #tpu.memory_space<vmem>>, vector<1x96x32xbf16>
    %138 = vector.shape_cast %137 : vector<1x96x32xbf16> to vector<96x32xbf16>
    %cst_67 = arith.constant dense<0.000000e+00> : vector<256x32xf32>
    %139 = tpu.matmul %130, %138, %cst_67 {dimension_numbers = #tpu.dot_dimension_numbers<[1], [0], [0], [1], [0, 0, 1, 1], [], []>} : vector<256x96xbf16>, vector<96x32xbf16>, vector<256x32xf32> -> vector<256x32xf32>
    %cst_68 = arith.constant 0.000000e+00 : f32
    %140 = vector.broadcast %cst_68 : f32 to vector<16x32xf32>
    %141 = vector.extract_strided_slice %133 {offsets = [0, 0], sizes = [240, 32], strides = [1, 1]} : vector<256x32xf32> to vector<240x32xf32>
    %142 = tpu.concatenate %140, %141 in 0 : vector<16x32xf32>, vector<240x32xf32> -> vector<256x32xf32>
    %143 = arith.addf %136, %142 : vector<256x32xf32>
    %144 = vector.extract_strided_slice %139 {offsets = [16, 0], sizes = [240, 32], strides = [1, 1]} : vector<256x32xf32> to vector<240x32xf32>
    %145 = tpu.concatenate %144, %140 in 0 : vector<240x32xf32>, vector<16x32xf32> -> vector<256x32xf32>
    %146 = arith.addf %143, %145 : vector<256x32xf32>
    %c2_69 = arith.constant 2 : index
    %c0_70 = arith.constant 0 : index
    %147 = vector.load %arg11[%c2_69, %c0_70] : memref<7x32xf32, #tpu.memory_space<vmem>>, vector<1x32xf32>
    %148 = vector.broadcast %147 : vector<1x32xf32> to vector<256x32xf32>
    %149 = arith.mulf %146, %148 : vector<256x32xf32>
    %c3 = arith.constant 3 : index
    %c0_71 = arith.constant 0 : index
    %150 = vector.load %arg11[%c3, %c0_71] : memref<7x32xf32, #tpu.memory_space<vmem>>, vector<1x32xf32>
    %151 = vector.broadcast %150 : vector<1x32xf32> to vector<256x32xf32>
    %152 = arith.addf %149, %151 : vector<256x32xf32>
    %cst_72 = arith.constant 0.000000e+00 : f32
    %153 = vector.broadcast %cst_72 : f32 to vector<256x32xf32>
    %154 = arith.maximumf %152, %153 : vector<256x32xf32>
    %c0_73 = arith.constant 0 : index
    %c0_74 = arith.constant 0 : index
    %155 = vector.load %arg7[%c0_73, %c0_74] : memref<32x2xf32, #tpu.memory_space<vmem>>, vector<32x2xf32>
    %c0_75 = arith.constant 0 : index
    %c0_76 = arith.constant 0 : index
    %156 = vector.load %arg9[%c0_75, %c0_76] : memref<1x2xf32, #tpu.memory_space<vmem>>, vector<1x2xf32>
    %c0_77 = arith.constant 0 : index
    %c0_78 = arith.constant 0 : index
    %157 = vector.load %arg8[%c0_77, %c0_78] : memref<2x32xf32, #tpu.memory_space<vmem>>, vector<2x32xf32>
    %c4 = arith.constant 4 : index
    %c0_79 = arith.constant 0 : index
    %158 = vector.load %arg11[%c4, %c0_79] : memref<7x32xf32, #tpu.memory_space<vmem>>, vector<1x32xf32>
    %c5 = arith.constant 5 : index
    %c0_80 = arith.constant 0 : index
    %159 = vector.load %arg11[%c5, %c0_80] : memref<7x32xf32, #tpu.memory_space<vmem>>, vector<1x32xf32>
    %c6 = arith.constant 6 : index
    %c0_81 = arith.constant 0 : index
    %160 = vector.load %arg11[%c6, %c0_81] : memref<7x32xf32, #tpu.memory_space<vmem>>, vector<1x1xf32>
    %cst_82 = arith.constant dense<0.000000e+00> : vector<32xf32>
    %161 = vector.multi_reduction <add>, %154, %cst_82 [0] : vector<256x32xf32> to vector<32xf32>
    %162 = vector.shape_cast %161 : vector<32xf32> to vector<1x32xf32>
    %cst_83 = arith.constant 3.906250e-03 : f32
    %163 = vector.broadcast %cst_83 : f32 to vector<1x32xf32>
    %164 = arith.mulf %162, %163 : vector<1x32xf32>
    %cst_84 = arith.constant dense<0.000000e+00> : vector<1x2xf32>
    %165 = tpu.matmul %164, %155, %cst_84 {dimension_numbers = #tpu.dot_dimension_numbers<[1], [0], [0], [1], [0, 0, 1, 1], [], []>} : vector<1x32xf32>, vector<32x2xf32>, vector<1x2xf32> -> vector<1x2xf32>
    %166 = arith.addf %165, %156 : vector<1x2xf32>
    %cst_85 = arith.constant 0.000000e+00 : f32
    %167 = vector.broadcast %cst_85 : f32 to vector<1x2xf32>
    %168 = arith.maximumf %166, %167 : vector<1x2xf32>
    %cst_86 = arith.constant dense<0.000000e+00> : vector<1x32xf32>
    %169 = tpu.matmul %168, %157, %cst_86 {dimension_numbers = #tpu.dot_dimension_numbers<[1], [0], [0], [1], [0, 0, 1, 1], [], []>} : vector<1x2xf32>, vector<2x32xf32>, vector<1x32xf32> -> vector<1x32xf32>
    %170 = arith.addf %169, %158 : vector<1x32xf32>
    %171 = arith.negf %170 : vector<1x32xf32>
    %172 = math.exp %171 : vector<1x32xf32>
    %cst_87 = arith.constant 1.000000e+00 : f32
    %173 = vector.broadcast %cst_87 : f32 to vector<1x32xf32>
    %174 = arith.addf %173, %172 : vector<1x32xf32>
    %175 = arith.divf %173, %174 : vector<1x32xf32>
    %176 = vector.broadcast %159 : vector<1x32xf32> to vector<256x32xf32>
    %177 = arith.mulf %154, %176 : vector<256x32xf32>
    %cst_88 = arith.constant dense<0.000000e+00> : vector<256xf32>
    %178 = vector.multi_reduction <add>, %177, %cst_88 [1] : vector<256x32xf32> to vector<256xf32>
    %179 = vector.shape_cast %178 : vector<256xf32> to vector<256x1xf32>
    %180 = vector.broadcast %160 : vector<1x1xf32> to vector<256x1xf32>
    %181 = arith.addf %179, %180 : vector<256x1xf32>
    %182 = arith.negf %181 : vector<256x1xf32>
    %183 = math.exp %182 : vector<256x1xf32>
    %cst_89 = arith.constant 1.000000e+00 : f32
    %184 = vector.broadcast %cst_89 : f32 to vector<256x1xf32>
    %185 = arith.addf %184, %183 : vector<256x1xf32>
    %186 = arith.divf %184, %185 : vector<256x1xf32>
    %187 = vector.broadcast %175 : vector<1x32xf32> to vector<256x32xf32>
    %188 = vector.broadcast %186 : vector<256x1xf32> to vector<256x32xf32>
    %189 = arith.addf %187, %188 : vector<256x32xf32>
    %190 = arith.mulf %154, %189 : vector<256x32xf32>
    %191 = vector.shape_cast %190 : vector<256x32xf32> to vector<16x16x32xf32>
    %c0_90 = arith.constant 0 : index
    %c0_91 = arith.constant 0 : index
    %c0_92 = arith.constant 0 : index
    %c0_93 = arith.constant 0 : index
    %192 = vector.load %arg12[%c0_90, %c0_91, %c0_92, %c0_93] : memref<1x16x16x32xf32, #tpu.memory_space<vmem>>, vector<1x16x16x32xf32>
    %193 = vector.shape_cast %192 : vector<1x16x16x32xf32> to vector<16x16x32xf32>
    %194 = vector.shape_cast %191 : vector<16x16x32xf32> to vector<1x16x16x32xf32>
    tpu.vector_store %arg12[%c0_90, %c0_91, %c0_92, %c0_93], %194 {strides = array<i32>} : memref<1x16x16x32xf32, #tpu.memory_space<vmem>>, vector<1x16x16x32xf32>,
    return
  }
  func.func @transform_0(%arg0: i32) -> (i32, i32, i32, i32) {
    %c0_i32 = arith.constant 0 : i32
    %c0_i32_0 = arith.constant 0 : i32
    %c0_i32_1 = arith.constant 0 : i32
    %c0_i32_2 = arith.constant 0 : i32
    return %arg0, %c0_i32, %c0_i32_0, %c0_i32_1 : i32, i32, i32, i32
  }
  func.func @transform_1(%arg0: i32) -> (i32, i32, i32) {
    %c0_i32 = arith.constant 0 : i32
    %c0_i32_0 = arith.constant 0 : i32
    %c0_i32_1 = arith.constant 0 : i32
    %c0_i32_2 = arith.constant 0 : i32
    return %c0_i32, %c0_i32_0, %c0_i32_1 : i32, i32, i32
  }
  func.func @transform_2(%arg0: i32) -> (i32, i32, i32) {
    %c0_i32 = arith.constant 0 : i32
    %c0_i32_0 = arith.constant 0 : i32
    %c0_i32_1 = arith.constant 0 : i32
    %c0_i32_2 = arith.constant 0 : i32
    return %c0_i32, %c0_i32_0, %c0_i32_1 : i32, i32, i32
  }
  func.func @transform_3(%arg0: i32) -> (i32, i32) {
    %c0_i32 = arith.constant 0 : i32
    %c0_i32_0 = arith.constant 0 : i32
    %c0_i32_1 = arith.constant 0 : i32
    return %c0_i32, %c0_i32_0 : i32, i32
  }
  func.func @transform_4(%arg0: i32) -> (i32, i32) {
    %c0_i32 = arith.constant 0 : i32
    %c0_i32_0 = arith.constant 0 : i32
    %c0_i32_1 = arith.constant 0 : i32
    return %c0_i32, %c0_i32_0 : i32, i32
  }
  func.func @transform_5(%arg0: i32) -> (i32, i32) {
    %c0_i32 = arith.constant 0 : i32
    %c0_i32_0 = arith.constant 0 : i32
    %c0_i32_1 = arith.constant 0 : i32
    return %c0_i32, %c0_i32_0 : i32, i32
  }
  func.func @transform_6(%arg0: i32) -> (i32, i32) {
    %c0_i32 = arith.constant 0 : i32
    %c0_i32_0 = arith.constant 0 : i32
    %c0_i32_1 = arith.constant 0 : i32
    return %c0_i32, %c0_i32_0 : i32, i32
  }
  func.func @transform_7(%arg0: i32) -> (i32, i32) {
    %c0_i32 = arith.constant 0 : i32
    %c0_i32_0 = arith.constant 0 : i32
    %c0_i32_1 = arith.constant 0 : i32
    return %c0_i32, %c0_i32_0 : i32, i32
  }
  func.func @transform_8(%arg0: i32) -> (i32, i32) {
    %c0_i32 = arith.constant 0 : i32
    %c0_i32_0 = arith.constant 0 : i32
    %c0_i32_1 = arith.constant 0 : i32
    return %c0_i32, %c0_i32_0 : i32, i32
  }
  func.func @transform_9(%arg0: i32) -> (i32, i32) {
    %c0_i32 = arith.constant 0 : i32
    %c0_i32_0 = arith.constant 0 : i32
    %c0_i32_1 = arith.constant 0 : i32
    return %c0_i32, %c0_i32_0 : i32, i32
  }
  func.func @transform_10(%arg0: i32) -> (i32, i32) {
    %c0_i32 = arith.constant 0 : i32
    %c0_i32_0 = arith.constant 0 : i32
    %c0_i32_1 = arith.constant 0 : i32
    return %c0_i32, %c0_i32_0 : i32, i32
  }
  func.func @transform_11(%arg0: i32) -> (i32, i32, i32, i32) {
    %c0_i32 = arith.constant 0 : i32
    %c0_i32_0 = arith.constant 0 : i32
    %c0_i32_1 = arith.constant 0 : i32
    %c0_i32_2 = arith.constant 0 : i32
    return %arg0, %c0_i32, %c0_i32_0, %c0_i32_1 : i32, i32, i32, i32
  }
}

</mosaic_0001>

<bundles_post_ra>
// kernel: tpu_custom_call.1
= control target key start
LH: loop header
LB: loop body
LE: loop exit
PB: predicated region body
PF: predicated region fallthrough
CT: control target
= control target key end

     0   :  { %16 = vsyncpa [#allocation3], 0  ;;  %s10605_s0 = inlined_call_operand.hbm [shape: f32[2,16,16,32], index: 0, kind: input, shape index: {}]   ;;  %s10606_s1 = inlined_call_operand.vmem [shape: bf16[3,96,32], index: 1, kind: input, shape index: {}]   ;;  %s10607_s2 = inlined_call_operand.vmem [shape: bf16[3,96,32], index: 2, kind: input, shape index: {}]   ;;  %s10608_s3 = inlined_call_operand.vmem [shape: f32[32,2], index: 3, kind: input, shape index: {}]   ;;  %s10609_s4 = inlined_call_operand.vmem [shape: f32[2,32], index: 4, kind: input, shape index: {}]   ;;  %s10610_s5 = inlined_call_operand.vmem [shape: f32[1,2], index: 5, kind: input, shape index: {}]   ;;  %s10611_s6 = inlined_call_operand.vmem [shape: f32[32,2], index: 6, kind: input, shape index: {}]   ;;  %s10612_s7 = inlined_call_operand.vmem [shape: f32[2,32], index: 7, kind: input, shape index: {}]   ;;  %s10613_s8 = inlined_call_operand.vmem [shape: f32[1,2], index: 8, kind: input, shape index: {}]   ;;  %s10614_s9 = inlined_call_operand.vmem [shape: f32[3,32], index: 9, kind: input, shape index: {}]   ;;  %s10615_s10 = inlined_call_operand.vmem [shape: f32[7,32], index: 10, kind: input, shape index: {}]   ;;  %s10616_s11 = inlined_call_operand.hbm [shape: f32[2,16,16,32], index: 11, kind: output, shape index: {}]  }
   0x1   :  { %18 = vsyncpa [#allocation3 + $0x1], 0 }
   0x2   :  { %19 = vsyncpa [#allocation4], 0 }
   0x3   :  { %21 = vsyncpa [#allocation4 + $0x1], 0  ;;  %s6993_s17 = smov 0   ;;  %s6995_s18 = smov 0  }
   0x4   :  { %s6997_s19 = smov 0   ;;  %s6999_s20 = smov 0  }
   0x5 LB: > { %10676 = sst [smem:[#allocation8_spill]] %s6911_s17  ;;  %s7014_s21 = sadd.s32 4294967295, %s6923_s20   ;;  %s6923_s20 = sphi %s6999_s20, %s11220_s20   ;;  %s6919_s19 = sphi %s6997_s19, %s11222_s19   ;;  %s6915_s18 = sphi %s6995_s18, %s11224_s18   ;;  %s6911_s17 = sphi %s6993_s17, %s11223_s17  }
   0x6   : > { %10677 = sst [smem:[#allocation9_spill]] %s6919_s19  ;;  %s5959_s22 = sadd.s32 4294967294, %s6923_s20  }
   0x7   : > { %s7018_s23 = sadd.s32 1, %s6923_s20   ;;  %s34_s24 = sadd.s32 1, %s6919_s19 }
   0x8   : > { %10678 = sst [smem:[#allocation10_spill]] %s7018_s23  ;;  %s31_s25 = ssub.s32 %s6923_s20, %s7018_s23 }
   0x9   : > { %p41_p0 = scmp.ne.s32.totalorder %s6919_s19, %s6915_s18  ;;  %p32_p1 = scmp.eq.s32.totalorder %s31_s25, 0 }
   0xa   : > { %p42_p2 = scmp.eq.s32.totalorder %s6923_s20, 0  ;;  %p47_p3 = scmp.ne.s32.totalorder %s6915_s18, %s6911_s17 }
   0xb   : > { %p48_p4 = scmp.eq.s32.totalorder %s7014_s21, 0  ;;  %p281_p7 = scmp.eq.s32.totalorder %s7014_s21, 1 }
   0xc   : > { %s7030_s26 = scalar_select %p32_p1, %s6919_s19, %s34_s24  }
   0xd   : > { %p7032_p5 = por %p42_p2, %p41_p0  ;;  %p7036_p6 = por %p48_p4, %p47_p3 }
   0xe   : > { %10679 = sst [smem:[#allocation11_spill]] %s7030_s26  ;;  %p287_p8 = scmp.eq.s32.totalorder %s5959_s22, 1 }
   0xf   : > { %p6459_p10 = scmp.lt.s32.totalorder %s6923_s20, 2  ;;  %p7043_p11 = por %p281_p7, %p41_p0 }
  0x10   : > { %p7047_p12 = por %p287_p8, %p47_p3  ;;  %s337_s12 = sand.u32 1, %s6919_s19  }
  0x11   : > { %s6397_s13 = sshll.u32 %s6923_s20, 8  ;;  %s5962_s14 = sshll.u32 %s337_s12, 8 }
  0x12   : > { %s10683_s30 = scalar_select %p7047_p12, 1, 0 }
  0x13   : > { %s346_s24 = scalar_lea.hbm %s10605_s0, %s6397_s13  ;;  %s341_s22 = scalar_lea.vmem [#allocation2], %s5962_s14 }
  0x14   : > { %10684 = sst [smem:[#allocation12_spill]] %s10683_s30  ;;  %s347_s25 = sshll.u32 %s346_s24, 4  ;;  %s348_s25 = int_to_ptr.hbm [resolvable:$true] %s347_s25 }
  0x15   : > { %s349_s26 = sshll.u32 %s341_s22, 4  ;;  %p7058_p13 = pnand %p6459_p10, %p7032_p5  ;;  %s350_s26 = int_to_ptr.vmem [resolvable:$true] %s349_s26 }
  0x16   : > { %p5965_p0 = scmp.ge.s32.totalorder %s6923_s20, 1  ;;  %p357_p1 = scmp.lt.s32.totalorder %s6923_s20, 3 }
  0x17   : > { %s338_s19 = scalar_lea.sflag [#allocation3], %s337_s12  ;;  %s6827_s30 = sshra.s32 %s348_s25, 4  ;;  %s6828_s30 = int_to_ptr.hbm [resolvable:$true] %s6827_s30 }
  0x18   : > { %s6829_s17 = scalar_lea.hbm %s6828_s30, 256  ;;  %p6831_p3 = pneg %p7058_p13 }
  0x19   : > { %p6830_p2 = scmp.ne.s32.totalorder %s6828_s30, %s6829_s17  ;;  %s6834_s27 = scalar_lea.hbm %s10605_s0, 512 }
  0x1a   : > { %p6835_p5 = scmp.lt.s32.totalorder %s6828_s30, %s10605_s0  ;;  %p6836_p8 = scmp.lt.s32.totalorder %s6834_s27, %s6829_s17 }
  0x1b   : > { %p6832_p4 = pnand %p6831_p3, %p6830_p2 }
  0x1c   : > { %p6837_p10 = por %p6836_p8, %p6835_p5 }
  0x1d   : > { %p6833_p7 = pneg %p6832_p4 }
  0x1f   : > { %p6838_p9 = pnand %p6837_p10, %p6833_p7 }
  0x21   : > { %6841 = shalt.err (!%p6838_p9)
}
  0x22   : > { %s6925_s12 = smov 128   ;;  %s6926_s24 = smov 8  }
  0x23   : > { %6454 = dma.hbm_to_vmem [thread:$0]  (!%p7058_p13), %s348_s25, 4096, %s350_s26, %s338_s19, %s6925_s12, %s6925_s12, %s6926_s24  }
  0x24   : > { %p358_p2 = pnand %p5965_p0, %p357_p1 }
  0x26   : > { %361 = sbr.rel (%p358_p2) target bundleno = 1950 (0x79e), region = 64 }
  0x2b   : > { %s7079_s22 = sand.u32 1, %s6915_s18  }
  0x2c   : > { %s5966_s17 = sshll.u32 %s7079_s22, 8  ;;  %s364_s30 = scalar_lea.sflag [#allocation3], %s7079_s22 }
  0x2d   : > { %s7085_s13 = scalar_lea.vmem [#allocation2], %s5966_s17 }
  0x2e   : > { %6902 = dma.done.wait (%p7036_p6), %s364_s30, 4096  }
  0x2f   : > { %6904 = vsyncadd (%p7036_p6), %s364_s30, 4294963200  ;;  %vm10626_vm0 = vcmask 261120   ;;  %v7094_v0 = vld [vmem:[%s10614_s9 + $0x1] ss:$0 sm:$0xff]  ;;  %v412_v1 = vld [vmem:[%s7085_s13 + $0x10] sm:$0xff]  ;;  %vm10623_vm1 = vcmask 1041408  }
  0x30   : > { %v410_v2 = vld [vmem:[%s7085_s13] sm:$0xff]  ;;  %v445_v3 = vld [vmem:[%s10608_s3 + $0x18] sm:$0xff]  ;;  %v596_v4 = vmul.f32 %v7094_v0, %v412_v1  ;;  %v444_v6 = vld [vmem:[%s10608_s3 + $0x10] sm:$0xff]  ;;  %v455_v16 = vsel %vm10626_vm0, %v412_v1, 0.0  ;;  %s6929_s27 = smov 32   ;;  %s6930_s15 = smov 64  }
  0x31   : > { %v594_v5 = vmul.f32 %v7094_v0, %v410_v2  ;;  %537 = vmatpush.msra.mxu0 %v445_v3  ;;  %v414_v7 = vld [vmem:[%s7085_s13 + $0x20] sm:$0xff]  ;;  %v452_v8 = vsel %vm10626_vm0, %v410_v2, 0.0  ;;  %v411_v10 = vld [vmem:[%s7085_s13 + $0x8] sm:$0xff]  ;;  %v413_v13 = vld [vmem:[%s7085_s13 + $0x18] sm:$0xff]  ;;  %s10448_s19 = scalar_lea.vmem [#allocation5], %s5966_s17  ;;  %s6434_s17 = sshll.u32 %s7014_s21, 8 }
  0x32   : > { %v598_v9 = vmul.f32 %v7094_v0, %v414_v7  ;;  %v632_v11 = vsel %vm10626_vm0, %v596_v4, 0.0  ;;  %v453_v15 = vsel %vm10626_vm0, %v411_v10, 0.0  ;;  %v597_v17 = vmul.f32 %v7094_v0, %v413_v13  ;;  %v443_v20 = vld [vmem:[%s10608_s3 + $0x8] sm:$0xff]  ;;  %v442_v21 = vld [vmem:[%s10608_s3] sm:$0xff]  ;;  %v7131_v27 = vld [vmem:[%s7085_s13 + $0x30] sm:$0xff]  ;;  %s5882_s26 = scalar_lea.hbm %s10616_s11, %s6434_s17  ;;  %s5883_s25 = sshll.u32 %s10448_s19, 4  ;;  %s5884_s25 = int_to_ptr.vmem [resolvable:$true] %s5883_s25 }
  0x33   : > { %v626_v12 = vsel %vm10626_vm0, %v594_v5, 0.0  ;;  %538 = vmatpush.msra.mxu0 %v444_v6  ;;  %633 = vadd.xlane.f32.xlu1 %v632_v11  ;;  %v595_v18 = vmul.f32 %v7094_v0, %v411_v10  ;;  %v454_v19 = vadd.f32 %v453_v15, %v452_v8  ;;  %v457_v22 = vsel %vm10626_vm0, %v413_v13, 0.0  ;;  %v7126_v23 = vld [vmem:[%s7085_s13 + $0x28] sm:$0xff]  ;;  %v417_v31 = vld [vmem:[%s7085_s13 + $0x38] sm:$0xff]  ;;  %v7141_v35 = vld [vmem:[%s7085_s13 + $0x40] sm:$0xff]  ;;  %s5885_s28 = sshll.u32 %s5882_s26, 4  ;;  %s5886_s28 = int_to_ptr.hbm [resolvable:$true] %s5885_s28 }
  0x34   : > { %627 = vadd.xlane.f32.xlu0 %v626_v12  ;;  %v638_v14 = vsel %vm10626_vm0, %v598_v9, 0.0  ;;  %v635_v25 = vsel %vm10626_vm0, %v597_v17, 0.0  ;;  %v459_v26 = vsel %vm10626_vm0, %v414_v7, 0.0  ;;  %v461_v30 = vsel %vm10626_vm0, %v7126_v23, 0.0  ;;  %v7145_v38 = vld [vmem:[%s7085_s13 + $0x48] sm:$0xff]  ;;  %v420_v42 = vld [vmem:[%s7085_s13 + $0x50] sm:$0xff] }
  0x35   : > { %639 = vadd.xlane.f32.xlu2 %v638_v14  ;;  %539 = vmatpush.msra.mxu0 %v443_v20  ;;  %v456_v24 = vadd.f32 %v455_v16, %v454_v19  ;;  %v629_v28 = vsel %vm10626_vm0, %v595_v18, 0.0  ;;  %v463_v32 = vsel %vm10626_vm0, %v7131_v27, 0.0  ;;  %v601_v34 = vmul.f32 %v7094_v0, %v417_v31  ;;  %v7154_v45 = vld [vmem:[%s7085_s13 + $0x58] sm:$0xff]  ;;  %v422_v48 = vld [vmem:[%s7085_s13 + $0x60] sm:$0xff]  ;;  %v7161_v51 = vld [vmem:[%s7085_s13 + $0x68] sm:$0xff]  ;;  %s5871_s14 = scalar_lea.sflag [#allocation4], %s7079_s22 }
  0x36   : > { %v465_v37 = vsel %vm10626_vm0, %v417_v31, 0.0  ;;  %v467_v41 = vsel %vm10626_vm0, %v7141_v35, 0.0  ;;  %v469_v44 = vsel %vm10626_vm0, %v7145_v38, 0.0  ;;  %v471_v47 = vsel %vm10626_vm0, %v420_v42, 0.0  ;;  %v7165_v54 = vld [vmem:[%s7085_s13 + $0x70] sm:$0xff]  ;;  %v7170_v57 = vld [vmem:[%s7085_s13 + $0x78] sm:$0xff] }
  0x37   : > { %540 = vmatpush.msra.mxu0 %v442_v21  ;;  %v458_v29 = vadd.f32 %v457_v22, %v456_v24  ;;  %v647_v40 = vsel %vm10626_vm0, %v601_v34, 0.0  ;;  %v473_v50 = vsel %vm10626_vm0, %v7154_v45, 0.0  ;;  %v475_v53 = vsel %vm10626_vm0, %v422_v48, 0.0  ;;  %v7175_v60 = vld [vmem:[%s7085_s13 + $0x80] sm:$0xff]  ;;  %v7180_v1 = vld [vmem:[%s7085_s13 + $0x88] sm:$0xff]  ;;  %v7185_v4 = vld [vmem:[%s7085_s13 + $0x90] sm:$0xff] }
  0x38   : > { %v477_v56 = vsel %vm10626_vm0, %v7161_v51, 0.0  ;;  %v479_v59 = vsel %vm10626_vm0, %v7165_v54, 0.0  ;;  %v481_v62 = vsel %vm10626_vm0, %v7170_v57, 0.0  ;;  %v483_v2 = vsel %vm10626_vm0, %v7175_v60, 0.0  ;;  %v7190_v7 = vld [vmem:[%s7085_s13 + $0x98] sm:$0xff]  ;;  %v7195_v9 = vld [vmem:[%s7085_s13 + $0xa0] sm:$0xff] }
  0x39   : > { %v460_v33 = vadd.f32 %v459_v26, %v458_v29  ;;  %v485_v5 = vsel %vm10626_vm0, %v7180_v1, 0.0  ;;  %v487_v8 = vsel %vm10626_vm0, %v7185_v4, 0.0  ;;  %v489_v11 = vsel %vm10626_vm0, %v7190_v7, 0.0  ;;  %v7200_v12 = vld [vmem:[%s7085_s13 + $0xa8] sm:$0xff]  ;;  %v432_v15 = vld [vmem:[%s7085_s13 + $0xb0] sm:$0xff]  ;;  %v433_v18 = vld [vmem:[%s7085_s13 + $0xb8] sm:$0xff] }
  0x3a   : > { %v491_v14 = vsel %vm10626_vm0, %v7195_v9, 0.0  ;;  %v493_v17 = vsel %vm10626_vm0, %v7200_v12, 0.0  ;;  %v495_v20 = vsel %vm10626_vm0, %v432_v15, 0.0  ;;  %v434_v21 = vld [vmem:[%s7085_s13 + $0xc0] sm:$0xff]  ;;  %v497_v24 = vsel %vm10626_vm0, %v433_v18, 0.0  ;;  %v436_v29 = vld [vmem:[%s7085_s13 + $0xd0] sm:$0xff] }
  0x3b   : > { %636 = vadd.xlane.f32.xlu1 %v635_v25  ;;  %v462_v36 = vadd.f32 %v461_v30, %v460_v33  ;;  %v435_v25 = vld [vmem:[%s7085_s13 + $0xc8] sm:$0xff]  ;;  %v599_v31 = vmul.f32 %v7094_v0, %v7126_v23  ;;  %v600_v33 = vmul.f32 %v7094_v0, %v7131_v27  ;;  %v438_v23 = vld [vmem:[%s7085_s13 + $0xe0] sm:$0xff]  ;;  %v602_v27 = vmul.f32 %v7094_v0, %v7141_v35  ;;  %s6871_s16 = sshra.s32 %s5886_s28, 4  ;;  %s6872_s16 = int_to_ptr.hbm [resolvable:$true] %s6871_s16 }
  0x3c   : > { %630 = vadd.xlane.f32.xlu0 %v629_v28  ;;  %v499_v28 = vsel %vm10626_vm0, %v434_v21, 0.0  ;;  %v501_v34 = vsel %vm10626_vm0, %v435_v25, 0.0  ;;  %v610_v21 = vmul.f32 %v7094_v0, %v7175_v60  ;;  %v613_v25 = vmul.f32 %v7094_v0, %v7190_v7  ;;  %v7273_v7 = vld [vmem:[%s10614_s9 + $0x2] ss:$0 sm:$0xff]  ;;  %s6873_s12 = scalar_lea.hbm %s6872_s16, 256  ;;  %p6878_p0 = scmp.lt.s32.totalorder %s6872_s16, %s10616_s11 }
  0x3d   : > { %v464_v39 = vadd.f32 %v463_v32, %v462_v36  ;;  %v604_v32 = vmul.f32 %v7094_v0, %v420_v42  ;;  %v437_v36 = vld [vmem:[%s7085_s13 + $0xd8] sm:$0xff]  ;;  %p6874_p6 = scmp.ne.s32.totalorder %s6872_s16, %s6873_s12 }
  0x3e   : > { %v683_v60 = vsel %vm10626_vm0, %v613_v25, 0.0 }
  0x3f   : > { %v466_v43 = vadd.f32 %v465_v37, %v464_v39  ;;  %v641_v39 = vsel %vm10626_vm0, %v599_v31, 0.0  ;;  %p6875_p9 = pnand %p6874_p6, %p7043_p11 }
  0x40   : > { %642 = vadd.xlane.f32.xlu2 %v641_v39 }
  0x41   : > { %v468_v46 = vadd.f32 %v467_v41, %v466_v43  ;;  %v644_v41 = vsel %vm10626_vm0, %v600_v33, 0.0  ;;  %v503_v43 = vsel %vm10626_vm0, %v436_v29, 0.0  ;;  %p6876_p13 = pneg %p6875_p9 }
  0x43   : > { %648 = vadd.xlane.f32.xlu1 %v647_v40  ;;  %v470_v49 = vadd.f32 %v469_v44, %v468_v46  ;;  %v656_v40 = vsel %vm10626_vm0, %v604_v32, 0.0  ;;  %v606_v44 = vmul.f32 %v7094_v0, %v422_v48  ;;  %v505_v46 = vsel %vm10626_vm0, %v437_v36, 0.0  ;;  %v441_v48 = vld [vmem:[%s7085_s13 + $0xf8] sm:$0xff] }
  0x44   : > { %645 = vadd.xlane.f32.xlu0 %v644_v41  ;;  %v614_v36 = vmul.f32 %v7094_v0, %v7195_v9 }
  0x45   : > { %v472_v52 = vadd.f32 %v471_v47, %v470_v49  ;;  %v603_v47 = vmul.f32 %v7094_v0, %v7145_v38  ;;  %v439_v49 = vld [vmem:[%s7085_s13 + $0xe8] sm:$0xff] }
  0x47   : > { %v474_v55 = vadd.f32 %v473_v50, %v472_v52  ;;  %v507_v52 = vsel %vm10626_vm0, %v438_v23, 0.0  ;;  %v653_v35 = vsel %vm10626_vm0, %v603_v47, 0.0 }
  0x49   : > { %v476_v58 = vadd.f32 %v475_v53, %v474_v55  ;;  %v440_v53 = vld [vmem:[%s7085_s13 + $0xf0] sm:$0xff] }
  0x4b   : > { %v478_v61 = vadd.f32 %v477_v56, %v476_v58  ;;  %657 = vadd.xlane.f32.xlu1 %v656_v40  ;;  %v650_v56 = vsel %vm10626_vm0, %v602_v27, 0.0  ;;  %v662_v58 = vsel %vm10626_vm0, %v606_v44, 0.0  ;;  %v686_v40 = vsel %vm10626_vm0, %v614_v36, 0.0 }
  0x4c   : > { %651 = vadd.xlane.f32.xlu2 %v650_v56  ;;  %654 = vadd.xlane.f32.xlu0 %v653_v35 }
  0x4d   : > { %v480_v63 = vadd.f32 %v479_v59, %v478_v61  ;;  %v509_v59 = vsel %vm10626_vm0, %v439_v49, 0.0 }
  0x4f   : > { %v482_v3 = vadd.f32 %v481_v62, %v480_v63  ;;  %v511_v62 = vsel %vm10626_vm0, %v440_v53, 0.0  ;;  %v605_v63 = vmul.f32 %v7094_v0, %v7154_v45 }
  0x51   : > { %v484_v6 = vadd.f32 %v483_v2, %v482_v3  ;;  %v609_v2 = vmul.f32 %v7094_v0, %v7170_v57  ;;  %v513_v3 = vsel %vm10626_vm0, %v441_v48, 0.0 }
  0x53   : > { %v486_v10 = vadd.f32 %v485_v5, %v484_v6  ;;  %663 = vadd.xlane.f32.xlu1 %v662_v58 }
  0x55   : > { %v488_v13 = vadd.f32 %v487_v8, %v486_v10  ;;  %v659_v8 = vsel %vm10626_vm0, %v605_v63, 0.0  ;;  %v671_v10 = vsel %vm10626_vm0, %v609_v2, 0.0 }
  0x56   : > { %660 = vadd.xlane.f32.xlu2 %v659_v8 }
  0x57   : > { %v490_v16 = vadd.f32 %v489_v11, %v488_v13 }
  0x59   : > { %v492_v19 = vadd.f32 %v491_v14, %v490_v16  ;;  %v607_v14 = vmul.f32 %v7094_v0, %v7161_v51  ;;  %v611_v51 = vmul.f32 %v7094_v0, %v7180_v1 }
  0x5b   : > { %v494_v22 = vadd.f32 %v493_v17, %v492_v19  ;;  %672 = vadd.xlane.f32.xlu1 %v671_v10  ;;  %v665_v16 = vsel %vm10626_vm0, %v607_v14, 0.0  ;;  %v608_v19 = vmul.f32 %v7094_v0, %v7165_v54  ;;  %v615_v54 = vmul.f32 %v7094_v0, %v7200_v12 }
  0x5d   : > { %v496_v26 = vadd.f32 %v495_v20, %v494_v22  ;;  %v668_v20 = vsel %vm10626_vm0, %v608_v19, 0.0  ;;  %v674_v22 = vsel %vm10626_vm0, %v610_v21, 0.0  ;;  %v447_v21 = vld [vmem:[%s10609_s4] sm:$0x3] }
  0x5e   : > { %666 = vadd.xlane.f32.xlu2 %v665_v16  ;;  %669 = vadd.xlane.f32.xlu0 %v668_v20 }
  0x5f   : > { %v498_v30 = vadd.f32 %v497_v24, %v496_v26  ;;  %v677_v24 = vsel %vm10626_vm0, %v611_v51, 0.0  ;;  %v612_v26 = vmul.f32 %v7094_v0, %v7185_v4  ;;  %5969 = vmatpush.msk.msra.mxu1 %vm10623_vm1, %v447_v21 }
  0x61   : > { %v500_v37 = vadd.f32 %v499_v28, %v498_v30  ;;  %v689_v28 = vsel %vm10626_vm0, %v615_v54, 0.0  ;;  %v680_v1 = vsel %vm10626_vm0, %v612_v26, 0.0 }
  0x63   : > { %v502_v42 = vadd.f32 %v501_v34, %v500_v37  ;;  %681 = vadd.xlane.f32.xlu1 %v680_v1 }
  0x65   : > { %v504_v50 = vadd.f32 %v503_v43, %v502_v42 }
  0x66   : > { %675 = vadd.xlane.f32.xlu0 %v674_v22  ;;  %678 = vadd.xlane.f32.xlu2 %v677_v24 }
  0x67   : > { %v506_v55 = vadd.f32 %v505_v46, %v504_v50 }
  0x69   : > { %v508_v61 = vadd.f32 %v507_v52, %v506_v55 }
  0x6b   : > { %v510_v38 = vadd.f32 %v509_v59, %v508_v61  ;;  %687 = vadd.xlane.f32.xlu1 %v686_v40 }
  0x6d   : > { %v512_v5 = vadd.f32 %v511_v62, %v510_v38 }
  0x6e   : > { %684 = vadd.xlane.f32.xlu0 %v683_v60  ;;  %690 = vadd.xlane.f32.xlu2 %v689_v28 }
  0x6f   : > { %v514_v6 = vadd.f32 %v513_v3, %v512_v5 }
  0x71   : > { %v515_v11 = vrot.slane %v514_v6, 4 }
  0x73   : > { %v516_v13 = vadd.f32 %v515_v11, %v514_v6 }
  0x75   : > { %v517_v15 = vrot.slane %v516_v13, 2 }
  0x77   : > { %v518_v45 = vadd.f32 %v517_v15, %v516_v13 }
  0x79   : > { %v519_v57 = vrot.slane %v518_v45, 1 }
  0x7b   : > { %v520_v17 = vadd.f32 %v519_v57, %v518_v45 }
  0x7d   : > { %v521_v18 = vmul.f32 0.00390625, %v520_v17 }
  0x7f   : > { %5968 = vmatmul.msk.f32.vlgmr.msra.gmra.mxu0 %vm10626_vm0, %v521_v18 }
  0xa6   : > { %v634_v29 = vpop.xlane.xlu1 %633 }
  0xa7   : > { %v628_v30 = vpop.xlane.xlu0 %627  ;;  %v725_v33 = vadd.f32 %v7273_v7, %v634_v29 }
  0xa8   : > { %v723_v12 = vadd.f32 %v7273_v7, %v628_v30  ;;  %v640_v32 = vpop.xlane.xlu2 %639  ;;  %v10641_v30 = vmov 0  }
  0xa9   : > { %v727_v34 = vadd.f32 %v7273_v7, %v640_v32  ;;  %v5974_v37 = vmul.f32 -1.442695, %v725_v33  ;;  %6501 = vset.pattern.permute.xlu0 %v10641_v30  ;;  %6503 = vset.pattern.permute.xlu2 %v10641_v30 }
  0xaa   : > { %v5972_v31 = vmul.f32 -1.442695, %v723_v12  ;;  %6502 = vset.pattern.permute.xlu1 %v10641_v30 }
  0xab   : > { %v5976_v41 = vmul.f32 -1.442695, %v727_v34 }
  0xac   : > { %6512 = vpow2.f32 %v5972_v31 }
  0xad   : > { %6514 = vpow2.f32 %v5974_v37 }
  0xae   : > { %v637_v4 = vpop.xlane.xlu1 %636  ;;  %6516 = vpow2.f32 %v5976_v41 }
  0xaf   : > { %v726_v39 = vadd.f32 %v7273_v7, %v637_v4  ;;  %v631_v43 = vpop.xlane.xlu0 %630 }
  0xb0   : > { %v724_v42 = vadd.f32 %v7273_v7, %v631_v43 }
  0xb1   : > { %v5975_v44 = vmul.f32 -1.442695, %v726_v39 }
  0xb2   : > { %v6513_v23 = vpop.eup %6512  ;;  %v5973_v0 = vmul.f32 -1.442695, %v724_v42 }
  0xb3   : > { %v7284_v47 = vadd.f32 1.0, %v6513_v23  ;;  %6518 = vpow2.f32 %v5975_v44  ;;  %v6515_v49 = vpop.eup %6514  ;;  %v643_v56 = vpop.xlane.xlu2 %642 }
  0xb4   : > { %v6517_v50 = vpop.eup %6516  ;;  %v7287_v52 = vadd.f32 1.0, %v6515_v49  ;;  %v728_v35 = vadd.f32 %v7273_v7, %v643_v56 }
  0xb5   : > { %6520 = vrcp.f32 %v7284_v47  ;;  %v7289_v55 = vadd.f32 1.0, %v6517_v50  ;;  %vm888_vm2 = vweird.f32 %v7284_v47  ;;  %v892_v31 = vand.u32 2147483647, %v7284_v47 }
  0xb6   : > { %v649_v27 = vpop.xlane.xlu1 %648  ;;  %6522 = vpow2.f32 %v5973_v0  ;;  %v5977_v63 = vmul.f32 -1.442695, %v728_v35  ;;  %v894_v33 = vand.u32 2147483648, %v7284_v47  ;;  %vm918_vm10 = vweird.f32 %v7287_v52 }
  0xb7   : > { %v730_v46 = vadd.f32 %v7273_v7, %v649_v27  ;;  %v646_v61 = vpop.xlane.xlu0 %645  ;;  %vm893_vm5 = vcmp.eq.f32.partialorder %v892_v31, 8.507059e+37  ;;  %vm948_vm6 = vweird.f32 %v7289_v55  ;;  %v952_v43 = vand.u32 2147483647, %v7289_v55 }
  0xb8   : > { %v729_v38 = vadd.f32 %v7273_v7, %v646_v61  ;;  %v895_v37 = vor.u32 1.1754944e-38, %v894_v33  ;;  %v954_v44 = vand.u32 2147483648, %v7289_v55 }
  0xb9   : > { %v5979_v9 = vmul.f32 -1.442695, %v730_v46  ;;  %v6519_v53 = vpop.eup %6518  ;;  %vm7360_vm8 = vcmp.eq.f32.partialorder %v952_v43, 8.507059e+37 }
  0xba   : > { %v7297_v5 = vadd.f32 1.0, %v6519_v53  ;;  %v5978_v6 = vmul.f32 -1.442695, %v729_v38  ;;  %v955_v53 = vor.u32 1.1754944e-38, %v954_v44 }
  0xbb   : > { %6524 = vpow2.f32 %v5979_v9  ;;  %v7291_v59 = vpop.eup %6520 }
  0xbc   : > { %v6523_v62 = vpop.eup %6522  ;;  %6526 = vrcp.f32 %v7287_v52  ;;  %v884_v10 = vmul.f32 %v7291_v59, %v7284_v47  ;;  %vm889_vm3 = vweird.f32 %v7291_v59 }
  0xbd   : > { %6528 = vrcp.f32 %v7289_v55  ;;  %v7300_v8 = vadd.f32 1.0, %v6523_v62  ;;  %vm7326_vm4 = vmor %vm888_vm2, %vm889_vm3 }
  0xbe   : > { %v658_v58 = vpop.xlane.xlu1 %657  ;;  %6530 = vpow2.f32 %v5977_v63  ;;  %v885_v13 = vsub.f32 1.0, %v884_v10 }
  0xbf   : > { %v733_v48 = vadd.f32 %v7273_v7, %v658_v58  ;;  %v652_v14 = vpop.xlane.xlu2 %651  ;;  %v655_v16 = vpop.xlane.xlu0 %654  ;;  %v909_v43 = vand.u32 2147483648, %v7300_v8 }
  0xc0   : > { %v886_v57 = vmul.f32 %v7291_v59, %v885_v13  ;;  %v731_v18 = vadd.f32 %v7273_v7, %v652_v14  ;;  %v732_v20 = vadd.f32 %v7273_v7, %v655_v16 }
  0xc1   : > { %v5982_v2 = vmul.f32 -1.442695, %v733_v48  ;;  %v6525_v3 = vpop.eup %6524  ;;  %v924_v48 = vand.u32 2147483648, %v7287_v52  ;;  %v910_v0 = vor.u32 1.1754944e-38, %v909_v43 }
  0xc2   : > { %v7304_v11 = vadd.f32 1.0, %v6525_v3  ;;  %v7307_v45 = vpop.eup %6526  ;;  %v887_v22 = vadd.f32 %v7291_v59, %v886_v57  ;;  %v5980_v54 = vmul.f32 -1.442695, %v731_v18  ;;  %v5981_v29 = vmul.f32 -1.442695, %v732_v20 }
  0xc3   : > { %6532 = vpow2.f32 %v5982_v2  ;;  %v7311_v17 = vpop.eup %6528  ;;  %vm919_vm11 = vweird.f32 %v7307_v45  ;;  %v925_v10 = vor.u32 1.1754944e-38, %v924_v48 }
  0xc4   : > { %6534 = vpow2.f32 %v5978_v6  ;;  %v6531_v51 = vpop.eup %6530  ;;  %v891_v12 = vsel %vm7326_vm4, %v7291_v59, %v887_v22  ;;  %v944_v34 = vmul.f32 %v7311_v17, %v7289_v55  ;;  %vm949_vm7 = vweird.f32 %v7311_v17  ;;  %vm7405_vm15 = vmor %vm918_vm10, %vm919_vm11 }
  0xc5   : > { %6536 = vrcp.f32 %v7297_v5  ;;  %v7324_v25 = vadd.f32 1.0, %v6531_v51  ;;  %v896_v46 = vsel %vm893_vm5, %v895_v37, %v891_v12  ;;  %vm7368_vm9 = vmor %vm948_vm6, %vm949_vm7  ;;  %v914_v59 = vmul.f32 %v7307_v45, %v7287_v52 }
  0xc6   : > { %v664_v15 = vpop.xlane.xlu1 %663  ;;  %6538 = vrcp.f32 %v7300_v8  ;;  %v945_v41 = vsub.f32 1.0, %v944_v34  ;;  %1366 = vperm.xlu0 %6501, %v896_v46   ;;  %v922_v55 = vand.u32 2147483647, %v7287_v52  ;;  %vm903_vm4 = vweird.f32 %v7300_v8 }
  0xc7   : > { %v735_v19 = vadd.f32 %v7273_v7, %v664_v15  ;;  %6540 = vrcp.f32 %v7304_v11  ;;  %v915_v63 = vsub.f32 1.0, %v914_v59  ;;  %vm963_vm12 = vweird.f32 %v7324_v25 }
  0xc8   : > { %6542 = vrcp.f32 %v7324_v25  ;;  %v946_v47 = vmul.f32 %v7311_v17, %v945_v41  ;;  %vm7390_vm13 = vcmp.eq.f32.partialorder %v922_v55, 8.507059e+37  ;;  %v969_v22 = vand.u32 2147483648, %v7324_v25 }
  0xc9   : > { %v6533_v24 = vpop.eup %6532  ;;  %v5984_v26 = vmul.f32 -1.442695, %v735_v19  ;;  %v661_v39 = vpop.xlane.xlu2 %660  ;;  %v916_v57 = vmul.f32 %v7307_v45, %v915_v63  ;;  %vm933_vm6 = vweird.f32 %v7297_v5  ;;  %vm993_vm11 = vweird.f32 %v7304_v11 }
  0xca   : > { %v6535_v28 = vpop.eup %6534  ;;  %v7330_v1 = vadd.f32 1.0, %v6533_v24  ;;  %v734_v42 = vadd.f32 %v7273_v7, %v661_v39  ;;  %v947_v58 = vadd.f32 %v7311_v17, %v946_v47 }
  0xcb   : > { %v7338_v4 = vpop.eup %6536  ;;  %v7341_v32 = vadd.f32 1.0, %v6535_v28 }
  0xcc   : > { %v7347_v36 = vpop.eup %6538  ;;  %6544 = vrcp.f32 %v7330_v1  ;;  %v5983_v9 = vmul.f32 -1.442695, %v734_v42  ;;  %v951_v38 = vsel %vm7368_vm9, %v7311_v17, %v947_v58  ;;  %v967_v17 = vand.u32 2147483647, %v7324_v25 }
  0xcd   : > { %6546 = vrcp.f32 %v7341_v32  ;;  %v7354_v23 = vpop.eup %6540  ;;  %v956_v3 = vsel %vm7360_vm8, %v955_v53, %v951_v38  ;;  %v899_v31 = vmul.f32 %v7347_v36, %v7300_v8  ;;  %vm904_vm5 = vweird.f32 %v7347_v36 }
  0xce   : > { %v673_v40 = vpop.xlane.xlu1 %672  ;;  %6548 = vpow2.f32 %v5980_v54  ;;  %v6543_v56 = vpop.eup %6542  ;;  %v917_v54 = vadd.f32 %v7307_v45, %v916_v57  ;;  %vm7420_vm3 = vcmp.eq.f32.partialorder %v967_v17, 8.507059e+37  ;;  %1386 = vperm.xlu0 %6501, %v956_v3   ;;  %v929_v44 = vmul.f32 %v7338_v4, %v7297_v5  ;;  %vm7455_vm9 = vmor %vm903_vm4, %vm904_vm5 }
  0xcf   : > { %v738_v27 = vadd.f32 %v7273_v7, %v673_v40  ;;  %6550 = vpow2.f32 %v5984_v26  ;;  %v959_v61 = vmul.f32 %v6543_v56, %v7324_v25  ;;  %vm964_vm14 = vweird.f32 %v6543_v56 }
  0xd0   : > { %6552 = vpow2.f32 %v5981_v29  ;;  %vm7416_vm2 = vmor %vm963_vm12, %vm964_vm14  ;;  %v970_v29 = vor.u32 1.1754944e-38, %v969_v22  ;;  %v921_v25 = vsel %vm7405_vm15, %v7307_v45, %v917_v54  ;;  %v900_v41 = vsub.f32 1.0, %v899_v31 }
  0xd1   : > { %v5987_v49 = vmul.f32 -1.442695, %v738_v27  ;;  %6554 = vpow2.f32 %v5983_v9  ;;  %v960_v13 = vsub.f32 1.0, %v959_v61  ;;  %v667_v16 = vpop.xlane.xlu2 %666  ;;  %v926_v34 = vsel %vm7390_vm13, %v925_v10, %v921_v25  ;;  %v446_v10 = vld [vmem:[%s10610_s5] sm:$0x1] }
  0xd2   : > { %v7377_v35 = vpop.eup %6544  ;;  %v736_v20 = vadd.f32 %v7273_v7, %v667_v16  ;;  %1376 = vperm.xlu2 %6503, %v926_v34   ;;  %v907_v45 = vand.u32 2147483647, %v7300_v8  ;;  %v901_v27 = vmul.f32 %v7347_v36, %v900_v41  ;;  %vm934_vm7 = vweird.f32 %v7338_v4 }
  0xd3   : > { %v7382_v62 = vpop.eup %6546  ;;  %6556 = vpow2.f32 %v5987_v49  ;;  %v961_v51 = vmul.f32 %v6543_v56, %v960_v13  ;;  %vm10622_vm8 = vcmask 15360   ;;  %v937_v9 = vand.u32 2147483647, %v7297_v5  ;;  %vm7494_vm14 = vmor %vm933_vm6, %vm934_vm7 }
  0xd4   : > { %v6549_v2 = vpop.eup %6548  ;;  %v5985_v60 = vmul.f32 -1.442695, %v736_v20  ;;  %vm7459_vm10 = vcmp.eq.f32.partialorder %v907_v45, 8.507059e+37  ;;  %v939_v49 = vand.u32 2147483648, %v7297_v5  ;;  %v902_v53 = vadd.f32 %v7347_v36, %v901_v27 }
  0xd5   : > { %v6551_v14 = vpop.eup %6550  ;;  %v7394_v15 = vadd.f32 1.0, %v6549_v2  ;;  %v962_v28 = vadd.f32 %v6543_v56, %v961_v51  ;;  %v989_v58 = vmul.f32 %v7354_v23, %v7304_v11  ;;  %vm7471_vm12 = vcmp.eq.f32.partialorder %v937_v9, 8.507059e+37 }
  0xd6   : > { %v6553_v18 = vpop.eup %6552  ;;  %v7398_v19 = vadd.f32 1.0, %v6551_v14  ;;  %v940_v48 = vor.u32 1.1754944e-38, %v939_v49  ;;  %vm994_vm13 = vweird.f32 %v7354_v23  ;;  %v997_v61 = vand.u32 2147483647, %v7304_v11 }
  0xd7   : > { %6558 = vrcp.f32 %v7394_v15  ;;  %v7411_v24 = vadd.f32 1.0, %v6553_v18  ;;  %v6555_v26 = vpop.eup %6554  ;;  %v966_v37 = vsel %vm7416_vm2, %v6543_v56, %v962_v28  ;;  %v930_v56 = vsub.f32 1.0, %v929_v44 }
  0xd8   : > { %6560 = vrcp.f32 %v7398_v19  ;;  %v7437_v39 = vadd.f32 1.0, %v6555_v26  ;;  %v971_v40 = vsel %vm7420_vm3, %v970_v29, %v966_v37  ;;  %v906_v63 = vsel %vm7455_vm9, %v7347_v36, %v902_v53  ;;  %vm7513_vm3 = vmor %vm993_vm11, %vm994_vm13 }
  0xd9   : > { %v6557_v12 = vpop.eup %6556  ;;  %6562 = vrcp.f32 %v7411_v24  ;;  %1391 = vperm.xlu0 %6501, %v971_v40   ;;  %v931_v2 = vmul.f32 %v7338_v4, %v930_v56  ;;  %v990_v3 = vsub.f32 1.0, %v989_v58  ;;  %v911_v13 = vsel %vm7459_vm10, %v910_v0, %v906_v63 }
  0xda   : > { %v7431_v33 = vadd.f32 1.0, %v6557_v12  ;;  %6564 = vpow2.f32 %v5985_v60  ;;  %vm7498_vm15 = vcmp.eq.f32.partialorder %v997_v61, 8.507059e+37  ;;  %v999_v16 = vand.u32 2147483648, %v7304_v11  ;;  %1371 = vperm.xlu1 %6502, %v911_v13  }
  0xdb   : > { %v932_v17 = vadd.f32 %v7338_v4, %v931_v2  ;;  %v991_v5 = vmul.f32 %v7354_v23, %v990_v3  ;;  %vm1023_vm2 = vweird.f32 %v7411_v24  ;;  %v1027_v22 = vand.u32 2147483647, %v7411_v24 }
  0xdc   : > { %6566 = vrcp.f32 %v7431_v33  ;;  %v1000_v21 = vor.u32 1.1754944e-38, %v999_v16  ;;  %v1029_v26 = vand.u32 2147483648, %v7411_v24  ;;  %v1034_v29 = vmul.f32 %v7377_v35, %v7330_v1 }
  0xdd   : > { %v7446_v42 = vpop.eup %6558  ;;  %v936_v7 = vsel %vm7494_vm14, %v7338_v4, %v932_v17  ;;  %v992_v52 = vadd.f32 %v7354_v23, %v991_v5  ;;  %vm7527_vm5 = vcmp.eq.f32.partialorder %v1027_v22, 8.507059e+37  ;;  %vm1038_vm7 = vweird.f32 %v7330_v1 }
  0xde   : > { %v7453_v46 = vpop.eup %6560  ;;  %v941_v11 = vsel %vm7471_vm12, %v940_v48, %v936_v7  ;;  %v1030_v31 = vor.u32 1.1754944e-38, %v1029_v26  ;;  %v1035_v40 = vsub.f32 1.0, %v1034_v29  ;;  %vm1039_vm9 = vweird.f32 %v7377_v35 }
  0xdf   : > { %v7465_v50 = vpop.eup %6562  ;;  %1381 = vperm.xlu2 %6503, %v941_v11   ;;  %v996_v4 = vsel %vm7513_vm3, %v7354_v23, %v992_v52  ;;  %v1042_v23 = vand.u32 2147483647, %v7330_v1  ;;  %v974_v45 = vmul.f32 %v7382_v62, %v7341_v32  ;;  %vm978_vm10 = vweird.f32 %v7341_v32  ;;  %vm7565_vm12 = vmor %vm1038_vm7, %vm1039_vm9 }
  0xe0   : > { %v6565_v59 = vpop.eup %6564  ;;  %v1019_v57 = vmul.f32 %v7465_v50, %v7411_v24  ;;  %vm1024_vm4 = vweird.f32 %v7465_v50  ;;  %v1001_v34 = vsel %vm7498_vm15, %v1000_v21, %v996_v4  ;;  %v1044_v24 = vand.u32 2147483648, %v7330_v1 }
  0xe1   : > { %v7477_v38 = vadd.f32 1.0, %v6565_v59  ;;  %vm7538_vm6 = vmor %vm1023_vm2, %vm1024_vm4  ;;  %v1036_v27 = vmul.f32 %v7377_v35, %v1035_v40  ;;  %vm979_vm11 = vweird.f32 %v7382_v62  ;;  %v975_v0 = vsub.f32 1.0, %v974_v45 }
  0xe2   : > { %v7483_v6 = vpop.eup %6566  ;;  %v1020_v51 = vsub.f32 1.0, %v1019_v57  ;;  %1401 = vperm.xlu1 %6502, %v1001_v34   ;;  %v1045_v8 = vor.u32 1.1754944e-38, %v1044_v24  ;;  %v982_v9 = vand.u32 2147483647, %v7341_v32  ;;  %vm1043_vm13 = vcmp.eq.f32.partialorder %v1042_v23, 8.507059e+37  ;;  %vm7585_vm2 = vmor %vm978_vm10, %vm979_vm11 }
  0xe3   : > { %6568 = vrcp.f32 %v7477_v38  ;;  %v1037_v49 = vadd.f32 %v7377_v35, %v1036_v27  ;;  %v1109_v53 = vmul.f32 %v7483_v6, %v7431_v33  ;;  %v976_v56 = vmul.f32 %v7382_v62, %v975_v0  ;;  %v7661_v0 = vpop.xlane.xlu0 %669 }
  0xe4   : > { %v1021_v60 = vmul.f32 %v7465_v50, %v1020_v51  ;;  %6570 = vrcp.f32 %v7437_v39  ;;  %vm1113_vm14 = vweird.f32 %v7431_v33  ;;  %vm1114_vm15 = vweird.f32 %v7483_v6 }
  0xe5   : > { %v1117_v1 = vand.u32 2147483647, %v7431_v33  ;;  %v1041_v58 = vsel %vm7565_vm12, %v7377_v35, %v1037_v49  ;;  %v1110_v48 = vsub.f32 1.0, %v1109_v53  ;;  %v1119_v61 = vand.u32 2147483648, %v7431_v33  ;;  %v7667_v53 = vpop.xlane.xlu1 %681 }
  0xe6   : > { %v1022_v37 = vadd.f32 %v7465_v50, %v1021_v60  ;;  %v1046_v2 = vsel %vm1043_vm13, %v1045_v8, %v1041_v58  ;;  %v977_v3 = vadd.f32 %v7382_v62, %v976_v56  ;;  %vm983_vm3 = vcmp.eq.f32.partialorder %v982_v9, 8.507059e+37  ;;  %v7659_v8 = vpop.xlane.xlu2 %678 }
  0xe7   : > { %vm1083_vm4 = vweird.f32 %v7477_v38  ;;  %v1087_v16 = vand.u32 2147483647, %v7477_v38  ;;  %v1089_v57 = vand.u32 2147483648, %v7477_v38  ;;  %vm1118_vm7 = vcmp.eq.f32.partialorder %v1117_v1, 8.507059e+37 }
  0xe8   : > { %v1026_v43 = vsel %vm7538_vm6, %v7465_v50, %v1022_v37  ;;  %v984_v50 = vand.u32 2147483648, %v7341_v32  ;;  %v1120_v32 = vor.u32 1.1754944e-38, %v1119_v61  ;;  %v981_v13 = vsel %vm7585_vm2, %v7382_v62, %v977_v3  ;;  %vm7605_vm6 = vmor %vm1113_vm14, %vm1114_vm15 }
  0xe9   : > { %v7547_v41 = vpop.eup %6568  ;;  %v1031_v44 = vsel %vm7527_vm5, %v1030_v31, %v1026_v43  ;;  %v1004_v62 = vmul.f32 %v7446_v42, %v7394_v15  ;;  %vm1008_vm9 = vweird.f32 %v7394_v15  ;;  %vm1009_vm10 = vweird.f32 %v7446_v42 }
  0xea   : > { %1411 = vperm.xlu0 %6501, %v1031_v44   ;;  %v985_v55 = vor.u32 1.1754944e-38, %v984_v50  ;;  %v7590_v63 = vpop.eup %6570  ;;  %v1079_v35 = vmul.f32 %v7547_v41, %v7477_v38  ;;  %vm1084_vm5 = vweird.f32 %v7547_v41  ;;  %1416 = vperm.xlu1 %6502, %v1046_v2   ;;  %v1012_v22 = vand.u32 2147483647, %v7394_v15  ;;  %vm1010_vm14 = vmor %vm1008_vm9, %vm1009_vm10 }
  0xeb   : > { %vm7624_vm11 = vmor %vm1083_vm4, %vm1084_vm5  ;;  %v1005_v51 = vsub.f32 1.0, %v1004_v62  ;;  %vm1088_vm12 = vcmp.eq.f32.partialorder %v1087_v16, 8.507059e+37  ;;  %vm1053_vm13 = vweird.f32 %v7437_v39  ;;  %vm1054_vm2 = vweird.f32 %v7590_v63  ;;  %v7665_v49 = vpop.xlane.xlu0 %675 }
  0xec   : > { %v1080_v36 = vsub.f32 1.0, %v1079_v35  ;;  %v986_v17 = vsel %vm983_vm3, %v985_v55, %v981_v13  ;;  %vm1013_vm15 = vcmp.eq.f32.partialorder %v1012_v22, 8.507059e+37  ;;  %v1059_v25 = vand.u32 2147483648, %v7437_v39  ;;  %vm1055_vm3 = vmor %vm1053_vm13, %vm1054_vm2 }
  0xed   : > { %1396 = vperm.xlu2 %6503, %v986_v17   ;;  %v1006_v26 = vmul.f32 %v7446_v42, %v1005_v51  ;;  %vm1068_vm5 = vweird.f32 %v7398_v19  ;;  %v1074_v45 = vand.u32 2147483648, %v7398_v19  ;;  %v1072_v27 = vand.u32 2147483647, %v7398_v19  ;;  %v7674_v58 = vpop.xlane.xlu1 %687 }
  0xee   : > { %v1081_v33 = vmul.f32 %v7547_v41, %v1080_v36  ;;  %v7663_v9 = vpop.xlane.xlu2 %690 }
  0xef   : > { %v1007_v29 = vadd.f32 %v7446_v42, %v1006_v26  ;;  %vm1073_vm9 = vcmp.eq.f32.partialorder %v1072_v27, 8.507059e+37 }
  0xf0   : > { %v1082_v52 = vadd.f32 %v7547_v41, %v1081_v33 }
  0xf1   : > { %v1011_v31 = vsel %vm1010_vm14, %v7446_v42, %v1007_v29 }
  0xf2   : > { %v1086_v38 = vsel %vm7624_vm11, %v7547_v41, %v1082_v52  ;;  %v1060_v41 = vor.u32 1.1754944e-38, %v1059_v25  ;;  %vm6928_vm11 = vmmov 0  }
  0xf3   : > { %v7672_v56 = vpop.xlane.xlu0 %684 }
  0xfc   : > { %v542_v18 = vpop.f32.mrf.mxu0 }
  0xfd   : > { %v543_v54 = vadd.f32 %v542_v18, %v446_v10  ;;  %v1111_v10 = vmul.f32 %v7483_v6, %v1110_v48  ;;  %v1090_v18 = vor.u32 1.1754944e-38, %v1089_v57 }
  0xff   : > { %v545_v12 = vmax.f32 %v543_v54, 0.0  ;;  %v1112_v5 = vadd.f32 %v7483_v6, %v1111_v10  ;;  %v1014_v54 = vand.u32 2147483648, %v7394_v15  ;;  %v1091_v28 = vsel %vm1088_vm12, %v1090_v18, %v1086_v38  ;;  %vm2364_vm12 = vmpackc.low %vm6928_vm11, %vm6928_vm11 }
 0x100   : > { %v1057_v15 = vand.u32 2147483647, %v7437_v39  ;;  %1431 = vperm.xlu1 %6502, %v1091_v28  }
 0x101   : > { %5970 = vmatmul.msk.f32.vlgmr.msra.gmra.mxu1 %vm10622_vm8, %v545_v12  ;;  %v1116_v20 = vsel %vm7605_vm6, %v7483_v6, %v1112_v5  ;;  %v1049_v6 = vmul.f32 %v7590_v63, %v7437_v39  ;;  %v1015_v11 = vor.u32 1.1754944e-38, %v1014_v54  ;;  %v1064_v12 = vmul.f32 %v7453_v46, %v7398_v19  ;;  %v448_v19 = vld [vmem:[%s10614_s9] sm:$0x1] }
 0x102   : > { %v1121_v7 = vsel %vm1118_vm7, %v1120_v32, %v1116_v20  ;;  %vm1058_vm4 = vcmp.eq.f32.partialorder %v1057_v15, 8.507059e+37  ;;  %vm1069_vm6 = vweird.f32 %v7453_v46  ;;  %v1075_v39 = vor.u32 1.1754944e-38, %v1074_v45 }
 0x103   : > { %1441 = vperm.xlu0 %6501, %v1121_v7   ;;  %v1050_v60 = vsub.f32 1.0, %v1049_v6  ;;  %v1065_v34 = vsub.f32 1.0, %v1064_v12  ;;  %v1016_v37 = vsel %vm1013_vm15, %v1015_v11, %v1011_v31  ;;  %vm1070_vm7 = vmor %vm1068_vm5, %vm1069_vm6  ;;  %v2396_v6 = vsel %vm2364_vm12, 65537, %v10641_v30 }
 0x104   : > { %1406 = vperm.xlu2 %6503, %v1016_v37   ;;  %v2428_v28 = vunpack.c.l.b16 %v2396_v6  ;;  %vm10624_vm6 = vsmask.f32 7424 }
 0x105   : > { %v1051_v4 = vmul.f32 %v7590_v63, %v1050_v60  ;;  %v1066_v24 = vmul.f32 %v7453_v46, %v1065_v34 }
 0x107   : > { %v1052_v40 = vadd.f32 %v7590_v63, %v1051_v4  ;;  %v1067_v43 = vadd.f32 %v7453_v46, %v1066_v24 }
 0x109   : > { %v1056_v23 = vsel %vm1055_vm3, %v7590_v63, %v1052_v40  ;;  %v1071_v44 = vsel %vm1070_vm7, %v7453_v46, %v1067_v43  ;;  %v1914_v63 = vlaneseq  ;;  %v6778_v43 = vld [vmem:[%s7085_s13 + $0x18] sm:$0xff] }
 0x10a   : > { %v1061_v42 = vsel %vm1058_vm4, %v1060_v41, %v1056_v23  ;;  %v1076_v47 = vsel %vm1073_vm9, %v1075_v39, %v1071_v44  ;;  %v6776_v23 = vld [vmem:[%s7085_s13] sm:$0xff] }
 0x10b   : > { %v7676_v10 = vshrl.u32 %v1914_v63, 7  ;;  %v6779_v39 = vld [vmem:[%s7085_s13 + $0x20] sm:$0xff] }
 0x10c   : > { %1421 = vperm.xlu2 %6503, %v1061_v42   ;;  %v6777_v42 = vld [vmem:[%s7085_s13 + $0x10] sm:$0xff] }
 0x10d   : > { %v1918_v32 = vadd.s32 24, %v7676_v10  ;;  %v1916_v33 = vadd.s32 8, %v7676_v10 }
 0x10f   : > { %v1972_v17 = vand.u32 15, %v1918_v32  ;;  %v1958_v54 = vand.u32 15, %v1916_v33 }
 0x111   : > { %vm7682_vm13 = vcmp.eq.s32.totalorder %v1972_v17, 15  ;;  %vm7695_vm4 = vcmp.eq.s32.totalorder %v1958_v54, 15 }
 0x112   : > { %vm2638_vm3 = vmpackc.low %vm7682_vm13, %vm7682_vm13 }
 0x113   : > { %v7693_v29 = vsel %vm2638_vm3, 65537, %v10641_v30  ;;  %vm2636_vm5 = vmpackc.low %vm7695_vm4, %vm7695_vm4 }
 0x114   : > { %1426 = vperm.xlu2 %6503, %v1076_v47   ;;  %v6780_v47 = vld [vmem:[%s7085_s13 + $0x8] sm:$0xff] }
 0x12c   : > { %v1377_v50 = vpop.permute.xlu2 %1376 }
 0x138   : > { %v1367_v61 = vpop.permute.xlu0 %1366 }
 0x139   : > { %v1382_v1 = vpop.permute.xlu2 %1381 }
 0x140   : > { %v1387_v36 = vpop.permute.xlu0 %1386 }
 0x147   : > { %v1397_v3 = vpop.permute.xlu2 %1396 }
 0x14b   : > { %v1392_v38 = vpop.permute.xlu0 %1391 }
 0x14c   : > { %v1372_v48 = vpop.permute.xlu1 %1371 }
 0x154   : > { %v7679_v13 = vpop.permute.xlu1 %1401 }
 0x15c   : > { %v1417_v52 = vpop.permute.xlu1 %1416 }
 0x15e   : > { %v1407_v57 = vpop.permute.xlu2 %1406 }
 0x166   : > { %v1422_v60 = vpop.permute.xlu2 %1421 }
 0x17e   : > { %v571_v46 = vpop.f32.mrf.mxu1 }
 0x17f   : > { %v572_v59 = vadd.f32 %v571_v46, %v448_v19  ;;  %v6781_v19 = vld [vmem:[%s7085_s13 + $0x30] sm:$0xff] }
 0x181   : > { %v5971_v55 = vmul.f32 -1.442695, %v572_v59 }
 0x183   : > { %6572 = vpow2.f32 %v5971_v55  ;;  %v6783_v55 = vld [vmem:[%s7085_s13 + $0x28] sm:$0xff] }
 0x189   : > { %v6573_v2 = vpop.eup %6572 }
 0x18a   : > { %v577_v35 = vadd.f32 1.0, %v6573_v2 }
 0x18c   : > { %6574 = vrcp.f32 %v577_v35  ;;  %v589_v62 = vand.u32 2147483648, %v577_v35  ;;  %v587_v20 = vand.u32 2147483647, %v577_v35  ;;  %vm583_vm14 = vweird.f32 %v577_v35 }
 0x18e   : > { %v590_v22 = vor.u32 1.1754944e-38, %v589_v62  ;;  %vm588_vm2 = vcmp.eq.f32.partialorder %v587_v20, 8.507059e+37  ;;  %v7730_v62 = vunpack.c.l.b16 %v10641_v30 }
 0x192   : > { %v6575_v14 = vpop.eup %6574 }
 0x193   : > { %v579_v16 = vmul.f32 %v6575_v14, %v577_v35  ;;  %vm584_vm10 = vweird.f32 %v6575_v14 }
 0x194   : > { %vm585_vm15 = vmor %vm583_vm14, %vm584_vm10  ;;  %vm10625_vm10 = vsmask.f32 256 }
 0x195   : > { %v580_v5 = vsub.f32 1.0, %v579_v16 }
 0x197   : > { %v581_v18 = vmul.f32 %v6575_v14, %v580_v5  ;;  %v1432_v5 = vpop.permute.xlu1 %1431 }
 0x199   : > { %v582_v51 = vadd.f32 %v6575_v14, %v581_v18 }
 0x19b   : > { %v586_v7 = vsel %vm585_vm15, %v6575_v14, %v582_v51  ;;  %v7719_v14 = vunpack.i.l.s16 %v2428_v28  ;;  %v1412_v51 = vpop.permute.xlu0 %1411 }
 0x19c   : > { %v591_v26 = vsel %vm588_vm2, %v590_v22, %v586_v7 }
 0x19d   : > { %v7690_v11 = vperm.slane %v591_v26, 0  ;;  %v1427_v26 = vpop.permute.xlu2 %1426  ;;  %vm7777_vm7 = vcmp.ne.s32.totalorder %v7719_v14, %v7730_v62 }
 0x19f   : > { %v1524_v4 = vadd.f32 %v1367_v61, %v7690_v11  ;;  %v1526_v25 = vadd.f32 %v1377_v50, %v7690_v11  ;;  %v1527_v31 = vadd.f32 %v1382_v1, %v7690_v11  ;;  %v1528_v15 = vadd.f32 %v1387_v36, %v7690_v11  ;;  %v6782_v1 = vld [vmem:[%s7085_s13 + $0x40] sm:$0xff] }
 0x1a0   : > { %v1530_v34 = vadd.f32 %v1397_v3, %v7690_v11  ;;  %v1525_v37 = vadd.f32 %v1372_v48, %v7690_v11  ;;  %v1532_v40 = vadd.f32 %v1407_v57, %v7690_v11  ;;  %v1529_v41 = vadd.f32 %v1392_v38, %v7690_v11 }
 0x1a1   : > { %v1556_v24 = vmul.f32 %v6776_v23, %v1524_v4  ;;  %v1558_v45 = vmul.f32 %v6777_v42, %v1526_v25  ;;  %v1559_v27 = vmul.f32 %v6778_v43, %v1527_v31  ;;  %v1560_v44 = vmul.f32 %v6779_v39, %v1528_v15  ;;  %v6784_v4 = vld [vmem:[%s7085_s13 + $0x38] sm:$0xff]  ;;  %v6786_v15 = vld [vmem:[%s7085_s13 + $0x48] sm:$0xff] }
 0x1a2   : > { %v1557_v50 = vmul.f32 %v6780_v47, %v1525_v37  ;;  %v1562_v46 = vmul.f32 %v6781_v19, %v1530_v34  ;;  %v1564_v59 = vmul.f32 %v6782_v1, %v1532_v40  ;;  %v1561_v48 = vmul.f32 %v6783_v55, %v1529_v41  ;;  %v6785_v31 = vld [vmem:[%s7085_s13 + $0x58] sm:$0xff]  ;;  %v6787_v34 = vld [vmem:[%s7085_s13 + $0x50] sm:$0xff]  ;;  %v6788_v41 = vld [vmem:[%s7085_s13 + $0x60] sm:$0xff] }
 0x1a3   : > { %v1588_v61 = vpack.c.bf16 %v1556_v24, %v1556_v24  ;;  %v1590_v63 = vpack.c.bf16 %v1558_v45, %v1558_v45  ;;  %v1592_v2 = vpack.c.bf16 %v1560_v44, %v1560_v44  ;;  %v2702_v3 = vunpack.c.l.b16 %v7693_v29  ;;  %v6789_v24 = vld [vmem:[%s7085_s13 + $0x68] sm:$0xff] }
 0x1a4   : > { %v1591_v35 = vpack.c.bf16 %v1559_v27, %v1559_v27  ;;  %v1593_v32 = vpack.c.bf16 %v1561_v48, %v1561_v48  ;;  %v7727_v36 = vsel %vm2636_vm5, 65537, %v10641_v30  ;;  %v1589_v16 = vpack.c.bf16 %v1557_v50, %v1557_v50 }
 0x1a5   : > { %v1596_v57 = vpack.c.bf16 %v1564_v59, %v1564_v59  ;;  %v1656_v17 = vunpack.c.l.b16 %v1592_v2  ;;  %v1594_v33 = vpack.c.bf16 %v1562_v46, %v1562_v46  ;;  %v1652_v20 = vunpack.c.l.b16 %v1588_v61 }
 0x1a6   : > { %v1657_v18 = vunpack.c.l.b16 %v1593_v32  ;;  %v1654_v21 = vunpack.c.l.b16 %v1590_v63  ;;  %v1531_v22 = vadd.f32 %v7679_v13, %v7690_v11  ;;  %v1535_v54 = vadd.f32 %v1422_v60, %v7690_v11 }
 0x1a7   : > { %v1533_v7 = vadd.f32 %v1412_v51, %v7690_v11  ;;  %v1534_v6 = vadd.f32 %v1417_v52, %v7690_v11  ;;  %v1655_v38 = vunpack.c.l.b16 %v1591_v35  ;;  %v1536_v28 = vadd.f32 %v1427_v26, %v7690_v11 }
 0x1a8   : > { %v1537_v29 = vadd.f32 %v1432_v5, %v7690_v11  ;;  %v7739_v12 = vpack.c.b16 %v1657_v18, %v1656_v17  ;;  %v1563_v25 = vmul.f32 %v6784_v4, %v1531_v22  ;;  %v1567_v13 = vmul.f32 %v6785_v31, %v1535_v54 }
 0x1a9   : > { %v1565_v60 = vmul.f32 %v6786_v15, %v1533_v7  ;;  %v1566_v37 = vmul.f32 %v6787_v34, %v1534_v6  ;;  %v1653_v40 = vunpack.c.l.b16 %v1589_v16  ;;  %v1658_v52 = vunpack.c.l.b16 %v1594_v33 }
 0x1aa   : > { %v1568_v23 = vmul.f32 %v6788_v41, %v1536_v28  ;;  %v1569_v42 = vmul.f32 %v6789_v24, %v1537_v29  ;;  %2879 = vrot.lane.b32.xlu0 %v7739_v12, %s6929_s27  ;;  %v1595_v45 = vpack.c.bf16 %v1563_v25, %v1563_v25  ;;  %v1599_v43 = vpack.c.bf16 %v1567_v13, %v1567_v13 }
 0x1ab   : > { %v1597_v27 = vpack.c.bf16 %v1565_v60, %v1565_v60  ;;  %v1598_v39 = vpack.c.bf16 %v1566_v37, %v1566_v37  ;;  %v1660_v44 = vunpack.c.l.b16 %v1596_v57  ;;  %v1720_v19 = vshll.u32 %v7739_v12, 16  ;;  %v6427_v60 = vld [vmem:[%s10607_s2 + $0x58] sm:$0xff] }
 0x1ac   : > { %v1600_v47 = vpack.c.bf16 %v1568_v23, %v1568_v23  ;;  %v1601_v50 = vpack.c.bf16 %v1569_v42, %v1569_v42  ;;  %v1659_v46 = vunpack.c.l.b16 %v1595_v45  ;;  %v1663_v1 = vunpack.c.l.b16 %v1599_v43 }
 0x1ad   : > { %v1661_v59 = vunpack.c.l.b16 %v1597_v27  ;;  %v1662_v55 = vunpack.c.l.b16 %v1598_v39  ;;  %v7750_v63 = vpack.c.b16 %v1653_v40, %v1652_v20  ;;  %v7753_v2 = vunpack.c.h.b16 %v10641_v30 }
 0x1ae   : > { %v1664_v48 = vunpack.c.l.b16 %v1600_v47  ;;  %v1665_v61 = vunpack.c.l.b16 %v1601_v50  ;;  %v1687_v35 = vpack.c.b16 %v1659_v46, %v1658_v52  ;;  %v7757_v16 = vpack.c.b16 %v1655_v38, %v1654_v21 }
 0x1af   : > { %v7755_v32 = vpack.c.b16 %v1663_v1, %v1662_v55  ;;  %v6039_v57 = vunpack.i.l.s16 %v2702_v3  ;;  %2875 = vrot.lane.b32.xlu1 %v7750_v63, %s6929_s27  ;;  %v7763_v5 = vpack.c.b16 %v1661_v59, %v1660_v44  ;;  %v2700_v33 = vunpack.c.l.b16 %v7727_v36 }
 0x1b0   : > { %v7761_v17 = vpack.c.b16 %v1665_v61, %v1664_v48  ;;  %2881 = vrot.lane.b32.xlu2 %v1687_v35, %s6929_s27  ;;  %v1725_v18 = vshrl.u32 %v1687_v35, 16  ;;  %v1728_v20 = vshll.u32 %v1687_v35, 16  ;;  %v1705_v51 = vshll.u32 %v7750_v63, 16 }
 0x1b1   : > { %v1853_v21 = vrot.slane %v1720_v19, 1  ;;  %v1741_v3 = vshrl.u32 %v7755_v32, 16  ;;  %v1712_v22 = vshll.u32 %v7757_v16, 16  ;;  %v1717_v36 = vshrl.u32 %v7739_v12, 16 }
 0x1b2   : > { %2887 = vrot.lane.b32.xlu0 %v7761_v17, %s6929_s27  ;;  %v1727_v54 = vrot.slane %v1725_v18, 7  ;;  %vm2759_vm9 = vcmp.ne.s32.totalorder %v6039_v57, %v7753_v2  ;;  %v1709_v6 = vshrl.u32 %v7757_v16, 16  ;;  %v1736_v38 = vshll.u32 %v7763_v5, 16 }
 0x1b3   : > { %v1850_v26 = vrot.slane %v1712_v22, 1  ;;  %v6037_v28 = vunpack.i.l.s16 %v2700_v33  ;;  %v1848_v29 = vrot.slane %v1705_v51, 1  ;;  %v1855_v4 = vor.u32 %v1853_v21, %v1717_v36  ;;  %vm7789_vm11 = vmpackc.low %vm2759_vm9, %vm7777_vm7 }
 0x1b4   : > { %v1856_v25 = vrot.slane %v1728_v20, 1  ;;  %v1702_v31 = vshrl.u32 %v7750_v63, 16  ;;  %v1743_v13 = vrot.slane %v1741_v3, 7  ;;  %v1733_v34 = vshrl.u32 %v7763_v5, 16 }
 0x1b5   : > { %v1852_v15 = vor.u32 %v1850_v26, %v1709_v6  ;;  %v1719_v40 = vrot.slane %v1717_v36, 7  ;;  %v1730_v52 = vor.u32 %v1728_v20, %v1727_v54  ;;  %v1749_v23 = vshrl.u32 %v7761_v17, 16 }
 0x1b6   : > { %v7795_v37 = vsel %vm10624_vm6, %v1855_v4, %v1856_v25  ;;  %v1858_v41 = vor.u32 %v1856_v25, %v1725_v18  ;;  %v7801_v42 = vrot.slane %v1736_v38, 1  ;;  %v1744_v45 = vshll.u32 %v7755_v32, 16 }
 0x1b7   : > { %2877 = vrot.lane.b32.xlu1 %v7757_v16, %s6929_s27  ;;  %v1854_v24 = vsel %vm10624_vm6, %v1852_v15, %v1853_v21  ;;  %v1849_v27 = vor.u32 %v1848_v29, %v1702_v31  ;;  %v7809_v39 = vsel %vm10625_vm10, %v1719_v40, %v1730_v52  ;;  %vm2752_vm12 = vcmp.ne.s32.totalorder %v6037_v28, %v7753_v2  ;;  %v6792_v29 = vld [vmem:[%s7085_s13 + $0xb0] sm:$0xff]  ;;  %v6793_v15 = vld [vmem:[%s7085_s13 + $0xc0] sm:$0xff]  ;;  %v6794_v52 = vld [vmem:[%s7085_s13 + $0xb8] sm:$0xff] }
 0x1b8   : > { %2885 = vrot.lane.b32.xlu2 %v7755_v32, %s6929_s27  ;;  %v2860_v43 = vsel %vm7789_vm11, 0, %v1854_v24  ;;  %v7815_v44 = vsel %vm10624_vm6, %v1858_v41, %v7801_v42  ;;  %v1735_v47 = vrot.slane %v1733_v34, 7  ;;  %v1746_v50 = vor.u32 %v1744_v45, %v1743_v13  ;;  %vm7824_vm13 = vmpackc.low %vm2752_vm12, %vm7777_vm7 }
 0x1b9   : > { %v7819_v46 = vrot.slane %v1749_v23, 7  ;;  %v1711_v1 = vrot.slane %v1709_v6, 7  ;;  %v1851_v59 = vsel %vm10624_vm6, %v1849_v27, %v1850_v26  ;;  %v1722_v61 = vor.u32 %v1720_v19, %v1719_v40 }
 0x1ba   : > { %2925 = vrot.lane.b32.xlu0 %v2860_v43, %s6930_s15  ;;  %v7829_v48 = vsel %vm10625_vm10, %v1735_v47, %v1746_v50  ;;  %v1752_v63 = vshll.u32 %v7761_v17, 16  ;;  %v1704_v16 = vrot.slane %v1702_v31, 7  ;;  %v2859_v57 = vsel %vm7824_vm13, 0, %v1851_v59 }
 0x1bb   : > { %v7835_v35 = vsel %vm10625_vm10, %v1711_v1, %v1722_v61  ;;  %v1714_v18 = vor.u32 %v1712_v22, %v1711_v1  ;;  %v1738_v20 = vor.u32 %v1736_v38, %v1735_v47  ;;  %v7857_v22 = vld [vmem:[%s10614_s9 + $0x2] ss:$0 sm:$0xff]  ;;  %v1926_v28 = vadd.s32 88, %v7676_v10  ;;  %v6403_v61 = vld [vmem:[%s10606_s1 + $0x28] sm:$0xff] }
 0x1bc   : > { %v1754_v33 = vor.u32 %v1752_v63, %v7819_v46  ;;  %v7843_v12 = vor.u32 %v1705_v51, %v1704_v16  ;;  %v1865_v36 = vrot.slane %v1752_v63, 1  ;;  %v737_v51 = vadd.f32 %v7857_v22, %v7661_v0  ;;  %v6415_v63 = vld [vmem:[%s10606_s1 + $0x88] sm:$0xff]  ;;  %3119 = vmatpush.bf16.msrb.mxu1 %v6403_v61  ;;  %6435 = vmatpush.bf16.msra.mxu2 %v6403_v61 }
 0x1bd   : > { %v7849_v17 = vsel %vm10625_vm10, %v1704_v16, %v1714_v18  ;;  %v7852_v21 = vsel %vm10625_vm10, %v1727_v54, %v1738_v20  ;;  %v2028_v38 = vand.u32 15, %v1926_v28  ;;  %v7867_v54 = vld [vmem:[%s10614_s9 + $0x1] ss:$0 sm:$0xff]  ;;  %v1920_v31 = vadd.s32 40, %v7676_v10  ;;  %3268 = vmatpush.bf16.msrb.mxu0 %v6415_v63  ;;  %6441 = vmatpush.bf16.msra.mxu3 %v6415_v63 }
 0x1be   : > { %v7846_v19 = vsel %vm10625_vm10, %v1743_v13, %v1754_v33  ;;  %v7861_v6 = vor.u32 %v1865_v36, %v1749_v23  ;;  %v5986_v26 = vmul.f32 -1.442695, %v737_v51  ;;  %v616_v4 = vmul.f32 %v6792_v29, %v7867_v54 }
 0x1bf   : > { %2883 = vrot.lane.b32.xlu1 %v7763_v5, %s6929_s27  ;;  %vm2614_vm14 = vcmp.eq.s32.totalorder %v2028_v38, 15  ;;  %v618_v40 = vmul.f32 %v6793_v15, %v7867_v54  ;;  %v617_v41 = vmul.f32 %v6794_v52, %v7867_v54  ;;  %v1986_v23 = vand.u32 15, %v1920_v31  ;;  %v6412_v31 = vld [vmem:[%s10606_s1 + $0x70] sm:$0xff] }
 0x1c0   : > { %2923 = vrot.lane.b32.xlu2 %v2859_v57, %s6930_s15  ;;  %6576 = vpow2.f32 %v5986_v26  ;;  %v692_v0 = vsel %vm10626_vm0, %v616_v4, 0.0  ;;  %vm2646_vm15 = vmpackc.low %vm2614_vm14, %vm2614_vm14  ;;  %v1922_v50 = vadd.s32 56, %v7676_v10  ;;  %v7886_v59 = vrot.slane %v1744_v45, 1  ;;  %v6402_v57 = vld [vmem:[%s10606_s1 + $0x20] sm:$0xff] }
 0x1c1   : > { %v2678_v24 = vsel %vm2646_vm15, 65537, %v10641_v30  ;;  %v698_v43 = vsel %vm10626_vm0, %v618_v40, 0.0  ;;  %v695_v27 = vsel %vm10626_vm0, %v617_v41, 0.0  ;;  %vm2608_vm2 = vcmp.eq.s32.totalorder %v1986_v23, 15  ;;  %v6414_v45 = vld [vmem:[%s10606_s1 + $0x80] sm:$0xff]  ;;  %3120 = vmatpush.bf16.msrb.mxu1 %v6402_v57  ;;  %6436 = vmatpush.bf16.msra.mxu2 %v6402_v57 }
 0x1c2   : > { %v2710_v47 = vunpack.c.l.b16 %v2678_v24  ;;  %vm2640_vm3 = vmpackc.low %vm2608_vm2, %vm2608_vm2  ;;  %v2000_v20 = vand.u32 15, %v1922_v50  ;;  %v1864_v51 = vor.u32 %v7886_v59, %v1741_v3  ;;  %3269 = vmatpush.bf16.msrb.mxu0 %v6414_v45  ;;  %v1924_v29 = vadd.s32 72, %v7676_v10  ;;  %6442 = vmatpush.bf16.msra.mxu3 %v6414_v45  ;;  %v6401_v3 = vld [vmem:[%s10606_s1 + $0x18] sm:$0xff]  ;;  %v6411_v50 = vld [vmem:[%s10606_s1 + $0x68] sm:$0xff] }
 0x1c3   : > { %v2672_v33 = vsel %vm2640_vm3, 65537, %v10641_v30  ;;  %v10736_v32 = vmov 0  ;;  %v6398_v45 = vld [vmem:[%s10606_s1] sm:$0xff] }
 0x1c4   : > { %v6047_v16 = vunpack.i.l.s16 %v2710_v47  ;;  %v2704_v26 = vunpack.c.l.b16 %v2672_v33  ;;  %vm7907_vm5 = vcmp.eq.s32.totalorder %v2000_v20, 15  ;;  %v1866_v4 = vsel %vm10624_vm6, %v1864_v51, %v1865_v36  ;;  %v6400_v36 = vld [vmem:[%s10606_s1 + $0x10] sm:$0xff]  ;;  %v6399_v47 = vld [vmem:[%s10606_s1 + $0x8] sm:$0xff] }
 0x1c5   : > { %vm2642_vm12 = vmpackc.low %vm7907_vm5, %vm7907_vm5  ;;  %3121 = vmatpush.bf16.msrb.mxu1 %v6401_v3  ;;  %v2014_v52 = vand.u32 15, %v1924_v29  ;;  %6437 = vmatpush.bf16.msra.mxu2 %v6401_v3  ;;  %v1951_v3 = vand.u32 15, %v7676_v10 }
 0x1c6   : > { %v6577_v25 = vpop.eup %6576  ;;  %vm2787_vm4 = vcmp.ne.s32.totalorder %v6047_v16, %v7753_v2  ;;  %v2674_v41 = vsel %vm2642_vm12, 65537, %v10641_v30  ;;  %v1919_v16 = vadd.s32 32, %v7676_v10 }
 0x1c7   : > { %v7873_v13 = vadd.f32 1.0, %v6577_v25  ;;  %vm7915_vm9 = vmpackc.low %vm2787_vm4, %vm7777_vm7  ;;  %v6413_v25 = vld [vmem:[%s10606_s1 + $0x78] sm:$0xff]  ;;  %vm7945_vm3 = vcmp.eq.s32.totalorder %v2014_v52, 15  ;;  %v2706_v63 = vunpack.c.l.b16 %v2674_v41 }
 0x1c8   : > { %v10737_v32 = vsel %vm7915_vm9, 4294967295, %v10736_v32  ;;  %3270 = vmatpush.bf16.msrb.mxu0 %v6413_v25  ;;  %v2864_v15 = vsel %vm7915_vm9, 0, %v1866_v4  ;;  %6443 = vmatpush.bf16.msra.mxu3 %v6413_v25  ;;  %vm2644_vm12 = vmpackc.low %vm7945_vm3, %vm7945_vm3 }
 0x1c9   : > { %6578 = vrcp.f32 %v7873_v13  ;;  %vm1098_vm14 = vweird.f32 %v7873_v13  ;;  %v1104_v23 = vand.u32 2147483648, %v7873_v13  ;;  %3122 = vmatpush.bf16.msrb.mxu1 %v6400_v36  ;;  %6438 = vmatpush.bf16.msra.mxu2 %v6400_v36  ;;  %v6043_v20 = vunpack.i.l.s16 %v2706_v63 }
 0x1cb   : > { %v1105_v57 = vor.u32 1.1754944e-38, %v1104_v23 }
 0x1cc   : > { %3271 = vmatpush.bf16.msrb.mxu0 %v6412_v31  ;;  %6444 = vmatpush.bf16.msra.mxu3 %v6412_v31  ;;  %v1861_v31 = vor.u32 %v7801_v42, %v1733_v34  ;;  %v6426_v34 = vld [vmem:[%s10607_s2 + $0x50] sm:$0xff] }
 0x1cd   : > { %3123 = vmatpush.bf16.msrb.mxu1 %v6399_v47  ;;  %6439 = vmatpush.bf16.msra.mxu2 %v6399_v47 }
 0x1ce   : > { %v1863_v5 = vsel %vm10624_vm6, %v1861_v31, %v7886_v59 }
 0x1cf   : > { %v7884_v1 = vpop.eup %6578 }
 0x1d0   : > { %v1094_v18 = vmul.f32 %v7884_v1, %v7873_v13  ;;  %vm1099_vm15 = vweird.f32 %v7884_v1  ;;  %3272 = vmatpush.bf16.msrb.mxu0 %v6411_v50  ;;  %6445 = vmatpush.bf16.msra.mxu3 %v6411_v50 }
 0x1d1   : > { %vm7955_vm4 = vmor %vm1098_vm14, %vm1099_vm15  ;;  %3124 = vmatpush.bf16.msrb.mxu1 %v6398_v45  ;;  %vm2773_vm15 = vcmp.ne.s32.totalorder %v6043_v20, %v7753_v2  ;;  %6440 = vmatpush.bf16.msra.mxu2 %v6398_v45 }
 0x1d2   : > { %v1095_v28 = vsub.f32 1.0, %v1094_v18  ;;  %v6410_v18 = vld [vmem:[%s10606_s1 + $0x60] sm:$0xff]  ;;  %vm7989_vm3 = vmpackc.low %vm2773_vm15, %vm7777_vm7 }
 0x1d3   : > { %v2862_v36 = vsel %vm7989_vm3, 0, %v7815_v44 }
 0x1d4   : > { %v1096_v40 = vmul.f32 %v7884_v1, %v1095_v28  ;;  %v1979_v28 = vand.u32 15, %v1919_v16  ;;  %3273 = vmatpush.bf16.msrb.mxu0 %v6410_v18  ;;  %6446 = vmatpush.bf16.msra.mxu3 %v6410_v18 }
 0x1d6   : > { %v1097_v24 = vadd.f32 %v7884_v1, %v1096_v40  ;;  %v743_v40 = vadd.f32 %v7857_v22, %v7674_v58  ;;  %v740_v58 = vadd.f32 %v7857_v22, %v7659_v8  ;;  %v8030_v8 = vpop.permute.xlu0 %1441 }
 0x1d8   : > { %v1101_v33 = vsel %vm7955_vm4, %v7884_v1, %v1097_v24  ;;  %v739_v1 = vadd.f32 %v7857_v22, %v7665_v49  ;;  %v5992_v42 = vmul.f32 -1.442695, %v743_v40  ;;  %v1917_v24 = vadd.s32 16, %v7676_v10  ;;  %4476 = vmatpush.bf16.msrb.mxu3 %v6427_v60 }
 0x1d9   : > { %v5989_v50 = vmul.f32 -1.442695, %v740_v58 }
 0x1da   : > { %v5988_v25 = vmul.f32 -1.442695, %v739_v1  ;;  %v1965_v16 = vand.u32 15, %v1917_v24 }
 0x1dc   : > { %6580 = vpow2.f32 %v5988_v25  ;;  %4477 = vmatpush.bf16.msrb.mxu3 %v6426_v34 }
 0x1dd   : > { %6582 = vpow2.f32 %v5992_v42 }
 0x1de   : > { %6584 = vpow2.f32 %v5989_v50 }
 0x1e4   : > { %693 = vadd.xlane.f32.xlu0 %v692_v0  ;;  %v6041_v0 = vunpack.i.l.s16 %v2704_v26  ;;  %v2676_v26 = vsel %vm2644_vm12, 65537, %v10641_v30  ;;  %vm2331_vm12 = vcmp.eq.s32.totalorder %v1951_v3, 0 }
 0x1e5   : > { %v2708_v29 = vunpack.c.l.b16 %v2676_v26 }
 0x1e6   : > { %vm2766_vm2 = vcmp.ne.s32.totalorder %v6041_v0, %v7753_v2 }
 0x1e7   : > { %vm7961_vm5 = vmpackc.low %vm2766_vm2, %vm7777_vm7  ;;  %vm2335_vm2 = vcmp.eq.s32.totalorder %v1979_v28, 0  ;;  %v6045_v0 = vunpack.i.l.s16 %v2708_v29 }
 0x1e8   : > { %v2861_v51 = vsel %vm7961_vm5, 0, %v7795_v37  ;;  %v1927_v37 = vadd.s32 96, %v7676_v10  ;;  %vm2367_vm4 = vmpackc.low %vm2335_vm2, %vm2335_vm2 }
 0x1e9   : > { %699 = vadd.xlane.f32.xlu2 %v698_v43  ;;  %696 = vadd.xlane.f32.xlu1 %v695_v27  ;;  %v1102_v43 = vand.u32 2147483647, %v7873_v13  ;;  %vm2363_vm2 = vmpackc.low %vm2331_vm12, %vm2331_vm12  ;;  %vm8036_vm12 = vcmp.ne.s32.totalorder %v7719_v14, %v7753_v2  ;;  %v10752_v14 = vmov 0 }
 0x1ea   : > { %v2035_v49 = vand.u32 15, %v1927_v37  ;;  %v2395_v23 = vsel %vm2363_vm2, 65537, %v10641_v30  ;;  %vm8052_vm2 = vcmp.eq.s32.totalorder %v1965_v16, 0 }
 0x1eb   : > { %vm1103_vm14 = vcmp.eq.f32.partialorder %v1102_v43, 8.507059e+37  ;;  %v6581_v43 = vpop.eup %6580  ;;  %v2427_v61 = vunpack.c.l.b16 %v2395_v23  ;;  %vm2365_vm6 = vmpackc.low %vm8052_vm2, %vm8052_vm2  ;;  %vm10627_vm2 = vcmask 523264  }
 0x1ec   : > { %v1106_v38 = vsel %vm1103_vm14, %v1105_v57, %v1101_v33  ;;  %vm2780_vm14 = vcmp.ne.s32.totalorder %v6045_v0, %v7753_v2  ;;  %vm8005_vm15 = vcmp.eq.s32.totalorder %v2035_v49, 0  ;;  %v8032_v63 = vadd.f32 1.0, %v6581_v43  ;;  %v6583_v26 = vpop.eup %6582 }
 0x1ed   : > { %vm2375_vm8 = vmpackc.low %vm8005_vm15, %vm8005_vm15  ;;  %v742_v33 = vadd.f32 %v7857_v22, %v7672_v56  ;;  %v6004_v18 = vunpack.i.l.s16 %v2427_v61  ;;  %v10757_v56 = vmov 0  ;;  %v8070_v25 = vadd.f32 1.0, %v6583_v26  ;;  %v6585_v49 = vpop.eup %6584 }
 0x1ee   : > { %v2407_v47 = vsel %vm2375_vm8, 65537, %v10641_v30  ;;  %vm1844_vm8 = vcmask 1040384   ;;  %6586 = vrcp.f32 %v8032_v63  ;;  %v2397_v40 = vsel %vm2365_vm6, 65537, %v10641_v30 }
 0x1ef   : > { %v2439_v45 = vunpack.c.l.b16 %v2407_v47  ;;  %vm8057_vm1 = vmand %vm1844_vm8, %vm10625_vm10  ;;  %v5991_v29 = vmul.f32 -1.442695, %v742_v33  ;;  %v8089_v52 = vadd.f32 1.0, %v6585_v49  ;;  %v2429_v58 = vunpack.c.l.b16 %v2397_v40  ;;  %v6796_v47 = vld [vmem:[%s7085_s13 + $0xc8] sm:$0xff] }
 0x1f0   : > { %v10758_v56 = vsel %vm8057_vm1, 4294967295, %v10757_v56  ;;  %v1846_v31 = vsel %vm8057_vm1, 0, %v7843_v12  ;;  %vm10766_vm6 = vcmask 261120   ;;  %v619_v50 = vmul.f32 %v6796_v47, %v7867_v54 }
 0x1f1   : > { %v6016_v28 = vunpack.i.l.s16 %v2439_v45  ;;  %10759 = vst [vmem:[#allocation14_spill] sm:$0xff] %v10758_v56  ;;  %6588 = vpow2.f32 %v5991_v29  ;;  %v6006_v45 = vunpack.i.l.s16 %v2429_v58  ;;  %v1134_v29 = vand.u32 2147483648, %v8032_v63 }
 0x1f2   : > { %6590 = vrcp.f32 %v8070_v25  ;;  %v1132_v49 = vand.u32 2147483647, %v8032_v63  ;;  %v1194_v47 = vand.u32 2147483648, %v8070_v25 }
 0x1f3   : > { %vm2521_vm8 = vcmp.ne.s32.totalorder %v6016_v28, %v7730_v62  ;;  %6592 = vrcp.f32 %v8089_v52 }
 0x1f8   : > { %2933 = vrot.lane.b32.xlu0 %v2864_v15, %s6930_s15  ;;  %v2399_v15 = vsel %vm2367_vm4, 65537, %v10641_v30  ;;  %vm8015_vm4 = vmpackc.low %vm2780_vm14, %vm7777_vm7 }
 0x1f9   : > { %v2431_v44 = vunpack.c.l.b16 %v2399_v15  ;;  %v2863_v59 = vsel %vm8015_vm4, 0, %v1863_v5 }
 0x1fb   : > { %v6008_v27 = vunpack.i.l.s16 %v2431_v44  ;;  %v10763_v44 = vmov 0 }
 0x1fd   : > { %vm2493_vm14 = vcmp.ne.s32.totalorder %v6008_v27, %v7730_v62 }
 0x1fe   : > { %vm8048_vm15 = vmpackc.low %vm8036_vm12, %vm2493_vm14  ;;  %vm2479_vm14 = vcmp.ne.s32.totalorder %v6004_v18, %v7730_v62 }
 0x1ff   : > { %v10753_v14 = vsel %vm8048_vm15, 4294967295, %v10752_v14  ;;  %v2589_v3 = vsel %vm8048_vm15, 0, %v7835_v35  ;;  %vm8080_vm10 = vmpackc.low %vm8036_vm12, %vm2479_vm14  ;;  %v10760_v35 = vmov 0  ;;  %vm10774_vm15 = vcmask 523264  }
 0x200   : > { %10754 = vst [vmem:[#allocation13_spill] sm:$0xff] %v10753_v14  ;;  %v10761_v35 = vsel %vm8080_vm10, 4294967295, %v10760_v35  ;;  %vm8094_vm14 = vmpackc.low %vm8036_vm12, %vm2521_vm8  ;;  %v2587_v12 = vsel %vm8080_vm10, 0, %v1846_v31 }
 0x201   : > { %2927 = vrot.lane.b32.xlu2 %v2861_v51, %s6930_s15  ;;  %10762 = vst [vmem:[#allocation15_spill] sm:$0xff] %v10761_v35  ;;  %v10764_v44 = vsel %vm8094_vm14, 4294967295, %v10763_v44  ;;  %vm10767_vm8 = vmmov %vm10766_vm6 }
 0x202   : > { %1436 = vperm.xlu1 %6502, %v1106_v38   ;;  %v6795_v38 = vld [vmem:[%s7085_s13 + $0xd8] sm:$0xff]  ;;  %10765 = vst [vmem:[#allocation16_spill] sm:$0xff] %v10764_v44 }
 0x203   : > { %v621_v1 = vmul.f32 %v6795_v38, %v7867_v54 }
 0x205   : > { %v707_v15 = vsel %vm10626_vm0, %v621_v1, 0.0  ;;  %v10768_v1 = vmov 0 }
 0x20a   : > { %2929 = vrot.lane.b32.xlu1 %v2862_v36, %s6930_s15  ;;  %v8009_v41 = vpop.permute.xlu2 %2881  ;;  %v8076_v36 = vpop.eup %6586 }
 0x20b   : > { %v1124_v42 = vmul.f32 %v8076_v36, %v8032_v63  ;;  %v6589_v16 = vpop.eup %6588 }
 0x20c   : > { %v6591_v18 = vpop.eup %6590  ;;  %v8120_v51 = vadd.f32 1.0, %v6589_v16  ;;  %v6797_v16 = vld [vmem:[%s7085_s13 + $0xd0] sm:$0xff] }
 0x20d   : > { %v1125_v33 = vsub.f32 1.0, %v1124_v42  ;;  %v1184_v28 = vmul.f32 %v6591_v18, %v8070_v25  ;;  %v6593_v38 = vpop.eup %6592  ;;  %v1135_v42 = vor.u32 1.1754944e-38, %v1134_v29  ;;  %vm1189_vm10 = vweird.f32 %v6591_v18 }
 0x20e   : > { %6594 = vrcp.f32 %v8120_v51 }
 0x20f   : > { %v1126_v26 = vmul.f32 %v8076_v36, %v1125_v33  ;;  %v1185_v31 = vsub.f32 1.0, %v1184_v28  ;;  %v1149_v28 = vand.u32 2147483648, %v8089_v52 }
 0x212   : > { %2931 = vrot.lane.b32.xlu1 %v2863_v59, %s6930_s15  ;;  %v8044_v20 = vpop.permute.xlu2 %2885  ;;  %v2593_v59 = vsel %vm8094_vm14, 0, %v7846_v19  ;;  %v701_v19 = vsel %vm10766_vm6, %v619_v50, 0.0 }
 0x21a   : > { %v2924_v23 = vpop.permute.xlu2 %2923 }
 0x21c   : > { %v2880_v37 = vpop.permute.xlu0 %2879 }
 0x21d   : > { %v8073_v0 = vsel %vm10626_vm0, %v2589_v3, %v2880_v37  ;;  %vm10628_vm0 = vcmask 785408   ;;  %v1127_v3 = vadd.f32 %v8076_v36, %v1126_v26  ;;  %v1195_v26 = vor.u32 1.1754944e-38, %v1194_v47 }
 0x221   : > { %v2876_v5 = vpop.permute.xlu1 %2875 }
 0x222   : > { %708 = vadd.xlane.f32.xlu0 %v707_v15  ;;  %v2957_v24 = vsel %vm10766_vm6, %v2587_v12, %v2876_v5  ;;  %v1139_v5 = vmul.f32 %v6593_v38, %v8089_v52 }
 0x223   : > { %v8104_v43 = vsel %vm10627_vm2, %v2957_v24, %v2924_v23  ;;  %vm2486_vm2 = vcmp.ne.s32.totalorder %v6006_v45, %v7730_v62  ;;  %v1186_v24 = vmul.f32 %v6591_v18, %v1185_v31  ;;  %v620_v45 = vmul.f32 %v6797_v16, %v7867_v54 }
 0x224   : > { %v2888_v27 = vpop.permute.xlu0 %2887  ;;  %6092 = vmatmul.msk.bf16.vlgmr.msrb.gmra.mxu1 %vm10628_vm0, %v8104_v43  ;;  %6156 = vmatmul.msk.bf16.vlgmr.msrb.gmra.mxu0 %vm10628_vm0, %v8104_v43  ;;  %vm1129_vm0 = vweird.f32 %v8076_v36  ;;  %vm8129_vm14 = vmpackc.low %vm8036_vm12, %vm2486_vm2  ;;  %vm10773_vm2 = vcmask 261120  }
 0x225   : > { %v8116_v61 = vsel %vm10767_vm8, %v2593_v59, %v2888_v27  ;;  %vm1128_vm8 = vweird.f32 %v8032_v63  ;;  %v10769_v1 = vsel %vm8129_vm14, 4294967295, %v10768_v1  ;;  %v2588_v12 = vsel %vm8129_vm14, 0, %v7849_v17  ;;  %v6595_v27 = vpop.eup %6594 }
 0x226   : > { %10770 = vst [vmem:[#allocation17_spill] sm:$0xff] %v10769_v1  ;;  %vm8137_vm6 = vmor %vm1128_vm8, %vm1129_vm0  ;;  %vm1133_vm0 = vcmp.eq.f32.partialorder %v1132_v49, 8.507059e+37  ;;  %v1140_v59 = vsub.f32 1.0, %v1139_v5  ;;  %vm1188_vm8 = vweird.f32 %v8070_v25  ;;  %vm10775_vm14 = vcmask 785408  }
 0x227   : > { %v1131_v63 = vsel %vm8137_vm6, %v8076_v36, %v1127_v3  ;;  %v1187_v50 = vadd.f32 %v6591_v18, %v1186_v24  ;;  %v1192_v36 = vand.u32 2147483647, %v8070_v25  ;;  %vm1143_vm6 = vweird.f32 %v8089_v52 }
 0x228   : > { %v1136_v17 = vsel %vm1133_vm0, %v1135_v42, %v1131_v63  ;;  %v1141_v33 = vmul.f32 %v6593_v38, %v1140_v59  ;;  %v1147_v25 = vand.u32 2147483647, %v8089_v52  ;;  %vm1174_vm9 = vweird.f32 %v6595_v27 }
 0x229   : > { %v2878_v37 = vpop.permute.xlu1 %2877  ;;  %vm1193_vm0 = vcmp.eq.f32.partialorder %v1192_v36, 8.507059e+37  ;;  %v1177_v42 = vand.u32 2147483647, %v8120_v51  ;;  %v744_v59 = vadd.f32 %v7857_v22, %v7663_v9 }
 0x22a   : > { %702 = vadd.xlane.f32.xlu2 %v701_v19  ;;  %v2960_v58 = vsel %vm10773_vm2, %v2588_v12, %v2878_v37  ;;  %vm10776_vm2 = vmmov %vm10775_vm14  ;;  %v1169_v19 = vmul.f32 %v6595_v27, %v8120_v51  ;;  %v1142_v3 = vadd.f32 %v6593_v38, %v1141_v33 }
 0x22b   : > { %v5993_v47 = vmul.f32 -1.442695, %v744_v59 }
 0x22c   : > { %v2926_v15 = vpop.permute.xlu0 %2925  ;;  %v1170_v49 = vsub.f32 1.0, %v1169_v19  ;;  %v6798_v19 = vld [vmem:[%s7085_s13 + $0xf0] sm:$0xff] }
 0x22d   : > { %v8147_v23 = vsel %vm10774_vm15, %v2960_v58, %v2926_v15  ;;  %vm1190_vm15 = vmor %vm1188_vm8, %vm1189_vm10  ;;  %v1150_v15 = vor.u32 1.1754944e-38, %v1149_v28  ;;  %vm1148_vm10 = vcmp.eq.f32.partialorder %v1147_v25, 8.507059e+37  ;;  %vm1173_vm8 = vweird.f32 %v8120_v51 }
 0x22e   : > { %v1191_v29 = vsel %vm1190_vm15, %v6591_v18, %v1187_v50  ;;  %v1171_v5 = vmul.f32 %v6595_v27, %v1170_v49  ;;  %v1179_v18 = vand.u32 2147483648, %v8120_v51  ;;  %vm1175_vm15 = vmor %vm1173_vm8, %vm1174_vm9  ;;  %v1921_v50 = vadd.s32 48, %v7676_v10 }
 0x22f   : > { %v1196_v31 = vsel %vm1193_vm0, %v1195_v26, %v1191_v29  ;;  %6596 = vpow2.f32 %v5993_v47  ;;  %v624_v26 = vmul.f32 %v6798_v19, %v7867_v54  ;;  %v1928_v25 = vadd.s32 104, %v7676_v10 }
 0x230   : > { %v1172_v58 = vadd.f32 %v6595_v27, %v1171_v5  ;;  %v1180_v52 = vor.u32 1.1754944e-38, %v1179_v18  ;;  %v1993_v33 = vand.u32 15, %v1921_v50  ;;  %vm10782_vm0 = vcmask 785408  }
 0x231   : > { %v1923_v18 = vadd.s32 64, %v7676_v10 }
 0x232   : > { %v1176_v63 = vsel %vm1175_vm15, %v6595_v27, %v1172_v58 }
 0x234   : > { %6093 = vmatmul.msk.bf16.gmra.mxu1 %vm10775_vm14, %v8147_v23  ;;  %6157 = vmatmul.msk.bf16.gmra.mxu0 %vm10776_vm2, %v8147_v23  ;;  %vm1144_vm14 = vweird.f32 %v6593_v38  ;;  %vm10777_vm2 = vcmask 261120  }
 0x235   : > { %v704_v37 = vsel %vm10777_vm2, %v620_v45, 0.0  ;;  %vm1145_vm1 = vmor %vm1143_vm6, %vm1144_vm14  ;;  %vm1178_vm6 = vcmp.eq.f32.partialorder %v1177_v42, 8.507059e+37  ;;  %vm10781_vm14 = vcmask 523264   ;;  %v6597_v49 = vpop.eup %6596  ;;  %v6799_v42 = vld [vmem:[%s7085_s13 + $0xe0] sm:$0xff] }
 0x236   : > { %1446 = vperm.xlu0 %6501, %v1136_v17   ;;  %v1146_v40 = vsel %vm1145_vm1, %v6593_v38, %v1142_v3  ;;  %v1181_v24 = vsel %vm1178_vm6, %v1180_v52, %v1176_v63  ;;  %v8169_v38 = vpop.permute.xlu1 %2883  ;;  %v741_v17 = vadd.f32 %v7857_v22, %v7667_v53  ;;  %vm8180_vm1 = vcmp.eq.s32.totalorder %v1993_v33, 0  ;;  %vm10780_vm9 = vmmov %vm10777_vm2 }
 0x237   : > { %v1151_v12 = vsel %vm1148_vm10, %v1150_v15, %v1146_v40  ;;  %v716_v29 = vsel %vm10780_vm9, %v624_v26, 0.0  ;;  %vm10783_vm2 = vmmov %vm10782_vm0  ;;  %v8197_v5 = vadd.f32 1.0, %v6597_v49  ;;  %v622_v52 = vmul.f32 %v6799_v42, %v7867_v54 }
 0x238   : > { %v5990_v27 = vmul.f32 -1.442695, %v741_v17  ;;  %vm2369_vm10 = vmpackc.low %vm8180_vm1, %vm8180_vm1  ;;  %v1539_v63 = vadd.f32 %v8030_v8, %v7690_v11  ;;  %v2007_v17 = vand.u32 15, %v1923_v18 }
 0x239   : > { %vm10786_vm15 = vmmov %vm10780_vm9 }
 0x23a   : > { %vm8218_vm1 = vcmp.eq.s32.totalorder %v2007_v17, 0 }
 0x23c   : > { %705 = vadd.xlane.f32.xlu1 %v704_v37 }
 0x23e   : > { %1466 = vperm.xlu0 %6501, %v1196_v31  }
 0x242   : > { %1451 = vperm.xlu2 %6503, %v1151_v12   ;;  %v2401_v12 = vsel %vm2369_vm10, 65537, %v10641_v30 }
 0x24a   : > { %1461 = vperm.xlu2 %6503, %v1181_v24   ;;  %v2433_v24 = vunpack.c.l.b16 %v2401_v12  ;;  %v6801_v12 = vld [vmem:[%s7085_s13 + $0x70] sm:$0xff] }
 0x25c   : > { %v700_v36 = vpop.xlane.xlu2 %699  ;;  %v697_v16 = vpop.xlane.xlu1 %696 }
 0x25d   : > { %v747_v51 = vadd.f32 %v7857_v22, %v700_v36  ;;  %v746_v9 = vadd.f32 %v7857_v22, %v697_v16  ;;  %v710_v36 = vsel %vm10786_vm15, %v622_v52, 0.0  ;;  %v6010_v16 = vunpack.i.l.s16 %v2433_v24 }
 0x25f   : > { %v5996_v45 = vmul.f32 -1.442695, %v747_v51  ;;  %v5995_v37 = vmul.f32 -1.442695, %v746_v9  ;;  %v6800_v51 = vld [vmem:[%s7085_s13 + $0x78] sm:$0xff] }
 0x260   : > { %v1571_v8 = vmul.f32 %v6800_v51, %v1539_v63  ;;  %v10789_v63 = vmov 0 }
 0x261   : > { %6598 = vpow2.f32 %v5996_v45 }
 0x262   : > { %6600 = vpow2.f32 %v5990_v27 }
 0x263   : > { %6602 = vpow2.f32 %v5995_v37 }
 0x264   : > { %v2928_v28 = vpop.permute.xlu2 %2927 }
 0x265   : > { %v8187_v3 = vsel %vm10781_vm14, %v8073_v0, %v2928_v28  ;;  %v2042_v0 = vand.u32 15, %v1928_v25 }
 0x266   : > { %6094 = vmatmul.msk.bf16.gmra.mxu1 %vm10782_vm0, %v8187_v3  ;;  %6158 = vmatmul.msk.bf16.gmra.mxu0 %vm10783_vm2, %v8187_v3  ;;  %vm2500_vm0 = vcmp.ne.s32.totalorder %v6010_v16, %v7730_v62  ;;  %vm2371_vm2 = vmpackc.low %vm8218_vm1, %vm8218_vm1  ;;  %vm10793_vm1 = vcmask 523264  }
 0x267   : > { %v6599_v31 = vpop.eup %6598  ;;  %vm8207_vm8 = vcmp.eq.s32.totalorder %v2042_v0, 15  ;;  %vm8243_vm15 = vmpackc.low %vm8036_vm12, %vm2500_vm0 }
 0x268   : > { %717 = vadd.xlane.f32.xlu0 %v716_v29  ;;  %v875_v15 = vadd.f32 1.0, %v6599_v31  ;;  %v6601_v40 = vpop.eup %6600  ;;  %vm2648_vm6 = vmpackc.low %vm8207_vm8, %vm8207_vm8  ;;  %v1603_v31 = vpack.c.bf16 %v1571_v8, %v1571_v8  ;;  %v10790_v63 = vsel %vm8243_vm15, 4294967295, %v10789_v63  ;;  %v2590_v8 = vsel %vm8243_vm15, 0, %v7809_v39 }
 0x269   : > { %v8201_v58 = vadd.f32 1.0, %v6601_v40  ;;  %v6603_v47 = vpop.eup %6602  ;;  %v2680_v53 = vsel %vm2648_vm6, 65537, %v10641_v30  ;;  %10791 = vst [vmem:[#allocation18_spill] sm:$0xff] %v10790_v63  ;;  %vm10792_vm6 = vcmask 261120  }
 0x26a   : > { %6604 = vrcp.f32 %v875_v15  ;;  %v8222_v33 = vadd.f32 1.0, %v6603_v47  ;;  %vm1248_vm9 = vweird.f32 %v875_v15  ;;  %v1254_v19 = vand.u32 2147483648, %v875_v15 }
 0x26b   : > { %6606 = vrcp.f32 %v8197_v5  ;;  %v1252_v9 = vand.u32 2147483647, %v875_v15  ;;  %v2712_v0 = vunpack.c.l.b16 %v2680_v53  ;;  %v1667_v51 = vunpack.c.l.b16 %v1603_v31 }
 0x26c   : > { %6608 = vrcp.f32 %v8201_v58  ;;  %v1255_v40 = vor.u32 1.1754944e-38, %v1254_v19  ;;  %v2966_v45 = vsel %vm10792_vm6, %v2590_v8, %v8009_v41  ;;  %vm1158_vm6 = vweird.f32 %v8201_v58 }
 0x26d   : > { %6610 = vrcp.f32 %v8222_v33  ;;  %vm1253_vm8 = vcmp.eq.f32.partialorder %v1252_v9, 8.507059e+37 }
 0x270   : > { %v6605_v50 = vpop.eup %6604 }
 0x271   : > { %v1244_v27 = vmul.f32 %v6605_v50, %v875_v15  ;;  %vm1249_vm14 = vweird.f32 %v6605_v50  ;;  %v8225_v28 = vpop.eup %6606  ;;  %v2403_v15 = vsel %vm2371_vm2, 65537, %v10641_v30 }
 0x272   : > { %v8232_v49 = vpop.eup %6608  ;;  %vm1250_vm10 = vmor %vm1248_vm9, %vm1249_vm14  ;;  %v1199_v52 = vmul.f32 %v8225_v28, %v8197_v5  ;;  %vm10794_vm9 = vcmask 785408  }
 0x273   : > { %711 = vadd.xlane.f32.xlu2 %v710_v36  ;;  %v1245_v26 = vsub.f32 1.0, %v1244_v27  ;;  %v1154_v17 = vmul.f32 %v8232_v49, %v8201_v58  ;;  %v6049_v36 = vunpack.i.l.s16 %v2712_v0  ;;  %v8258_v19 = vpop.eup %6610  ;;  %vm10795_vm14 = vmmov %vm10794_vm9 }
 0x274   : > { %v1437_v29 = vpop.permute.xlu1 %1436  ;;  %v1200_v27 = vsub.f32 1.0, %v1199_v52  ;;  %v1209_v52 = vand.u32 2147483648, %v8197_v5 }
 0x275   : > { %v1538_v37 = vadd.f32 %v1437_v29, %v7690_v11  ;;  %v1246_v25 = vmul.f32 %v6605_v50, %v1245_v26  ;;  %v2435_v26 = vunpack.c.l.b16 %v2403_v15  ;;  %vm2794_vm0 = vcmp.ne.s32.totalorder %v6049_v36, %v7753_v2 }
 0x276   : > { %v1201_v41 = vmul.f32 %v8225_v28, %v1200_v27  ;;  %vm8283_vm2 = vmpackc.low %vm2794_vm0, %vm7777_vm7  ;;  %v1164_v36 = vand.u32 2147483648, %v8201_v58  ;;  %v1210_v8 = vor.u32 1.1754944e-38, %v1209_v52 }
 0x277   : > { %v1570_v18 = vmul.f32 %v6801_v12, %v1538_v37  ;;  %v1247_v42 = vadd.f32 %v6605_v50, %v1246_v25  ;;  %v1155_v37 = vsub.f32 1.0, %v1154_v17  ;;  %v1229_v25 = vmul.f32 %v8258_v19, %v8222_v33 }
 0x278   : > { %v10796_v12 = vmov 0 }
 0x279   : > { %v1602_v24 = vpack.c.bf16 %v1570_v18, %v1570_v18  ;;  %v1251_v59 = vsel %vm1250_vm10, %v6605_v50, %v1247_v42  ;;  %v1925_v50 = vadd.s32 80, %v7676_v10  ;;  %v10797_v12 = vsel %vm8283_vm2, 4294967295, %v10796_v12 }
 0x27a   : > { %v1256_v47 = vsel %vm1253_vm8, %v1255_v40, %v1251_v59  ;;  %v6012_v40 = vunpack.i.l.s16 %v2435_v26  ;;  %vm1203_vm10 = vweird.f32 %v8197_v5  ;;  %vm1204_vm8 = vweird.f32 %v8225_v28 }
 0x27b   : > { %v1666_v16 = vunpack.c.l.b16 %v1602_v24  ;;  %v2021_v31 = vand.u32 15, %v1925_v50  ;;  %v1156_v18 = vmul.f32 %v8232_v49, %v1155_v37  ;;  %v1207_v42 = vand.u32 2147483647, %v8197_v5  ;;  %vm8304_vm0 = vmor %vm1203_vm10, %vm1204_vm8 }
 0x27c   : > { %1486 = vperm.xlu0 %6501, %v1256_v47   ;;  %v2930_v9 = vpop.permute.xlu1 %2929  ;;  %v1202_v24 = vadd.f32 %v8225_v28, %v1201_v41  ;;  %v1230_v59 = vsub.f32 1.0, %v1229_v25  ;;  %v1165_v50 = vor.u32 1.1754944e-38, %v1164_v36  ;;  %v694_v25 = vpop.xlane.xlu0 %693 }
 0x27d   : > { %v8263_v53 = vpack.c.b16 %v1667_v51, %v1666_v16  ;;  %v8266_v29 = vsel %vm10793_vm1, %v2966_v45, %v2930_v9  ;;  %vm10798_vm1 = vsmask.f32 7424  ;;  %v1162_v51 = vand.u32 2147483647, %v8201_v58 }
 0x27e   : > { %6095 = vmatmul.msk.bf16.gmra.mxu1 %vm10794_vm9, %v8266_v29  ;;  %6159 = vmatmul.msk.bf16.gmra.mxu0 %vm10795_vm14, %v8266_v29  ;;  %vm1159_vm9 = vweird.f32 %v8232_v49  ;;  %vm8298_vm14 = vcmp.eq.s32.totalorder %v2021_v31, 0  ;;  %v1206_v27 = vsel %vm8304_vm0, %v8225_v28, %v1202_v24  ;;  %vm1208_vm8 = vcmp.eq.f32.partialorder %v1207_v42, 8.507059e+37 }
 0x27f   : > { %v1760_v39 = vshll.u32 %v8263_v53, 16  ;;  %vm8313_vm15 = vmor %vm1158_vm6, %vm1159_vm9  ;;  %v1231_v45 = vmul.f32 %v8258_v19, %v1230_v59  ;;  %v10805_v58 = vmov 0  ;;  %vm1163_vm6 = vcmp.eq.f32.partialorder %v1162_v51, 8.507059e+37 }
 0x280   : > { %vm2373_vm10 = vmpackc.low %vm8298_vm14, %vm8298_vm14  ;;  %v1211_v41 = vsel %vm1208_vm8, %v1210_v8, %v1206_v27  ;;  %vm1234_vm9 = vweird.f32 %v8258_v19  ;;  %vm10808_vm14 = vcmask 261120   ;;  %vm1233_vm0 = vweird.f32 %v8222_v33 }
 0x281   : > { %v8279_v0 = vrot.slane %v1760_v39, 1  ;;  %v2405_v9 = vsel %vm2373_vm10, 65537, %v10641_v30  ;;  %v1232_v31 = vadd.f32 %v8258_v19, %v1231_v45  ;;  %vm1235_vm8 = vmor %vm1233_vm0, %vm1234_vm9  ;;  %vm10815_vm9 = vcmask 261120  }
 0x282   : > { %v2437_v42 = vunpack.c.l.b16 %v2405_v9  ;;  %vm10816_vm0 = vcmask 523264  }
 0x283   : > { %v1869_v15 = vsel %vm10798_vm1, %v7861_v6, %v8279_v0  ;;  %vm2507_vm1 = vcmp.ne.s32.totalorder %v6012_v40, %v7730_v62  ;;  %v1157_v6 = vadd.f32 %v8232_v49, %v1156_v18 }
 0x284   : > { %v2865_v47 = vsel %vm8283_vm2, 0, %v1869_v15  ;;  %vm8326_vm2 = vmpackc.low %vm8036_vm12, %vm2507_vm1  ;;  %v2932_v37 = vpop.permute.xlu1 %2931  ;;  %vm10810_vm1 = vcmask 785408   ;;  %v6014_v24 = vunpack.i.l.s16 %v2437_v42  ;;  %v2934_v17 = vpop.permute.xlu0 %2933 }
 0x285   : > { %2935 = vrot.lane.b32.xlu1 %v2865_v47, %s6930_s15  ;;  %v10806_v58 = vsel %vm8326_vm2, 4294967295, %v10805_v58  ;;  %v1161_v26 = vsel %vm8313_vm15, %v8232_v49, %v1157_v6  ;;  %v2591_v28 = vsel %vm8326_vm2, 0, %v7852_v21  ;;  %v1239_v49 = vand.u32 2147483648, %v8222_v33  ;;  %vm10811_vm10 = vmmov %vm10810_vm1 }
 0x286   : > { %10807 = vst [vmem:[#allocation19_spill] sm:$0xff] %v10806_v58  ;;  %v2969_v40 = vsel %vm10808_vm14, %v2591_v28, %v8169_v38  ;;  %v1166_v18 = vsel %vm1163_vm6, %v1165_v50, %v1161_v26  ;;  %vm10809_vm15 = vcmask 523264   ;;  %v1237_v21 = vand.u32 2147483647, %v8222_v33  ;;  %v6802_v28 = vld [vmem:[%s7085_s13 + $0x88] sm:$0xff] }
 0x287   : > { %v8343_v52 = vsel %vm10809_vm15, %v2969_v40, %v2932_v37  ;;  %v1236_v38 = vsel %vm1235_vm8, %v8258_v19, %v1232_v31  ;;  %v1240_v15 = vor.u32 1.1754944e-38, %v1239_v49  ;;  %vm2514_vm14 = vcmp.ne.s32.totalorder %v6014_v24, %v7730_v62  ;;  %v6803_v24 = vld [vmem:[%s7085_s13 + $0x80] sm:$0xff] }
 0x288   : > { %vm1238_vm6 = vcmp.eq.f32.partialorder %v1237_v21, 8.507059e+37  ;;  %vm8355_vm15 = vmpackc.low %vm8036_vm12, %vm2514_vm14  ;;  %v10812_v33 = vmov 0  ;;  %v1930_v47 = vadd.s32 120, %v7676_v10  ;;  %v745_v50 = vadd.f32 %v7857_v22, %v694_v25 }
 0x289   : > { %v1241_v59 = vsel %vm1238_vm6, %v1240_v15, %v1236_v38  ;;  %v10813_v33 = vsel %vm8355_vm15, 4294967295, %v10812_v33  ;;  %v2592_v19 = vsel %vm8355_vm15, 0, %v7829_v48  ;;  %vm10818_vm14 = vsmask.f32 256 }
 0x28a   : > { %10814 = vst [vmem:[#allocation20_spill] sm:$0xff] %v10813_v33  ;;  %v2972_v5 = vsel %vm10815_vm9, %v2592_v19, %v8044_v20  ;;  %v2056_v36 = vand.u32 15, %v1930_v47  ;;  %v1757_v20 = vshrl.u32 %v8263_v53, 16  ;;  %v5994_v38 = vmul.f32 -1.442695, %v745_v50  ;;  %v6814_v33 = vld [vmem:[%s7085_s13 + $0xb0] sm:$0xff] }
 0x28b   : > { %1471 = vperm.xlu2 %6503, %v1211_v41   ;;  %v8368_v51 = vsel %vm10816_vm0, %v2972_v5, %v2934_v17  ;;  %vm10819_vm0 = vcmask 261120   ;;  %vm10840_vm2 = vsmask.f32 7424 }
 0x28c   : > { %vm2618_vm8 = vcmp.eq.s32.totalorder %v2056_v36, 15  ;;  %v1870_v50 = vor.u32 %v8279_v0, %v1757_v20 }
 0x28d   : > { %1456 = vperm.xlu1 %6502, %v1166_v18   ;;  %vm2650_vm6 = vmpackc.low %vm2618_vm8, %vm2618_vm8  ;;  %v8383_v18 = vrot.slane %v1757_v20, 7 }
 0x28e   : > { %6096 = vmatmul.msk.bf16.gmra.mxu1 %vm10810_vm1, %v8343_v52  ;;  %6160 = vmatmul.msk.bf16.gmra.mxu0 %vm10811_vm10, %v8343_v52  ;;  %vm10817_vm10 = vmmov %vm10810_vm1  ;;  %v2682_v9 = vsel %vm2650_vm6, 65537, %v10641_v30  ;;  %vm10822_vm6 = vsmask.f32 7424 }
 0x28f   : > { %v2714_v21 = vunpack.c.l.b16 %v2682_v9  ;;  %v1762_v17 = vor.u32 %v1760_v39, %v8383_v18 }
 0x291   : > { %v6051_v47 = vunpack.i.l.s16 %v2714_v21  ;;  %v8391_v36 = vsel %vm10818_vm14, %v7819_v46, %v1762_v17 }
 0x293   : > { %1481 = vperm.xlu2 %6503, %v1241_v59   ;;  %vm2801_vm9 = vcmp.ne.s32.totalorder %v6051_v47, %v7753_v2 }
 0x295   : > { %v8370_v8 = vpop.xlane.xlu0 %708 }
 0x29b   : > { %2889 = vrot.lane.b32.xlu2 %v8263_v53, %s6929_s27 }
 0x29d   : > { %v703_v6 = vpop.xlane.xlu2 %702 }
 0x29e   : > { %v748_v16 = vadd.f32 %v7857_v22, %v703_v6  ;;  %6097 = vmatmul.msk.bf16.gmra.mxu1 %vm10810_vm1, %v8368_v51  ;;  %6161 = vmatmul.msk.bf16.gmra.mxu0 %vm10817_vm10, %v8368_v51  ;;  %v6804_v6 = vld [vmem:[%s7085_s13 + $0xe8] sm:$0xff]  ;;  %vm8407_vm1 = vmpackc.low %vm2801_vm9, %vm7777_vm7 }
 0x2a0   : > { %v5997_v48 = vmul.f32 -1.442695, %v748_v16  ;;  %v623_v16 = vmul.f32 %v6804_v6, %v7867_v54 }
 0x2a1   : > { %v3275_v27 = vpop.f32.mrf.mxu0 }
 0x2a2   : > { %6612 = vpow2.f32 %v5997_v48  ;;  %v713_v39 = vsel %vm10819_vm0, %v623_v16, 0.0 }
 0x2a5   : > { %v1452_v45 = vpop.permute.xlu2 %1451 }
 0x2a6   : > { %v1541_v26 = vadd.f32 %v1452_v45, %v7690_v11 }
 0x2a8   : > { %v1447_v37 = vpop.permute.xlu0 %1446  ;;  %v6613_v41 = vpop.eup %6612  ;;  %v1573_v31 = vmul.f32 %v6802_v28, %v1541_v26 }
 0x2a9   : > { %v1540_v40 = vadd.f32 %v1447_v37, %v7690_v11  ;;  %v876_v49 = vadd.f32 1.0, %v6613_v41  ;;  %v3276_v42 = vpop.f32.mrf.mxu0  ;;  %v10820_v37 = vmov 0 }
 0x2aa   : > { %v1605_v15 = vpack.c.bf16 %v1573_v31, %v1573_v31  ;;  %v10821_v37 = vsel %vm8407_vm1, 4294967295, %v10820_v37 }
 0x2ab   : > { %v1572_v25 = vmul.f32 %v6803_v24, %v1540_v40  ;;  %6614 = vrcp.f32 %v876_v49  ;;  %vm1263_vm10 = vweird.f32 %v876_v49  ;;  %v1269_v28 = vand.u32 2147483648, %v876_v49 }
 0x2ac   : > { %6616 = vpow2.f32 %v5994_v38  ;;  %v1669_v19 = vunpack.c.l.b16 %v1605_v15  ;;  %v1267_v31 = vand.u32 2147483647, %v876_v49  ;;  %v6805_v38 = vld [vmem:[%s7085_s13 + $0xf8] sm:$0xff] }
 0x2ad   : > { %v1604_v59 = vpack.c.bf16 %v1572_v25, %v1572_v25  ;;  %v625_v15 = vmul.f32 %v6805_v38, %v7867_v54  ;;  %v1270_v25 = vor.u32 1.1754944e-38, %v1269_v28 }
 0x2ae   : > { %vm1268_vm9 = vcmp.eq.f32.partialorder %v1267_v31, 8.507059e+37 }
 0x2af   : > { %v1668_v5 = vunpack.c.l.b16 %v1604_v59  ;;  %v706_v26 = vpop.xlane.xlu1 %705 }
 0x2b0   : > { %v749_v40 = vadd.f32 %v7857_v22, %v706_v26 }
 0x2b1   : > { %v8395_v48 = vpack.c.b16 %v1669_v19, %v1668_v5  ;;  %v6615_v27 = vpop.eup %6614 }
 0x2b2   : > { %v1259_v53 = vmul.f32 %v6615_v27, %v876_v49  ;;  %v6617_v9 = vpop.eup %6616  ;;  %vm1264_vm8 = vweird.f32 %v6615_v27  ;;  %v5998_v17 = vmul.f32 -1.442695, %v749_v40  ;;  %v719_v49 = vsel %vm10819_vm0, %v625_v15, 0.0  ;;  %v6407_v15 = vld [vmem:[%s10606_s1 + $0x48] sm:$0xff] }
 0x2b3   : > { %v1768_v45 = vshll.u32 %v8395_v48, 16  ;;  %v873_v42 = vadd.f32 1.0, %v6617_v9  ;;  %vm1265_vm14 = vmor %vm1263_vm10, %vm1264_vm8 }
 0x2b4   : > { %v1260_v41 = vsub.f32 1.0, %v1259_v53 }
 0x2b5   : > { %v8403_v46 = vrot.slane %v1768_v45, 1  ;;  %6618 = vrcp.f32 %v873_v42  ;;  %vm1218_vm10 = vweird.f32 %v873_v42  ;;  %v1224_v54 = vand.u32 2147483648, %v873_v42 }
 0x2b6   : > { %v1261_v20 = vmul.f32 %v6615_v27, %v1260_v41  ;;  %6620 = vpow2.f32 %v5998_v17 }
 0x2b7   : > { %v1872_v0 = vsel %vm10822_vm6, %v1870_v50, %v8403_v46  ;;  %714 = vadd.xlane.f32.xlu1 %v713_v39  ;;  %v1222_v39 = vand.u32 2147483647, %v873_v42  ;;  %v1225_v26 = vor.u32 1.1754944e-38, %v1224_v54  ;;  %v6404_v54 = vld [vmem:[%s10606_s1 + $0x30] sm:$0xff] }
 0x2b8   : > { %v2866_v21 = vsel %vm8407_vm1, 0, %v1872_v0  ;;  %v1262_v24 = vadd.f32 %v6615_v27, %v1261_v20  ;;  %v6409_v20 = vld [vmem:[%s10606_s1 + $0x58] sm:$0xff] }
 0x2b9   : > { %2937 = vrot.lane.b32.xlu2 %v2866_v21, %s6930_s15  ;;  %3391 = vmatpush.bf16.msra.mxu1 %v6409_v20 }
 0x2ba   : > { %v1266_v59 = vsel %vm1265_vm14, %v6615_v27, %v1262_v24  ;;  %vm1223_vm14 = vcmp.eq.f32.partialorder %v1222_v39, 8.507059e+37  ;;  %v1462_v24 = vpop.permute.xlu2 %1461  ;;  %v1932_v39 = vadd.s32 136, %v7676_v10 }
 0x2bb   : > { %v1271_v22 = vsel %vm1268_vm9, %v1270_v25, %v1266_v59  ;;  %v6619_v47 = vpop.eup %6618  ;;  %v1765_v59 = vshrl.u32 %v8395_v48, 16 }
 0x2bc   : > { %v6621_v19 = vpop.eup %6620  ;;  %v1214_v5 = vmul.f32 %v6619_v47, %v873_v42  ;;  %vm1219_vm8 = vweird.f32 %v6619_v47  ;;  %v6408_v42 = vld [vmem:[%s10606_s1 + $0x50] sm:$0xff] }
 0x2bd   : > { %v877_v6 = vadd.f32 1.0, %v6621_v19  ;;  %vm1220_vm6 = vmor %vm1218_vm10, %vm1219_vm8  ;;  %3392 = vmatpush.bf16.msra.mxu1 %v6408_v42  ;;  %v8438_v19 = vor.u32 %v8403_v46, %v1765_v59 }
 0x2be   : > { %v1215_v16 = vsub.f32 1.0, %v1214_v5 }
 0x2bf   : > { %720 = vadd.xlane.f32.xlu1 %v719_v49  ;;  %6622 = vrcp.f32 %v877_v6  ;;  %vm1278_vm9 = vweird.f32 %v877_v6  ;;  %v1284_v40 = vand.u32 2147483648, %v877_v6  ;;  %v1282_v38 = vand.u32 2147483647, %v877_v6  ;;  %v6406_v49 = vld [vmem:[%s10606_s1 + $0x40] sm:$0xff] }
 0x2c0   : > { %v1216_v53 = vmul.f32 %v6619_v47, %v1215_v16 }
 0x2c1   : > { %1491 = vperm.xlu2 %6503, %v1271_v22   ;;  %v1285_v25 = vor.u32 1.1754944e-38, %v1284_v40  ;;  %vm1283_vm8 = vcmp.eq.f32.partialorder %v1282_v38, 8.507059e+37  ;;  %3393 = vmatpush.bf16.msra.mxu1 %v6407_v15  ;;  %v8435_v22 = vrot.slane %v1765_v59, 7  ;;  %v8514_v15 = vpop.f32.mrf.mxu1 }
 0x2c2   : > { %v1217_v27 = vadd.f32 %v6619_v47, %v1216_v53  ;;  %v6405_v53 = vld [vmem:[%s10606_s1 + $0x38] sm:$0xff] }
 0x2c3   : > { %v1770_v5 = vor.u32 %v1768_v45, %v8435_v22 }
 0x2c4   : > { %v1221_v9 = vsel %vm1220_vm6, %v6619_v47, %v1217_v27  ;;  %vm10823_vm6 = vsmask.f32 256 }
 0x2c5   : > { %v6623_v50 = vpop.eup %6622  ;;  %v1226_v0 = vsel %vm1223_vm14, %v1225_v26, %v1221_v9  ;;  %3394 = vmatpush.bf16.msra.mxu1 %v6406_v49  ;;  %v8455_v46 = vsel %vm10823_vm6, %v8383_v18, %v1770_v5  ;;  %v1934_v18 = vadd.s32 152, %v7676_v10  ;;  %vm10824_vm14 = vcmask 523264   ;;  %v6808_v5 = vld [vmem:[%s7085_s13 + $0xa0] sm:$0xff] }
 0x2c6   : > { %v1274_v41 = vmul.f32 %v6623_v50, %v877_v6  ;;  %vm1279_vm0 = vweird.f32 %v6623_v50  ;;  %v8446_v6 = vld [vmem:[%s10614_s9 + $0x2] ss:$0 sm:$0xff] }
 0x2c7   : > { %vm1280_vm10 = vmor %vm1278_vm9, %vm1279_vm0  ;;  %v750_v16 = vadd.f32 %v8446_v6, %v8370_v8  ;;  %vm10827_vm0 = vcmask 785408  }
 0x2c8   : > { %v1275_v28 = vsub.f32 1.0, %v1274_v41  ;;  %v2070_v41 = vand.u32 15, %v1932_v39 }
 0x2c9   : > { %v5999_v45 = vmul.f32 -1.442695, %v750_v16  ;;  %3395 = vmatpush.bf16.msra.mxu1 %v6405_v53 }
 0x2ca   : > { %v1276_v31 = vmul.f32 %v6623_v50, %v1275_v28  ;;  %v1467_v28 = vpop.permute.xlu0 %1466  ;;  %vm8472_vm9 = vcmp.eq.s32.totalorder %v2070_v41, 15 }
 0x2cb   : > { %6624 = vpow2.f32 %v5999_v45 }
 0x2cc   : > { %v1277_v21 = vadd.f32 %v6623_v50, %v1276_v31  ;;  %v2084_v31 = vand.u32 15, %v1934_v18 }
 0x2cd   : > { %3396 = vmatpush.bf16.msra.mxu1 %v6404_v54 }
 0x2ce   : > { %v1281_v17 = vsel %vm1280_vm10, %v6623_v50, %v1277_v21  ;;  %v1929_v50 = vadd.s32 112, %v7676_v10  ;;  %v1544_v21 = vadd.f32 %v1467_v28, %v7690_v11  ;;  %vm10828_vm10 = vmmov %vm10827_vm0  ;;  %vm8486_vm6 = vcmp.eq.s32.totalorder %v2084_v31, 15  ;;  %v6810_v31 = vld [vmem:[%s7085_s13 + $0x90] sm:$0xff] }
 0x2cf   : > { %v1286_v47 = vsel %vm1283_vm8, %v1285_v25, %v1281_v17  ;;  %v1543_v17 = vadd.f32 %v1462_v24, %v7690_v11  ;;  %v6809_v24 = vld [vmem:[%s7085_s13 + $0x98] sm:$0xff] }
 0x2d0   : > { %v1576_v16 = vmul.f32 %v6808_v5, %v1544_v21 }
 0x2d1   : > { %v6625_v9 = vpop.eup %6624 }
 0x2d2   : > { %v8465_v40 = vadd.f32 1.0, %v6625_v9  ;;  %v1608_v39 = vpack.c.bf16 %v1576_v16, %v1576_v16 }
 0x2d4   : > { %v1672_v25 = vunpack.c.l.b16 %v1608_v39 }
 0x2d8   : > { %1476 = vperm.xlu1 %6502, %v1226_v0   ;;  %v2049_v0 = vand.u32 15, %v1929_v50 }
 0x2da   : > { %vm8480_vm8 = vcmp.eq.s32.totalorder %v2049_v0, 0 }
 0x2e0   : > { %2891 = vrot.lane.b32.xlu1 %v8395_v48, %s6929_s27 }
 0x2e6   : > { %v712_v48 = vpop.xlane.xlu2 %711 }
 0x2e7   : > { %v751_v27 = vadd.f32 %v8446_v6, %v712_v48  ;;  %v1575_v48 = vmul.f32 %v6809_v24, %v1543_v17 }
 0x2e8   : > { %1496 = vperm.xlu1 %6502, %v1286_v47  }
 0x2e9   : > { %v6000_v8 = vmul.f32 -1.442695, %v751_v27  ;;  %v1607_v28 = vpack.c.bf16 %v1575_v48, %v1575_v48 }
 0x2eb   : > { %6626 = vpow2.f32 %v6000_v8 }
 0x2ec   : > { %6628 = vrcp.f32 %v8465_v40 }
 0x2ee   : > { %v1472_v26 = vpop.permute.xlu2 %1471 }
 0x2ef   : > { %v1545_v20 = vadd.f32 %v1472_v26, %v7690_v11 }
 0x2f1   : > { %v6627_v59 = vpop.eup %6626 }
 0x2f2   : > { %v8498_v53 = vadd.f32 1.0, %v6627_v59  ;;  %v8510_v9 = vpop.eup %6628 }
 0x2f3   : > { %v1289_v17 = vmul.f32 %v8510_v9, %v8465_v40  ;;  %vm1294_vm15 = vweird.f32 %v8510_v9 }
 0x2f4   : > { %6630 = vrcp.f32 %v8498_v53 }
 0x2f6   : > { %v8506_v50 = vpop.permute.xlu2 %1481 }
 0x2f7   : > { %v2936_v42 = vpop.permute.xlu1 %2935 }
 0x2f8   : > { %v8470_v38 = vsel %vm10824_vm14, %v8116_v61, %v2936_v42  ;;  %v6807_v61 = vld [vmem:[%s7085_s13 + $0xa8] sm:$0xff]  ;;  %vm2652_vm14 = vmpackc.low %vm8472_vm9, %vm8472_vm9  ;;  %vm10833_vm9 = vcmask 785408  }
 0x2f9   : > { %6098 = vmatmul.msk.bf16.gmra.mxu1 %vm10827_vm0, %v8470_v38  ;;  %6162 = vmatmul.msk.bf16.gmra.mxu0 %vm10828_vm10, %v8470_v38  ;;  %v1577_v49 = vmul.f32 %v6807_v61, %v1545_v20  ;;  %vm2377_vm0 = vmpackc.low %vm8480_vm8, %vm8480_vm8  ;;  %v2684_v54 = vsel %vm2652_vm14, 65537, %v10641_v30 }
 0x2fa   : > { %vm2654_vm10 = vmpackc.low %vm8486_vm6, %vm8486_vm6  ;;  %v2409_v27 = vsel %vm2377_vm0, 65537, %v10641_v30  ;;  %v2716_v41 = vunpack.c.l.b16 %v2684_v54  ;;  %v6631_v24 = vpop.eup %6630  ;;  %v1290_v54 = vsub.f32 1.0, %v1289_v17 }
 0x2fb   : > { %v1609_v45 = vpack.c.bf16 %v1577_v49, %v1577_v49  ;;  %v2686_v26 = vsel %vm2654_vm10, 65537, %v10641_v30  ;;  %v2441_v20 = vunpack.c.l.b16 %v2409_v27  ;;  %v1671_v49 = vunpack.c.l.b16 %v1607_v28 }
 0x2fc   : > { %v2718_v21 = vunpack.c.l.b16 %v2686_v26  ;;  %v6053_v61 = vunpack.i.l.s16 %v2716_v41  ;;  %v10834_v41 = vmov 0  ;;  %v1291_v28 = vmul.f32 %v8510_v9, %v1290_v54 }
 0x2fd   : > { %v1673_v0 = vunpack.c.l.b16 %v1609_v45  ;;  %v6018_v5 = vunpack.i.l.s16 %v2441_v20  ;;  %v8550_v20 = vpop.f32.mrf.mxu1 }
 0x2fe   : > { %v6055_v48 = vunpack.i.l.s16 %v2718_v21  ;;  %vm2808_vm8 = vcmp.ne.s32.totalorder %v6053_v61, %v7753_v2  ;;  %v2890_v27 = vpop.permute.xlu2 %2889  ;;  %v1299_v61 = vand.u32 2147483648, %v8465_v40 }
 0x2ff   : > { %v1457_v8 = vpop.permute.xlu1 %1456  ;;  %v8518_v47 = vpack.c.b16 %v1673_v0, %v1672_v25  ;;  %vm2528_vm6 = vcmp.ne.s32.totalorder %v6018_v5, %v7730_v62  ;;  %vm8537_vm0 = vmpackc.low %vm2808_vm8, %vm7777_vm7  ;;  %v10837_v0 = vmov 0  ;;  %v10841_v25 = vmov 0 }
 0x300   : > { %v1542_v18 = vadd.f32 %v1457_v8, %v7690_v11  ;;  %vm2815_vm14 = vcmp.ne.s32.totalorder %v6055_v48, %v7753_v2  ;;  %v10835_v41 = vsel %vm8537_vm0, 4294967295, %v10834_v41  ;;  %vm8544_vm10 = vmpackc.low %vm8036_vm12, %vm2528_vm6  ;;  %v1297_v5 = vand.u32 2147483647, %v8465_v40 }
 0x301   : > { %v1784_v39 = vshll.u32 %v8518_v47, 16  ;;  %10836 = vst [vmem:[#allocation21_spill] sm:$0xff] %v10835_v41  ;;  %v10838_v0 = vsel %vm8544_vm10, 4294967295, %v10837_v0  ;;  %vm8558_vm8 = vmpackc.low %vm2815_vm14, %vm7777_vm7  ;;  %vm10847_vm14 = vcmask 261120  }
 0x302   : > { %v1574_v42 = vmul.f32 %v6810_v31, %v1542_v18  ;;  %v1304_v18 = vmul.f32 %v6631_v24, %v8498_v53  ;;  %10839 = vst [vmem:[#allocation22_spill] sm:$0xff] %v10838_v0  ;;  %v10842_v25 = vsel %vm8558_vm8, 4294967295, %v10841_v25  ;;  %vm10844_vm6 = vmmov %vm10840_vm2 }
 0x303   : > { %v1877_v21 = vrot.slane %v1784_v39, 1  ;;  %10843 = vst [vmem:[#allocation23_spill] sm:$0xff] %v10842_v25 }
 0x304   : > { %v1606_v59 = vpack.c.bf16 %v1574_v42, %v1574_v42 }
 0x306   : > { %v1670_v16 = vunpack.c.l.b16 %v1606_v59  ;;  %v1305_v59 = vsub.f32 1.0, %v1304_v18 }
 0x308   : > { %v8520_v45 = vpack.c.b16 %v1671_v49, %v1670_v16  ;;  %v1292_v49 = vadd.f32 %v8510_v9, %v1291_v28  ;;  %v2594_v16 = vsel %vm8544_vm10, 0, %v8391_v36  ;;  %v1306_v28 = vmul.f32 %v6631_v24, %v1305_v59 }
 0x309   : > { %6196 = vmatmul.msk.bf16.vlgmr.msra.gmra.mxu1 %vm10833_vm9, %v8104_v43  ;;  %vm1293_vm9 = vweird.f32 %v8465_v40  ;;  %v2978_v18 = vsel %vm10847_vm14, %v2594_v16, %v2890_v27  ;;  %vm1298_vm10 = vcmp.eq.f32.partialorder %v1297_v5, 8.507059e+37  ;;  %vm1308_vm14 = vweird.f32 %v8498_v53  ;;  %v718_v5 = vpop.xlane.xlu0 %717 }
 0x30a   : > { %2893 = vrot.lane.b32.xlu1 %v8520_v45, %s6929_s27  ;;  %v1776_v8 = vshll.u32 %v8520_v45, 16  ;;  %v1773_v26 = vshrl.u32 %v8520_v45, 16  ;;  %v1314_v40 = vand.u32 2147483648, %v8498_v53  ;;  %v1307_v27 = vadd.f32 %v6631_v24, %v1306_v28 }
 0x30b   : > { %v1312_v59 = vand.u32 2147483647, %v8498_v53  ;;  %v753_v16 = vadd.f32 %v8446_v6, %v718_v5  ;;  %v1781_v53 = vshrl.u32 %v8518_v47, 16 }
 0x30c   : > { %v1874_v43 = vrot.slane %v1776_v8, 1 }
 0x30d   : > { %v6002_v54 = vmul.f32 -1.442695, %v753_v16 }
 0x30e   : > { %v1875_v31 = vsel %vm10840_vm2, %v8438_v19, %v1874_v43  ;;  %v1876_v42 = vor.u32 %v1874_v43, %v1773_v26  ;;  %vm8578_vm2 = vmor %vm1293_vm9, %vm1294_vm15  ;;  %vm10849_vm15 = vcmask 785408  }
 0x30f   : > { %v2867_v17 = vsel %vm8537_vm0, 0, %v1875_v31  ;;  %v1300_v31 = vor.u32 1.1754944e-38, %v1299_v61  ;;  %vm10850_vm9 = vmmov %vm10849_vm15  ;;  %v8597_v61 = vpop.f32.mrf.mxu1  ;;  %6632 = vpow2.f32 %v6002_v54 }
 0x310   : > { %2939 = vrot.lane.b32.xlu2 %v2867_v17, %s6930_s15  ;;  %v1878_v19 = vsel %vm10844_vm6, %v1876_v42, %v1877_v21  ;;  %vm10848_vm6 = vcmask 523264   ;;  %v1296_v42 = vsel %vm8578_vm2, %v8510_v9, %v1292_v49  ;;  %vm10851_vm2 = vmmov %vm10850_vm9  ;;  %v1315_v9 = vor.u32 1.1754944e-38, %v1314_v40 }
 0x311   : > { %v2868_v48 = vsel %vm8558_vm8, 0, %v1878_v19  ;;  %vm1309_vm8 = vweird.f32 %v6631_v24  ;;  %v1301_v17 = vsel %vm1298_vm10, %v1300_v31, %v1296_v42  ;;  %vm10852_vm10 = vmmov %vm10851_vm2 }
 0x312   : > { %2941 = vrot.lane.b32.xlu0 %v2868_v48, %s6930_s15 }
 0x313   : > { %v2938_v43 = vpop.permute.xlu2 %2937 }
 0x314   : > { %v8585_v36 = vsel %vm10848_vm6, %v2978_v18, %v2938_v43  ;;  %vm1310_vm6 = vmor %vm1308_vm14, %vm1309_vm8  ;;  %v8607_v18 = vrot.slane %v1781_v53, 7  ;;  %v8609_v43 = vor.u32 %v1877_v21, %v1781_v53  ;;  %v1775_v21 = vrot.slane %v1773_v26, 7 }
 0x315   : > { %6099 = vmatmul.msk.bf16.vlgmr.msra.gmra.mxu2 %vm10849_vm15, %v8585_v36  ;;  %6163 = vmatmul.msk.bf16.vlgmr.msra.gmra.mxu3 %vm10850_vm9, %v8585_v36  ;;  %v1311_v19 = vsel %vm1310_vm6, %v6631_v24, %v1307_v27  ;;  %vm1313_vm15 = vcmp.eq.f32.partialorder %v1312_v59, 8.507059e+37  ;;  %v6633_v42 = vpop.eup %6632  ;;  %vm10853_vm8 = vmmov %vm10851_vm2  ;;  %vm10854_vm9 = vsmask.f32 256 }
 0x316   : > { %v1316_v49 = vsel %vm1313_vm15, %v1315_v9, %v1311_v19  ;;  %v8617_v40 = vadd.f32 1.0, %v6633_v42  ;;  %v1778_v19 = vor.u32 %v1776_v8, %v1775_v21  ;;  %vm10855_vm14 = vmmov %vm10854_vm9  ;;  %v1936_v42 = vadd.s32 168, %v7676_v10 }
 0x317   : > { %v8605_v48 = vpop.f32.mrf.mxu1 }
 0x318   : > { %1501 = vperm.xlu2 %6503, %v1301_v17  }
 0x319   : > { %6197 = vmatmul.msk.bf16.gmra.mxu1 %vm10851_vm2, %v8147_v23  ;;  %v1786_v23 = vor.u32 %v1784_v39, %v8607_v18 }
 0x31a   : > { %2895 = vrot.lane.b32.xlu0 %v8518_v47, %s6929_s27 }
 0x31b   : > { %v8636_v26 = vsel %vm10855_vm14, %v1775_v21, %v1786_v23  ;;  %v1492_v53 = vpop.permute.xlu2 %1491  ;;  %vm10862_vm14 = vcmask 785408  }
 0x31f   : > { %v8614_v24 = vpop.f32.mrf.mxu1 }
 0x320   : > { %1506 = vperm.xlu2 %6503, %v1316_v49  }
 0x327   : > { %v8622_v59 = vpop.f32.mrf.mxu1 }
 0x329   : > { %6198 = vmatmul.msk.bf16.gmra.mxu1 %vm10852_vm10, %v8187_v3 }
 0x32a   : > { %v715_v28 = vpop.xlane.xlu1 %714 }
 0x32b   : > { %v752_v31 = vadd.f32 %v8446_v6, %v715_v28 }
 0x32d   : > { %v6001_v47 = vmul.f32 -1.442695, %v752_v31  ;;  %v1549_v31 = vadd.f32 %v1492_v53, %v7690_v11  ;;  %v6811_v53 = vld [vmem:[%s7085_s13 + $0xc8] sm:$0xff] }
 0x32f   : > { %6634 = vpow2.f32 %v6001_v47  ;;  %v8638_v5 = vpop.f32.mrf.mxu1  ;;  %v1938_v47 = vadd.s32 184, %v7676_v10  ;;  %v1581_v30 = vmul.f32 %v6811_v53, %v1549_v31 }
 0x330   : > { %6636 = vrcp.f32 %v8617_v40 }
 0x331   : > { %v1613_v53 = vpack.c.bf16 %v1581_v30, %v1581_v30 }
 0x332   : > { %v721_v27 = vpop.xlane.xlu1 %720 }
 0x333   : > { %v754_v39 = vadd.f32 %v8446_v6, %v721_v27  ;;  %v8633_v6 = vsel %vm10854_vm9, %v8435_v22, %v1778_v19  ;;  %v2112_v19 = vand.u32 15, %v1938_v47 }
 0x335   : > { %v6635_v3 = vpop.eup %6634  ;;  %v6003_v17 = vmul.f32 -1.442695, %v754_v39 }
 0x336   : > { %v880_v9 = vadd.f32 1.0, %v6635_v3  ;;  %v8629_v49 = vpop.eup %6636 }
 0x337   : > { %6638 = vpow2.f32 %v6003_v17  ;;  %v1334_v45 = vmul.f32 %v8629_v49, %v8617_v40  ;;  %v2098_v17 = vand.u32 15, %v1936_v42  ;;  %v6812_v42 = vld [vmem:[%s7085_s13 + $0xc0] sm:$0xff] }
 0x338   : > { %6640 = vrcp.f32 %v880_v9  ;;  %v1329_v21 = vand.u32 2147483648, %v880_v9  ;;  %v1327_v3 = vand.u32 2147483647, %v880_v9  ;;  %vm1323_vm2 = vweird.f32 %v880_v9 }
 0x339   : > { %6199 = vmatmul.msk.bf16.gmra.mxu1 %vm10853_vm8, %v8266_v29  ;;  %v1487_v29 = vpop.permute.xlu0 %1486  ;;  %v1335_v23 = vsub.f32 1.0, %v1334_v45  ;;  %vm8657_vm10 = vcmp.eq.s32.totalorder %v2098_v17, 15  ;;  %vm8661_vm8 = vcmp.eq.s32.totalorder %v2112_v19, 15 }
 0x33a   : > { %v1548_v27 = vadd.f32 %v1487_v29, %v7690_v11  ;;  %v1330_v47 = vor.u32 1.1754944e-38, %v1329_v21 }
 0x33b   : > { %v1336_v29 = vmul.f32 %v8629_v49, %v1335_v23 }
 0x33c   : > { %v1580_v31 = vmul.f32 %v6812_v42, %v1548_v27  ;;  %v6813_v27 = vld [vmem:[%s7085_s13 + $0xb8] sm:$0xff]  ;;  %v1344_v42 = vand.u32 2147483648, %v8617_v40 }
 0x33d   : > { %v6639_v16 = vpop.eup %6638 }
 0x33e   : > { %v6641_v8 = vpop.eup %6640  ;;  %v8642_v54 = vadd.f32 1.0, %v6639_v16  ;;  %v1547_v16 = vadd.f32 %v8506_v50, %v7690_v11 }
 0x33f   : > { %v1319_v28 = vmul.f32 %v6641_v8, %v880_v9  ;;  %vm1324_vm6 = vweird.f32 %v6641_v8  ;;  %v8666_v9 = vpop.f32.mrf.mxu1 }
 0x340   : > { %6642 = vrcp.f32 %v8642_v54  ;;  %vm8652_vm15 = vmor %vm1323_vm2, %vm1324_vm6  ;;  %vm1328_vm6 = vcmp.eq.f32.partialorder %v1327_v3, 8.507059e+37  ;;  %vm1339_vm2 = vweird.f32 %v8629_v49  ;;  %v1579_v19 = vmul.f32 %v6813_v27, %v1547_v16 }
 0x341   : > { %v1320_v22 = vsub.f32 1.0, %v1319_v28  ;;  %v1342_v3 = vand.u32 2147483647, %v8617_v40  ;;  %v10863_v28 = vmov 0   ;;  %v1612_v16 = vpack.c.bf16 %v1580_v31, %v1580_v31 }
 0x342   : > { %vm1353_vm9 = vweird.f32 %v8642_v54  ;;  %v1611_v31 = vpack.c.bf16 %v1579_v19, %v1579_v19  ;;  %v1677_v27 = vunpack.c.l.b16 %v1613_v53 }
 0x343   : > { %v1321_v39 = vmul.f32 %v6641_v8, %v1320_v22  ;;  %v1676_v14 = vunpack.c.l.b16 %v1612_v16  ;;  %v10874_v16 = vmov 0 }
 0x345   : > { %v1322_v45 = vadd.f32 %v6641_v8, %v1321_v39  ;;  %v1931_v39 = vadd.s32 128, %v7676_v10 }
 0x346   : > { %v6643_v50 = vpop.eup %6642 }
 0x347   : > { %v1326_v23 = vsel %vm8652_vm15, %v6641_v8, %v1322_v45  ;;  %v1349_v17 = vmul.f32 %v6643_v50, %v8642_v54  ;;  %v1337_v8 = vadd.f32 %v8629_v49, %v1336_v29  ;;  %vm10864_vm15 = vmpackc.low %vm8657_vm10, %vm8657_vm10  ;;  %v1357_v29 = vand.u32 2147483647, %v8642_v54  ;;  %v8716_v53 = vpop.f32.mrf.mxu1 }
 0x348   : > { %v1331_v21 = vsel %vm1328_vm6, %v1330_v47, %v1326_v23  ;;  %v2688_v30 = vsel %vm10864_vm15, 65537, %v10863_v28  ;;  %vm10865_vm6 = vweird.f32 %v8617_v40  ;;  %v1359_v23 = vand.u32 2147483648, %v8642_v54  ;;  %vm10868_vm15 = vmpackc.low %vm8661_vm8, %vm8661_vm8 }
 0x349   : > { %1511 = vperm.xlu1 %6502, %v1331_v21   ;;  %6200 = vmatmul.msk.bf16.gmra.mxu1 %vm10862_vm14, %v8343_v52  ;;  %v1350_v45 = vsub.f32 1.0, %v1349_v17  ;;  %vm8696_vm14 = vmor %vm10865_vm6, %vm1339_vm2  ;;  %vm1354_vm10 = vweird.f32 %v6643_v50  ;;  %v2690_v40 = vsel %vm10868_vm15, 65537, %v10863_v28  ;;  %v1345_v21 = vor.u32 1.1754944e-38, %v1344_v42 }
 0x34a   : > { %v1477_v47 = vpop.permute.xlu1 %1476  ;;  %v2720_v44 = vunpack.c.l.b16 %v2688_v30  ;;  %v1341_v63 = vsel %vm8696_vm14, %v8629_v49, %v1337_v8  ;;  %vm1343_vm2 = vcmp.eq.f32.partialorder %v1342_v3, 8.507059e+37  ;;  %vm1355_vm6 = vmor %vm1353_vm9, %vm1354_vm10  ;;  %v2063_v25 = vand.u32 15, %v1931_v39 }
 0x34b   : > { %v1546_v0 = vadd.f32 %v1477_v47, %v7690_v11  ;;  %v1351_v17 = vmul.f32 %v6643_v50, %v1350_v45  ;;  %v1360_v47 = vor.u32 1.1754944e-38, %v1359_v23  ;;  %v2722_v22 = vunpack.c.l.b16 %v2690_v40 }
 0x34c   : > { %vm1358_vm8 = vcmp.eq.f32.partialorder %v1357_v29, 8.507059e+37  ;;  %v1346_v42 = vsel %vm1343_vm2, %v1345_v21, %v1341_v63  ;;  %v6057_v30 = vunpack.i.l.s16 %v2720_v44  ;;  %v8718_v49 = vpack.c.b16 %v1677_v27, %v1676_v14 }
 0x34d   : > { %v1578_v58 = vmul.f32 %v6814_v33, %v1546_v0  ;;  %v1352_v45 = vadd.f32 %v6643_v50, %v1351_v17  ;;  %v1675_v0 = vunpack.c.l.b16 %v1611_v31  ;;  %vm2347_vm14 = vcmp.eq.s32.totalorder %v2063_v25, 0 }
 0x34e   : > { %v6059_v54 = vunpack.i.l.s16 %v2722_v22  ;;  %vm2822_vm9 = vcmp.ne.s32.totalorder %v6057_v30, %v7753_v2  ;;  %vm2379_vm10 = vmpackc.low %vm2347_vm14, %vm2347_vm14  ;;  %v10869_v14 = vmov 0  ;;  %v1940_v27 = vadd.s32 200, %v7676_v10 }
 0x34f   : > { %v1610_v1 = vpack.c.bf16 %v1578_v58, %v1578_v58  ;;  %v1356_v19 = vsel %vm1355_vm6, %v6643_v50, %v1352_v45  ;;  %v1800_v58 = vshll.u32 %v8718_v49, 16  ;;  %vm8730_vm2 = vmpackc.low %vm2822_vm9, %vm7777_vm7  ;;  %v2411_v63 = vsel %vm2379_vm10, 65537, %v10863_v28  ;;  %v8752_v29 = vpop.f32.mrf.mxu1 }
 0x350   : > { %v1361_v33 = vsel %vm1358_vm8, %v1360_v47, %v1356_v19  ;;  %vm2829_vm15 = vcmp.ne.s32.totalorder %v6059_v54, %v7753_v2  ;;  %v10870_v14 = vsel %vm8730_vm2, 4294967295, %v10869_v14  ;;  %vm10872_vm6 = vcmask 785408  }
 0x351   : > { %v1674_v52 = vunpack.c.l.b16 %v1610_v1  ;;  %1516 = vperm.xlu1 %6502, %v1346_v42   ;;  %1521 = vperm.xlu0 %6501, %v1361_v33   ;;  %10871 = vst [vmem:[#allocation24_spill] sm:$0xff] %v10870_v14  ;;  %vm10873_vm8 = vsmask.f32 7424  ;;  %v1883_v3 = vrot.slane %v1800_v58, 1  ;;  %vm8748_vm14 = vmpackc.low %vm2829_vm15, %vm7777_vm7  ;;  %v2443_v23 = vunpack.c.l.b16 %v2411_v63 }
 0x352   : > { %v10875_v16 = vsel %vm8748_vm14, 4294967295, %v10874_v16  ;;  %vm10877_vm9 = vmmov %vm10873_vm8  ;;  %v2892_v31 = vpop.permute.xlu1 %2891  ;;  %v1933_v45 = vadd.s32 144, %v7676_v10  ;;  %v10878_v47 = vmov 0  ;;  %v2126_v22 = vand.u32 15, %v1940_v27 }
 0x353   : > { %v8720_v8 = vpack.c.b16 %v1675_v0, %v1674_v52  ;;  %10876 = vst [vmem:[#allocation25_spill] sm:$0xff] %v10875_v16  ;;  %v6020_v40 = vunpack.i.l.s16 %v2443_v23 }
 0x354   : > { %v2077_v19 = vand.u32 15, %v1933_v45 }
 0x355   : > { %v1792_v50 = vshll.u32 %v8720_v8, 16  ;;  %v1789_v1 = vshrl.u32 %v8720_v8, 16  ;;  %vm2535_vm10 = vcmp.ne.s32.totalorder %v6020_v40, %v7730_v62 }
 0x356   : > { %vm8770_vm15 = vmpackc.low %vm8036_vm12, %vm2535_vm10  ;;  %vm2628_vm10 = vcmp.eq.s32.totalorder %v2126_v22, 15  ;;  %vm2349_vm0 = vcmp.eq.s32.totalorder %v2077_v19, 0  ;;  %v8793_v22 = vpop.f32.mrf.mxu0  ;;  %v1797_v19 = vshrl.u32 %v8718_v49, 16 }
 0x357   : > { %v1880_v44 = vrot.slane %v1792_v50, 1  ;;  %v8765_v21 = vpop.f32.mrf.mxu1  ;;  %v10879_v47 = vsel %vm8770_vm15, 4294967295, %v10878_v47  ;;  %v2595_v42 = vsel %vm8770_vm15, 0, %v8455_v46  ;;  %vm2660_vm15 = vmpackc.low %vm2628_vm10, %vm2628_vm10  ;;  %v6815_v46 = vld [vmem:[%s7085_s13 + $0xd0] sm:$0xff] }
 0x358   : > { %10880 = vst [vmem:[#allocation26_spill] sm:$0xff] %v10879_v47  ;;  %vm2381_vm1 = vmpackc.low %vm2349_vm0, %vm2349_vm0  ;;  %v2692_v63 = vsel %vm2660_vm15, 65537, %v10863_v28 }
 0x359   : > { %2899 = vrot.lane.b32.xlu0 %v8718_v49, %s6929_s27  ;;  %6201 = vmatmul.msk.bf16.gmra.mxu1 %vm10872_vm6, %v8368_v51  ;;  %v1881_v25 = vsel %vm10873_vm8, %v8609_v43, %v1880_v44  ;;  %v1882_v39 = vor.u32 %v1880_v44, %v1789_v1  ;;  %vm10881_vm8 = vcmask 261120   ;;  %v2724_v23 = vunpack.c.l.b16 %v2692_v63 }
 0x35a   : > { %v2869_v51 = vsel %vm8730_vm2, 0, %v1881_v25  ;;  %v2981_v33 = vsel %vm10881_vm8, %v2595_v42, %v2892_v31  ;;  %v1497_v30 = vpop.permute.xlu1 %1496  ;;  %vm10884_vm2 = vmmov %vm10872_vm6  ;;  %v1791_v63 = vrot.slane %v1789_v1, 7  ;;  %vm10893_vm8 = vsmask.f32 256 }
 0x35b   : > { %2943 = vrot.lane.b32.xlu2 %v2869_v51, %s6930_s15  ;;  %v1884_v43 = vsel %vm10877_vm9, %v1882_v39, %v1883_v3  ;;  %vm10882_vm9 = vcmask 523264   ;;  %v1550_v54 = vadd.f32 %v1497_v30, %v7690_v11  ;;  %v2413_v39 = vsel %vm2381_vm1, 65537, %v10863_v28  ;;  %vm10885_vm0 = vmmov %vm10884_vm2 }
 0x35c   : > { %v2870_v17 = vsel %vm8748_vm14, 0, %v1884_v43  ;;  %vm10883_vm14 = vmmov %vm10872_vm6  ;;  %v2445_v31 = vunpack.c.l.b16 %v2413_v39  ;;  %v6061_v42 = vunpack.i.l.s16 %v2724_v23  ;;  %v1885_v39 = vor.u32 %v1883_v3, %v1797_v19 }
 0x35d   : > { %2945 = vrot.lane.b32.xlu1 %v2870_v17, %s6930_s15  ;;  %v6816_v17 = vld [vmem:[%s7085_s13 + $0xd8] sm:$0xff]  ;;  %v10889_v23 = vmov 0  ;;  %vm10895_vm10 = vmmov %vm10893_vm8 }
 0x35e   : > { %vm2836_vm1 = vcmp.ne.s32.totalorder %v6061_v42, %v7753_v2 }
 0x35f   : > { %v8784_v44 = vpop.f32.mrf.mxu1 }
 0x363   : > { %2897 = vrot.lane.b32.xlu2 %v8720_v8, %s6929_s27 }
 0x369   : > { %6202 = vmatmul.msk.bf16.gmra.mxu1 %vm10872_vm6, %v8470_v38  ;;  %v1582_v38 = vmul.f32 %v6815_v46, %v1550_v54  ;;  %v8798_v46 = vrot.slane %v1797_v19, 7  ;;  %vm10892_vm6 = vsmask.f32 7424 }
 0x36a   : > { %v2940_v0 = vpop.permute.xlu2 %2939 }
 0x36b   : > { %v3021_v52 = vsel %vm10882_vm9, %v2981_v33, %v2940_v0  ;;  %v1614_v43 = vpack.c.bf16 %v1582_v38, %v1582_v38  ;;  %v6022_v0 = vunpack.i.l.s16 %v2445_v31  ;;  %v1802_v1 = vor.u32 %v1800_v58, %v8798_v46 }
 0x36c   : > { %6100 = vmatmul.msk.bf16.gmra.mxu2 %vm10883_vm14, %v3021_v52  ;;  %6164 = vmatmul.msk.bf16.gmra.mxu3 %vm10884_vm2, %v3021_v52  ;;  %vm8809_vm14 = vmpackc.low %vm2836_vm1, %vm7777_vm7  ;;  %v1794_v31 = vor.u32 %v1792_v50, %v1791_v63  ;;  %vm10894_vm9 = vcmask 261120   ;;  %vm10897_vm1 = vcmask 785408  }
 0x36d   : > { %v1678_v33 = vunpack.c.l.b16 %v1614_v43  ;;  %vm2542_vm2 = vcmp.ne.s32.totalorder %v6022_v0, %v7730_v62  ;;  %v1935_v0 = vadd.s32 160, %v7676_v10 }
 0x36e   : > { %vm8815_vm15 = vmpackc.low %vm8036_vm12, %vm2542_vm2  ;;  %v8837_v42 = vsel %vm10895_vm10, %v8607_v18, %v1794_v31 }
 0x36f   : > { %v10890_v23 = vsel %vm8815_vm15, 4294967295, %v10889_v23  ;;  %v2596_v19 = vsel %vm8815_vm15, 0, %v8633_v6  ;;  %vm10898_vm2 = vmmov %vm10897_vm1 }
 0x370   : > { %10891 = vst [vmem:[#allocation28_spill] sm:$0xff] %v10890_v23 }
 0x372   : > { %v1502_v25 = vpop.permute.xlu2 %1501 }
 0x373   : > { %v1551_v51 = vadd.f32 %v1502_v25, %v7690_v11 }
 0x375   : > { %v1583_v40 = vmul.f32 %v6816_v17, %v1551_v51  ;;  %v3280_v17 = vpop.f32.mrf.mxu0 }
 0x376   : > { %v8791_v27 = vpop.f32.mrf.mxu1 }
 0x377   : > { %v1615_v45 = vpack.c.bf16 %v1583_v40, %v1583_v40 }
 0x379   : > { %v1679_v30 = vunpack.c.l.b16 %v1615_v45  ;;  %6203 = vmatmul.msk.bf16.gmra.mxu1 %vm10885_vm0, %v8585_v36  ;;  %v10886_v36 = vmov 0  ;;  %v8828_v45 = vsel %vm10893_vm8, %v1791_v63, %v1802_v1  ;;  %vm10896_vm0 = vcmask 523264   ;;  %vm10900_vm8 = vmmov %vm10897_vm1 }
 0x37a   : > { %v10887_v36 = vsel %vm8809_vm14, 4294967295, %v10886_v36 }
 0x37b   : > { %v1697_v54 = vpack.c.b16 %v1679_v30, %v1678_v33  ;;  %10888 = vst [vmem:[#allocation27_spill] sm:$0xff] %v10887_v36 }
 0x37c   : > { %v2894_v43 = vpop.permute.xlu1 %2893 }
 0x37d   : > { %2901 = vrot.lane.b32.xlu1 %v1697_v54, %s6929_s27  ;;  %v1808_v38 = vshll.u32 %v1697_v54, 16  ;;  %v2984_v49 = vsel %vm10894_vm9, %v2596_v19, %v2894_v43  ;;  %v3283_v50 = vpop.f32.mrf.mxu0  ;;  %v1937_v43 = vadd.s32 176, %v7676_v10 }
 0x37e   : > { %v8805_v25 = vpop.f32.mrf.mxu1 }
 0x37f   : > { %v1886_v51 = vrot.slane %v1808_v38, 1  ;;  %v2105_v31 = vand.u32 15, %v1937_v43  ;;  %v8864_v43 = vld [vmem:[%s10615_s10] ss:$0 sm:$0xff] }
 0x381   : > { %v1887_v3 = vsel %vm10892_vm6, %v1885_v39, %v1886_v51  ;;  %vm10899_vm6 = vmmov %vm10897_vm1  ;;  %v2091_v39 = vand.u32 15, %v1935_v0 }
 0x382   : > { %v2871_v40 = vsel %vm8809_vm14, 0, %v1887_v3  ;;  %v1805_v3 = vshrl.u32 %v1697_v54, 16 }
 0x383   : > { %2947 = vrot.lane.b32.xlu2 %v2871_v40, %s6930_s15  ;;  %vm2351_vm9 = vcmp.eq.s32.totalorder %v2091_v39, 0 }
 0x384   : > { %v2942_v58 = vpop.permute.xlu0 %2941  ;;  %vm2383_vm10 = vmpackc.low %vm2351_vm9, %vm2351_vm9  ;;  %v8856_v54 = vor.u32 %v1886_v51, %v1805_v3 }
 0x385   : > { %v3023_v33 = vsel %vm10896_vm0, %v2984_v49, %v2942_v58  ;;  %v3285_v30 = vpop.f32.mrf.mxu0  ;;  %v2415_v40 = vsel %vm2383_vm10, 65537, %v10863_v28  ;;  %v8851_v49 = vrot.slane %v1805_v3, 7  ;;  %vm2353_vm0 = vcmp.eq.s32.totalorder %v2105_v31, 0 }
 0x386   : > { %6101 = vmatmul.msk.bf16.gmra.mxu2 %vm10897_vm1, %v3023_v33  ;;  %6165 = vmatmul.msk.bf16.gmra.mxu3 %vm10898_vm2, %v3023_v33  ;;  %v3398_v8 = vpop.f32.mrf.mxu1  ;;  %vm2385_vm1 = vmpackc.low %vm2353_vm0, %vm2353_vm0  ;;  %vm10906_vm10 = vcmask 261120   ;;  %vm10907_vm0 = vcmask 523264  }
 0x389   : > { %6204 = vmatmul.msk.bf16.gmra.mxu1 %vm10899_vm6, %v3021_v52  ;;  %v2447_v52 = vunpack.c.l.b16 %v2415_v40  ;;  %v8859_v40 = vor.u32 %v1808_v38, %v8851_v49  ;;  %v2417_v38 = vsel %vm2385_vm1, 65537, %v10863_v28  ;;  %vm10908_vm1 = vcmask 785408  }
 0x38b   : > { %v6024_v36 = vunpack.i.l.s16 %v2447_v52 }
 0x38c   : > { %v2896_v31 = vpop.permute.xlu0 %2895 }
 0x38d   : > { %v8845_v18 = vpop.f32.mrf.mxu0  ;;  %vm2549_vm2 = vcmp.ne.s32.totalorder %v6024_v36, %v7730_v62  ;;  %v10903_v36 = vmov 0 }
 0x38e   : > { %v3400_v6 = vpop.f32.mrf.mxu1 }
 0x38f   : > { %v3479_v52 = vadd.f32 %v3400_v6, %v3280_v17 }
 0x391   : > { %v3513_v6 = vmul.f32 %v8864_v43, %v3479_v52 }
 0x395   : > { %v8849_v19 = vpop.f32.mrf.mxu0 }
 0x396   : > { %v3403_v63 = vpop.f32.mrf.mxu1 }
 0x397   : > { %v3404_v39 = vadd.f32 %v3403_v63, %v8514_v15 }
 0x399   : > { %6205 = vmatmul.msk.bf16.gmra.mxu1 %vm10900_vm8, %v3023_v33  ;;  %v1939_v33 = vadd.s32 192, %v7676_v10  ;;  %vm8881_vm8 = vmpackc.low %vm8036_vm12, %vm2549_vm2 }
 0x39a   : > { %v10904_v36 = vsel %vm8881_vm8, 4294967295, %v10903_v36  ;;  %v2597_v14 = vsel %vm8881_vm8, 0, %v8636_v26  ;;  %vm10909_vm2 = vmmov %vm10908_vm1 }
 0x39b   : > { %v2119_v16 = vand.u32 15, %v1939_v33  ;;  %10905 = vst [vmem:[#allocation29_spill] sm:$0xff] %v10904_v36  ;;  %v2449_v33 = vunpack.c.l.b16 %v2417_v38 }
 0x39d   : > { %vm8868_vm6 = vcmp.eq.s32.totalorder %v2119_v16, 0  ;;  %v3293_v63 = vpop.f32.mrf.mxu0 }
 0x39e   : > { %v3405_v1 = vpop.f32.mrf.mxu1  ;;  %vm2387_vm9 = vmpackc.low %vm8868_vm6, %vm8868_vm6 }
 0x39f   : > { %v3406_v58 = vadd.f32 %v3405_v1, %v8550_v20  ;;  %v3480_v20 = vadd.f32 %v3404_v39, %v3283_v50  ;;  %v1507_v1 = vpop.permute.xlu2 %1506  ;;  %v8877_v50 = vld [vmem:[%s10615_s10 + $0x1] ss:$0 sm:$0xff]  ;;  %v1942_v39 = vadd.s32 216, %v7676_v10 }
 0x3a0   : > { %v1552_v3 = vadd.f32 %v1507_v1, %v7690_v11  ;;  %v6817_v1 = vld [vmem:[%s7085_s13 + $0xe0] sm:$0xff]  ;;  %v3547_v52 = vadd.f32 %v8877_v50, %v3513_v6 }
 0x3a1   : > { %v3481_v23 = vadd.f32 %v3406_v58, %v3285_v30  ;;  %v3514_v16 = vmul.f32 %v8864_v43, %v3480_v20  ;;  %v2140_v51 = vand.u32 15, %v1942_v39 }
 0x3a2   : > { %v1584_v47 = vmul.f32 %v6817_v1, %v1552_v3  ;;  %v6026_v1 = vunpack.i.l.s16 %v2449_v33  ;;  %v3579_v6 = vmax.f32 %v3547_v52, 0.0 }
 0x3a3   : > { %v3515_v15 = vmul.f32 %v8864_v43, %v3481_v23  ;;  %v3478_v23 = vadd.f32 %v3398_v8, %v8793_v22  ;;  %v3548_v20 = vadd.f32 %v8877_v50, %v3514_v16  ;;  %v2419_v22 = vsel %vm2387_vm9, 65537, %v10863_v28  ;;  %vm10910_vm9 = vmmov %vm10908_vm1 }
 0x3a4   : > { %v2987_v8 = vsel %vm10906_vm10, %v2597_v14, %v2896_v31  ;;  %v2451_v26 = vunpack.c.l.b16 %v2419_v22  ;;  %vm2630_vm6 = vcmp.eq.s32.totalorder %v2140_v51, 15  ;;  %v1616_v16 = vpack.c.bf16 %v1584_v47, %v1584_v47 }
 0x3a5   : > { %v3549_v58 = vadd.f32 %v8877_v50, %v3515_v15  ;;  %v3512_v17 = vmul.f32 %v8864_v43, %v3478_v23  ;;  %v3580_v23 = vmax.f32 %v3548_v20, 0.0  ;;  %vm2662_vm10 = vmpackc.low %vm2630_vm6, %vm2630_vm6  ;;  %v10911_v51 = vmov 0 }
 0x3a6   : > { %v3408_v0 = vpop.f32.mrf.mxu1  ;;  %v2694_v31 = vsel %vm2662_vm10, 65537, %v10863_v28  ;;  %v8911_v47 = vunpack.i.l.s16 %v2451_v26  ;;  %v1680_v20 = vunpack.c.l.b16 %v1616_v16 }
 0x3a7   : > { %v3581_v38 = vmax.f32 %v3549_v58, 0.0  ;;  %v3546_v14 = vadd.f32 %v8877_v50, %v3512_v17  ;;  %v3295_v58 = vpop.f32.mrf.mxu0  ;;  %v3612_v22 = vpack.c.bf16 %v3580_v23, %v3580_v23  ;;  %v2726_v17 = vunpack.c.l.b16 %v2694_v31 }
 0x3a9   : > { %v3613_v33 = vpack.c.bf16 %v3581_v38, %v3581_v38  ;;  %v3676_v31 = vunpack.c.l.b16 %v3612_v22 }
 0x3ae   : > { %v3410_v30 = vpop.f32.mrf.mxu1 }
 0x3af   : > { %v3411_v38 = vadd.f32 %v3410_v30, %v8605_v48 }
 0x3b1   : > { %v3483_v22 = vadd.f32 %v3411_v38, %v8849_v19 }
 0x3b5   : > { %v2944_v15 = vpop.permute.xlu2 %2943 }
 0x3b6   : > { %v3413_v41 = vpop.f32.mrf.mxu1  ;;  %v3025_v3 = vsel %vm10907_vm0, %v2987_v8, %v2944_v15  ;;  %vm2556_vm0 = vcmp.ne.s32.totalorder %v6026_v1, %v7730_v62  ;;  %v3578_v15 = vmax.f32 %v3546_v14, 0.0 }
 0x3b7   : > { %v3414_v36 = vadd.f32 %v3413_v41, %v8614_v24  ;;  %6102 = vmatmul.msk.bf16.gmra.mxu2 %vm10908_vm1, %v3025_v3  ;;  %6166 = vmatmul.msk.bf16.gmra.mxu3 %vm10909_vm2, %v3025_v3  ;;  %v3409_v41 = vadd.f32 %v3408_v0, %v8597_v61  ;;  %vm8916_vm1 = vmpackc.low %vm8036_vm12, %vm2556_vm0  ;;  %v1944_v61 = vadd.s32 232, %v7676_v10  ;;  %v1946_v0 = vadd.s32 248, %v7676_v10 }
 0x3b8   : > { %6206 = vmatmul.msk.bf16.gmra.mxu1 %vm10910_vm9, %v3025_v3  ;;  %v10912_v51 = vsel %vm8916_vm1, 4294967295, %v10911_v51  ;;  %v6818_v3 = vld [vmem:[%s7085_s13 + $0xe8] sm:$0xff]  ;;  %v2598_v35 = vsel %vm8916_vm1, 0, %v8837_v42  ;;  %v3610_v30 = vpack.c.bf16 %v3578_v15, %v3578_v15  ;;  %v3298_v15 = vpop.f32.mrf.mxu0  ;;  %vm10924_vm1 = vsmask.f32 7424 }
 0x3b9   : > { %v3484_v24 = vadd.f32 %v3414_v36, %v3293_v63  ;;  %v3677_v63 = vunpack.c.l.b16 %v3613_v33  ;;  %v3482_v36 = vadd.f32 %v3409_v41, %v8845_v18  ;;  %v2154_v14 = vand.u32 15, %v1944_v61  ;;  %vm10929_vm14 = vmmov %vm10924_vm1 }
 0x3ba   : > { %v2168_v52 = vand.u32 15, %v1946_v0  ;;  %v6063_v33 = vunpack.i.l.s16 %v2726_v17  ;;  %v3611_v18 = vpack.c.bf16 %v3579_v6, %v3579_v6 }
 0x3bb   : > { %v1512_v39 = vpop.permute.xlu1 %1511  ;;  %v3518_v16 = vmul.f32 %v8864_v43, %v3484_v24  ;;  %vm2632_vm2 = vcmp.eq.s32.totalorder %v2154_v14, 15  ;;  %v8934_v41 = vpack.c.b16 %v3677_v63, %v3676_v31  ;;  %v3517_v14 = vmul.f32 %v8864_v43, %v3483_v22 }
 0x3bc   : > { %v1553_v8 = vadd.f32 %v1512_v39, %v7690_v11  ;;  %vm8930_vm6 = vcmp.eq.s32.totalorder %v2168_v52, 15  ;;  %vm2664_vm9 = vmpackc.low %vm2632_vm2, %vm2632_vm2  ;;  %vm2843_vm0 = vcmp.ne.s32.totalorder %v6063_v33, %v7753_v2  ;;  %v3675_v38 = vunpack.c.l.b16 %v3611_v18 }
 0x3bd   : > { %v2696_v61 = vsel %vm2664_vm9, 65537, %v10863_v28  ;;  %vm2666_vm10 = vmpackc.low %vm8930_vm6, %vm8930_vm6  ;;  %v2898_v18 = vpop.permute.xlu2 %2897  ;;  %vm10917_vm6 = vsmask.f32 7424  ;;  %v3730_v7 = vshrl.u32 %v8934_v41, 16 }
 0x3be   : > { %v1585_v1 = vmul.f32 %v6818_v3, %v1553_v8  ;;  %v3415_v26 = vpop.f32.mrf.mxu1  ;;  %v3552_v8 = vadd.f32 %v8877_v50, %v3518_v16  ;;  %v2728_v63 = vunpack.c.l.b16 %v2696_v61  ;;  %v6820_v16 = vld [vmem:[%s7085_s13 + $0xf8] sm:$0xff]  ;;  %vm8965_vm2 = vmpackc.low %vm2843_vm0, %vm7777_vm7 }
 0x3bf   : > { %v3416_v23 = vadd.f32 %v3415_v26, %v8622_v59  ;;  %v3516_v59 = vmul.f32 %v8864_v43, %v3482_v36  ;;  %v2698_v36 = vsel %vm2666_vm10, 65537, %v10863_v28  ;;  %vm10918_vm10 = vcmask 261120  }
 0x3c0   : > { %v1617_v39 = vpack.c.bf16 %v1585_v1, %v1585_v1  ;;  %v6819_v1 = vld [vmem:[%s7085_s13 + $0xf0] sm:$0xff]  ;;  %v2730_v31 = vunpack.c.l.b16 %v2698_v36  ;;  %v3584_v48 = vmax.f32 %v3552_v8, 0.0 }
 0x3c1   : > { %v3485_v56 = vadd.f32 %v3416_v23, %v3295_v58  ;;  %v3550_v3 = vadd.f32 %v8877_v50, %v3516_v59 }
 0x3c2   : > { %v1681_v24 = vunpack.c.l.b16 %v1617_v39  ;;  %v3674_v39 = vunpack.c.l.b16 %v3610_v30 }
 0x3c3   : > { %v3519_v42 = vmul.f32 %v8864_v43, %v3485_v56  ;;  %v1517_v58 = vpop.permute.xlu1 %1516  ;;  %v1522_v17 = vpop.permute.xlu0 %1521 }
 0x3c4   : > { %v1554_v6 = vadd.f32 %v1517_v58, %v7690_v11  ;;  %v1555_v0 = vadd.f32 %v1522_v17, %v7690_v11  ;;  %v8946_v19 = vpack.c.b16 %v1681_v24, %v1680_v20  ;;  %v10915_v58 = vmov 0 }
 0x3c5   : > { %v3553_v56 = vadd.f32 %v8877_v50, %v3519_v42  ;;  %v10916_v58 = vsel %vm8965_vm2, 4294967295, %v10915_v58  ;;  %v8969_v61 = vpack.c.b16 %v3675_v38, %v3674_v39 }
 0x3c6   : > { %v1586_v26 = vmul.f32 %v6819_v1, %v1554_v6  ;;  %v1587_v23 = vmul.f32 %v6820_v16, %v1555_v0  ;;  %2903 = vrot.lane.b32.xlu2 %v8946_v19, %s6929_s27  ;;  %v1816_v11 = vshll.u32 %v8946_v19, 16  ;;  %v3418_v20 = vpop.f32.mrf.mxu1  ;;  %v2990_v0 = vsel %vm10918_vm10, %v2598_v35, %v2898_v18  ;;  %v3300_v16 = vpop.f32.mrf.mxu0 }
 0x3c7   : > { %v3419_v52 = vadd.f32 %v3418_v20, %v8638_v5  ;;  %v3585_v22 = vmax.f32 %v3553_v56, 0.0  ;;  %v6065_v5 = vunpack.i.l.s16 %v2728_v63  ;;  %v6067_v1 = vunpack.i.l.s16 %v2730_v31 }
 0x3c8   : > { %v1618_v24 = vpack.c.bf16 %v1586_v26, %v1586_v26  ;;  %v1619_v59 = vpack.c.bf16 %v1587_v23, %v1587_v23  ;;  %v1889_v42 = vrot.slane %v1816_v11, 1  ;;  %v3616_v26 = vpack.c.bf16 %v3584_v48, %v3584_v48 }
 0x3c9   : > { %v3486_v17 = vadd.f32 %v3419_v52, %v3298_v15  ;;  %v3733_v56 = vshll.u32 %v8934_v41, 16  ;;  %v3551_v63 = vadd.f32 %v8877_v50, %v3517_v14  ;;  %v3617_v38 = vpack.c.bf16 %v3585_v22, %v3585_v22 }
 0x3ca   : > { %v1682_v30 = vunpack.c.l.b16 %v1618_v24  ;;  %v1683_v8 = vunpack.c.l.b16 %v1619_v59  ;;  %v1890_v6 = vsel %vm10917_vm6, %v8856_v54, %v1889_v42  ;;  %vm2850_vm0 = vcmp.ne.s32.totalorder %v6065_v5, %v7753_v2 }
 0x3cb   : > { %v3520_v36 = vmul.f32 %v8864_v43, %v3486_v17  ;;  %v2872_v33 = vsel %vm8965_vm2, 0, %v1890_v6  ;;  %v3726_v35 = vshll.u32 %v8969_v61, 16  ;;  %v3582_v54 = vmax.f32 %v3550_v3, 0.0  ;;  %vm8999_vm9 = vmpackc.low %vm2850_vm0, %vm7777_vm7 }
 0x3cc   : > { %2949 = vrot.lane.b32.xlu0 %v2872_v33, %s6930_s15  ;;  %v8978_v15 = vpack.c.b16 %v1683_v8, %v1682_v30  ;;  %v1813_v23 = vshrl.u32 %v8946_v19, 16  ;;  %v3583_v39 = vmax.f32 %v3551_v63, 0.0  ;;  %v3723_v14 = vshrl.u32 %v8969_v61, 16 }
 0x3cd   : > { %v3554_v20 = vadd.f32 %v8877_v50, %v3520_v36  ;;  %v3614_v24 = vpack.c.bf16 %v3582_v54, %v3582_v54  ;;  %vm10919_vm10 = vcmask 523264   ;;  %v3681_v30 = vunpack.c.l.b16 %v3617_v38 }
 0x3ce   : > { %v3420_v52 = vpop.f32.mrf.mxu1  ;;  %v1824_v31 = vshll.u32 %v8978_v15, 16  ;;  %v1891_v3 = vor.u32 %v1889_v42, %v1813_v23  ;;  %v1821_v17 = vshrl.u32 %v8978_v15, 16  ;;  %vm10922_vm6 = vcmask 785408  }
 0x3cf   : > { %v3421_v48 = vadd.f32 %v3420_v52, %v8666_v9  ;;  %v2946_v18 = vpop.permute.xlu1 %2945  ;;  %vm10925_vm2 = vcmask 1047552   ;;  %v3868_v5 = vrot.slane %v3733_v56, 1  ;;  %v3615_v6 = vpack.c.bf16 %v3583_v39, %v3583_v39  ;;  %vm10928_vm0 = vmmov %vm10922_vm6 }
 0x3d0   : > { %v3027_v59 = vsel %vm10919_vm10, %v2990_v0, %v2946_v18  ;;  %v1892_v22 = vrot.slane %v1824_v31, 1  ;;  %vm10923_vm10 = vmmov %vm10922_vm6  ;;  %v3586_v0 = vmax.f32 %v3554_v20, 0.0  ;;  %v3866_v38 = vrot.slane %v3726_v35, 1 }
 0x3d1   : > { %v3487_v8 = vadd.f32 %v3421_v48, %v3300_v16  ;;  %6103 = vmatmul.msk.bf16.gmra.mxu2 %vm10922_vm6, %v3027_v59  ;;  %6167 = vmatmul.msk.bf16.gmra.mxu3 %vm10923_vm10, %v3027_v59  ;;  %vm9008_vm8 = vmand %vm10925_vm2, %vm10924_vm1  ;;  %vm10930_vm6 = vcmp.ne.s32.totalorder %v6067_v1, %v7753_v2  ;;  %v3678_v20 = vunpack.c.l.b16 %v3614_v24  ;;  %v3679_v52 = vunpack.c.l.b16 %v3615_v6  ;;  %v3303_v24 = vpop.f32.mrf.mxu0 }
 0x3d2   : > { %6207 = vmatmul.msk.bf16.gmra.mxu1 %vm10928_vm0, %v3027_v59  ;;  %v1893_v36 = vsel %vm10929_vm14, %v1891_v3, %v1892_v22  ;;  %v1894_v33 = vor.u32 %v1892_v22, %v1821_v17  ;;  %vm9022_vm1 = vmpackc.low %vm10930_vm6, %vm7777_vm7  ;;  %v3680_v39 = vunpack.c.l.b16 %v3616_v26  ;;  %v3725_v1 = vrot.slane %v3723_v14, 7  ;;  %v6433_v26 = vld [vmem:[%s10607_s2 + $0x88] sm:$0xff] }
 0x3d3   : > { %v3521_v54 = vmul.f32 %v8864_v43, %v3487_v8  ;;  %v2873_v16 = vsel %vm8999_vm9, 0, %v1893_v36  ;;  %v9038_v59 = vpack.c.b16 %v3679_v52, %v3678_v20  ;;  %v3867_v8 = vor.u32 %v3866_v38, %v3723_v14  ;;  %4353 = vmatpush.bf16.msrb.mxu2 %v6433_v26  ;;  %vm10938_vm6 = vmmov %vm10929_vm14 }
 0x3d4   : > { %2905 = vrot.lane.b32.xlu0 %v8978_v15, %s6929_s27  ;;  %2951 = vrot.lane.b32.xlu1 %v2873_v16, %s6930_s15  ;;  %v1913_v2 = vsel %vm9008_vm8, %v1894_v33, 0  ;;  %v9043_v3 = vpack.c.b16 %v3681_v30, %v3680_v39  ;;  %v9046_v6 = vor.u32 %v3726_v35, %v3725_v1  ;;  %v3618_v36 = vpack.c.bf16 %v3586_v0, %v3586_v0 }
 0x3d5   : > { %v3555_v48 = vadd.f32 %v8877_v50, %v3521_v54  ;;  %v2874_v18 = vsel %vm9022_vm1, 0, %v1913_v2  ;;  %vm2563_vm7 = vcmp.ne.s32.totalorder %v8911_v47, %v7730_v62  ;;  %v3869_v16 = vsel %vm10929_vm14, %v3867_v8, %v3868_v5  ;;  %v2900_v2 = vpop.permute.xlu0 %2899 }
 0x3d6   : > { %2953 = vrot.lane.b32.xlu2 %v2874_v18, %s6930_s15  ;;  %v3423_v22 = vpop.f32.mrf.mxu1  ;;  %v3741_v20 = vshll.u32 %v9038_v59, 16  ;;  %v9053_v30 = vrot.slane %v3730_v7, 7  ;;  %vm9057_vm2 = vmpackc.low %vm8036_vm12, %vm2563_vm7  ;;  %v3749_v47 = vshll.u32 %v9043_v3, 16  ;;  %v3682_v14 = vunpack.c.l.b16 %v3618_v36 }
 0x3d7   : > { %v3587_v33 = vmax.f32 %v3555_v48, 0.0  ;;  %v3424_v54 = vadd.f32 %v3423_v22, %v8716_v53  ;;  %v3946_v38 = vsel %vm7824_vm13, 0, %v3869_v16  ;;  %v2599_v26 = vsel %vm9057_vm2, 0, %v8828_v45 }
 0x3d8   : > { %v3871_v48 = vrot.slane %v3741_v20, 1  ;;  %v3735_v18 = vor.u32 %v3733_v56, %v9053_v30  ;;  %v3870_v8 = vor.u32 %v3868_v5, %v3730_v7  ;;  %v3874_v36 = vrot.slane %v3749_v47, 1 }
 0x3d9   : > { %v3619_v52 = vpack.c.bf16 %v3587_v33, %v3587_v33  ;;  %v3488_v39 = vadd.f32 %v3424_v54, %v3303_v24  ;;  %vm10935_vm13 = vsmask.f32 256  ;;  %vm10936_vm10 = vcmask 261120   ;;  %v3305_v16 = vpop.f32.mrf.mxu0 }
 0x3da   : > { %v9084_v33 = vsel %vm10935_vm13, %v3725_v1, %v3735_v18  ;;  %v2993_v56 = vsel %vm10936_vm10, %v2599_v26, %v2900_v2  ;;  %vm10937_vm0 = vcmask 523264   ;;  %vm10939_vm7 = vcmask 785408   ;;  %vm10942_vm10 = vmmov %vm10938_vm6 }
 0x3db   : > { %v3683_v0 = vunpack.c.l.b16 %v3619_v52  ;;  %v3522_v53 = vmul.f32 %v8864_v43, %v3488_v39  ;;  %vm10940_vm14 = vmmov %vm10939_vm7  ;;  %v1823_v19 = vrot.slane %v1821_v17, 7 }
 0x3dc   : > { %3962 = vrot.lane.b32.xlu1 %v8969_v61, %s6929_s27  ;;  %4010 = vrot.lane.b32.xlu0 %v3946_v38, %s6930_s15  ;;  %v3738_v61 = vshrl.u32 %v9038_v59, 16  ;;  %vm10941_vm13 = vmmov %vm10939_vm7  ;;  %v3746_v38 = vshrl.u32 %v9043_v3, 16 }
 0x3dd   : > { %v9076_v24 = vpack.c.b16 %v3683_v0, %v3682_v14  ;;  %v2948_v55 = vpop.permute.xlu2 %2947  ;;  %v3556_v45 = vadd.f32 %v8877_v50, %v3522_v53  ;;  %v3308_v53 = vpop.f32.mrf.mxu3 }
 0x3de   : > { %v3425_v22 = vpop.f32.mrf.mxu1  ;;  %3964 = vrot.lane.b32.xlu2 %v8934_v41, %s6929_s27  ;;  %v3029_v52 = vsel %vm10937_vm0, %v2993_v56, %v2948_v55  ;;  %v3872_v41 = vsel %vm10938_vm6, %v3870_v8, %v3871_v48  ;;  %v3873_v39 = vor.u32 %v3871_v48, %v3738_v61  ;;  %v3876_v55 = vor.u32 %v3874_v36, %v3746_v38 }
 0x3df   : > { %v3426_v54 = vadd.f32 %v3425_v22, %v8752_v29  ;;  %v3757_v5 = vshll.u32 %v9076_v24, 16  ;;  %v3947_v29 = vsel %vm7789_vm11, 0, %v3872_v41  ;;  %v3588_v0 = vmax.f32 %v3556_v45, 0.0  ;;  %vm10943_vm11 = vmmov %vm10938_vm6 }
 0x3e0   : > { %v3875_v1 = vsel %vm10942_vm10, %v3873_v39, %v3874_v36  ;;  %v3740_v45 = vrot.slane %v3738_v61, 7 }
 0x3e1   : > { %v3489_v7 = vadd.f32 %v3426_v54, %v3305_v16  ;;  %6104 = vmatmul.msk.bf16.gmra.mxu2 %vm10939_vm7, %v3029_v52  ;;  %6168 = vmatmul.msk.bf16.gmra.mxu3 %vm10940_vm14, %v3029_v52  ;;  %v3877_v2 = vrot.slane %v3757_v5, 1  ;;  %v3948_v18 = vsel %vm7961_vm5, 0, %v3875_v1  ;;  %v3620_v56 = vpack.c.bf16 %v3588_v0, %v3588_v0 }
 0x3e2   : > { %6208 = vmatmul.msk.bf16.gmra.mxu1 %vm10941_vm13, %v3029_v52  ;;  %v1815_v1 = vrot.slane %v1813_v23, 7  ;;  %vm10944_vm5 = vsmask.f32 256  ;;  %vm10950_vm14 = vnez %v10737_v32 }
 0x3e3   : > { %v3523_v14 = vmul.f32 %v8864_v43, %v3489_v7  ;;  %v3878_v54 = vsel %vm10943_vm11, %v3876_v55, %v3877_v2  ;;  %v3684_v39 = vunpack.c.l.b16 %v3620_v56  ;;  %vm10946_vm0 = vmmov %vm10944_vm5  ;;  %vm10953_vm11 = vnez %v10797_v12 }
 0x3e4   : > { %3966 = vrot.lane.b32.xlu0 %v9038_v59, %s6929_s27  ;;  %4012 = vrot.lane.b32.xlu1 %v3947_v29, %s6930_s15  ;;  %v3949_v41 = vsel %vm7989_vm3, 0, %v3878_v54  ;;  %vm10945_vm3 = vmmov %vm10938_vm6  ;;  %v1941_v12 = vadd.s32 208, %v7676_v10 }
 0x3e5   : > { %v3557_v48 = vadd.f32 %v8877_v50, %v3523_v14  ;;  %v3310_v36 = vpop.f32.mrf.mxu3  ;;  %vm10948_vm6 = vmmov %vm10946_vm0 }
 0x3e6   : > { %v3428_v26 = vpop.f32.mrf.mxu1  ;;  %4014 = vrot.lane.b32.xlu2 %v3948_v18, %s6930_s15  ;;  %v6432_v18 = vld [vmem:[%s10607_s2 + $0x80] sm:$0xff]  ;;  %vm10949_vm7 = vmmov %vm10945_vm3 }
 0x3e7   : > { %v3429_v22 = vadd.f32 %v3428_v26, %v8765_v21  ;;  %v3589_v8 = vmax.f32 %v3557_v48, 0.0  ;;  %v3743_v21 = vor.u32 %v3741_v20, %v3740_v45  ;;  %v3754_v20 = vshrl.u32 %v9076_v24, 16  ;;  %4354 = vmatpush.bf16.msrb.mxu2 %v6432_v18  ;;  %vm10951_vm13 = vmmov %vm10946_vm0 }
 0x3e8   : > { %vm10952_vm10 = vmmov %vm10945_vm3 }
 0x3e9   : > { %v3490_v16 = vadd.f32 %v3429_v22, %v3308_v53  ;;  %v3621_v52 = vpack.c.bf16 %v3589_v8, %v3589_v8  ;;  %v9130_v4 = vsel %vm10944_vm5, %v9053_v30, %v3743_v21  ;;  %v3879_v48 = vor.u32 %v3877_v2, %v3754_v20  ;;  %vm10954_vm5 = vmmov %vm10946_vm0 }
 0x3ea   : > { %v1826_v21 = vor.u32 %v1824_v31, %v1823_v19 }
 0x3eb   : > { %v3524_v13 = vmul.f32 %v8864_v43, %v3490_v16  ;;  %v3685_v7 = vunpack.c.l.b16 %v3621_v52 }
 0x3ec   : > { %4016 = vrot.lane.b32.xlu0 %v3949_v41, %s6930_s15  ;;  %3968 = vrot.lane.b32.xlu1 %v9043_v3, %s6929_s27  ;;  %v3748_v41 = vrot.slane %v3746_v38, 7 }
 0x3ed   : > { %v9122_v61 = vpack.c.b16 %v3685_v7, %v3684_v39  ;;  %v3558_v29 = vadd.f32 %v8877_v50, %v3524_v13 }
 0x3ee   : > { %v3430_v14 = vpop.f32.mrf.mxu1  ;;  %3970 = vrot.lane.b32.xlu2 %v9076_v24, %s6929_s27 }
 0x3ef   : > { %v3431_v0 = vadd.f32 %v3430_v14, %v8784_v44  ;;  %v3765_v59 = vshll.u32 %v9122_v61, 16  ;;  %v3590_v26 = vmax.f32 %v3558_v29, 0.0  ;;  %v1818_v44 = vor.u32 %v1816_v11, %v1815_v1  ;;  %v3313_v8 = vpop.f32.mrf.mxu3 }
 0x3f0   : > { %v3762_v38 = vshrl.u32 %v9122_v61, 16 }
 0x3f1   : > { %v3491_v53 = vadd.f32 %v3431_v0, %v3310_v36  ;;  %v3880_v23 = vrot.slane %v3765_v59, 1  ;;  %v9153_v22 = vsel %vm10946_vm0, %v8851_v49, %v1818_v44  ;;  %v3622_v16 = vpack.c.bf16 %v3590_v26, %v3590_v26  ;;  %v6425_v44 = vld [vmem:[%s10607_s2 + $0x48] sm:$0xff] }
 0x3f2   : > { %4478 = vmatpush.bf16.msrb.mxu3 %v6425_v44 }
 0x3f3   : > { %v3525_v30 = vmul.f32 %v8864_v43, %v3491_v53  ;;  %v3881_v60 = vsel %vm10945_vm3, %v3879_v48, %v3880_v23  ;;  %v3686_v39 = vunpack.c.l.b16 %v3622_v16 }
 0x3f4   : > { %3972 = vrot.lane.b32.xlu0 %v9122_v61, %s6929_s27  ;;  %v3950_v2 = vsel %vm8015_vm4, 0, %v3881_v60  ;;  %vm10947_vm4 = vmmov %vm10946_vm0  ;;  %vm10955_vm0 = vnez %v10821_v37  ;;  %v6418_v37 = vld [vmem:[%s10607_s2 + $0x10] sm:$0xff] }
 0x3f5   : > { %v3559_v55 = vadd.f32 %v8877_v50, %v3525_v30  ;;  %4018 = vrot.lane.b32.xlu1 %v3950_v2, %s6930_s15  ;;  %v9169_v36 = vsel %vm10947_vm4, %v1815_v1, %v1826_v21  ;;  %v3161_v30 = vpop.f32.mrf.mxu2 }
 0x3f6   : > { %v3433_v56 = vpop.f32.mrf.mxu1 }
 0x3f7   : > { %v3434_v11 = vadd.f32 %v3433_v56, %v8791_v27  ;;  %v3591_v54 = vmax.f32 %v3559_v55, 0.0  ;;  %v3751_v27 = vor.u32 %v3749_v47, %v3748_v41  ;;  %v3315_v31 = vpop.f32.mrf.mxu3  ;;  %v3882_v47 = vor.u32 %v3880_v23, %v3762_v38 }
 0x3f8   : > { %v3756_v56 = vrot.slane %v3754_v20, 7 }
 0x3f9   : > { %v3492_v52 = vadd.f32 %v3434_v11, %v3313_v8  ;;  %v3623_v13 = vpack.c.bf16 %v3591_v54, %v3591_v54  ;;  %v9172_v29 = vsel %vm10948_vm6, %v3740_v45, %v3751_v27  ;;  %v6431_v45 = vld [vmem:[%s10607_s2 + $0x78] sm:$0xff] }
 0x3fa   : > { %4355 = vmatpush.bf16.msrb.mxu2 %v6431_v45 }
 0x3fb   : > { %v3526_v49 = vmul.f32 %v8864_v43, %v3492_v52  ;;  %v3687_v7 = vunpack.c.l.b16 %v3623_v13  ;;  %v3759_v52 = vor.u32 %v3757_v5, %v3756_v56 }
 0x3fd   : > { %v9166_v17 = vpack.c.b16 %v3687_v7, %v3686_v39  ;;  %v3560_v0 = vadd.f32 %v8877_v50, %v3526_v49  ;;  %v3163_v49 = vpop.f32.mrf.mxu2  ;;  %v9200_v7 = vsel %vm10951_vm13, %v3748_v41, %v3759_v52 }
 0x3fe   : > { %v3435_v14 = vpop.f32.mrf.mxu1 }
 0x3ff   : > { %v3436_v53 = vadd.f32 %v3435_v14, %v8805_v25  ;;  %v3773_v15 = vshll.u32 %v9166_v17, 16  ;;  %3974 = vrot.lane.b32.xlu1 %v9166_v17, %s6929_s27  ;;  %v3592_v25 = vmax.f32 %v3560_v0, 0.0  ;;  %v3770_v20 = vshrl.u32 %v9166_v17, 16  ;;  %v6429_v17 = vld [vmem:[%s10607_s2 + $0x68] sm:$0xff] }
 0x401   : > { %v3493_v3 = vadd.f32 %v3436_v53, %v3315_v31  ;;  %v3883_v1 = vrot.slane %v3773_v15, 1  ;;  %v3624_v8 = vpack.c.bf16 %v3592_v25, %v3592_v25 }
 0x403   : > { %v3527_v48 = vmul.f32 %v8864_v43, %v3493_v3  ;;  %v3884_v18 = vsel %vm10949_vm7, %v3882_v47, %v3883_v1  ;;  %v3688_v32 = vunpack.c.l.b16 %v3624_v8  ;;  %v3885_v24 = vor.u32 %v3883_v1, %v3770_v20  ;;  %v6421_v1 = vld [vmem:[%s10607_s2 + $0x28] sm:$0xff]  ;;  %vm10956_vm7 = vmmov %vm10954_vm5 }
 0x404   : > { %v3951_v60 = vsel %vm10950_vm14, 0, %v3884_v18  ;;  %4204 = vmatpush.bf16.msra.mxu0 %v6421_v1  ;;  %v2133_v8 = vand.u32 15, %v1941_v12  ;;  %v2902_v1 = vpop.permute.xlu1 %2901 }
 0x405   : > { %v3561_v26 = vadd.f32 %v8877_v50, %v3527_v48  ;;  %4020 = vrot.lane.b32.xlu2 %v3951_v60, %s6930_s15  ;;  %v3764_v48 = vrot.slane %v3762_v38, 7 }
 0x406   : > { %v3438_v23 = vpop.f32.mrf.mxu1  ;;  %vm2357_vm4 = vcmp.eq.s32.totalorder %v2133_v8, 0 }
 0x407   : > { %v3439_v2 = vadd.f32 %v3438_v23, %v3161_v30  ;;  %v3593_v55 = vmax.f32 %v3561_v26, 0.0  ;;  %v3767_v23 = vor.u32 %v3765_v59, %v3764_v48  ;;  %v6430_v59 = vld [vmem:[%s10607_s2 + $0x70] sm:$0xff]  ;;  %vm2389_vm6 = vmpackc.low %vm2357_vm4, %vm2357_vm4  ;;  %vm10961_vm4 = vcmask 523264  }
 0x408   : > { %4356 = vmatpush.bf16.msrb.mxu2 %v6430_v59  ;;  %v2421_v52 = vsel %vm2389_vm6, 65537, %v10863_v28  ;;  %vm10962_vm6 = vcmask 785408  }
 0x409   : > { %v3318_v19 = vpop.f32.mrf.mxu3  ;;  %v3625_v11 = vpack.c.bf16 %v3593_v55, %v3593_v55 }
 0x40a   : > { %v3494_v54 = vadd.f32 %v3439_v2, %v3318_v19  ;;  %v9224_v2 = vsel %vm10954_vm5, %v3756_v56, %v3767_v23  ;;  %v6420_v56 = vld [vmem:[%s10607_s2 + $0x20] sm:$0xff] }
 0x40b   : > { %v3689_v16 = vunpack.c.l.b16 %v3625_v11  ;;  %4205 = vmatpush.bf16.msra.mxu0 %v6420_v56 }
 0x40c   : > { %v3528_v34 = vmul.f32 %v8864_v43, %v3494_v54  ;;  %4357 = vmatpush.bf16.msrb.mxu2 %v6429_v17 }
 0x40d   : > { %v9197_v13 = vpack.c.b16 %v3689_v16, %v3688_v32  ;;  %v6419_v32 = vld [vmem:[%s10607_s2 + $0x18] sm:$0xff]  ;;  %v6424_v16 = vld [vmem:[%s10607_s2 + $0x40] sm:$0xff] }
 0x40e   : > { %v3440_v39 = vpop.f32.mrf.mxu1  ;;  %v3562_v14 = vadd.f32 %v8877_v50, %v3528_v34  ;;  %v3772_v34 = vrot.slane %v3770_v20, 7  ;;  %4479 = vmatpush.bf16.msrb.mxu3 %v6424_v16  ;;  %v6417_v20 = vld [vmem:[%s10607_s2 + $0x8] sm:$0xff] }
 0x40f   : > { %v3441_v21 = vadd.f32 %v3440_v39, %v3163_v49  ;;  %v3781_v27 = vshll.u32 %v9197_v13, 16  ;;  %3976 = vrot.lane.b32.xlu2 %v9197_v13, %s6929_s27  ;;  %v3778_v55 = vshrl.u32 %v9197_v13, 16  ;;  %4206 = vmatpush.bf16.msra.mxu0 %v6419_v32  ;;  %v1943_v39 = vadd.s32 224, %v7676_v10 }
 0x410   : > { %v3594_v41 = vmax.f32 %v3562_v14, 0.0  ;;  %v3775_v49 = vor.u32 %v3773_v15, %v3772_v34  ;;  %v2453_v14 = vunpack.c.l.b16 %v2421_v52 }
 0x411   : > { %v3320_v0 = vpop.f32.mrf.mxu3  ;;  %v3886_v5 = vrot.slane %v3781_v27, 1 }
 0x412   : > { %v3495_v53 = vadd.f32 %v3441_v21, %v3320_v0  ;;  %v3626_v18 = vpack.c.bf16 %v3594_v41, %v3594_v41  ;;  %v9259_v21 = vsel %vm10956_vm7, %v3764_v48, %v3775_v49  ;;  %v2147_v0 = vand.u32 15, %v1943_v39  ;;  %vm10963_vm7 = vmmov %vm10962_vm6 }
 0x413   : > { %v3887_v31 = vsel %vm10952_vm10, %v3885_v24, %v3886_v5  ;;  %v3888_v19 = vor.u32 %v3886_v5, %v3778_v55  ;;  %4207 = vmatpush.bf16.msra.mxu0 %v6418_v37  ;;  %v6030_v24 = vunpack.i.l.s16 %v2453_v14  ;;  %v6416_v5 = vld [vmem:[%s10607_s2] sm:$0xff] }
 0x414   : > { %v3529_v3 = vmul.f32 %v8864_v43, %v3495_v53  ;;  %v3952_v47 = vsel %vm10953_vm11, 0, %v3887_v31  ;;  %v3690_v60 = vunpack.c.l.b16 %v3626_v18  ;;  %vm2359_vm14 = vcmp.eq.s32.totalorder %v2147_v0, 0  ;;  %v3166_v53 = vpop.f32.mrf.mxu2 }
 0x415   : > { %4022 = vrot.lane.b32.xlu0 %v3952_v47, %s6930_s15  ;;  %vm2570_vm13 = vcmp.ne.s32.totalorder %v6030_v24, %v7730_v62  ;;  %v9271_v31 = vrot.slane %v3778_v55, 7  ;;  %vm2391_vm10 = vmpackc.low %vm2359_vm14, %vm2359_vm14  ;;  %v1811_v47 = vsel %vm10954_vm5, %v8798_v46, %v8859_v40 }
 0x416   : > { %v3563_v45 = vadd.f32 %v8877_v50, %v3529_v3  ;;  %v3443_v15 = vpop.f32.mrf.mxu1  ;;  %vm9275_vm11 = vmpackc.low %vm8036_vm12, %vm2570_vm13  ;;  %v2423_v48 = vsel %vm2391_vm10, 65537, %v10863_v28 }
 0x417   : > { %4208 = vmatpush.bf16.msra.mxu0 %v6417_v20  ;;  %v3444_v41 = vadd.f32 %v3443_v15, %v3166_v53  ;;  %v2455_v46 = vunpack.c.l.b16 %v2423_v48  ;;  %vm10964_vm14 = vmmov %vm10962_vm6  ;;  %v10969_v15 = vld [vmem:[#allocation14_spill] sm:$0xff] }
 0x418   : > { %v3595_v25 = vmax.f32 %v3563_v45, 0.0 }
 0x419   : > { %v6032_v59 = vunpack.i.l.s16 %v2455_v46 }
 0x41a   : > { %v3627_v30 = vpack.c.bf16 %v3595_v25, %v3595_v25  ;;  %v1945_v25 = vadd.s32 240, %v7676_v10 }
 0x41b   : > { %4209 = vmatpush.bf16.msra.mxu0 %v6416_v5  ;;  %vm2577_vm10 = vcmp.ne.s32.totalorder %v6032_v59, %v7730_v62  ;;  %v6422_v59 = vld [vmem:[%s10607_s2 + $0x30] sm:$0xff] }
 0x41c   : > { %v3691_v26 = vunpack.c.l.b16 %v3627_v30  ;;  %v3783_v30 = vor.u32 %v3781_v27, %v9271_v31  ;;  %v3168_v10 = vpop.f32.mrf.mxu2  ;;  %v2161_v13 = vand.u32 15, %v1945_v25 }
 0x41e   : > { %v9221_v44 = vpack.c.b16 %v3691_v26, %v3690_v60  ;;  %v2600_v60 = vsel %vm9275_vm11, 0, %v1811_v47  ;;  %v3445_v12 = vpop.f32.mrf.mxu1  ;;  %vm9302_vm13 = vcmp.eq.s32.totalorder %v2161_v13, 0 }
 0x41f   : > { %v3446_v27 = vadd.f32 %v3445_v12, %v3168_v10 }
 0x420   : > { %v3789_v38 = vshll.u32 %v9221_v44, 16  ;;  %3978 = vrot.lane.b32.xlu0 %v9221_v44, %s6929_s27  ;;  %v3786_v16 = vshrl.u32 %v9221_v44, 16  ;;  %v2904_v5 = vpop.permute.xlu2 %2903 }
 0x422   : > { %v9232_v61 = vrot.slane %v3789_v38, 1  ;;  %v9319_v20 = vrot.slane %v3786_v16, 7 }
 0x424   : > { %v3890_v11 = vsel %vm10945_vm3, %v3888_v19, %v9232_v61  ;;  %vm10959_vm3 = vcmask 261120  }
 0x425   : > { %v3953_v54 = vsel %vm10955_vm0, 0, %v3890_v11  ;;  %v2996_v23 = vsel %vm10959_vm3, %v2600_v60, %v2902_v1  ;;  %vm10960_vm0 = vmmov %vm10954_vm5  ;;  %v3171_v1 = vpop.f32.mrf.mxu2 }
 0x426   : > { %4024 = vrot.lane.b32.xlu1 %v3953_v54, %s6930_s15  ;;  %v9292_v55 = vsel %vm10960_vm0, %v3772_v34, %v3783_v30  ;;  %v6423_v54 = vld [vmem:[%s10607_s2 + $0x38] sm:$0xff]  ;;  %vm2393_vm5 = vmpackc.low %vm9302_vm13, %vm9302_vm13  ;;  %vm10970_vm0 = vnez %v10969_v15  ;;  %v6428_v30 = vld [vmem:[%s10607_s2 + $0x60] sm:$0xff]  ;;  %vm10976_vm13 = vsmask.f32 256 }
 0x427   : > { %4480 = vmatpush.bf16.msrb.mxu3 %v6423_v54  ;;  %vm9315_vm3 = vmpackc.low %vm8036_vm12, %vm2577_vm10  ;;  %v2425_v17 = vsel %vm2393_vm5, 65537, %v10863_v28  ;;  %v3865_v53 = vsel %vm10970_vm0, 0, %v9046_v6  ;;  %v3791_v28 = vor.u32 %v3789_v38, %v9319_v20  ;;  %4358 = vmatpush.bf16.msrb.mxu2 %v6428_v30  ;;  %vm10978_vm5 = vcmask 785408  }
 0x428   : > { %v2601_v47 = vsel %vm9315_vm3, 0, %v9153_v22  ;;  %v2457_v48 = vunpack.c.l.b16 %v2425_v17  ;;  %vm10979_vm0 = vmmov %vm10978_vm5 }
 0x42a   : > { %v6034_v38 = vunpack.i.l.s16 %v2457_v48 }
 0x42b   : > { %4481 = vmatpush.bf16.msrb.mxu3 %v6422_v59  ;;  %v9401_v59 = vld [vmem:[%s10615_s10 + $0x1] ss:$0 sm:$0xff] }
 0x430   : > { %v2954_v13 = vpop.permute.xlu2 %2953 }
 0x43a   : > { %v3323_v45 = vpop.f32.mrf.mxu3 }
 0x43b   : > { %v3496_v18 = vadd.f32 %v3444_v41, %v3323_v45  ;;  %v3448_v45 = vpop.f32.mrf.mxu1 }
 0x43d   : > { %v3530_v26 = vmul.f32 %v8864_v43, %v3496_v18 }
 0x43e   : > { %v2950_v40 = vpop.permute.xlu0 %2949 }
 0x43f   : > { %v3031_v8 = vsel %vm10961_vm4, %v2996_v23, %v2950_v40  ;;  %v3564_v19 = vadd.f32 %v8877_v50, %v3530_v26  ;;  %vm10971_vm4 = vcmask 261120   ;;  %v10972_v26 = vld [vmem:[#allocation15_spill] sm:$0xff] }
 0x440   : > { %6105 = vmatmul.msk.bf16.gmra.mxu2 %vm10962_vm6, %v3031_v8  ;;  %6169 = vmatmul.msk.bf16.gmra.mxu3 %vm10963_vm7, %v3031_v8  ;;  %v2999_v6 = vsel %vm10971_vm4, %v2601_v47, %v2904_v5  ;;  %vm10973_vm6 = vnez %v10972_v26  ;;  %vm10974_vm7 = vmmov %vm10971_vm4  ;;  %v9394_v26 = vld [vmem:[%s10615_s10] ss:$0 sm:$0xff] }
 0x441   : > { %6209 = vmatmul.msk.bf16.gmra.mxu1 %vm10964_vm14, %v3031_v8  ;;  %v3596_v34 = vmax.f32 %v3564_v19, 0.0  ;;  %v3930_v23 = vsel %vm10973_vm6, 0, %v3865_v53  ;;  %vm10975_vm14 = vcmask 523264   ;;  %v9343_v8 = vsel %vm10976_vm13, %v9271_v31, %v3791_v28  ;;  %vm10980_vm4 = vmmov %vm10979_vm0 }
 0x442   : > { %v3325_v56 = vpop.f32.mrf.mxu3  ;;  %vm10977_vm10 = vmmov %vm10975_vm14  ;;  %v3449_v31 = vadd.f32 %v3448_v45, %v3171_v1 }
 0x443   : > { %v3497_v11 = vadd.f32 %v3446_v27, %v3325_v56  ;;  %v3628_v0 = vpack.c.bf16 %v3596_v34, %v3596_v34  ;;  %vm10981_vm6 = vmmov %vm10979_vm0  ;;  %v3891_v27 = vor.u32 %v9232_v61, %v3786_v16  ;;  %v3450_v32 = vpop.f32.mrf.mxu1  ;;  %v10983_v34 = vld [vmem:[#allocation21_spill] sm:$0xff]  ;;  %v3173_v16 = vpop.f32.mrf.mxu2 }
 0x444   : > { %vm10984_vm13 = vnez %v10983_v34 }
 0x445   : > { %v3531_v37 = vmul.f32 %v8864_v43, %v3497_v11  ;;  %v3692_v18 = vunpack.c.l.b16 %v3628_v0 }
 0x446   : > { %v2906_v52 = vpop.permute.xlu0 %2905  ;;  %v2952_v49 = vpop.permute.xlu1 %2951 }
 0x447   : > { %v3565_v39 = vadd.f32 %v8877_v50, %v3531_v37  ;;  %v3033_v46 = vsel %vm10975_vm14, %v2999_v6, %v2952_v49  ;;  %vm10982_vm14 = vsmask.f32 7424 }
 0x449   : > { %v3597_v24 = vmax.f32 %v3565_v39, 0.0 }
 0x44b   : > { %v3629_v41 = vpack.c.bf16 %v3597_v24, %v3597_v24  ;;  %v3965_v24 = vpop.permute.xlu2 %3964 }
 0x44d   : > { %v3693_v25 = vunpack.c.l.b16 %v3629_v41  ;;  %v10988_v41 = vld [vmem:[#allocation17_spill] sm:$0xff] }
 0x44e   : > { %v3963_v60 = vpop.permute.xlu1 %3962  ;;  %v4011_v22 = vpop.permute.xlu0 %4010 }
 0x44f   : > { %v4044_v12 = vsel %vm10974_vm7, %v3930_v23, %v3963_v60  ;;  %v9339_v40 = vpack.c.b16 %v3693_v25, %v3692_v18  ;;  %vm2584_vm7 = vcmp.ne.s32.totalorder %v6034_v38, %v7730_v62  ;;  %v3451_v62 = vadd.f32 %v3450_v32, %v3173_v16  ;;  %v3453_v47 = vpop.f32.mrf.mxu1  ;;  %v3176_v18 = vpop.f32.mrf.mxu2 }
 0x450   : > { %v9346_v44 = vsel %vm10977_vm10, %v4044_v12, %v4011_v22  ;;  %6106 = vmatmul.msk.bf16.gmra.mxu2 %vm10978_vm5, %v3033_v46  ;;  %6170 = vmatmul.msk.bf16.gmra.mxu3 %vm10979_vm0, %v3033_v46  ;;  %vm9370_vm10 = vmpackc.low %vm8036_vm12, %vm2584_vm7  ;;  %vm10987_vm5 = vcmask 261120   ;;  %vm10989_vm0 = vnez %v10988_v41 }
 0x451   : > { %6210 = vmatmul.msk.bf16.gmra.mxu1 %vm10980_vm4, %v3033_v46  ;;  %6236 = vmatmul.msk.bf16.vlgmr.msra.gmra.mxu0 %vm10981_vm6, %v9346_v44  ;;  %v3797_v10 = vshll.u32 %v9339_v40, 16  ;;  %v2602_v39 = vsel %vm9370_vm10, 0, %v9169_v36  ;;  %v3931_v57 = vsel %vm10989_vm0, 0, %v9084_v33  ;;  %vm10990_vm12 = vmmov %vm10987_vm5  ;;  %vm10991_vm4 = vcmask 523264  }
 0x452   : > { %3980 = vrot.lane.b32.xlu1 %v9339_v40, %s6929_s27  ;;  %v3002_v5 = vsel %vm10987_vm5, %v2602_v39, %v2906_v52  ;;  %v4047_v45 = vsel %vm10990_vm12, %v3931_v57, %v3965_v24  ;;  %vm10992_vm7 = vmmov %vm10981_vm6  ;;  %v3454_v33 = vadd.f32 %v3453_v47, %v3176_v18 }
 0x453   : > { %v3892_v19 = vrot.slane %v3797_v10, 1  ;;  %v3035_v36 = vsel %vm10991_vm4, %v3002_v5, %v2954_v13  ;;  %vm10995_vm5 = vmmov %vm10981_vm6  ;;  %v4015_v39 = vpop.permute.xlu2 %4014 }
 0x454   : > { %v3328_v56 = vpop.f32.mrf.mxu3 }
 0x455   : > { %v3498_v11 = vadd.f32 %v3449_v31, %v3328_v56  ;;  %v3893_v54 = vsel %vm10982_vm14, %v3891_v27, %v3892_v19  ;;  %vm10993_vm14 = vmmov %vm10991_vm4  ;;  %v3794_v31 = vshrl.u32 %v9339_v40, 16  ;;  %vm10998_vm4 = vsmask.f32 7424 }
 0x456   : > { %v3954_v37 = vsel %vm10984_vm13, 0, %v3893_v54  ;;  %v4013_v15 = vpop.permute.xlu1 %4012  ;;  %vm10994_vm13 = vmmov %vm10981_vm6  ;;  %v3967_v13 = vpop.permute.xlu0 %3966  ;;  %v10996_v54 = vld [vmem:[#allocation13_spill] sm:$0xff] }
 0x457   : > { %v3532_v61 = vmul.f32 %v8864_v43, %v3498_v11  ;;  %4026 = vrot.lane.b32.xlu2 %v3954_v37, %s6930_s15  ;;  %v4093_v52 = vsel %vm10993_vm14, %v4047_v45, %v4013_v15  ;;  %v3178_v38 = vpop.f32.mrf.mxu2  ;;  %vm10997_vm0 = vnez %v10996_v54  ;;  %v3894_v16 = vor.u32 %v3892_v19, %v3794_v31  ;;  %v11019_v54 = vld [vmem:[#allocation20_spill] sm:$0xff] }
 0x458   : > { %v3932_v32 = vsel %vm10997_vm0, 0, %v9130_v4 }
 0x459   : > { %v3566_v0 = vadd.f32 %v8877_v50, %v3532_v61  ;;  %v4050_v37 = vsel %vm10990_vm12, %v3932_v32, %v3967_v13 }
 0x45b   : > { %v3598_v1 = vmax.f32 %v3566_v0, 0.0  ;;  %v3971_v40 = vpop.permute.xlu2 %3970 }
 0x45c   : > { %v3330_v17 = vpop.f32.mrf.mxu3 }
 0x45d   : > { %v3499_v53 = vadd.f32 %v3451_v62, %v3330_v17  ;;  %v3630_v30 = vpack.c.bf16 %v3598_v1, %v3598_v1  ;;  %v11001_v17 = vld [vmem:[#allocation23_spill] sm:$0xff] }
 0x45e   : > { %vm11002_vm14 = vnez %v11001_v17 }
 0x45f   : > { %v3533_v48 = vmul.f32 %v8864_v43, %v3499_v53  ;;  %v3694_v22 = vunpack.c.l.b16 %v3630_v30  ;;  %v4017_v30 = vpop.permute.xlu0 %4016  ;;  %v3181_v32 = vpop.f32.mrf.mxu2 }
 0x460   : > { %6107 = vmatmul.msk.bf16.gmra.mxu2 %vm10981_vm6, %v3035_v36  ;;  %6171 = vmatmul.msk.bf16.gmra.mxu3 %vm10992_vm7, %v3035_v36  ;;  %vm10999_vm6 = vmmov %vm10995_vm5 }
 0x461   : > { %v3567_v25 = vadd.f32 %v8877_v50, %v3533_v48  ;;  %6211 = vmatmul.msk.bf16.gmra.mxu1 %vm10994_vm13, %v3035_v36  ;;  %6237 = vmatmul.msk.bf16.gmra.mxu0 %vm10995_vm5, %v4093_v52  ;;  %v3455_v50 = vpop.f32.mrf.mxu1  ;;  %vm11000_vm7 = vmmov %vm10995_vm5  ;;  %vm11003_vm13 = vcmask 523264   ;;  %v3796_v48 = vrot.slane %v3794_v31, 7  ;;  %v3969_v36 = vpop.permute.xlu1 %3968 }
 0x462   : > { %v3456_v27 = vadd.f32 %v3455_v50, %v3178_v38  ;;  %v4095_v15 = vsel %vm11003_vm13, %v4050_v37, %v4015_v39 }
 0x463   : > { %v3599_v28 = vmax.f32 %v3567_v25, 0.0  ;;  %v11004_v25 = vld [vmem:[#allocation18_spill] sm:$0xff]  ;;  %v4021_v37 = vpop.permute.xlu2 %4020 }
 0x464   : > { %v3333_v6 = vpop.f32.mrf.mxu3  ;;  %vm11005_vm0 = vnez %v11004_v25 }
 0x465   : > { %v3500_v43 = vadd.f32 %v3454_v33, %v3333_v6  ;;  %v3631_v60 = vpack.c.bf16 %v3599_v28, %v3599_v28  ;;  %v3933_v33 = vsel %vm11005_vm0, 0, %v9172_v29 }
 0x466   : > { %v4053_v28 = vsel %vm10990_vm12, %v3933_v33, %v3969_v36 }
 0x467   : > { %v3534_v23 = vmul.f32 %v9394_v26, %v3500_v43  ;;  %v3695_v12 = vunpack.c.l.b16 %v3631_v60  ;;  %v3799_v60 = vor.u32 %v3797_v10, %v3796_v48  ;;  %v4097_v50 = vsel %vm11003_vm13, %v4053_v28, %v4017_v30 }
 0x469   : > { %v3716_v46 = vpack.c.b16 %v3695_v12, %v3694_v22  ;;  %v3568_v56 = vadd.f32 %v9401_v59, %v3534_v23  ;;  %v11008_v22 = vld [vmem:[#allocation24_spill] sm:$0xff]  ;;  %v4019_v10 = vpop.permute.xlu1 %4018 }
 0x46b   : > { %v3805_v11 = vshll.u32 %v3716_v46, 16  ;;  %3982 = vrot.lane.b32.xlu2 %v3716_v46, %s6929_s27  ;;  %v3600_v0 = vmax.f32 %v3568_v56, 0.0 }
 0x46c   : > { %v3335_v34 = vpop.f32.mrf.mxu3 }
 0x46d   : > { %v3501_v61 = vadd.f32 %v3456_v27, %v3335_v34  ;;  %v3895_v62 = vrot.slane %v3805_v11, 1  ;;  %v3632_v53 = vpack.c.bf16 %v3600_v0, %v3600_v0  ;;  %v3973_v27 = vpop.permute.xlu0 %3972 }
 0x46f   : > { %v3535_v24 = vmul.f32 %v9394_v26, %v3501_v61  ;;  %v3896_v5 = vsel %vm10998_vm4, %v3894_v16, %v3895_v62  ;;  %v3696_v47 = vunpack.c.l.b16 %v3632_v53 }
 0x470   : > { %6300 = vmatmul.msk.bf16.vlgmr.msrb.gmra.mxu2 %vm10999_vm6, %v9346_v44  ;;  %6340 = vmatmul.msk.bf16.vlgmr.msrb.gmra.mxu3 %vm11000_vm7, %v9346_v44  ;;  %v3955_v4 = vsel %vm11002_vm14, 0, %v3896_v5  ;;  %v3802_v44 = vshrl.u32 %v3716_v46, 16  ;;  %vm11006_vm6 = vmmov %vm10995_vm5  ;;  %vm11009_vm14 = vnez %v11008_v22  ;;  %v11012_v46 = vld [vmem:[#allocation19_spill] sm:$0xff] }
 0x471   : > { %v3569_v19 = vadd.f32 %v9401_v59, %v3535_v24  ;;  %4028 = vrot.lane.b32.xlu0 %v3955_v4, %s6930_s15  ;;  %6238 = vmatmul.msk.bf16.gmra.mxu0 %vm10995_vm5, %v4095_v15  ;;  %vm11007_vm7 = vmmov %vm10995_vm5  ;;  %vm11010_vm5 = vsmask.f32 256  ;;  %vm11013_vm12 = vnez %v11012_v46  ;;  %v3458_v24 = vpop.f32.mrf.mxu1  ;;  %v3975_v5 = vpop.permute.xlu1 %3974  ;;  %v11027_v4 = vld [vmem:[#allocation16_spill] sm:$0xff] }
 0x472   : > { %v3897_v6 = vor.u32 %v3895_v62, %v3802_v44  ;;  %v9436_v29 = vsel %vm11010_vm5, %v9319_v20, %v3799_v60  ;;  %vm11011_vm0 = vmmov %vm11006_vm6  ;;  %v3934_v38 = vsel %vm11013_vm12, 0, %v9200_v7  ;;  %v3804_v20 = vrot.slane %v3802_v44, 7  ;;  %v3183_v62 = vpop.f32.mrf.mxu2 }
 0x473   : > { %v3601_v41 = vmax.f32 %v3569_v19, 0.0  ;;  %v3459_v25 = vadd.f32 %v3458_v24, %v3181_v32 }
 0x474   : > { %v3807_v31 = vor.u32 %v3805_v11, %v3804_v20 }
 0x475   : > { %v3633_v57 = vpack.c.bf16 %v3601_v41, %v3601_v41 }
 0x476   : > { %v9449_v56 = vsel %vm11010_vm5, %v3796_v48, %v3807_v31  ;;  %v11033_v48 = vld [vmem:[#allocation22_spill] sm:$0xff] }
 0x477   : > { %v3697_v45 = vunpack.c.l.b16 %v3633_v57 }
 0x479   : > { %v3717_v1 = vpack.c.b16 %v3697_v45, %v3696_v47  ;;  %v3460_v57 = vpop.f32.mrf.mxu1  ;;  %v3977_v45 = vpop.permute.xlu2 %3976 }
 0x47a   : > { %v3186_v41 = vpop.f32.mrf.mxu2  ;;  %v3461_v60 = vadd.f32 %v3460_v57, %v3183_v62 }
 0x47b   : > { %v3813_v18 = vshll.u32 %v3717_v1, 16  ;;  %3984 = vrot.lane.b32.xlu0 %v3717_v1, %s6929_s27  ;;  %v3810_v61 = vshrl.u32 %v3717_v1, 16 }
 0x47d   : > { %v3898_v43 = vrot.slane %v3813_v18, 1  ;;  %v9459_v11 = vrot.slane %v3810_v61, 7 }
 0x47f   : > { %v3899_v23 = vsel %vm10998_vm4, %v3897_v6, %v3898_v43  ;;  %vm11014_vm4 = vcmask 261120   ;;  %v9461_v39 = vor.u32 %v3898_v43, %v3810_v61 }
 0x480   : > { %6301 = vmatmul.msk.bf16.gmra.mxu2 %vm11006_vm6, %v4093_v52  ;;  %6341 = vmatmul.msk.bf16.gmra.mxu3 %vm11007_vm7, %v4093_v52  ;;  %v3956_v12 = vsel %vm11009_vm14, 0, %v3899_v23  ;;  %v4056_v52 = vsel %vm11014_vm4, %v3934_v38, %v3971_v40  ;;  %vm11015_vm6 = vmmov %vm11003_vm13 }
 0x481   : > { %4030 = vrot.lane.b32.xlu1 %v3956_v12, %s6930_s15  ;;  %6239 = vmatmul.msk.bf16.gmra.mxu0 %vm11011_vm0, %v4097_v50  ;;  %v4099_v13 = vsel %vm11015_vm6, %v4056_v52, %v4019_v10  ;;  %vm11016_vm7 = vmmov %vm11011_vm0  ;;  %v11040_v10 = vld [vmem:[#allocation26_spill] sm:$0xff] }
 0x482   : > { %vm11017_vm14 = vmmov %vm11011_vm0  ;;  %v3188_v47 = vpop.f32.mrf.mxu2 }
 0x483   : > { %vm11018_vm13 = vmmov %vm11011_vm0  ;;  %vm11020_vm0 = vnez %v11019_v54 }
 0x484   : > { %v3935_v7 = vsel %vm11020_vm0, 0, %v9224_v2  ;;  %vm11021_vm12 = vmmov %vm11014_vm4  ;;  %v3815_v2 = vor.u32 %v3813_v18, %v9459_v11 }
 0x485   : > { %v4059_v34 = vsel %vm11021_vm12, %v3935_v7, %v3973_v27  ;;  %vm11022_vm4 = vmmov %vm11016_vm7 }
 0x486   : > { %vm11023_vm6 = vmmov %vm11022_vm4 }
 0x487   : > { %v4023_v17 = vpop.permute.xlu0 %4022  ;;  %vm11029_vm0 = vmmov %vm11021_vm12 }
 0x490   : > { %6302 = vmatmul.msk.bf16.gmra.mxu2 %vm11016_vm7, %v4095_v15  ;;  %6342 = vmatmul.msk.bf16.gmra.mxu3 %vm11017_vm14, %v4095_v15  ;;  %vm11024_vm7 = vcmask 523264   ;;  %vm11025_vm14 = vmmov %vm11022_vm4 }
 0x491   : > { %6240 = vmatmul.msk.bf16.gmra.mxu0 %vm11018_vm13, %v4099_v13  ;;  %v4101_v16 = vsel %vm11024_vm7, %v4059_v34, %v4021_v37  ;;  %vm11026_vm13 = vmmov %vm11010_vm5  ;;  %vm11028_vm5 = vnez %v11027_v4 }
 0x492   : > { %v9465_v0 = vsel %vm11026_vm13, %v3804_v20, %v3815_v2  ;;  %v3936_v15 = vsel %vm11028_vm5, 0, %v9259_v21  ;;  %vm11030_vm12 = vmmov %vm11024_vm7  ;;  %v3979_v12 = vpop.permute.xlu0 %3978 }
 0x493   : > { %v4062_v19 = vsel %vm11029_vm0, %v3936_v15, %v3975_v5  ;;  %vm11032_vm7 = vmmov %vm11022_vm4 }
 0x494   : > { %v4103_v53 = vsel %vm11030_vm12, %v4062_v19, %v4023_v17  ;;  %vm11035_vm13 = vmmov %vm11029_vm0 }
 0x495   : > { %vm11036_vm5 = vmmov %vm11030_vm12 }
 0x496   : > { %vm11037_vm0 = vmmov %vm11022_vm4 }
 0x497   : > { %vm11038_vm12 = vmmov %vm11037_vm0 }
 0x498   : > { %v4025_v1 = vpop.permute.xlu1 %4024 }
 0x4a0   : > { %6303 = vmatmul.msk.bf16.gmra.mxu2 %vm11022_vm4, %v4097_v50  ;;  %6343 = vmatmul.msk.bf16.gmra.mxu3 %vm11023_vm6, %v4097_v50  ;;  %vm11031_vm6 = vmmov %vm11022_vm4 }
 0x4a1   : > { %6241 = vmatmul.msk.bf16.gmra.mxu0 %vm11025_vm14, %v4101_v16  ;;  %vm11034_vm14 = vnez %v11033_v48 }
 0x4a2   : > { %v3937_v36 = vsel %vm11034_vm14, 0, %v9292_v55  ;;  %vm11043_vm14 = vmmov %vm11036_vm5 }
 0x4a3   : > { %v4065_v44 = vsel %vm11035_vm13, %v3937_v36, %v3977_v45 }
 0x4a4   : > { %v4105_v18 = vsel %vm11036_vm5, %v4065_v44, %v4025_v1  ;;  %vm11045_vm5 = vmmov %vm11037_vm0 }
 0x4b0   : > { %6304 = vmatmul.msk.bf16.gmra.mxu2 %vm11022_vm4, %v4099_v13  ;;  %6344 = vmatmul.msk.bf16.gmra.mxu3 %vm11031_vm6, %v4099_v13  ;;  %vm11039_vm4 = vmmov %vm11037_vm0  ;;  %vm11041_vm6 = vnez %v11040_v10 }
 0x4b1   : > { %6242 = vmatmul.msk.bf16.gmra.mxu0 %vm11032_vm7, %v4103_v53  ;;  %v4027_v40 = vpop.permute.xlu2 %4026  ;;  %v3938_v46 = vsel %vm11041_vm6, 0, %v9343_v8  ;;  %vm11042_vm7 = vmmov %vm11035_vm13 }
 0x4b2   : > { %v4068_v20 = vsel %vm11042_vm7, %v3938_v46, %v3979_v12  ;;  %vm11044_vm13 = vmmov %vm11037_vm0 }
 0x4b3   : > { %v9493_v31 = vsel %vm11043_vm14, %v4068_v20, %v4027_v40  ;;  %vm11049_vm6 = vmmov %vm11037_vm0  ;;  %vm11052_vm14 = vcmask 261120  }
 0x4b4   : > { %vm11050_vm7 = vmmov %vm11037_vm0 }
 0x4be   : > { %v3463_v21 = vpop.f32.mrf.mxu1 }
 0x4bf   : > { %v3464_v54 = vadd.f32 %v3463_v21, %v3186_v41  ;;  %v11047_v21 = vld [vmem:[#allocation25_spill] sm:$0xff] }
 0x4c0   : > { %6305 = vmatmul.msk.bf16.gmra.mxu2 %vm11037_vm0, %v4101_v16  ;;  %6345 = vmatmul.msk.bf16.gmra.mxu3 %vm11038_vm12, %v4101_v16  ;;  %vm11046_vm12 = vsmask.f32 7424 }
 0x4c1   : > { %6243 = vmatmul.msk.bf16.gmra.mxu0 %vm11039_vm4, %v4105_v18  ;;  %vm11048_vm4 = vnez %v11047_v21 }
 0x4c3   : > { %v3191_v33 = vpop.f32.mrf.mxu2  ;;  %v3338_v30 = vpop.f32.mrf.mxu3 }
 0x4c4   : > { %v3502_v28 = vadd.f32 %v3459_v25, %v3338_v30  ;;  %v3981_v30 = vpop.permute.xlu1 %3980 }
 0x4c6   : > { %v3536_v6 = vmul.f32 %v9394_v26, %v3502_v28  ;;  %v3465_v43 = vpop.f32.mrf.mxu1 }
 0x4c7   : > { %v3466_v17 = vadd.f32 %v3465_v43, %v3188_v47 }
 0x4c8   : > { %v3570_v55 = vadd.f32 %v9401_v59, %v3536_v6 }
 0x4ca   : > { %v3602_v38 = vmax.f32 %v3570_v55, 0.0  ;;  %v3939_v55 = vsel %vm8815_vm15, 0, %v9436_v29  ;;  %vm11055_vm15 = vmmov %vm11046_vm12 }
 0x4cb   : > { %v9485_v23 = vpop.f32.mrf.mxu2  ;;  %v3340_v22 = vpop.f32.mrf.mxu3 }
 0x4cc   : > { %v3503_v50 = vadd.f32 %v3461_v60, %v3340_v22  ;;  %v3634_v8 = vpack.c.bf16 %v3602_v38, %v3602_v38 }
 0x4ce   : > { %v3537_v52 = vmul.f32 %v9394_v26, %v3503_v50  ;;  %v3468_v13 = vpop.f32.mrf.mxu1  ;;  %v3698_v2 = vunpack.c.l.b16 %v3634_v8  ;;  %v4071_v50 = vsel %vm11052_vm14, %v3939_v55, %v3981_v30  ;;  %v11060_v30 = vld [vmem:[#allocation29_spill] sm:$0xff] }
 0x4cf   : > { %v3469_v6 = vadd.f32 %v3468_v13, %v3191_v33 }
 0x4d0   : > { %v3571_v27 = vadd.f32 %v9401_v59, %v3537_v52  ;;  %6306 = vmatmul.msk.bf16.gmra.mxu2 %vm11044_vm13, %v4103_v53  ;;  %6346 = vmatmul.msk.bf16.gmra.mxu3 %vm11045_vm5, %v4103_v53  ;;  %vm11053_vm13 = vcmask 523264   ;;  %vm11054_vm5 = vmmov %vm11037_vm0 }
 0x4d1   : > { %6244 = vmatmul.msk.bf16.gmra.mxu0 %vm11037_vm0, %v9493_v31 }
 0x4d2   : > { %v3603_v7 = vmax.f32 %v3571_v27, 0.0 }
 0x4d3   : > { %v3196_v32 = vpop.f32.mrf.mxu2  ;;  %v3343_v34 = vpop.f32.mrf.mxu3 }
 0x4d4   : > { %v3504_v37 = vadd.f32 %v3464_v54, %v3343_v34  ;;  %v3635_v61 = vpack.c.bf16 %v3603_v7, %v3603_v7 }
 0x4d6   : > { %v3538_v16 = vmul.f32 %v9394_v26, %v3504_v37  ;;  %v3470_v62 = vpop.f32.mrf.mxu1  ;;  %v3699_v24 = vunpack.c.l.b16 %v3635_v61 }
 0x4d7   : > { %v3471_v7 = vadd.f32 %v3470_v62, %v9485_v23 }
 0x4d8   : > { %v9501_v5 = vpack.c.b16 %v3699_v24, %v3698_v2  ;;  %v3572_v4 = vadd.f32 %v9401_v59, %v3538_v16 }
 0x4da   : > { %v3821_v15 = vshll.u32 %v9501_v5, 16  ;;  %3986 = vrot.lane.b32.xlu1 %v9501_v5, %s6929_s27  ;;  %v3604_v45 = vmax.f32 %v3572_v4, 0.0 }
 0x4db   : > { %v3198_v19 = vpop.f32.mrf.mxu2  ;;  %v3345_v53 = vpop.f32.mrf.mxu3 }
 0x4dc   : > { %v3505_v41 = vadd.f32 %v3466_v17, %v3345_v53  ;;  %v3901_v57 = vrot.slane %v3821_v15, 1  ;;  %v3636_v43 = vpack.c.bf16 %v3604_v45, %v3604_v45 }
 0x4de   : > { %v3539_v1 = vmul.f32 %v9394_v26, %v3505_v41  ;;  %v3473_v48 = vpop.f32.mrf.mxu1  ;;  %v3902_v47 = vsel %vm11046_vm12, %v9461_v39, %v3901_v57  ;;  %v3700_v13 = vunpack.c.l.b16 %v3636_v43  ;;  %vm11058_vm12 = vmmov %vm11054_vm5 }
 0x4df   : > { %v3474_v36 = vadd.f32 %v3473_v48, %v3196_v32  ;;  %v3957_v44 = vsel %vm11048_vm4, 0, %v3902_v47  ;;  %v3818_v32 = vshrl.u32 %v9501_v5, 16  ;;  %v11056_v48 = vld [vmem:[#allocation27_spill] sm:$0xff]  ;;  %vm11059_vm4 = vmmov %vm11054_vm5 }
 0x4e0   : > { %v3573_v25 = vadd.f32 %v9401_v59, %v3539_v1  ;;  %4032 = vrot.lane.b32.xlu2 %v3957_v44, %s6930_s15  ;;  %6307 = vmatmul.msk.bf16.gmra.mxu2 %vm11049_vm6, %v4105_v18  ;;  %vm11057_vm0 = vnez %v11056_v48  ;;  %vm11061_vm6 = vnez %v11060_v30  ;;  %v9610_v48 = vld [vmem:[%s10615_s10 + $0x2] ss:$0 sm:$0xff] }
 0x4e1   : > { %v3542_v28 = vmul.f32 %v9394_v26, %v3474_v36  ;;  %6347 = vmatmul.msk.bf16.gmra.mxu3 %vm11050_vm7, %v4105_v18  ;;  %v3903_v17 = vor.u32 %v3901_v57, %v3818_v32  ;;  %v3983_v57 = vpop.permute.xlu2 %3982  ;;  %vm11062_vm7 = vmmov %vm11052_vm14 }
 0x4e2   : > { %v3605_v60 = vmax.f32 %v3573_v25, 0.0  ;;  %vm11063_vm14 = vmmov %vm11053_vm13 }
 0x4e3   : > { %v3201_v22 = vpop.f32.mrf.mxu2  ;;  %v3348_v12 = vpop.f32.mrf.mxu3  ;;  %v3576_v38 = vadd.f32 %v9401_v59, %v3542_v28  ;;  %v3940_v28 = vsel %vm11061_vm6, 0, %v9449_v56 }
 0x4e4   : > { %v3506_v40 = vadd.f32 %v3469_v6, %v3348_v12  ;;  %v4029_v10 = vpop.permute.xlu0 %4028  ;;  %v3637_v46 = vpack.c.bf16 %v3605_v60, %v3605_v60  ;;  %v4074_v60 = vsel %vm11062_vm7, %v3940_v28, %v3983_v57 }
 0x4e5   : > { %v9525_v52 = vsel %vm11053_vm13, %v4071_v50, %v4029_v10  ;;  %v3608_v54 = vmax.f32 %v3576_v38, 0.0  ;;  %vm11064_vm13 = vmmov %vm11059_vm4 }
 0x4e6   : > { %v3540_v18 = vmul.f32 %v9394_v26, %v3506_v40  ;;  %v3475_v33 = vpop.f32.mrf.mxu1  ;;  %6245 = vmatmul.msk.bf16.gmra.mxu0 %vm11054_vm5, %v9525_v52  ;;  %v3701_v29 = vunpack.c.l.b16 %v3637_v46  ;;  %vm11065_vm5 = vmmov %vm11055_vm15 }
 0x4e7   : > { %v3476_v20 = vadd.f32 %v3475_v33, %v3198_v19  ;;  %v3640_v62 = vpack.c.bf16 %v3608_v54, %v3608_v54  ;;  %v9544_v19 = vpop.f32.mrf.mxu0 }
 0x4e8   : > { %v9530_v27 = vpack.c.b16 %v3701_v29, %v3700_v13  ;;  %v3574_v34 = vadd.f32 %v9401_v59, %v3540_v18 }
 0x4e9   : > { %v3543_v8 = vmul.f32 %v9394_v26, %v3476_v20  ;;  %v3704_v21 = vunpack.c.l.b16 %v3640_v62  ;;  %v3820_v62 = vrot.slane %v3818_v32, 7 }
 0x4ea   : > { %v3829_v37 = vshll.u32 %v9530_v27, 16  ;;  %3988 = vrot.lane.b32.xlu2 %v9530_v27, %s6929_s27  ;;  %v3606_v53 = vmax.f32 %v3574_v34, 0.0  ;;  %v3826_v38 = vshrl.u32 %v9530_v27, 16 }
 0x4eb   : > { %v3577_v61 = vadd.f32 %v9401_v59, %v3543_v8  ;;  %v3202_v16 = vpop.f32.mrf.mxu2  ;;  %v3350_v2 = vpop.f32.mrf.mxu3 }
 0x4ec   : > { %v3507_v24 = vadd.f32 %v3471_v7, %v3350_v2  ;;  %v3904_v23 = vrot.slane %v3829_v37, 1 }
 0x4ed   : > { %v3609_v4 = vmax.f32 %v3577_v61, 0.0 }
 0x4ee   : > { %v3541_v41 = vmul.f32 %v9394_v26, %v3507_v24  ;;  %v3905_v45 = vsel %vm11055_vm15, %v3903_v17, %v3904_v23  ;;  %v3638_v26 = vpack.c.bf16 %v3606_v53, %v3606_v53  ;;  %v3906_v54 = vor.u32 %v3904_v23, %v3826_v38 }
 0x4ef   : > { %v3641_v1 = vpack.c.bf16 %v3609_v4, %v3609_v4  ;;  %v3958_v47 = vsel %vm11057_vm0, 0, %v3905_v45  ;;  %v4213_v56 = vpop.f32.mrf.mxu0  ;;  %vm11066_vm15 = vnez %v10916_v58  ;;  %vm11067_vm0 = vmmov %vm11059_vm4  ;;  %v3823_v4 = vor.u32 %v3821_v15, %v3820_v62 }
 0x4f0   : > { %v3575_v36 = vadd.f32 %v9401_v59, %v3541_v41  ;;  %4034 = vrot.lane.b32.xlu0 %v3958_v47, %s6930_s15  ;;  %6308 = vmatmul.msk.bf16.gmra.mxu2 %vm11058_vm12, %v9493_v31  ;;  %vm11068_vm12 = vmmov %vm11065_vm5  ;;  %v3828_v41 = vrot.slane %v3826_v38, 7 }
 0x4f1   : > { %v3705_v44 = vunpack.c.l.b16 %v3641_v1  ;;  %6348 = vmatmul.msk.bf16.gmra.mxu3 %vm11059_vm4, %v9493_v31  ;;  %v3702_v31 = vunpack.c.l.b16 %v3638_v26  ;;  %vm11069_vm4 = vmmov %vm11067_vm0 }
 0x4f2   : > { %v3607_v25 = vmax.f32 %v3575_v36, 0.0  ;;  %v3831_v47 = vor.u32 %v3829_v37, %v3828_v41 }
 0x4f3   : > { %v9559_v6 = vpack.c.b16 %v3705_v44, %v3704_v21  ;;  %v4360_v59 = vpop.f32.mrf.mxu2  ;;  %v4483_v43 = vpop.f32.mrf.mxu3 }
 0x4f4   : > { %v4031_v39 = vpop.permute.xlu1 %4030  ;;  %v3639_v55 = vpack.c.bf16 %v3607_v25, %v3607_v25 }
 0x4f5   : > { %v4111_v22 = vsel %vm11063_vm14, %v4074_v60, %v4031_v39  ;;  %v3845_v12 = vshll.u32 %v9559_v6, 16  ;;  %v3842_v46 = vshrl.u32 %v9559_v6, 16 }
 0x4f6   : > { %6246 = vmatmul.msk.bf16.gmra.mxu0 %vm11064_vm13, %v4111_v22  ;;  %v3703_v50 = vunpack.c.l.b16 %v3639_v55  ;;  %vm11076_vm13 = vcmask 261120  }
 0x4f7   : > { %v3910_v40 = vrot.slane %v3845_v12, 1  ;;  %v4216_v17 = vpop.f32.mrf.mxu0  ;;  %v3844_v30 = vrot.slane %v3842_v46, 7 }
 0x4f8   : > { %v9567_v10 = vpack.c.b16 %v3703_v50, %v3702_v31  ;;  %v9635_v31 = vld [vmem:[%s10615_s10 + $0x5] ss:$0 sm:$0xff] }
 0x4f9   : > { %v3912_v33 = vor.u32 %v3910_v40, %v3842_v46  ;;  %v3847_v39 = vor.u32 %v3845_v12, %v3844_v30 }
 0x4fa   : > { %v3837_v18 = vshll.u32 %v9567_v10, 16  ;;  %3990 = vrot.lane.b32.xlu0 %v9567_v10, %s6929_s27  ;;  %v3834_v20 = vshrl.u32 %v9567_v10, 16 }
 0x4fb   : > { %v4361_v13 = vpop.f32.mrf.mxu2  ;;  %v4485_v29 = vpop.f32.mrf.mxu3  ;;  %v3929_v61 = vsel %vm9008_vm8, %v3912_v33, 0  ;;  %vm11070_vm8 = vsmask.f32 256 }
 0x4fc   : > { %v3907_v8 = vrot.slane %v3837_v18, 1  ;;  %v3961_v42 = vsel %vm9022_vm1, 0, %v3929_v61  ;;  %v9602_v9 = vsel %vm11070_vm8, %v9459_v11, %v3823_v4  ;;  %vm11072_vm1 = vmmov %vm11067_vm0  ;;  %v3836_v50 = vrot.slane %v3834_v20, 7 }
 0x4fd   : > { %vm11073_vm6 = vmmov %vm11070_vm8 }
 0x4fe   : > { %v3908_v7 = vsel %vm11065_vm5, %v3906_v54, %v3907_v8  ;;  %v3909_v34 = vor.u32 %v3907_v8, %v3834_v20  ;;  %v9615_v36 = vsel %vm11073_vm6, %v3820_v62, %v3831_v47  ;;  %v3839_v54 = vor.u32 %v3837_v18, %v3836_v50  ;;  %vm11074_vm7 = vmmov %vm11073_vm6 }
 0x4ff   : > { %v3959_v16 = vsel %vm11066_vm15, 0, %v3908_v7  ;;  %v4218_v53 = vpop.f32.mrf.mxu0  ;;  %v9648_v20 = vsel %vm11074_vm7, %v3836_v50, %v3847_v39  ;;  %vm11075_vm14 = vmmov %vm11073_vm6  ;;  %vm11085_vm6 = vcmask 785408  }
 0x500   : > { %4036 = vrot.lane.b32.xlu1 %v3959_v16, %s6930_s15  ;;  %6309 = vmatmul.msk.bf16.gmra.mxu2 %vm11067_vm0, %v9525_v52  ;;  %v3911_v2 = vsel %vm11068_vm12, %v3909_v34, %v3910_v40  ;;  %v9654_v34 = vsel %vm11075_vm14, %v3828_v41, %v3839_v54  ;;  %vm11077_vm5 = vmmov %vm11076_vm13 }
 0x501   : > { %6349 = vmatmul.msk.bf16.gmra.mxu3 %vm11069_vm4, %v9525_v52  ;;  %v3960_v24 = vsel %vm8999_vm9, 0, %v3911_v2  ;;  %vm11071_vm9 = vmmov %vm11067_vm0  ;;  %vm11081_vm4 = vnez %v10912_v51 }
 0x502   : > { %4038 = vrot.lane.b32.xlu2 %v3960_v24, %s6930_s15  ;;  %4040 = vrot.lane.b32.xlu0 %v3961_v42, %s6930_s15  ;;  %vm11078_vm15 = vmmov %vm11077_vm5  ;;  %v3941_v30 = vsel %vm11081_vm4, 0, %v9465_v0 }
 0x503   : > { %v4363_v58 = vpop.f32.mrf.mxu2  ;;  %v4488_v23 = vpop.f32.mrf.mxu3  ;;  %vm11079_vm0 = vmmov %vm11077_vm5 }
 0x504   : > { %v4489_v5 = vadd.f32 %v4488_v23, %v9544_v19  ;;  %v4563_v1 = vadd.f32 %v4483_v43, %v4363_v58  ;;  %v9621_v19 = vld [vmem:[%s10615_s10 + $0x3] ss:$0 sm:$0xff]  ;;  %vm11080_vm12 = vmmov %vm11079_vm0 }
 0x505   : > { %vm11082_vm8 = vmmov %vm11079_vm0 }
 0x506   : > { %v4597_v57 = vmul.f32 %v9610_v48, %v4563_v1  ;;  %vm11086_vm7 = vmmov %vm11085_vm6 }
 0x507   : > { %v4221_v15 = vpop.f32.mrf.mxu0  ;;  %vm11087_vm14 = vmmov %vm11085_vm6 }
 0x508   : > { %3992 = vrot.lane.b32.xlu1 %v9559_v6, %s6929_s27  ;;  %v4631_v27 = vadd.f32 %v9621_v19, %v4597_v57  ;;  %vm11092_vm4 = vmmov %vm11079_vm0  ;;  %s6877_s27 = scalar_lea.hbm %s10616_s11, 512 }
 0x509   : > { %p6879_p1 = scmp.lt.s32.totalorder %s6877_s27, %s6873_s12 }
 0x50a   : > { %v9629_v55 = vmax.f32 %v4631_v27, 0.0 }
 0x50b   : > { %v4365_v63 = vpop.f32.mrf.mxu2  ;;  %v4490_v52 = vpop.f32.mrf.mxu3  ;;  %p6880_p3 = por %p6879_p1, %p6878_p0 }
 0x50c   : > { %v4491_v25 = vadd.f32 %v4490_v52, %v4213_v56  ;;  %v4564_v28 = vadd.f32 %v4485_v29, %v4365_v63  ;;  %v4844_v12 = vmul.f32 %v9635_v31, %v9629_v55 }
 0x50d   : > { %p6881_p4 = pnand %p6880_p3, %p6876_p13 }
 0x50e   : > { %v4598_v60 = vmul.f32 %v9610_v48, %v4564_v28  ;;  %v4876_v24 = vsel %vm11076_vm13, %v4844_v12, 0.0  ;;  %vm11088_vm13 = vmmov %vm11079_vm0 }
 0x50f   : > { %v4223_v43 = vpop.f32.mrf.mxu0 }
 0x510   : > { %6310 = vmatmul.msk.bf16.gmra.mxu2 %vm11071_vm9, %v4111_v22  ;;  %v4632_v33 = vadd.f32 %v9621_v19, %v4598_v60  ;;  %vm11083_vm9 = vmmov %vm11079_vm0 }
 0x511   : > { %6350 = vmatmul.msk.bf16.gmra.mxu3 %vm11072_vm1, %v4111_v22  ;;  %vm11084_vm1 = vcmask 523264  }
 0x512   : > { %v9650_v8 = vmax.f32 %v4632_v33, 0.0 }
 0x513   : > { %v4368_v45 = vpop.f32.mrf.mxu2  ;;  %v4493_v32 = vpop.f32.mrf.mxu3 }
 0x514   : > { %v4565_v11 = vadd.f32 %v4489_v5, %v4368_v45  ;;  %v4494_v56 = vadd.f32 %v4493_v32, %v4216_v17  ;;  %v4845_v23 = vmul.f32 %v9635_v31, %v9650_v8 }
 0x516   : > { %v4599_v21 = vmul.f32 %v9610_v48, %v4565_v11 }
 0x517   : > { %v4226_v61 = vpop.f32.mrf.mxu0 }
 0x518   : > { %v4633_v59 = vadd.f32 %v9621_v19, %v4599_v21 }
 0x51a   : > { %v9637_v40 = vmax.f32 %v4633_v59, 0.0 }
 0x51b   : > { %v4370_v44 = vpop.f32.mrf.mxu2  ;;  %v4495_v26 = vpop.f32.mrf.mxu3 }
 0x51c   : > { %v4566_v37 = vadd.f32 %v4491_v25, %v4370_v44  ;;  %v4846_v29 = vmul.f32 %v9635_v31, %v9637_v40  ;;  %v4496_v2 = vadd.f32 %v4495_v26, %v4218_v53  ;;  %v4879_v53 = vsel %vm11078_vm15, %v4845_v23, 0.0  ;;  %v3985_v26 = vpop.permute.xlu0 %3984  ;;  %vm11090_vm15 = vmmov %vm11079_vm0 }
 0x51d   : > { %v4077_v27 = vsel %vm11083_vm9, %v3941_v30, %v3985_v26  ;;  %vm11094_vm9 = vmmov %vm11085_vm6 }
 0x51e   : > { %v4600_v22 = vmul.f32 %v9610_v48, %v4566_v37  ;;  %v4882_v18 = vsel %vm11077_vm5, %v4846_v29, 0.0  ;;  %vm11089_vm5 = vmmov %vm11079_vm0 }
 0x51f   : > { %v4228_v11 = vpop.f32.mrf.mxu0 }
 0x520   : > { %v4634_v6 = vadd.f32 %v9621_v19, %v4600_v22 }
 0x522   : > { %v9656_v16 = vmax.f32 %v4634_v6, 0.0 }
 0x523   : > { %v4373_v46 = vpop.f32.mrf.mxu2  ;;  %v4498_v38 = vpop.f32.mrf.mxu3 }
 0x524   : > { %v4567_v13 = vadd.f32 %v4494_v56, %v4373_v46  ;;  %v4847_v4 = vmul.f32 %v9635_v31, %v9656_v16  ;;  %v4499_v41 = vadd.f32 %v4498_v38, %v4221_v15 }
 0x526   : > { %v4601_v7 = vmul.f32 %v9610_v48, %v4567_v13  ;;  %v4885_v32 = vsel %vm11079_vm0, %v4847_v4, 0.0 }
 0x527   : > { %v4231_v0 = vpop.f32.mrf.mxu0 }
 0x528   : > { %v4635_v58 = vadd.f32 %v9621_v19, %v4601_v7 }
 0x52a   : > { %v9667_v52 = vmax.f32 %v4635_v58, 0.0 }
 0x52b   : > { %v4500_v42 = vpop.f32.mrf.mxu3  ;;  %4877 = vadd.xlane.f32.xlu2 %v4876_v24  ;;  %v4375_v10 = vpop.f32.mrf.mxu2 }
 0x52c   : > { %v4568_v17 = vadd.f32 %v4496_v2, %v4375_v10  ;;  %4883 = vadd.xlane.f32.xlu0 %v4882_v18  ;;  %v4848_v21 = vmul.f32 %v9635_v31, %v9667_v52  ;;  %v4501_v37 = vadd.f32 %v4500_v42, %v4223_v43 }
 0x52e   : > { %v4602_v62 = vmul.f32 %v9610_v48, %v4568_v17  ;;  %v4888_v28 = vsel %vm11082_vm8, %v4848_v21, 0.0  ;;  %vm11093_vm8 = vmmov %vm11084_vm1 }
 0x52f   : > { %v4233_v24 = vpop.f32.mrf.mxu0 }
 0x530   : > { %v4636_v63 = vadd.f32 %v9621_v19, %v4602_v62 }
 0x532   : > { %v9670_v45 = vmax.f32 %v4636_v63, 0.0  ;;  %4880 = vadd.xlane.f32.xlu1 %v4879_v53 }
 0x533   : > { %v4503_v5 = vpop.f32.mrf.mxu3  ;;  %4886 = vadd.xlane.f32.xlu2 %v4885_v32  ;;  %v4378_v1 = vpop.f32.mrf.mxu2 }
 0x534   : > { %v4569_v47 = vadd.f32 %v4499_v41, %v4378_v1  ;;  %v4849_v57 = vmul.f32 %v9635_v31, %v9670_v45  ;;  %v4504_v33 = vadd.f32 %v4503_v5, %v4226_v61 }
 0x536   : > { %v4603_v44 = vmul.f32 %v9610_v48, %v4569_v47  ;;  %v4891_v15 = vsel %vm11080_vm12, %v4849_v57, 0.0  ;;  %vm11091_vm12 = vmmov %vm11079_vm0 }
 0x537   : > { %4892 = vadd.xlane.f32.xlu0 %v4891_v15  ;;  %v4236_v53 = vpop.f32.mrf.mxu0 }
 0x538   : > { %v4637_v25 = vadd.f32 %v9621_v19, %v4603_v44 }
 0x53a   : > { %v9685_v59 = vmax.f32 %v4637_v25, 0.0  ;;  %v4033_v60 = vpop.permute.xlu2 %4032  ;;  %4889 = vadd.xlane.f32.xlu1 %v4888_v28 }
 0x53b   : > { %v4113_v39 = vsel %vm11084_vm1, %v4077_v27, %v4033_v60  ;;  %v4380_v22 = vpop.f32.mrf.mxu2  ;;  %v4505_v50 = vpop.f32.mrf.mxu3  ;;  %v4698_v60 = vld [vmem:[%s10611_s6 + $0x18] sm:$0xff]  ;;  %vm11095_vm1 = vmmov %vm11085_vm6 }
 0x53c   : > { %v4570_v56 = vadd.f32 %v4501_v37, %v4380_v22  ;;  %6247 = vmatmul.msk.bf16.gmra.mxu0 %vm11085_vm6, %v4113_v39  ;;  %6311 = vmatmul.msk.bf16.gmra.mxu2 %vm11086_vm7, %v4113_v39  ;;  %v4850_v51 = vmul.f32 %v9635_v31, %v9685_v59  ;;  %v4506_v10 = vadd.f32 %v4505_v50, %v4228_v11  ;;  %vm11096_vm6 = vmmov %vm11095_vm1 }
 0x53d   : > { %6351 = vmatmul.msk.bf16.gmra.mxu3 %vm11087_vm14, %v4113_v39  ;;  %4789 = vmatpush.msrb.mxu1 %v4698_v60  ;;  %vm11098_vm7 = vmmov %vm11079_vm0 }
 0x53e   : > { %v4604_v43 = vmul.f32 %v9610_v48, %v4570_v56  ;;  %v4894_v46 = vsel %vm11088_vm13, %v4850_v51, 0.0  ;;  %v3942_v51 = vsel %vm9057_vm2, 0, %v9602_v9  ;;  %vm11097_vm2 = vmmov %vm11079_vm0 }
 0x53f   : > { %4895 = vadd.xlane.f32.xlu2 %v4894_v46  ;;  %v4238_v37 = vpop.f32.mrf.mxu0  ;;  %vm11099_vm14 = vmmov %vm11079_vm0 }
 0x540   : > { %v4638_v38 = vadd.f32 %v9621_v19, %v4604_v43  ;;  %vm11100_vm13 = vmmov %vm11093_vm8 }
 0x542   : > { %v9696_v13 = vmax.f32 %v4638_v38, 0.0 }
 0x543   : > { %v4383_v6 = vpop.f32.mrf.mxu2  ;;  %v4508_v12 = vpop.f32.mrf.mxu3 }
 0x544   : > { %v4571_v29 = vadd.f32 %v4504_v33, %v4383_v6  ;;  %v4851_v54 = vmul.f32 %v9635_v31, %v9696_v13  ;;  %v4509_v41 = vadd.f32 %v4508_v12, %v4231_v0 }
 0x546   : > { %v4605_v7 = vmul.f32 %v9610_v48, %v4571_v29  ;;  %v4897_v2 = vsel %vm11089_vm5, %v4851_v54, 0.0  ;;  %vm11101_vm5 = vmmov %vm11095_vm1 }
 0x547   : > { %4898 = vadd.xlane.f32.xlu1 %v4897_v2 }
 0x548   : > { %v4639_v42 = vadd.f32 %v9621_v19, %v4605_v7  ;;  %v4241_v7 = vpop.f32.mrf.mxu0 }
 0x54a   : > { %v9703_v18 = vmax.f32 %v4639_v42, 0.0 }
 0x54b   : > { %v4385_v61 = vpop.f32.mrf.mxu2  ;;  %v4510_v17 = vpop.f32.mrf.mxu3 }
 0x54c   : > { %v4572_v58 = vadd.f32 %v4506_v10, %v4385_v61  ;;  %v4852_v23 = vmul.f32 %v9635_v31, %v9703_v18  ;;  %v4511_v15 = vadd.f32 %v4510_v17, %v4233_v24  ;;  %v3987_v50 = vpop.permute.xlu1 %3986 }
 0x54d   : > { %v4080_v0 = vsel %vm11092_vm4, %v3942_v51, %v3987_v50  ;;  %vm11106_vm4 = vmmov %vm11097_vm2 }
 0x54e   : > { %v4606_v62 = vmul.f32 %v9610_v48, %v4572_v58  ;;  %v4900_v4 = vsel %vm11090_vm15, %v4852_v23, 0.0  ;;  %vm11102_vm15 = vmmov %vm11095_vm1 }
 0x54f   : > { %4901 = vadd.xlane.f32.xlu0 %v4900_v4 }
 0x550   : > { %v4640_v63 = vadd.f32 %v9621_v19, %v4606_v62  ;;  %v3989_v62 = vpop.permute.xlu2 %3988 }
 0x552   : > { %v9710_v32 = vmax.f32 %v4640_v63, 0.0 }
 0x553   : > { %v4388_v5 = vpop.f32.mrf.mxu2  ;;  %v4513_v1 = vpop.f32.mrf.mxu3 }
 0x554   : > { %v4573_v11 = vadd.f32 %v4509_v41, %v4388_v5  ;;  %v4853_v47 = vmul.f32 %v9635_v31, %v9710_v32  ;;  %v4514_v43 = vadd.f32 %v4513_v1, %v4236_v53  ;;  %v4243_v53 = vpop.f32.mrf.mxu0  ;;  %v3943_v41 = vsel %vm9275_vm11, 0, %v9615_v36  ;;  %vm11104_vm11 = vmmov %vm11097_vm2 }
 0x555   : > { %v4083_v5 = vsel %vm11099_vm14, %v3943_v41, %v3989_v62  ;;  %vm11112_vm14 = vmmov %vm11093_vm8 }
 0x556   : > { %v4607_v57 = vmul.f32 %v9610_v48, %v4573_v11  ;;  %v4903_v21 = vsel %vm11079_vm0, %v4853_v47, 0.0  ;;  %vm11103_vm0 = vmmov %vm11095_vm1 }
 0x557   : > { %4904 = vadd.xlane.f32.xlu2 %v4903_v21 }
 0x558   : > { %v4641_v44 = vadd.f32 %v9621_v19, %v4607_v57 }
 0x55a   : > { %v9717_v26 = vmax.f32 %v4641_v44, 0.0 }
 0x55b   : > { %v4390_v25 = vpop.f32.mrf.mxu2  ;;  %v4515_v30 = vpop.f32.mrf.mxu3 }
 0x55c   : > { %v4574_v28 = vadd.f32 %v4511_v15, %v4390_v25  ;;  %v4854_v27 = vmul.f32 %v9635_v31, %v9717_v26  ;;  %v4516_v24 = vadd.f32 %v4515_v30, %v4238_v37  ;;  %v4246_v37 = vpop.f32.mrf.mxu0 }
 0x55e   : > { %v4608_v39 = vmul.f32 %v9610_v48, %v4574_v28  ;;  %v4906_v22 = vsel %vm11091_vm12, %v4854_v27, 0.0  ;;  %vm11105_vm12 = vmmov %vm11097_vm2 }
 0x55f   : > { %4907 = vadd.xlane.f32.xlu1 %v4906_v22 }
 0x560   : > { %v4642_v56 = vadd.f32 %v9621_v19, %v4608_v39 }
 0x562   : > { %v9731_v46 = vmax.f32 %v4642_v56, 0.0  ;;  %v4035_v38 = vpop.permute.xlu0 %4034 }
 0x563   : > { %v4115_v33 = vsel %vm11093_vm8, %v4080_v0, %v4035_v38  ;;  %v4393_v6 = vpop.f32.mrf.mxu2  ;;  %v3944_v0 = vsel %vm9315_vm3, 0, %v9654_v34  ;;  %vm11109_vm3 = vmmov %vm11103_vm0 }
 0x564   : > { %v4575_v12 = vadd.f32 %v4514_v43, %v4393_v6  ;;  %6248 = vmatmul.msk.bf16.gmra.mxu0 %vm11094_vm9, %v4115_v33  ;;  %6312 = vmatmul.msk.bf16.gmra.mxu2 %vm11095_vm1, %v4115_v33  ;;  %v4855_v29 = vmul.f32 %v9635_v31, %v9731_v46  ;;  %v4518_v54 = vpop.f32.mrf.mxu3  ;;  %vm11107_vm9 = vmmov %vm11103_vm0  ;;  %v4248_v34 = vpop.f32.mrf.mxu0 }
 0x565   : > { %6352 = vmatmul.msk.bf16.gmra.mxu3 %vm11096_vm6, %v4115_v33  ;;  %v4519_v1 = vadd.f32 %v4518_v54, %v4241_v7  ;;  %v4039_v33 = vpop.permute.xlu2 %4038  ;;  %vm11108_vm1 = vmmov %vm11103_vm0 }
 0x566   : > { %v4609_v35 = vmul.f32 %v9610_v48, %v4575_v12  ;;  %v4909_v9 = vsel %vm11097_vm2, %v4855_v29, 0.0  ;;  %vm11110_vm6 = vmmov %vm11097_vm2 }
 0x567   : > { %4910 = vadd.xlane.f32.xlu0 %v4909_v9 }
 0x568   : > { %v4643_v2 = vadd.f32 %v9621_v19, %v4609_v35 }
 0x56a   : > { %v9742_v42 = vmax.f32 %v4643_v2, 0.0 }
 0x56b   : > { %v4395_v10 = vpop.f32.mrf.mxu2 }
 0x56c   : > { %v4576_v61 = vadd.f32 %v4516_v24, %v4395_v10  ;;  %v4856_v17 = vmul.f32 %v9635_v31, %v9742_v42  ;;  %v4520_v4 = vpop.f32.mrf.mxu3  ;;  %v3991_v50 = vpop.permute.xlu0 %3990 }
 0x56d   : > { %v4521_v28 = vadd.f32 %v4520_v4, %v4243_v53  ;;  %v4086_v43 = vsel %vm11106_vm4, %v3944_v0, %v3991_v50  ;;  %v4251_v41 = vpop.f32.mrf.mxu0  ;;  %v9813_v50 = vld [vmem:[%s10615_s10 + $0x6] ss:$0 sm:$0xff] }
 0x56e   : > { %v4610_v58 = vmul.f32 %v9610_v48, %v4576_v61  ;;  %v4912_v23 = vsel %vm11098_vm7, %v4856_v17, 0.0  ;;  %v4119_v35 = vsel %vm11093_vm8, %v4086_v43, %v4039_v33  ;;  %vm11111_vm7 = vmmov %vm11097_vm2 }
 0x56f   : > { %4913 = vadd.xlane.f32.xlu2 %v4912_v23 }
 0x570   : > { %v4644_v63 = vadd.f32 %v9621_v19, %v4610_v58 }
 0x572   : > { %v9753_v11 = vmax.f32 %v4644_v63, 0.0  ;;  %v4037_v47 = vpop.permute.xlu1 %4036 }
 0x573   : > { %v4117_v57 = vsel %vm11100_vm13, %v4083_v5, %v4037_v47  ;;  %v4398_v21 = vpop.f32.mrf.mxu2  ;;  %v3945_v5 = vsel %vm9370_vm10, 0, %v9648_v20  ;;  %vm11113_vm13 = vmmov %vm11103_vm0 }
 0x574   : > { %v4577_v44 = vadd.f32 %v4519_v1, %v4398_v21  ;;  %6249 = vmatmul.msk.bf16.gmra.mxu0 %vm11101_vm5, %v4117_v57  ;;  %6313 = vmatmul.msk.bf16.gmra.mxu2 %vm11102_vm15, %v4117_v57  ;;  %v4857_v15 = vmul.f32 %v9635_v31, %v9753_v11  ;;  %v4523_v30 = vpop.f32.mrf.mxu3  ;;  %vm11114_vm5 = vmmov %vm11103_vm0 }
 0x575   : > { %6353 = vmatmul.msk.bf16.gmra.mxu3 %vm11103_vm0, %v4117_v57  ;;  %v4524_v6 = vadd.f32 %v4523_v30, %v4246_v37  ;;  %v4041_v57 = vpop.permute.xlu0 %4040  ;;  %vm11115_vm10 = vmmov %vm11103_vm0  ;;  %v4253_v37 = vpop.f32.mrf.mxu0 }
 0x576   : > { %v4611_v3 = vmul.f32 %v9610_v48, %v4577_v44  ;;  %v4915_v36 = vsel %vm11104_vm11, %v4857_v15, 0.0  ;;  %vm11116_vm15 = vmmov %vm11097_vm2 }
 0x577   : > { %4916 = vadd.xlane.f32.xlu1 %v4915_v36  ;;  %vm11117_vm0 = vmmov %vm11097_vm2 }
 0x578   : > { %v4645_v25 = vadd.f32 %v9621_v19, %v4611_v3  ;;  %vm11118_vm11 = vmmov %vm11117_vm0 }
 0x57a   : > { %v9764_v27 = vmax.f32 %v4645_v25, 0.0  ;;  %v3993_v62 = vpop.permute.xlu1 %3992 }
 0x57b   : > { %v4400_v60 = vpop.f32.mrf.mxu2  ;;  %v4089_v1 = vsel %vm11111_vm7, %v3945_v5, %v3993_v62 }
 0x57c   : > { %v4578_v39 = vadd.f32 %v4521_v28, %v4400_v60  ;;  %v4858_v22 = vmul.f32 %v9635_v31, %v9764_v27  ;;  %v4525_v29 = vpop.f32.mrf.mxu3  ;;  %v4121_v3 = vsel %vm11112_vm14, %v4089_v1, %v4041_v57 }
 0x57d   : > { %v4526_v10 = vadd.f32 %v4525_v29, %v4248_v34 }
 0x57e   : > { %v4612_v56 = vmul.f32 %v9610_v48, %v4578_v39  ;;  %v4918_v51 = vsel %vm11105_vm12, %v4858_v22, 0.0 }
 0x57f   : > { %4919 = vadd.xlane.f32.xlu0 %v4918_v51 }
 0x580   : > { %v4646_v38 = vadd.f32 %v9621_v19, %v4612_v56 }
 0x582   : > { %v9775_v12 = vmax.f32 %v4646_v38, 0.0 }
 0x583   : > { %v4403_v54 = vpop.f32.mrf.mxu2 }
 0x584   : > { %v4579_v9 = vadd.f32 %v4524_v6, %v4403_v54  ;;  %6250 = vmatmul.msk.bf16.gmra.mxu0 %vm11107_vm9, %v4119_v35  ;;  %6314 = vmatmul.msk.bf16.gmra.mxu2 %vm11108_vm1, %v4119_v35  ;;  %v4859_v14 = vmul.f32 %v9635_v31, %v9775_v12  ;;  %v4528_v4 = vpop.f32.mrf.mxu3 }
 0x585   : > { %6354 = vmatmul.msk.bf16.gmra.mxu3 %vm11109_vm3, %v4119_v35  ;;  %v4529_v21 = vadd.f32 %v4528_v4, %v4251_v41  ;;  %v4697_v35 = vld [vmem:[%s10611_s6 + $0x10] sm:$0xff] }
 0x586   : > { %v4613_v7 = vmul.f32 %v9610_v48, %v4579_v9  ;;  %v4921_v2 = vsel %vm11110_vm6, %v4859_v14, 0.0  ;;  %4790 = vmatpush.msrb.mxu1 %v4697_v35 }
 0x587   : > { %4922 = vadd.xlane.f32.xlu2 %v4921_v2 }
 0x588   : > { %v4647_v24 = vadd.f32 %v9621_v19, %v4613_v7 }
 0x58a   : > { %v9786_v61 = vmax.f32 %v4647_v24, 0.0 }
 0x58b   : > { %v4405_v17 = vpop.f32.mrf.mxu2 }
 0x58c   : > { %v4580_v58 = vadd.f32 %v4526_v10, %v4405_v17  ;;  %v4860_v23 = vmul.f32 %v9635_v31, %v9786_v61  ;;  %v4530_v30 = vpop.f32.mrf.mxu3 }
 0x58d   : > { %v4531_v60 = vadd.f32 %v4530_v30, %v4253_v37 }
 0x58e   : > { %v4614_v63 = vmul.f32 %v9610_v48, %v4580_v58  ;;  %v4924_v53 = vsel %vm11097_vm2, %v4860_v23, 0.0  ;;  %v9831_v23 = vpop.f32.mrf.mxu0 }
 0x58f   : > { %4925 = vadd.xlane.f32.xlu1 %v4924_v53 }
 0x590   : > { %v4648_v47 = vadd.f32 %v9621_v19, %v4614_v63 }
 0x592   : > { %v9797_v44 = vmax.f32 %v4648_v47, 0.0 }
 0x593   : > { %v4408_v15 = vpop.f32.mrf.mxu2 }
 0x594   : > { %v4581_v36 = vadd.f32 %v4529_v21, %v4408_v15  ;;  %6251 = vmatmul.msk.bf16.gmra.mxu0 %vm11113_vm13, %v4121_v3  ;;  %6315 = vmatmul.msk.bf16.gmra.mxu2 %vm11114_vm5, %v4121_v3  ;;  %v4861_v49 = vmul.f32 %v9635_v31, %v9797_v44 }
 0x595   : > { %6355 = vmatmul.msk.bf16.gmra.mxu3 %vm11115_vm10, %v4121_v3  ;;  %vm11119_vm10 = vcmask 1041408  }
 0x596   : > { %v4615_v20 = vmul.f32 %v9610_v48, %v4581_v36  ;;  %v4927_v25 = vsel %vm11116_vm15, %v4861_v49, 0.0  ;;  %v9833_v47 = vpop.f32.mrf.mxu0  ;;  %vm11120_vm15 = vmmov %vm11117_vm0 }
 0x597   : > { %4928 = vadd.xlane.f32.xlu0 %v4927_v25 }
 0x598   : > { %v4649_v28 = vadd.f32 %v9621_v19, %v4615_v20 }
 0x59a   : > { %v9808_v39 = vmax.f32 %v4649_v28, 0.0 }
 0x59b   : > { %v4410_v22 = vpop.f32.mrf.mxu2 }
 0x59c   : > { %v4582_v56 = vadd.f32 %v4531_v60, %v4410_v22  ;;  %v4862_v51 = vmul.f32 %v9635_v31, %v9808_v39 }
 0x59e   : > { %v4616_v0 = vmul.f32 %v9610_v48, %v4582_v56  ;;  %v4878_v43 = vpop.xlane.xlu2 %4877  ;;  %v4930_v38 = vsel %vm11117_vm0, %v4862_v51, 0.0 }
 0x59f   : > { %v4973_v33 = vadd.f32 %v9813_v50, %v4878_v43  ;;  %v4884_v6 = vpop.xlane.xlu0 %4883  ;;  %4931 = vadd.xlane.f32.xlu2 %v4930_v38 }
 0x5a0   : > { %v4650_v29 = vadd.f32 %v9621_v19, %v4616_v0  ;;  %v4975_v54 = vadd.f32 %v9813_v50, %v4884_v6  ;;  %v9835_v6 = vpop.f32.mrf.mxu0 }
 0x5a1   : > { %v6360_v9 = vmul.f32 -1.442695, %v4973_v33 }
 0x5a2   : > { %v9825_v14 = vmax.f32 %v4650_v29, 0.0  ;;  %v6362_v34 = vmul.f32 -1.442695, %v4975_v54 }
 0x5a3   : > { %6644 = vpow2.f32 %v6360_v9 }
 0x5a4   : > { %6646 = vpow2.f32 %v6362_v34  ;;  %v4863_v7 = vmul.f32 %v9635_v31, %v9825_v14 }
 0x5a5   : > { %v4881_v2 = vpop.xlane.xlu1 %4880 }
 0x5a6   : > { %v4974_v24 = vadd.f32 %v9813_v50, %v4881_v2  ;;  %v4933_v10 = vsel %vm11118_vm11, %v4863_v7, 0.0  ;;  %vm11121_vm11 = vmmov %vm11117_vm0 }
 0x5a7   : > { %4934 = vadd.xlane.f32.xlu1 %v4933_v10 }
 0x5a8   : > { %v6361_v17 = vmul.f32 -1.442695, %v4974_v24 }
 0x5a9   : > { %v6645_v58 = vpop.eup %6644 }
 0x5aa   : > { %v6647_v62 = vpop.eup %6646  ;;  %v5101_v4 = vadd.f32 1.0, %v6645_v58  ;;  %6648 = vpow2.f32 %v6361_v17  ;;  %v4533_v17 = vpop.f32.mrf.mxu3 }
 0x5ab   : > { %v5103_v63 = vadd.f32 1.0, %v6647_v62  ;;  %v4887_v58 = vpop.xlane.xlu2 %4886  ;;  %v9837_v62 = vpop.f32.mrf.mxu0 }
 0x5ac   : > { %6650 = vrcp.f32 %v5101_v4  ;;  %v5144_v3 = vand.u32 2147483648, %v5101_v4  ;;  %v5142_v20 = vand.u32 2147483647, %v5101_v4  ;;  %vm5138_vm8 = vweird.f32 %v5101_v4 }
 0x5ad   : > { %6652 = vrcp.f32 %v5103_v63  ;;  %vm5168_vm9 = vweird.f32 %v5103_v63  ;;  %v5174_v37 = vand.u32 2147483648, %v5103_v63  ;;  %v5172_v56 = vand.u32 2147483647, %v5103_v63 }
 0x5ae   : > { %v5145_v60 = vor.u32 1.1754944e-38, %v5144_v3  ;;  %vm5143_vm3 = vcmp.eq.f32.partialorder %v5142_v20, 8.507059e+37 }
 0x5af   : > { %v5175_v29 = vor.u32 1.1754944e-38, %v5174_v37  ;;  %vm5173_vm2 = vcmp.eq.f32.partialorder %v5172_v56, 8.507059e+37 }
 0x5b0   : > { %v6649_v53 = vpop.eup %6648 }
 0x5b1   : > { %v5102_v41 = vadd.f32 1.0, %v6649_v53 }
 0x5b2   : > { %v6651_v5 = vpop.eup %6650 }
 0x5b3   : > { %v6653_v1 = vpop.eup %6652  ;;  %6654 = vrcp.f32 %v5102_v41  ;;  %v5134_v57 = vmul.f32 %v6651_v5, %v5101_v4  ;;  %vm5139_vm12 = vweird.f32 %v6651_v5  ;;  %v5159_v54 = vand.u32 2147483648, %v5102_v41 }
 0x5b4   : > { %v5164_v21 = vmul.f32 %v6653_v1, %v5103_v63  ;;  %vm5169_vm4 = vweird.f32 %v6653_v1  ;;  %vm5140_vm1 = vmor %vm5138_vm8, %vm5139_vm12  ;;  %v5157_v9 = vand.u32 2147483647, %v5102_v41  ;;  %vm5153_vm14 = vweird.f32 %v5102_v41 }
 0x5b5   : > { %v5135_v15 = vsub.f32 1.0, %v5134_v57  ;;  %vm5170_vm6 = vmor %vm5168_vm9, %vm5169_vm4  ;;  %v5160_v2 = vor.u32 1.1754944e-38, %v5159_v54  ;;  %v4976_v4 = vadd.f32 %v9813_v50, %v4887_v58 }
 0x5b6   : > { %v5165_v36 = vsub.f32 1.0, %v5164_v21  ;;  %vm5158_vm5 = vcmp.eq.f32.partialorder %v5157_v9, 8.507059e+37  ;;  %v4893_v21 = vpop.xlane.xlu0 %4892  ;;  %v4696_v9 = vld [vmem:[%s10611_s6 + $0x8] sm:$0xff]  ;;  %vm11122_vm12 = vmmov %vm11117_vm0 }
 0x5b7   : > { %v5136_v49 = vmul.f32 %v6651_v5, %v5135_v15  ;;  %v6363_v53 = vmul.f32 -1.442695, %v4976_v4  ;;  %4791 = vmatpush.msrb.mxu1 %v4696_v9  ;;  %vm11123_vm4 = vmmov %vm11117_vm0 }
 0x5b8   : > { %v5166_v25 = vmul.f32 %v6653_v1, %v5165_v36  ;;  %v4978_v36 = vadd.f32 %v9813_v50, %v4893_v21  ;;  %vm11124_vm8 = vmmov %vm11117_vm0 }
 0x5b9   : > { %v6655_v30 = vpop.eup %6654  ;;  %v5137_v28 = vadd.f32 %v6651_v5, %v5136_v49  ;;  %v9840_v57 = vpop.f32.mrf.mxu0  ;;  %6656 = vpow2.f32 %v6363_v53  ;;  %v4709_v9 = vsel %vm11124_vm8, %v9656_v16, 0.0  ;;  %vm11125_vm9 = vmmov %vm11117_vm0 }
 0x5ba   : > { %v5167_v22 = vadd.f32 %v6653_v1, %v5166_v25  ;;  %v5149_v51 = vmul.f32 %v6655_v30, %v5102_v41  ;;  %vm5154_vm7 = vweird.f32 %v6655_v30  ;;  %v4534_v41 = vadd.f32 %v4533_v17, %v9831_v23 }
 0x5bb   : > { %v5141_v0 = vsel %vm5140_vm1, %v6651_v5, %v5137_v28  ;;  %vm5155_vm13 = vmor %vm5153_vm14, %vm5154_vm7  ;;  %v4535_v5 = vpop.f32.mrf.mxu3 }
 0x5bc   : > { %v5146_v43 = vsel %vm5143_vm3, %v5145_v60, %v5141_v0  ;;  %v5171_v38 = vsel %vm5170_vm6, %v6653_v1, %v5167_v22  ;;  %v5150_v33 = vsub.f32 1.0, %v5149_v51  ;;  %v4890_v1 = vpop.xlane.xlu1 %4889  ;;  %v4536_v25 = vadd.f32 %v4535_v5, %v9833_v47  ;;  %v4896_v22 = vpop.xlane.xlu2 %4895  ;;  %vm11126_vm1 = vmmov %vm11117_vm0 }
 0x5bd   : > { %5616 = vperm.xlu0 %6501, %v5146_v43   ;;  %v5176_v34 = vsel %vm5173_vm2, %v5175_v29, %v5171_v38  ;;  %v4977_v15 = vadd.f32 %v9813_v50, %v4890_v1  ;;  %v6365_v60 = vmul.f32 -1.442695, %v4978_v36  ;;  %v4979_v0 = vadd.f32 %v9813_v50, %v4896_v22  ;;  %vm11127_vm6 = vmmov %vm11117_vm0 }
 0x5be   : > { %v5151_v35 = vmul.f32 %v6655_v30, %v5150_v33  ;;  %v4704_v22 = vsel %vm11122_vm12, %v9629_v55, 0.0  ;;  %vm11128_vm14 = vmmov %vm11117_vm0 }
 0x5bf   : > { %v4413_v63 = vpop.f32.mrf.mxu2  ;;  %v6364_v49 = vmul.f32 -1.442695, %v4977_v15  ;;  %v6657_v37 = vpop.eup %6656  ;;  %v6366_v47 = vmul.f32 -1.442695, %v4979_v0  ;;  %v4707_v0 = vsel %vm11123_vm4, %v9637_v40, 0.0  ;;  %vm11131_vm12 = vmmov %vm11126_vm1 }
 0x5c0   : > { %5626 = vperm.xlu1 %6502, %v5176_v34   ;;  %v5152_v7 = vadd.f32 %v6655_v30, %v5151_v35  ;;  %v4583_v3 = vadd.f32 %v4534_v41, %v4413_v63  ;;  %v9849_v51 = vadd.f32 1.0, %v6657_v37  ;;  %v4705_v37 = vsel %vm11121_vm11, %v9650_v8, 0.0 }
 0x5c1   : > { %6658 = vpow2.f32 %v6364_v49  ;;  %v9847_v23 = vpop.f32.mrf.mxu0 }
 0x5c2   : > { %v5156_v24 = vsel %vm5155_vm13, %v6655_v30, %v5152_v7  ;;  %v4617_v30 = vmul.f32 %v9610_v48, %v4583_v3  ;;  %6660 = vpow2.f32 %v6365_v60  ;;  %vm5183_vm2 = vweird.f32 %v9849_v51  ;;  %vm11129_vm13 = vmmov %vm11117_vm0 }
 0x5c3   : > { %v5161_v10 = vsel %vm5158_vm5, %v5160_v2, %v5156_v24  ;;  %v4538_v28 = vpop.f32.mrf.mxu3  ;;  %6662 = vrcp.f32 %v9849_v51  ;;  %v4700_v2 = vld [vmem:[%s10612_s7] sm:$0x3] }
 0x5c4   : > { %5621 = vperm.xlu2 %6503, %v5161_v10   ;;  %v4651_v43 = vadd.f32 %v9621_v19, %v4617_v30  ;;  %6664 = vpow2.f32 %v6366_v47  ;;  %6357 = vmatpush.msk.msrb.mxu0 %vm11119_vm10, %v4700_v2  ;;  %v4539_v63 = vadd.f32 %v4538_v28, %v9835_v6  ;;  %v4706_v47 = vadd.f32 %v4705_v37, %v4704_v22 }
 0x5c6   : > { %v9855_v33 = vmax.f32 %v4651_v43, 0.0 }
 0x5c7   : > { %v4415_v20 = vpop.f32.mrf.mxu2  ;;  %v6659_v29 = vpop.eup %6658 }
 0x5c8   : > { %v4584_v56 = vadd.f32 %v4536_v25, %v4415_v20  ;;  %v6661_v34 = vpop.eup %6660  ;;  %v9868_v24 = vadd.f32 1.0, %v6659_v29  ;;  %v4864_v10 = vmul.f32 %v9635_v31, %v9855_v33 }
 0x5c9   : > { %v9873_v17 = vpop.eup %6662  ;;  %v9875_v58 = vadd.f32 1.0, %v6661_v34 }
 0x5ca   : > { %v4618_v38 = vmul.f32 %v9610_v48, %v4584_v56  ;;  %6666 = vrcp.f32 %v9868_v24  ;;  %v4936_v53 = vsel %vm11120_vm15, %v4864_v10, 0.0  ;;  %v5179_v1 = vmul.f32 %v9873_v17, %v9849_v51  ;;  %v6665_v41 = vpop.eup %6664  ;;  %vm11130_vm15 = vmmov %vm11117_vm0 }
 0x5cb   : > { %v9858_v35 = vpop.f32.mrf.mxu3  ;;  %6668 = vrcp.f32 %v9875_v58  ;;  %v9892_v49 = vadd.f32 1.0, %v6665_v41  ;;  %v4708_v10 = vadd.f32 %v4707_v0, %v4706_v47  ;;  %vm5184_vm3 = vweird.f32 %v9873_v17 }
 0x5cc   : > { %v4652_v54 = vadd.f32 %v9621_v19, %v4618_v38  ;;  %v5180_v20 = vsub.f32 1.0, %v5179_v1  ;;  %v5189_v41 = vand.u32 2147483648, %v9849_v51  ;;  %vm5185_vm7 = vmor %vm5183_vm2, %vm5184_vm3  ;;  %vm5213_vm8 = vweird.f32 %v9875_v58 }
 0x5cd   : > { %6670 = vrcp.f32 %v9892_v49  ;;  %v4710_v1 = vadd.f32 %v4709_v9, %v4708_v10 }
 0x5ce   : > { %v9877_v4 = vmax.f32 %v4652_v54, 0.0  ;;  %v5190_v47 = vor.u32 1.1754944e-38, %v5189_v41  ;;  %v5202_v41 = vand.u32 2147483647, %v9868_v24 }
 0x5d0   : > { %v4865_v3 = vmul.f32 %v9635_v31, %v9877_v4  ;;  %v9894_v25 = vpop.eup %6666  ;;  %vm5203_vm3 = vcmp.eq.f32.partialorder %v5202_v41, 8.507059e+37 }
 0x5d1   : > { %v9900_v60 = vpop.eup %6668  ;;  %v5194_v38 = vmul.f32 %v9894_v25, %v9868_v24  ;;  %vm5199_vm10 = vweird.f32 %v9894_v25 }
 0x5d2   : > { %v4939_v28 = vsel %vm11117_vm0, %v4865_v3, 0.0  ;;  %v5209_v2 = vmul.f32 %v9900_v60, %v9875_v58  ;;  %v4713_v3 = vsel %vm11127_vm6, %v9670_v45, 0.0  ;;  %vm5198_vm0 = vweird.f32 %v9868_v24 }
 0x5d3   : > { %vm5214_vm11 = vweird.f32 %v9900_v60  ;;  %vm9962_vm4 = vmor %vm5198_vm0, %vm5199_vm10 }
 0x5d4   : > { %vm11138_vm0 = vmmov %vm11127_vm6 }
 0x5e1   : > { %v9863_v7 = vpop.f32.mrf.mxu0 }
 0x5e7   : > { %v4418_v5 = vpop.f32.mrf.mxu2  ;;  %4937 = vadd.xlane.f32.xlu0 %v4936_v53  ;;  %v4711_v53 = vsel %vm11126_vm1, %v9667_v52, 0.0 }
 0x5e8   : > { %v4585_v21 = vadd.f32 %v4539_v63, %v4418_v5  ;;  %v9885_v15 = vpop.f32.mrf.mxu3 }
 0x5e9   : > { %v9889_v36 = vpop.f32.mrf.mxu0 }
 0x5ea   : > { %v4619_v6 = vmul.f32 %v9610_v48, %v4585_v21  ;;  %v9930_v21 = vpop.eup %6670 }
 0x5ec   : > { %v4653_v30 = vadd.f32 %v9621_v19, %v4619_v6  ;;  %v5181_v19 = vmul.f32 %v9873_v17, %v5180_v20  ;;  %v5187_v6 = vand.u32 2147483647, %v9849_v51  ;;  %v5210_v20 = vsub.f32 1.0, %v5209_v2 }
 0x5ed   : > { %4940 = vadd.xlane.f32.xlu2 %v4939_v28  ;;  %v4715_v28 = vsel %vm11128_vm14, %v9685_v59, 0.0  ;;  %v4717_v51 = vsel %vm11129_vm13, %v9696_v13, 0.0  ;;  %vm5229_vm14 = vweird.f32 %v9930_v21  ;;  %vm11136_vm13 = vmmov %vm11127_vm6 }
 0x5ee   : > { %v9904_v56 = vmax.f32 %v4653_v30, 0.0  ;;  %v5182_v5 = vadd.f32 %v9873_v17, %v5181_v19  ;;  %v4712_v30 = vadd.f32 %v4711_v53, %v4710_v1  ;;  %vm5188_vm5 = vcmp.eq.f32.partialorder %v5187_v6, 8.507059e+37 }
 0x5ef   : > { %v9909_v43 = vpop.f32.mrf.mxu2  ;;  %v5211_v2 = vmul.f32 %v9900_v60, %v5210_v20  ;;  %v4721_v6 = vsel %vm11131_vm12, %v9710_v32, 0.0  ;;  %v4729_v41 = vsel %vm11136_vm13, %v9753_v11, 0.0  ;;  %vm11139_vm12 = vmmov %vm11138_vm0 }
 0x5f0   : > { %v9914_v29 = vpop.f32.mrf.mxu3  ;;  %v4866_v54 = vmul.f32 %v9635_v31, %v9904_v56  ;;  %v5195_v31 = vsub.f32 1.0, %v5194_v38  ;;  %v5186_v22 = vsel %vm5185_vm7, %v9873_v17, %v5182_v5  ;;  %v4714_v19 = vadd.f32 %v4713_v3, %v4712_v30  ;;  %vm11135_vm7 = vmmov %vm11127_vm6 }
 0x5f1   : > { %v9920_v34 = vpop.f32.mrf.mxu0  ;;  %v4719_v5 = vsel %vm11130_vm15, %v9703_v18, 0.0  ;;  %v5212_v3 = vadd.f32 %v9900_v60, %v5211_v2  ;;  %v5219_v30 = vand.u32 2147483648, %v9875_v58  ;;  %vm11137_vm15 = vmmov %vm11127_vm6 }
 0x5f2   : > { %v4942_v63 = vsel %vm11125_vm9, %v4866_v54, 0.0  ;;  %v5196_v0 = vmul.f32 %v9894_v25, %v5195_v31  ;;  %v5224_v54 = vmul.f32 %v9930_v21, %v9892_v49  ;;  %v4716_v10 = vadd.f32 %v4715_v28, %v4714_v19  ;;  %vm11134_vm9 = vmmov %vm11126_vm1 }
 0x5f3   : > { %4943 = vadd.xlane.f32.xlu1 %v4942_v63  ;;  %v5191_v63 = vsel %vm5188_vm5, %v5190_v47, %v5186_v22  ;;  %v5204_v31 = vand.u32 2147483648, %v9868_v24  ;;  %v5217_v24 = vand.u32 2147483647, %v9875_v58  ;;  %v4723_v19 = vsel %vm11134_vm9, %v9717_v26, 0.0  ;;  %vm5215_vm1 = vmor %vm5213_vm8, %vm5214_vm11 }
 0x5f4   : > { %v5197_v17 = vadd.f32 %v9894_v25, %v5196_v0  ;;  %v4718_v53 = vadd.f32 %v4717_v51, %v4716_v10  ;;  %v5225_v1 = vsub.f32 1.0, %v5224_v54  ;;  %vm5228_vm5 = vweird.f32 %v9892_v49  ;;  %vm11141_vm8 = vmmov %vm11138_vm0 }
 0x5f5   : > { %v5205_v54 = vor.u32 1.1754944e-38, %v5204_v31  ;;  %vm5218_vm2 = vcmp.eq.f32.partialorder %v5217_v24, 8.507059e+37  ;;  %vm5230_vm10 = vmor %vm5228_vm5, %vm5229_vm14 }
 0x5f6   : > { %v4720_v28 = vadd.f32 %v4719_v5, %v4718_v53  ;;  %v5201_v0 = vsel %vm9962_vm4, %v9894_v25, %v5197_v17  ;;  %v5226_v51 = vmul.f32 %v9930_v21, %v5225_v1  ;;  %v4725_v25 = vsel %vm11127_vm6, %v9731_v46, 0.0  ;;  %vm11140_vm4 = vmmov %vm11138_vm0 }
 0x5f7   : > { %v9938_v37 = vpop.f32.mrf.mxu2  ;;  %v5206_v17 = vsel %vm5203_vm3, %v5205_v54, %v5201_v0  ;;  %v5220_v53 = vor.u32 1.1754944e-38, %v5219_v30  ;;  %v4727_v5 = vsel %vm11135_vm7, %v9742_v42, 0.0  ;;  %v4541_v30 = vadd.f32 %v9858_v35, %v9837_v62  ;;  %vm11142_vm9 = vmmov %vm11138_vm0 }
 0x5f8   : > { %v9942_v38 = vpop.f32.mrf.mxu3  ;;  %v4722_v2 = vadd.f32 %v4721_v6, %v4720_v28  ;;  %v5227_v1 = vadd.f32 %v9930_v21, %v5226_v51  ;;  %v4731_v0 = vsel %vm11137_vm15, %v9764_v27, 0.0  ;;  %v4544_v62 = vadd.f32 %v9885_v15, %v9840_v57  ;;  %vm11144_vm3 = vmmov %vm11138_vm0 }
 0x5f9   : > { %v9948_v9 = vpop.f32.mrf.mxu0  ;;  %v4586_v51 = vadd.f32 %v4541_v30, %v9909_v43  ;;  %v4549_v57 = vadd.f32 %v9942_v38, %v9863_v7  ;;  %vm11145_vm6 = vmmov %vm11138_vm0 }
 0x5fa   : > { %v4724_v58 = vadd.f32 %v4723_v19, %v4722_v2  ;;  %v5231_v19 = vsel %vm5230_vm10, %v9930_v21, %v5227_v1  ;;  %v4546_v21 = vadd.f32 %v9914_v29, %v9847_v23  ;;  %v4587_v43 = vadd.f32 %v4544_v62, %v9938_v37  ;;  %v4902_v29 = vpop.xlane.xlu0 %4901  ;;  %v10017_v37 = vld [vmem:[%s10615_s10 + $0x2] ss:$0 sm:$0xff]  ;;  %vm11148_vm7 = vmmov %vm11138_vm0 }
 0x5fb   : > { %5631 = vperm.xlu0 %6501, %v5191_v63   ;;  %v5216_v63 = vsel %vm5215_vm1, %v9900_v60, %v5212_v3  ;;  %v5234_v60 = vand.u32 2147483648, %v9892_v49  ;;  %v5232_v3 = vand.u32 2147483647, %v9892_v49  ;;  %v4733_v49 = vsel %vm11138_vm0, %v9775_v12, 0.0  ;;  %vm11143_vm1 = vmmov %vm11138_vm0 }
 0x5fc   : > { %v5221_v31 = vsel %vm5218_vm2, %v5220_v53, %v5216_v63  ;;  %v4726_v6 = vadd.f32 %v4725_v25, %v4724_v58  ;;  %v4899_v53 = vpop.xlane.xlu1 %4898  ;;  %v4739_v23 = vsel %vm11141_vm8, %v9808_v39, 0.0  ;;  %vm11146_vm2 = vmmov %vm11138_vm0 }
 0x5fd   : > { %v5235_v63 = vor.u32 1.1754944e-38, %v5234_v60  ;;  %vm5233_vm11 = vcmp.eq.f32.partialorder %v5232_v3, 8.507059e+37  ;;  %vm11150_vm14 = vmmov %vm11138_vm0 }
 0x5fe   : > { %v4728_v20 = vadd.f32 %v4727_v5, %v4726_v6  ;;  %v4620_v5 = vmul.f32 %v9610_v48, %v4586_v51  ;;  %v4980_v6 = vadd.f32 %v9813_v50, %v4899_v53  ;;  %v4621_v48 = vmul.f32 %v10017_v37, %v4587_v43  ;;  %vm11152_vm13 = vmmov %vm11138_vm0 }
 0x5ff   : > { %v4425_v22 = vpop.f32.mrf.mxu2  ;;  %v5236_v25 = vsel %vm5233_vm11, %v5235_v63, %v5231_v19  ;;  %vm11154_vm5 = vmmov %vm11138_vm0 }
 0x600   : > { %v4550_v47 = vpop.f32.mrf.mxu3  ;;  %v4730_v54 = vadd.f32 %v4729_v41, %v4728_v20  ;;  %v4588_v15 = vadd.f32 %v4546_v21, %v4425_v22  ;;  %v10024_v22 = vld [vmem:[%s10615_s10 + $0x3] ss:$0 sm:$0xff]  ;;  %v6367_v63 = vmul.f32 -1.442695, %v4980_v6  ;;  %vm11155_vm10 = vmmov %vm11138_vm0 }
 0x601   : > { %v9975_v10 = vpop.f32.mrf.mxu0  ;;  %v4551_v41 = vadd.f32 %v4550_v47, %v9889_v36  ;;  %v4654_v20 = vadd.f32 %v10024_v22, %v4620_v5  ;;  %v4981_v36 = vadd.f32 %v9813_v50, %v4902_v29  ;;  %v4743_v47 = vsel %vm11143_vm1, %v9855_v33, 0.0  ;;  %vm11158_vm15 = vmmov %vm11138_vm0 }
 0x602   : > { %v4732_v35 = vadd.f32 %v4731_v0, %v4730_v54  ;;  %v4741_v0 = vsel %vm11142_vm9, %v9825_v14, 0.0  ;;  %v4622_v19 = vmul.f32 %v10017_v37, %v4588_v15  ;;  %6672 = vpow2.f32 %v6367_v63  ;;  %vm11160_vm11 = vmmov %vm11138_vm0 }
 0x603   : > { %5636 = vperm.xlu0 %6501, %v5206_v17   ;;  %v4735_v17 = vsel %vm11139_vm12, %v9786_v61, 0.0  ;;  %vm11161_vm12 = vmmov %vm11138_vm0 }
 0x604   : > { %v4734_v58 = vadd.f32 %v4733_v49, %v4732_v35  ;;  %v10035_v35 = vmax.f32 %v4654_v20, 0.0  ;;  %v4695_v20 = vld [vmem:[%s10611_s6] sm:$0xff]  ;;  %vm11163_vm8 = vmmov %vm11138_vm0 }
 0x605   : > { %5641 = vperm.xlu2 %6503, %v5221_v31   ;;  %v4737_v31 = vsel %vm11140_vm4, %v9797_v44, 0.0  ;;  %4792 = vmatpush.msrb.mxu1 %v4695_v20  ;;  %vm11162_vm4 = vmmov %vm11138_vm0 }
 0x606   : > { %v4736_v1 = vadd.f32 %v4735_v17, %v4734_v58  ;;  %v4656_v17 = vadd.f32 %v10024_v22, %v4622_v19  ;;  %v6368_v58 = vmul.f32 -1.442695, %v4981_v36 }
 0x607   : > { %v4428_v28 = vpop.f32.mrf.mxu2 }
 0x608   : > { %v4553_v24 = vpop.f32.mrf.mxu3  ;;  %v4589_v3 = vadd.f32 %v4549_v57, %v4428_v28  ;;  %v4738_v38 = vadd.f32 %v4737_v31, %v4736_v1  ;;  %v4655_v28 = vadd.f32 %v10024_v22, %v4621_v48  ;;  %v4747_v31 = vsel %vm11145_vm6, %v9904_v56, 0.0  ;;  %vm11164_vm6 = vmmov %vm11138_vm0 }
 0x609   : > { %v9995_v2 = vpop.f32.mrf.mxu0  ;;  %v4554_v53 = vadd.f32 %v4553_v24, %v9920_v34  ;;  %v4905_v24 = vpop.xlane.xlu2 %4904  ;;  %v10049_v29 = vmax.f32 %v4656_v17, 0.0  ;;  %6674 = vpow2.f32 %v6368_v58 }
 0x60a   : > { %v4740_v51 = vadd.f32 %v4739_v23, %v4738_v38  ;;  %v4623_v49 = vmul.f32 %v10017_v37, %v4589_v3  ;;  %v10044_v57 = vmax.f32 %v4655_v28, 0.0  ;;  %v4749_v23 = vsel %vm11146_vm2, %v10035_v35, 0.0 }
 0x60b   : > { %11147 = vst [vmem:[#allocation14_spill] sm:$0xff] %v10049_v29 }
 0x60c   : > { %5646 = vperm.xlu1 %6502, %v5236_v25   ;;  %v4742_v62 = vadd.f32 %v4741_v0, %v4740_v51  ;;  %v4745_v25 = vsel %vm11144_vm3, %v9877_v4, 0.0  ;;  %v4657_v15 = vadd.f32 %v10024_v22, %v4623_v49  ;;  %v4982_v51 = vadd.f32 %v9813_v50, %v4905_v24 }
 0x60e   : > { %v4744_v43 = vadd.f32 %v4743_v47, %v4742_v62  ;;  %v10059_v0 = vmax.f32 %v4657_v15, 0.0  ;;  %v6369_v58 = vmul.f32 -1.442695, %v4982_v51 }
 0x60f   : > { %v4430_v60 = vpop.f32.mrf.mxu2 }
 0x610   : > { %v4555_v7 = vpop.f32.mrf.mxu3  ;;  %v4590_v54 = vadd.f32 %v4551_v41, %v4430_v60  ;;  %v4746_v60 = vadd.f32 %v4745_v25, %v4744_v43  ;;  %11149 = vst [vmem:[#allocation15_spill] sm:$0xff] %v10059_v0  ;;  %v4755_v17 = vsel %vm11152_vm13, %v10059_v0, 0.0 }
 0x611   : > { %v4286_v30 = vpop.f32.mrf.mxu0  ;;  %v4556_v47 = vadd.f32 %v4555_v7, %v9948_v9 }
 0x612   : > { %v4624_v21 = vmul.f32 %v10017_v37, %v4590_v54  ;;  %v4748_v38 = vadd.f32 %v4747_v31, %v4746_v60  ;;  %v4751_v30 = vsel %vm11148_vm7, %v10044_v57, 0.0  ;;  %v6673_v54 = vpop.eup %6672 }
 0x613   : > { %v10069_v25 = vadd.f32 1.0, %v6673_v54  ;;  %v6675_v15 = vpop.eup %6674 }
 0x614   : > { %v4658_v48 = vadd.f32 %v10024_v22, %v4624_v21  ;;  %v4750_v63 = vadd.f32 %v4749_v23, %v4748_v38  ;;  %v10085_v24 = vadd.f32 1.0, %v6675_v15 }
 0x615   : > { %6676 = vrcp.f32 %v10069_v25  ;;  %vm5243_vm1 = vweird.f32 %v10069_v25 }
 0x616   : > { %v10065_v36 = vmax.f32 %v4658_v48, 0.0  ;;  %v4752_v49 = vadd.f32 %v4751_v30, %v4750_v63  ;;  %6678 = vpow2.f32 %v6369_v58  ;;  %v10099_v30 = vld [vmem:[%s10615_s10 + $0x5] ss:$0 sm:$0xff] }
 0x617   : > { %v4433_v5 = vpop.f32.mrf.mxu2  ;;  %6680 = vrcp.f32 %v10085_v24  ;;  %v4868_v54 = vmul.f32 %v10099_v30, %v10044_v57  ;;  %v4869_v15 = vmul.f32 %v10099_v30, %v10049_v29 }
 0x618   : > { %v4591_v1 = vadd.f32 %v4554_v53, %v4433_v5  ;;  %v4558_v6 = vpop.f32.mrf.mxu3  ;;  %11151 = vst [vmem:[#allocation21_spill] sm:$0xff] %v10065_v36  ;;  %v4757_v9 = vsel %vm11154_vm5, %v10065_v36, 0.0 }
 0x619   : > { %v4287_v34 = vpop.f32.mrf.mxu0  ;;  %v4559_v3 = vadd.f32 %v4558_v6, %v9975_v10  ;;  %v4753_v10 = vsel %vm11150_vm14, %v10049_v29, 0.0  ;;  %vm5258_vm14 = vweird.f32 %v10085_v24 }
 0x61a   : > { %v4625_v41 = vmul.f32 %v10017_v37, %v4591_v1  ;;  %v4754_v5 = vadd.f32 %v4753_v10, %v4752_v49 }
 0x61b   : > { %v4627_v28 = vmul.f32 %v10017_v37, %v4559_v3  ;;  %v6677_v51 = vpop.eup %6676 }
 0x61c   : > { %v4659_v19 = vadd.f32 %v10024_v22, %v4625_v41  ;;  %v4756_v6 = vadd.f32 %v4755_v17, %v4754_v5  ;;  %v6679_v10 = vpop.eup %6678  ;;  %v4948_v17 = vsel %vm11162_vm4, %v4868_v54, 0.0  ;;  %vm5244_vm9 = vweird.f32 %v6677_v51 }
 0x61d   : > { %v4661_v7 = vadd.f32 %v10024_v22, %v4627_v28  ;;  %v6681_v58 = vpop.eup %6680  ;;  %vm5245_vm3 = vmor %vm5243_vm1, %vm5244_vm9 }
 0x61e   : > { %v10073_v53 = vmax.f32 %v4659_v19, 0.0  ;;  %v4867_v19 = vmul.f32 %v10099_v30, %v10035_v35  ;;  %vm5259_vm2 = vweird.f32 %v6681_v58  ;;  %vm11167_vm1 = vmmov %vm11162_vm4 }
 0x61f   : > { %v4435_v62 = vpop.f32.mrf.mxu2  ;;  %v10088_v41 = vmax.f32 %v4661_v7, 0.0  ;;  %v5254_v7 = vmul.f32 %v6681_v58, %v10085_v24  ;;  %vm5260_vm13 = vmor %vm5258_vm14, %vm5259_vm2 }
 0x620   : > { %11153 = vst [vmem:[#allocation17_spill] sm:$0xff] %v10073_v53  ;;  %v4592_v21 = vadd.f32 %v4556_v47, %v4435_v62  ;;  %v4560_v43 = vpop.f32.mrf.mxu3  ;;  %v4759_v23 = vsel %vm11155_vm10, %v10073_v53, 0.0  ;;  %v4945_v49 = vsel %vm11161_vm12, %v4867_v19, 0.0  ;;  %v5249_v19 = vand.u32 2147483648, %v10069_v25  ;;  %vm11165_vm12 = vmmov %vm11162_vm4 }
 0x621   : > { %v4561_v31 = vadd.f32 %v4560_v43, %v9995_v2  ;;  %v4758_v2 = vadd.f32 %v4757_v9, %v4756_v6  ;;  %11156 = vst [vmem:[#allocation13_spill] sm:$0xff] %v10088_v41  ;;  %v4763_v63 = vsel %vm11138_vm0, %v10088_v41, 0.0  ;;  %v5110_v43 = vadd.f32 1.0, %v6679_v10 }
 0x622   : > { %v4626_v1 = vmul.f32 %v10017_v37, %v4592_v21  ;;  %v5239_v21 = vmul.f32 %v6677_v51, %v10069_v25 }
 0x623   : > { %v4628_v60 = vmul.f32 %v10017_v37, %v4561_v31  ;;  %v4760_v38 = vadd.f32 %v4759_v23, %v4758_v2  ;;  %6682 = vrcp.f32 %v5110_v43 }
 0x624   : > { %v4660_v34 = vadd.f32 %v10024_v22, %v4626_v1  ;;  %v5240_v9 = vsub.f32 1.0, %v5239_v21 }
 0x625   : > { %v4662_v48 = vadd.f32 %v10024_v22, %v4628_v60  ;;  %v4951_v60 = vsel %vm11163_vm8, %v4869_v15, 0.0  ;;  %vm11166_vm8 = vmmov %vm11162_vm4 }
 0x626   : > { %v10090_v3 = vmax.f32 %v4660_v34, 0.0  ;;  %v5241_v23 = vmul.f32 %v6677_v51, %v5240_v9  ;;  %v5255_v34 = vsub.f32 1.0, %v5254_v7  ;;  %v5279_v7 = vand.u32 2147483648, %v5110_v43 }
 0x627   : > { %v10094_v20 = vmax.f32 %v4662_v48, 0.0 }
 0x628   : > { %11157 = vst [vmem:[#allocation23_spill] sm:$0xff] %v10090_v3  ;;  %v4761_v37 = vsel %vm11158_vm15, %v10090_v3, 0.0  ;;  %vm5273_vm15 = vweird.f32 %v5110_v43 }
 0x629   : > { %11159 = vst [vmem:[#allocation18_spill] sm:$0xff] %v10094_v20  ;;  %v4762_v22 = vadd.f32 %v4761_v37, %v4760_v38  ;;  %v4765_v28 = vsel %vm11160_vm11, %v10094_v20, 0.0  ;;  %v6683_v48 = vpop.eup %6682  ;;  %v5242_v37 = vadd.f32 %v6677_v51, %v5241_v23  ;;  %v5280_v23 = vor.u32 1.1754944e-38, %v5279_v7 }
 0x62a   : > { %v5269_v10 = vmul.f32 %v6683_v48, %v5110_v43  ;;  %vm5274_vm10 = vweird.f32 %v6683_v48 }
 0x62b   : > { %v4764_v47 = vadd.f32 %v4763_v63, %v4762_v22  ;;  %v5256_v22 = vmul.f32 %v6681_v58, %v5255_v34  ;;  %v5247_v63 = vand.u32 2147483647, %v10069_v25  ;;  %vm5275_vm0 = vmor %vm5273_vm15, %vm5274_vm10 }
 0x62d   : > { %v4766_v62 = vadd.f32 %v4765_v28, %v4764_v47  ;;  %4946 = vadd.xlane.f32.xlu0 %v4945_v49  ;;  %v5246_v47 = vsel %vm5245_vm3, %v6677_v51, %v5242_v37  ;;  %v5250_v28 = vor.u32 1.1754944e-38, %v5249_v19  ;;  %v5257_v49 = vadd.f32 %v6681_v58, %v5256_v22  ;;  %v4914_v22 = vpop.xlane.xlu2 %4913 }
 0x62e   : > { %4949 = vadd.xlane.f32.xlu2 %v4948_v17  ;;  %vm5248_vm7 = vcmp.eq.f32.partialorder %v5247_v63, 8.507059e+37  ;;  %v5270_v17 = vsub.f32 1.0, %v5269_v10 }
 0x62f   : > { %v4767_v5 = vrot.slane %v4766_v62, 4  ;;  %v5251_v21 = vsel %vm5248_vm7, %v5250_v28, %v5246_v47  ;;  %v5261_v25 = vsel %vm5260_vm13, %v6681_v58, %v5257_v49  ;;  %v4985_v47 = vadd.f32 %v9813_v50, %v4914_v22  ;;  %vm11168_vm7 = vmmov %vm11167_vm1 }
 0x630   : > { %v5271_v15 = vmul.f32 %v6683_v48, %v5270_v17  ;;  %v4870_v28 = vmul.f32 %v10099_v30, %v10059_v0 }
 0x631   : > { %v4768_v31 = vadd.f32 %v4767_v5, %v4766_v62  ;;  %v5264_v62 = vand.u32 2147483648, %v10085_v24  ;;  %v5262_v5 = vand.u32 2147483647, %v10085_v24  ;;  %v6372_v17 = vmul.f32 -1.442695, %v4985_v47 }
 0x632   : > { %v5272_v51 = vadd.f32 %v6683_v48, %v5271_v15 }
 0x633   : > { %v4769_v1 = vrot.slane %v4768_v31, 2  ;;  %vm5263_vm5 = vcmp.eq.f32.partialorder %v5262_v5, 8.507059e+37  ;;  %v4954_v5 = vsel %vm11165_vm12, %v4870_v28, 0.0 }
 0x635   : > { %v4770_v6 = vadd.f32 %v4769_v1, %v4768_v31  ;;  %v5265_v31 = vor.u32 1.1754944e-38, %v5264_v62  ;;  %v5277_v1 = vand.u32 2147483647, %v5110_v43  ;;  %v4923_v10 = vpop.xlane.xlu2 %4922 }
 0x636   : > { %4952 = vadd.xlane.f32.xlu1 %v4951_v60  ;;  %v5276_v60 = vsel %vm5275_vm0, %v6683_v48, %v5272_v51 }
 0x637   : > { %v4771_v2 = vrot.slane %v4770_v6, 1  ;;  %v5266_v9 = vsel %vm5263_vm5, %v5265_v31, %v5261_v25  ;;  %vm5278_vm11 = vcmp.eq.f32.partialorder %v5277_v1, 8.507059e+37  ;;  %v4871_v25 = vmul.f32 %v10099_v30, %v10065_v36 }
 0x638   : > { %v5281_v24 = vsel %vm5278_vm11, %v5280_v23, %v5276_v60 }
 0x639   : > { %v4772_v38 = vadd.f32 %v4771_v2, %v4770_v6  ;;  %v4908_v6 = vpop.xlane.xlu1 %4907  ;;  %v4911_v2 = vpop.xlane.xlu0 %4910  ;;  %v4957_v1 = vsel %vm11162_vm4, %v4871_v25, 0.0 }
 0x63a   : > { %v4983_v34 = vadd.f32 %v9813_v50, %v4908_v6  ;;  %v4984_v19 = vadd.f32 %v9813_v50, %v4911_v2  ;;  %v4988_v6 = vadd.f32 %v9813_v50, %v4923_v10 }
 0x63b   : > { %v4773_v54 = vmul.f32 0.00390625, %v4772_v38 }
 0x63c   : > { %v6370_v58 = vmul.f32 -1.442695, %v4983_v34  ;;  %v6371_v43 = vmul.f32 -1.442695, %v4984_v19  ;;  %v6375_v2 = vmul.f32 -1.442695, %v4988_v6  ;;  %v4872_v19 = vmul.f32 %v10099_v30, %v10073_v53 }
 0x63d   : > { %6356 = vmatmul.msk.f32.vlgmr.msrb.gmra.mxu1 %vm11164_vm6, %v4773_v54  ;;  %v4932_v51 = vpop.xlane.xlu2 %4931 }
 0x63e   : > { %6684 = vpow2.f32 %v6370_v58 }
 0x641   : > { %5651 = vperm.xlu0 %6501, %v5251_v21   ;;  %v4920_v38 = vpop.xlane.xlu0 %4919  ;;  %v4917_v25 = vpop.xlane.xlu1 %4916 }
 0x642   : > { %v4987_v63 = vadd.f32 %v9813_v50, %v4920_v38 }
 0x644   : > { %v6685_v37 = vpop.eup %6684  ;;  %v6374_v62 = vmul.f32 -1.442695, %v4987_v63 }
 0x645   : > { %v10126_v54 = vadd.f32 1.0, %v6685_v37  ;;  %v10149_v22 = vpop.permute.xlu2 %5621 }
 0x646   : > { %5656 = vperm.xlu2 %6503, %v5266_v9  }
 0x647   : > { %6686 = vrcp.f32 %v10126_v54  ;;  %vm5288_vm3 = vweird.f32 %v10126_v54 }
 0x648   : > { %6688 = vpow2.f32 %v6371_v43 }
 0x649   : > { %v4929_v48 = vpop.xlane.xlu0 %4928  ;;  %6690 = vpow2.f32 %v6374_v62  ;;  %v4991_v62 = vadd.f32 %v9813_v50, %v4932_v51 }
 0x64a   : > { %v4990_v9 = vadd.f32 %v9813_v50, %v4929_v48  ;;  %6692 = vpow2.f32 %v6372_v17  ;;  %v4960_v17 = vsel %vm11167_vm1, %v4872_v19, 0.0 }
 0x64b   : > { %v6378_v6 = vmul.f32 -1.442695, %v4991_v62 }
 0x64c   : > { %v6377_v23 = vmul.f32 -1.442695, %v4990_v9 }
 0x64d   : > { %v6687_v49 = vpop.eup %6686 }
 0x64e   : > { %v6689_v31 = vpop.eup %6688  ;;  %v5284_v15 = vmul.f32 %v6687_v49, %v10126_v54  ;;  %vm5289_vm9 = vweird.f32 %v6687_v49 }
 0x64f   : > { %5661 = vperm.xlu1 %6502, %v5281_v24   ;;  %v10140_v7 = vadd.f32 1.0, %v6689_v31  ;;  %v4874_v24 = vmul.f32 %v10099_v30, %v10088_v41  ;;  %v6691_v58 = vpop.eup %6690  ;;  %vm5290_vm6 = vmor %vm5288_vm3, %vm5289_vm9 }
 0x650   : > { %v5285_v60 = vsub.f32 1.0, %v5284_v15  ;;  %v6693_v37 = vpop.eup %6692  ;;  %v10152_v48 = vadd.f32 1.0, %v6691_v58  ;;  %v5292_v15 = vand.u32 2147483647, %v10126_v54 }
 0x651   : > { %v10133_v21 = vpop.permute.xlu0 %5616  ;;  %6694 = vrcp.f32 %v10140_v7  ;;  %v4966_v63 = vsel %vm11166_vm8, %v4874_v24, 0.0  ;;  %v10155_v10 = vadd.f32 1.0, %v6693_v37  ;;  %vm5303_vm13 = vweird.f32 %v10140_v7 }
 0x652   : > { %v5286_v38 = vmul.f32 %v6687_v49, %v5285_v60  ;;  %6696 = vpow2.f32 %v6377_v23  ;;  %v4875_v23 = vmul.f32 %v10099_v30, %v10094_v20  ;;  %vm5293_vm2 = vcmp.eq.f32.partialorder %v5292_v15, 8.507059e+37 }
 0x653   : > { %6698 = vpow2.f32 %v6375_v2  ;;  %vm5348_vm11 = vweird.f32 %v10152_v48  ;;  %vm5318_vm4 = vweird.f32 %v10155_v10 }
 0x654   : > { %v5287_v47 = vadd.f32 %v6687_v49, %v5286_v38  ;;  %6700 = vrcp.f32 %v10152_v48  ;;  %v4969_v19 = vsel %vm11168_vm7, %v4875_v23, 0.0 }
 0x655   : > { %6702 = vrcp.f32 %v10155_v10 }
 0x657   : > { %v10157_v28 = vpop.eup %6694 }
 0x658   : > { %v6697_v9 = vpop.eup %6696  ;;  %v5299_v51 = vmul.f32 %v10157_v28, %v10140_v7  ;;  %vm5304_vm14 = vweird.f32 %v10157_v28 }
 0x659   : > { %vm5305_vm5 = vmor %vm5303_vm13, %vm5304_vm14 }
 0x65a   : > { %v4938_v34 = vpop.xlane.xlu0 %4937  ;;  %v5300_v2 = vsub.f32 1.0, %v5299_v51 }
 0x65b   : > { %v4993_v43 = vadd.f32 %v9813_v50, %v4938_v34  ;;  %v6699_v34 = vpop.eup %6698 }
 0x65c   : > { %v10172_v38 = vpop.eup %6700 }
 0x65d   : > { %v6380_v31 = vmul.f32 -1.442695, %v4993_v43  ;;  %v10178_v43 = vpop.eup %6702  ;;  %vm5349_vm15 = vweird.f32 %v10172_v38 }
 0x65e   : > { %v5314_v15 = vmul.f32 %v10178_v43, %v10155_v10  ;;  %vm5319_vm0 = vweird.f32 %v10178_v43  ;;  %vm10235_vm12 = vmor %vm5348_vm11, %vm5349_vm15 }
 0x65f   : > { %6704 = vpow2.f32 %v6380_v31  ;;  %vm10252_vm8 = vmor %vm5318_vm4, %vm5319_vm0 }
 0x660   : > { %v4941_v24 = vpop.xlane.xlu2 %4940  ;;  %6706 = vpow2.f32 %v6378_v6 }
 0x661   : > { %v4994_v37 = vadd.f32 %v9813_v50, %v4941_v24  ;;  %v5315_v24 = vsub.f32 1.0, %v5314_v15 }
 0x663   : > { %v6381_v31 = vmul.f32 -1.442695, %v4994_v37  ;;  %v5307_v37 = vand.u32 2147483647, %v10140_v7 }
 0x665   : > { %v6705_v62 = vpop.eup %6704  ;;  %vm5308_vm10 = vcmp.eq.f32.partialorder %v5307_v37, 8.507059e+37 }
 0x666   : > { %v10188_v51 = vadd.f32 1.0, %v6705_v62 }
 0x668   : > { %vm5438_vm0 = vweird.f32 %v10188_v51 }
 0x66b   : > { %4955 = vadd.xlane.f32.xlu0 %v4954_v5  ;;  %v5294_v5 = vand.u32 2147483648, %v10126_v54  ;;  %v10170_v54 = vadd.f32 1.0, %v6697_v9 }
 0x66d   : > { %v5295_v60 = vor.u32 1.1754944e-38, %v5294_v5  ;;  %6708 = vrcp.f32 %v10170_v54  ;;  %v5344_v5 = vmul.f32 %v10172_v38, %v10152_v48 }
 0x66f   : > { %4958 = vadd.xlane.f32.xlu2 %v4957_v1  ;;  %v5291_v1 = vsel %vm5290_vm6, %v6687_v49, %v5287_v47  ;;  %v10174_v49 = vadd.f32 1.0, %v6699_v34  ;;  %v4926_v47 = vpop.xlane.xlu1 %4925  ;;  %v5309_v34 = vand.u32 2147483648, %v10140_v7  ;;  %vm5393_vm6 = vweird.f32 %v10170_v54 }
 0x670   : > { %v5296_v58 = vsel %vm5293_vm2, %v5295_v60, %v5291_v1  ;;  %v6707_v1 = vpop.eup %6706  ;;  %v10197_v60 = vld [vmem:[%s10615_s10 + $0x6] ss:$0 sm:$0xff] }
 0x671   : > { %6710 = vrcp.f32 %v10174_v49  ;;  %v4989_v23 = vadd.f32 %v10197_v60, %v4926_v47  ;;  %vm5363_vm14 = vweird.f32 %v10174_v49 }
 0x672   : > { %6712 = vpow2.f32 %v6381_v31  ;;  %v5316_v31 = vmul.f32 %v10178_v43, %v5315_v24 }
 0x673   : > { %v10192_v6 = vpop.eup %6708 }
 0x674   : > { %v5389_v62 = vmul.f32 %v10192_v6, %v10170_v54  ;;  %v5317_v24 = vadd.f32 %v10178_v43, %v5316_v31  ;;  %vm5394_vm3 = vweird.f32 %v10192_v6 }
 0x675   : > { %vm5395_vm7 = vmor %vm5393_vm6, %vm5394_vm3 }
 0x677   : > { %4967 = vadd.xlane.f32.xlu2 %v4966_v63  ;;  %v4986_v63 = vadd.f32 %v9813_v50, %v4917_v25  ;;  %v5345_v25 = vsub.f32 1.0, %v5344_v5  ;;  %v5310_v5 = vor.u32 1.1754944e-38, %v5309_v34  ;;  %v5354_v34 = vand.u32 2147483648, %v10152_v48 }
 0x679   : > { %4961 = vadd.xlane.f32.xlu1 %v4960_v17  ;;  %v5301_v17 = vmul.f32 %v10157_v28, %v5300_v2  ;;  %v6373_v9 = vmul.f32 -1.442695, %v4986_v63  ;;  %v4935_v2 = vpop.xlane.xlu1 %4934  ;;  %v5346_v47 = vmul.f32 %v10172_v38, %v5345_v25  ;;  %v5390_v25 = vsub.f32 1.0, %v5389_v62 }
 0x67a   : > { %v4992_v53 = vadd.f32 %v10197_v60, %v4935_v2  ;;  %v5369_v2 = vand.u32 2147483648, %v10174_v49 }
 0x67b   : > { %v5302_v50 = vadd.f32 %v10157_v28, %v5301_v17  ;;  %6714 = vpow2.f32 %v6373_v9  ;;  %v6376_v17 = vmul.f32 -1.442695, %v4989_v23  ;;  %v10218_v9 = vpop.permute.xlu0 %5631 }
 0x67c   : > { %6716 = vrcp.f32 %v10188_v51 }
 0x67d   : > { %v5306_v63 = vsel %vm5305_vm5, %v10157_v28, %v5302_v50  ;;  %v5347_v50 = vadd.f32 %v10172_v38, %v5346_v47 }
 0x67f   : > { %5666 = vperm.xlu0 %6501, %v5296_v58   ;;  %v10201_v58 = vadd.f32 1.0, %v6707_v1  ;;  %v5311_v1 = vsel %vm5308_vm10, %v5310_v5, %v5306_v63  ;;  %v5352_v63 = vand.u32 2147483647, %v10152_v48  ;;  %v5391_v48 = vmul.f32 %v10192_v6, %v5390_v25 }
 0x681   : > { %4970 = vadd.xlane.f32.xlu1 %v4969_v19  ;;  %v10205_v19 = vpop.eup %6710  ;;  %6718 = vrcp.f32 %v10201_v58  ;;  %v10227_v37 = vpop.permute.xlu1 %5626  ;;  %vm5353_vm9 = vcmp.eq.f32.partialorder %v5352_v63, 8.507059e+37  ;;  %v5392_v41 = vadd.f32 %v10192_v6, %v5391_v48  ;;  %vm5408_vm11 = vweird.f32 %v10201_v58 }
 0x682   : > { %v5359_v7 = vmul.f32 %v10205_v19, %v10174_v49  ;;  %v6713_v15 = vpop.eup %6712  ;;  %6720 = vpow2.f32 %v6376_v17  ;;  %v5324_v17 = vand.u32 2147483648, %v10155_v10  ;;  %vm5364_vm2 = vweird.f32 %v10205_v19 }
 0x683   : > { %v6715_v28 = vpop.eup %6714  ;;  %v10229_v20 = vadd.f32 1.0, %v6713_v15  ;;  %v5351_v15 = vsel %vm10235_vm12, %v10172_v38, %v5347_v50  ;;  %v5321_v38 = vsel %vm10252_vm8, %v10178_v43, %v5317_v24  ;;  %v10267_v43 = vpop.permute.xlu0 %5636  ;;  %vm5365_vm13 = vmor %vm5363_vm14, %vm5364_vm2 }
 0x684   : > { %v10222_v23 = vpop.eup %6716  ;;  %v5360_v47 = vsub.f32 1.0, %v5359_v7  ;;  %v10233_v5 = vadd.f32 1.0, %v6715_v28  ;;  %v5355_v28 = vor.u32 1.1754944e-38, %v5354_v34  ;;  %v5325_v34 = vor.u32 1.1754944e-38, %v5324_v17 }
 0x685   : > { %v5434_v7 = vmul.f32 %v10222_v23, %v10188_v51  ;;  %6722 = vrcp.f32 %v10229_v20  ;;  %v5397_v17 = vand.u32 2147483647, %v10170_v54  ;;  %vm5439_vm15 = vweird.f32 %v10222_v23 }
 0x686   : > { %6724 = vrcp.f32 %v10233_v5  ;;  %v5356_v25 = vsel %vm5353_vm9, %v5355_v28, %v5351_v15  ;;  %v10270_v15 = vpop.permute.xlu2 %5641  ;;  %vm10304_vm12 = vmor %vm5438_vm0, %vm5439_vm15  ;;  %vm5453_vm2 = vweird.f32 %v10229_v20 }
 0x687   : > { %v10241_v31 = vpop.eup %6718  ;;  %v5435_v63 = vsub.f32 1.0, %v5434_v7  ;;  %vm5398_vm5 = vcmp.eq.f32.partialorder %v5397_v17, 8.507059e+37 }
 0x688   : > { %v6721_v50 = vpop.eup %6720  ;;  %v5404_v62 = vmul.f32 %v10241_v31, %v10201_v58  ;;  %vm5409_vm4 = vweird.f32 %v10241_v31 }
 0x689   : > { %v4944_v36 = vpop.xlane.xlu1 %4943  ;;  %v10276_v48 = vadd.f32 1.0, %v6721_v50  ;;  %vm10322_vm9 = vmor %vm5408_vm11, %vm5409_vm4 }
 0x68a   : > { %v5405_v7 = vsub.f32 1.0, %v5404_v62  ;;  %v5370_v62 = vor.u32 1.1754944e-38, %v5369_v2 }
 0x68b   : > { %v10279_v28 = vpop.eup %6722  ;;  %6726 = vrcp.f32 %v10276_v48 }
 0x68c   : > { %v5406_v29 = vmul.f32 %v10241_v31, %v5405_v7  ;;  %vm5454_vm6 = vweird.f32 %v10279_v28 }
 0x68f   : > { %5671 = vperm.xlu2 %6503, %v5311_v1   ;;  %v5322_v1 = vand.u32 2147483647, %v10155_v10  ;;  %v5361_v10 = vmul.f32 %v10205_v19, %v5360_v47  ;;  %v5399_v47 = vand.u32 2147483648, %v10170_v54  ;;  %v5436_v54 = vmul.f32 %v10222_v23, %v5435_v63 }
 0x691   : > { %vm5323_vm1 = vcmp.eq.f32.partialorder %v5322_v1, 8.507059e+37  ;;  %v5362_v1 = vadd.f32 %v10205_v19, %v5361_v10  ;;  %v10285_v10 = vpop.eup %6724  ;;  %v5400_v50 = vor.u32 1.1754944e-38, %v5399_v47  ;;  %v10297_v47 = vpop.permute.xlu1 %5646 }
 0x692   : > { %v5326_v24 = vsel %vm5323_vm1, %v5325_v34, %v5321_v38  ;;  %v5396_v38 = vsel %vm5395_vm7, %v10192_v6, %v5392_v41  ;;  %v6379_v34 = vmul.f32 -1.442695, %v4992_v53  ;;  %v5449_v41 = vmul.f32 %v10279_v28, %v10229_v20  ;;  %vm5455_vm7 = vmor %vm5453_vm2, %vm5454_vm6 }
 0x693   : > { %v5401_v0 = vsel %vm5398_vm5, %v5400_v50, %v5396_v38  ;;  %v5329_v53 = vmul.f32 %v10285_v10, %v10233_v5  ;;  %v5407_v38 = vadd.f32 %v10241_v31, %v5406_v29  ;;  %v5414_v50 = vand.u32 2147483648, %v10201_v58  ;;  %v10318_v29 = vpop.eup %6726 }
 0x694   : > { %6728 = vpow2.f32 %v6379_v34  ;;  %vm11177_vm1 = vcmask 261120   ;;  %vm5333_vm5 = vweird.f32 %v10233_v5  ;;  %vm5379_vm0 = vweird.f32 %v10318_v29 }
 0x695   : > { %vm11178_vm2 = vcmask 15360  }
 0x697   : > { %5686 = vperm.xlu2 %6503, %v5356_v25   ;;  %v5367_v25 = vand.u32 2147483647, %v10174_v49  ;;  %v5437_v49 = vadd.f32 %v10222_v23, %v5436_v54  ;;  %v4995_v54 = vadd.f32 %v10197_v60, %v4944_v36 }
 0x699   : > { %vm5368_vm10 = vcmp.eq.f32.partialorder %v5367_v25, 8.507059e+37  ;;  %v5450_v25 = vsub.f32 1.0, %v5449_v41 }
 0x69a   : > { %5676 = vperm.xlu1 %6502, %v5326_v24   ;;  %v5366_v24 = vsel %vm5365_vm13, %v10205_v19, %v5362_v1  ;;  %v5444_v19 = vand.u32 2147483648, %v10188_v51  ;;  %vm5334_vm13 = vweird.f32 %v10285_v10 }
 0x69b   : > { %v5371_v63 = vsel %vm5368_vm10, %v5370_v62, %v5366_v24  ;;  %vm5335_vm10 = vmor %vm5333_vm5, %vm5334_vm13 }
 0x69c   : > { %v5445_v62 = vor.u32 1.1754944e-38, %v5444_v19  ;;  %v6382_v19 = vmul.f32 -1.442695, %v4995_v54 }
 0x69f   : > { %5701 = vperm.xlu2 %6503, %v5401_v0   ;;  %v5442_v0 = vand.u32 2147483647, %v10188_v51  ;;  %v5441_v51 = vsel %vm10304_vm12, %v10222_v23, %v5437_v49  ;;  %v6729_v23 = vpop.eup %6728  ;;  %v5411_v49 = vsel %vm10322_vm9, %v10241_v31, %v5407_v38 }
 0x6a0   : > { %v4947_v6 = vpop.xlane.xlu0 %4946 }
 0x6a1   : > { %v4996_v17 = vadd.f32 %v10197_v60, %v4947_v6  ;;  %v4950_v1 = vpop.xlane.xlu2 %4949  ;;  %v4873_v6 = vmul.f32 %v10099_v30, %v10090_v3  ;;  %vm5443_vm8 = vcmp.eq.f32.partialorder %v5442_v0, 8.507059e+37  ;;  %v5451_v30 = vmul.f32 %v10279_v28, %v5450_v25 }
 0x6a2   : > { %v4997_v2 = vadd.f32 %v10197_v60, %v4950_v1  ;;  %5691 = vperm.xlu1 %6502, %v5371_v63   ;;  %v5412_v63 = vand.u32 2147483647, %v10201_v58  ;;  %v5446_v41 = vsel %vm5443_vm8, %v5445_v62, %v5441_v51  ;;  %v5330_v58 = vsub.f32 1.0, %v5329_v53 }
 0x6a3   : > { %v6383_v34 = vmul.f32 -1.442695, %v4996_v17  ;;  %v5415_v17 = vor.u32 1.1754944e-38, %v5414_v50  ;;  %v4963_v1 = vsel %vm11177_vm1, %v4873_v6, 0.0  ;;  %v10331_v0 = vadd.f32 1.0, %v6729_v23 }
 0x6a4   : > { %v6384_v24 = vmul.f32 -1.442695, %v4997_v2  ;;  %vm5413_vm3 = vcmp.eq.f32.partialorder %v5412_v63, 8.507059e+37  ;;  %v5459_v25 = vand.u32 2147483648, %v10229_v20  ;;  %v5457_v53 = vand.u32 2147483647, %v10229_v20 }
 0x6a5   : > { %6730 = vpow2.f32 %v6383_v34  ;;  %v5416_v7 = vsel %vm5413_vm3, %v5415_v17, %v5411_v49  ;;  %v5452_v34 = vadd.f32 %v10279_v28, %v5451_v30  ;;  %v5331_v50 = vmul.f32 %v10285_v10, %v5330_v58 }
 0x6a6   : > { %6732 = vpow2.f32 %v6384_v24  ;;  %v5374_v6 = vmul.f32 %v10318_v29, %v10276_v48  ;;  %v5460_v36 = vor.u32 1.1754944e-38, %v5459_v25  ;;  %vm5458_vm14 = vcmp.eq.f32.partialorder %v5457_v53, 8.507059e+37 }
 0x6a7   : > { %5716 = vperm.xlu2 %6503, %v5446_v41   ;;  %6734 = vpow2.f32 %v6382_v19  ;;  %v5456_v62 = vsel %vm5455_vm7, %v10279_v28, %v5452_v34  ;;  %v5332_v20 = vadd.f32 %v10285_v10, %v5331_v50  ;;  %v5339_v49 = vand.u32 2147483648, %v10233_v5 }
 0x6a8   : > { %6736 = vrcp.f32 %v10331_v0  ;;  %v5461_v41 = vsel %vm5458_vm14, %v5460_v36, %v5456_v62  ;;  %v5337_v28 = vand.u32 2147483647, %v10233_v5  ;;  %v5375_v30 = vsub.f32 1.0, %v5374_v6 }
 0x6a9   : > { %v4953_v2 = vpop.xlane.xlu1 %4952  ;;  %4964 = vadd.xlane.f32.xlu0 %v4963_v1  ;;  %v5336_v58 = vsel %vm5335_vm10, %v10285_v10, %v5332_v20  ;;  %v4699_v10 = vld [vmem:[%s10613_s8] sm:$0x1]  ;;  %vm5378_vm7 = vweird.f32 %v10276_v48  ;;  %vm5423_vm10 = vweird.f32 %v10331_v0 }
 0x6aa   : > { %5706 = vperm.xlu1 %6502, %v5416_v7   ;;  %v4998_v38 = vadd.f32 %v10197_v60, %v4953_v2  ;;  %v5340_v7 = vor.u32 1.1754944e-38, %v5339_v49  ;;  %vm5338_vm15 = vcmp.eq.f32.partialorder %v5337_v28, 8.507059e+37  ;;  %vm5380_vm14 = vmor %vm5378_vm7, %vm5379_vm0 }
 0x6ab   : > { %v6731_v31 = vpop.eup %6730 }
 0x6ac   : > { %v6733_v54 = vpop.eup %6732  ;;  %v10337_v51 = vadd.f32 1.0, %v6731_v31  ;;  %v6385_v63 = vmul.f32 -1.442695, %v4998_v38  ;;  %v5376_v38 = vmul.f32 %v10318_v29, %v5375_v30  ;;  %v5341_v5 = vsel %vm5338_vm15, %v5340_v7, %v5336_v58 }
 0x6ad   : > { %v10343_v24 = vadd.f32 1.0, %v6733_v54  ;;  %v6735_v23 = vpop.eup %6734 }
 0x6ae   : > { %6738 = vrcp.f32 %v10337_v51  ;;  %v10355_v19 = vpop.eup %6736  ;;  %v10357_v1 = vadd.f32 1.0, %v6735_v23  ;;  %v5489_v53 = vand.u32 2147483648, %v10337_v51  ;;  %v5377_v49 = vadd.f32 %v10318_v29, %v5376_v38 }
 0x6af   : > { %6740 = vrcp.f32 %v10343_v24  ;;  %v5419_v54 = vmul.f32 %v10355_v19, %v10331_v0  ;;  %v5504_v36 = vand.u32 2147483648, %v10343_v24  ;;  %vm5483_vm4 = vweird.f32 %v10337_v51 }
 0x6b0   : > { %6742 = vpow2.f32 %v6385_v63  ;;  %v5487_v63 = vand.u32 2147483647, %v10337_v51  ;;  %vm5498_vm9 = vweird.f32 %v10343_v24  ;;  %vm5424_vm5 = vweird.f32 %v10355_v19 }
 0x6b1   : > { %6744 = vrcp.f32 %v10357_v1  ;;  %v5420_v58 = vsub.f32 1.0, %v5419_v54  ;;  %v5505_v3 = vor.u32 1.1754944e-38, %v5504_v36  ;;  %v5429_v36 = vand.u32 2147483648, %v10331_v0  ;;  %vm5425_vm15 = vmor %vm5423_vm10, %vm5424_vm5 }
 0x6b2   : > { %5721 = vperm.xlu1 %6502, %v5461_v41   ;;  %v5502_v41 = vand.u32 2147483647, %v10343_v24  ;;  %vm5488_vm1 = vcmp.eq.f32.partialorder %v5487_v63, 8.507059e+37 }
 0x6b4   : > { %v6739_v17 = vpop.eup %6738  ;;  %vm5503_vm6 = vcmp.eq.f32.partialorder %v5502_v41, 8.507059e+37 }
 0x6b5   : > { %v6741_v2 = vpop.eup %6740  ;;  %v5479_v34 = vmul.f32 %v6739_v17, %v10337_v51  ;;  %vm5484_vm11 = vweird.f32 %v6739_v17  ;;  %v5384_v51 = vand.u32 2147483648, %v10276_v48 }
 0x6b6   : > { %v5494_v31 = vmul.f32 %v6741_v2, %v10343_v24  ;;  %v6743_v62 = vpop.eup %6742  ;;  %vm5499_vm12 = vweird.f32 %v6741_v2  ;;  %vm5485_vm8 = vmor %vm5483_vm4, %vm5484_vm11  ;;  %v5382_v24 = vand.u32 2147483647, %v10276_v48 }
 0x6b7   : > { %v5480_v25 = vsub.f32 1.0, %v5479_v34  ;;  %v10376_v7 = vadd.f32 1.0, %v6743_v62  ;;  %v5490_v34 = vor.u32 1.1754944e-38, %v5489_v53  ;;  %vm5500_vm3 = vmor %vm5498_vm9, %vm5499_vm12  ;;  %v6745_v38 = vpop.eup %6744  ;;  %v5385_v53 = vor.u32 1.1754944e-38, %v5384_v51 }
 0x6b8   : > { %v5495_v50 = vsub.f32 1.0, %v5494_v31  ;;  %vm5383_vm13 = vcmp.eq.f32.partialorder %v5382_v24, 8.507059e+37  ;;  %vm5469_vm11 = vweird.f32 %v6745_v38  ;;  %vm5468_vm12 = vweird.f32 %v10357_v1 }
 0x6b9   : > { %v5481_v6 = vmul.f32 %v6739_v17, %v5480_v25  ;;  %6746 = vrcp.f32 %v10376_v7  ;;  %vm5470_vm4 = vmor %vm5468_vm12, %vm5469_vm11  ;;  %v5519_v51 = vand.u32 2147483648, %v10376_v7 }
 0x6ba   : > { %v4794_v20 = vpop.f32.mrf.mxu1  ;;  %v5496_v23 = vmul.f32 %v6741_v2, %v5495_v50 }
 0x6bb   : > { %v4795_v28 = vadd.f32 %v4794_v20, %v4699_v10  ;;  %v5482_v30 = vadd.f32 %v6739_v17, %v5481_v6 }
 0x6bc   : > { %v5497_v31 = vadd.f32 %v6741_v2, %v5496_v23 }
 0x6bd   : > { %v4797_v25 = vmax.f32 %v4795_v28, 0.0  ;;  %5681 = vperm.xlu0 %6501, %v5341_v5   ;;  %v5486_v50 = vsel %vm5485_vm8, %v6739_v17, %v5482_v30  ;;  %v5381_v17 = vsel %vm5380_vm14, %v10318_v29, %v5377_v49  ;;  %v5464_v5 = vmul.f32 %v6745_v38, %v10357_v1 }
 0x6be   : > { %v5491_v10 = vsel %vm5488_vm1, %v5490_v34, %v5486_v50  ;;  %v5501_v6 = vsel %vm5500_vm3, %v6741_v2, %v5497_v31  ;;  %v5421_v2 = vmul.f32 %v10355_v19, %v5420_v58  ;;  %v5386_v62 = vsel %vm5383_vm13, %v5385_v53, %v5381_v17 }
 0x6bf   : > { %5731 = vperm.xlu2 %6503, %v5491_v10   ;;  %6358 = vmatmul.msk.f32.vlgmr.msrb.gmra.mxu0 %vm11178_vm2, %v4797_v25  ;;  %v5506_v54 = vsel %vm5503_vm6, %v5505_v3, %v5501_v6  ;;  %v5465_v48 = vsub.f32 1.0, %v5464_v5  ;;  %v6747_v63 = vpop.eup %6746  ;;  %v5427_v29 = vand.u32 2147483647, %v10331_v0  ;;  %v5430_v49 = vor.u32 1.1754944e-38, %v5429_v36  ;;  %v10400_v6 = vpop.permute.xlu0 %5651 }
 0x6c0   : > { %5736 = vperm.xlu1 %6502, %v5506_v54   ;;  %v5422_v3 = vadd.f32 %v10355_v19, %v5421_v2  ;;  %v5509_v41 = vmul.f32 %v6747_v63, %v10376_v7  ;;  %v5474_v34 = vand.u32 2147483648, %v10357_v1  ;;  %v5472_v31 = vand.u32 2147483647, %v10357_v1  ;;  %v10405_v1 = vpop.permute.xlu2 %5656 }
 0x6c1   : > { %v5466_v23 = vmul.f32 %v6745_v38, %v5465_v48  ;;  %vm5428_vm0 = vcmp.eq.f32.partialorder %v5427_v29, 8.507059e+37  ;;  %vm5514_vm9 = vweird.f32 %v6747_v63  ;;  %vm5513_vm1 = vweird.f32 %v10376_v7  ;;  %v10409_v48 = vpop.permute.xlu1 %5661 }
 0x6c2   : > { %v5426_v20 = vsel %vm5425_vm15, %v10355_v19, %v5422_v3  ;;  %v5510_v58 = vsub.f32 1.0, %v5509_v41  ;;  %v5475_v19 = vor.u32 1.1754944e-38, %v5474_v34  ;;  %vm5473_vm8 = vcmp.eq.f32.partialorder %v5472_v31, 8.507059e+37  ;;  %vm5515_vm3 = vmor %vm5513_vm1, %vm5514_vm9 }
 0x6c3   : > { %v5431_v28 = vsel %vm5428_vm0, %v5430_v49, %v5426_v20  ;;  %v5467_v30 = vadd.f32 %v6745_v38, %v5466_v23  ;;  %v5517_v54 = vand.u32 2147483647, %v10376_v7 }
 0x6c4   : > { %v5511_v25 = vmul.f32 %v6747_v63, %v5510_v58 }
 0x6c5   : > { %5696 = vperm.xlu0 %6501, %v5386_v62   ;;  %v5471_v0 = vsel %vm5470_vm4, %v6745_v38, %v5467_v30  ;;  %v5520_v38 = vor.u32 1.1754944e-38, %v5519_v51  ;;  %vm5518_vm6 = vcmp.eq.f32.partialorder %v5517_v54, 8.507059e+37 }
 0x6c6   : > { %v5476_v50 = vsel %vm5473_vm8, %v5475_v19, %v5471_v0  ;;  %v5512_v10 = vadd.f32 %v6747_v63, %v5511_v25 }
 0x6c8   : > { %v5516_v24 = vsel %vm5515_vm3, %v6747_v63, %v5512_v10 }
 0x6c9   : > { %v5521_v17 = vsel %vm5518_vm6, %v5520_v38, %v5516_v24 }
 0x6cd   : > { %5711 = vperm.xlu0 %6501, %v5431_v28  }
 0x6d5   : > { %5726 = vperm.xlu0 %6501, %v5476_v50  }
 0x6dd   : > { %5741 = vperm.xlu0 %6501, %v5521_v17  }
 0x6de   : > { %v4956_v2 = vpop.xlane.xlu0 %4955 }
 0x6df   : > { %v4999_v5 = vadd.f32 %v10197_v60, %v4956_v2 }
 0x6e1   : > { %v6386_v53 = vmul.f32 -1.442695, %v4999_v5 }
 0x6e2   : > { %v4959_v62 = vpop.xlane.xlu2 %4958 }
 0x6e3   : > { %6748 = vpow2.f32 %v6386_v53  ;;  %v5000_v3 = vadd.f32 %v10197_v60, %v4959_v62 }
 0x6e5   : > { %v6387_v36 = vmul.f32 -1.442695, %v5000_v3 }
 0x6e7   : > { %6750 = vpow2.f32 %v6387_v36 }
 0x6e9   : > { %v6749_v7 = vpop.eup %6748 }
 0x6ea   : > { %v5127_v63 = vadd.f32 1.0, %v6749_v7  ;;  %v4968_v29 = vpop.xlane.xlu2 %4967 }
 0x6eb   : > { %v5003_v20 = vadd.f32 %v10197_v60, %v4968_v29 }
 0x6ec   : > { %6752 = vrcp.f32 %v5127_v63  ;;  %v4962_v23 = vpop.xlane.xlu1 %4961  ;;  %v5532_v54 = vand.u32 2147483647, %v5127_v63  ;;  %v5534_v24 = vand.u32 2147483648, %v5127_v63  ;;  %vm5528_vm7 = vweird.f32 %v5127_v63 }
 0x6ed   : > { %v6751_v41 = vpop.eup %6750  ;;  %v6390_v49 = vmul.f32 -1.442695, %v5003_v20  ;;  %v5001_v28 = vadd.f32 %v10197_v60, %v4962_v23 }
 0x6ee   : > { %v5128_v30 = vadd.f32 1.0, %v6751_v41  ;;  %vm5533_vm13 = vcmp.eq.f32.partialorder %v5532_v54, 8.507059e+37  ;;  %v5535_v36 = vor.u32 1.1754944e-38, %v5534_v24 }
 0x6ef   : > { %6754 = vpow2.f32 %v6390_v49  ;;  %v6388_v58 = vmul.f32 -1.442695, %v5001_v28 }
 0x6f0   : > { %6756 = vrcp.f32 %v5128_v30  ;;  %v5549_v7 = vand.u32 2147483648, %v5128_v30  ;;  %v5547_v23 = vand.u32 2147483647, %v5128_v30  ;;  %vm5543_vm10 = vweird.f32 %v5128_v30 }
 0x6f1   : > { %6758 = vpow2.f32 %v6388_v58 }
 0x6f2   : > { %v6753_v34 = vpop.eup %6752  ;;  %v5550_v58 = vor.u32 1.1754944e-38, %v5549_v7  ;;  %vm5548_vm0 = vcmp.eq.f32.partialorder %v5547_v23, 8.507059e+37 }
 0x6f3   : > { %v5524_v31 = vmul.f32 %v6753_v34, %v5127_v63  ;;  %vm5529_vm2 = vweird.f32 %v6753_v34 }
 0x6f4   : > { %v4971_v0 = vpop.xlane.xlu1 %4970  ;;  %vm5530_vm14 = vmor %vm5528_vm7, %vm5529_vm2 }
 0x6f5   : > { %v6755_v25 = vpop.eup %6754  ;;  %v5004_v19 = vadd.f32 %v10197_v60, %v4971_v0  ;;  %v5525_v50 = vsub.f32 1.0, %v5524_v31 }
 0x6f6   : > { %v6757_v10 = vpop.eup %6756  ;;  %v5131_v51 = vadd.f32 1.0, %v6755_v25 }
 0x6f7   : > { %v6759_v38 = vpop.eup %6758  ;;  %v6391_v17 = vmul.f32 -1.442695, %v5004_v19  ;;  %v5526_v2 = vmul.f32 %v6753_v34, %v5525_v50  ;;  %v5539_v5 = vmul.f32 %v6757_v10, %v5128_v30  ;;  %vm5544_vm5 = vweird.f32 %v6757_v10 }
 0x6f8   : > { %6760 = vrcp.f32 %v5131_v51  ;;  %v5129_v53 = vadd.f32 1.0, %v6759_v38  ;;  %vm5545_vm15 = vmor %vm5543_vm10, %vm5544_vm5  ;;  %v5594_v24 = vand.u32 2147483648, %v5131_v51  ;;  %vm5588_vm12 = vweird.f32 %v5131_v51 }
 0x6f9   : > { %6762 = vpow2.f32 %v6391_v17  ;;  %v5527_v62 = vadd.f32 %v6753_v34, %v5526_v2  ;;  %v5540_v3 = vsub.f32 1.0, %v5539_v5  ;;  %v5592_v17 = vand.u32 2147483647, %v5131_v51 }
 0x6fa   : > { %6764 = vrcp.f32 %v5129_v53  ;;  %v5564_v30 = vand.u32 2147483648, %v5129_v53  ;;  %vm5558_vm1 = vweird.f32 %v5129_v53 }
 0x6fb   : > { %v5531_v29 = vsel %vm5530_vm14, %v6753_v34, %v5527_v62  ;;  %v5541_v20 = vmul.f32 %v6757_v10, %v5540_v3  ;;  %v5595_v3 = vor.u32 1.1754944e-38, %v5594_v24  ;;  %vm5593_vm9 = vcmp.eq.f32.partialorder %v5592_v17, 8.507059e+37 }
 0x6fc   : > { %v5536_v41 = vsel %vm5533_vm13, %v5535_v36, %v5531_v29  ;;  %v5565_v23 = vor.u32 1.1754944e-38, %v5564_v30 }
 0x6fd   : > { %5746 = vperm.xlu2 %6503, %v5536_v41   ;;  %v5542_v49 = vadd.f32 %v6757_v10, %v5541_v20 }
 0x6fe   : > { %v6761_v28 = vpop.eup %6760 }
 0x6ff   : > { %v6763_v31 = vpop.eup %6762  ;;  %v5546_v0 = vsel %vm5545_vm15, %v6757_v10, %v5542_v49  ;;  %v5584_v63 = vmul.f32 %v6761_v28, %v5131_v51  ;;  %vm5589_vm11 = vweird.f32 %v6761_v28  ;;  %v5562_v10 = vand.u32 2147483647, %v5129_v53 }
 0x700   : > { %v6765_v25 = vpop.eup %6764  ;;  %v5132_v19 = vadd.f32 1.0, %v6763_v31  ;;  %v5551_v50 = vsel %vm5548_vm0, %v5550_v58, %v5546_v0  ;;  %vm5590_vm8 = vmor %vm5588_vm12, %vm5589_vm11 }
 0x701   : > { %5751 = vperm.xlu1 %6502, %v5551_v50   ;;  %v5585_v54 = vsub.f32 1.0, %v5584_v63  ;;  %v5554_v34 = vmul.f32 %v6765_v25, %v5129_v53  ;;  %vm5559_vm4 = vweird.f32 %v6765_v25  ;;  %vm5563_vm6 = vcmp.eq.f32.partialorder %v5562_v10, 8.507059e+37 }
 0x702   : > { %6766 = vrcp.f32 %v5132_v19  ;;  %vm5560_vm3 = vmor %vm5558_vm1, %vm5559_vm4  ;;  %v5609_v31 = vand.u32 2147483648, %v5132_v19  ;;  %v5607_v63 = vand.u32 2147483647, %v5132_v19  ;;  %vm5603_vm7 = vweird.f32 %v5132_v19 }
 0x703   : > { %v5586_v38 = vmul.f32 %v6761_v28, %v5585_v54  ;;  %v5555_v2 = vsub.f32 1.0, %v5554_v34  ;;  %v10414_v34 = vpop.permute.xlu0 %5666 }
 0x704   : > { %vm5608_vm13 = vcmp.eq.f32.partialorder %v5607_v63, 8.507059e+37 }
 0x705   : > { %v5587_v5 = vadd.f32 %v6761_v28, %v5586_v38  ;;  %v5556_v62 = vmul.f32 %v6765_v25, %v5555_v2 }
 0x707   : > { %v5591_v36 = vsel %vm5590_vm8, %v6761_v28, %v5587_v5  ;;  %v5557_v7 = vadd.f32 %v6765_v25, %v5556_v62  ;;  %v5610_v28 = vor.u32 1.1754944e-38, %v5609_v31  ;;  %v5672_v31 = vpop.permute.xlu2 %5671 }
 0x708   : > { %v6767_v29 = vpop.eup %6766  ;;  %v5596_v20 = vsel %vm5593_vm9, %v5595_v3, %v5591_v36  ;;  %vm11179_vm9 = vcmask 261120  }
 0x709   : > { %5766 = vperm.xlu1 %6502, %v5596_v20   ;;  %v5561_v41 = vsel %vm5560_vm3, %v6765_v25, %v5557_v7  ;;  %v5599_v49 = vmul.f32 %v6767_v29, %v5132_v19  ;;  %vm5604_vm2 = vweird.f32 %v6767_v29  ;;  %vm11180_vm1 = vmmov %vm11179_vm9 }
 0x70a   : > { %v5566_v51 = vsel %vm5563_vm6, %v5565_v23, %v5561_v41  ;;  %vm5605_vm14 = vmor %vm5603_vm7, %vm5604_vm2 }
 0x70b   : > { %5756 = vperm.xlu0 %6501, %v5566_v51   ;;  %v5600_v58 = vsub.f32 1.0, %v5599_v49  ;;  %vm11181_vm3 = vmmov %vm11180_vm1 }
 0x70c   : > { %v5677_v51 = vpop.permute.xlu1 %5676  ;;  %vm11182_vm6 = vmmov %vm11180_vm1 }
 0x70d   : > { %v5601_v0 = vmul.f32 %v6767_v29, %v5600_v58  ;;  %vm11183_vm2 = vmmov %vm11180_vm1 }
 0x70e   : > { %vm11184_vm7 = vmmov %vm11180_vm1 }
 0x70f   : > { %v5602_v50 = vadd.f32 %v6767_v29, %v5601_v0 }
 0x711   : > { %v5606_v53 = vsel %vm5605_vm14, %v6767_v29, %v5602_v50  ;;  %vm11185_vm14 = vmmov %vm11180_vm1 }
 0x712   : > { %v5611_v54 = vsel %vm5608_vm13, %v5610_v28, %v5606_v53  ;;  %vm11186_vm13 = vmmov %vm11180_vm1 }
 0x713   : > { %5771 = vperm.xlu0 %6501, %v5611_v54   ;;  %v5687_v54 = vpop.permute.xlu2 %5686 }
 0x714   : > { %v10420_v50 = vpop.permute.xlu1 %5691 }
 0x71c   : > { %v4965_v25 = vpop.xlane.xlu0 %4964 }
 0x71d   : > { %v5002_v24 = vadd.f32 %v10197_v60, %v4965_v25  ;;  %v4701_v60 = vld [vmem:[%s10615_s10 + $0x4] sm:$0x1] }
 0x71f   : > { %v6389_v38 = vmul.f32 -1.442695, %v5002_v24 }
 0x721   : > { %6768 = vpow2.f32 %v6389_v38 }
 0x727   : > { %v6769_v17 = vpop.eup %6768 }
 0x728   : > { %v5130_v2 = vadd.f32 1.0, %v6769_v17 }
 0x72a   : > { %6770 = vrcp.f32 %v5130_v2  ;;  %v5579_v19 = vand.u32 2147483648, %v5130_v2  ;;  %v5577_v3 = vand.u32 2147483647, %v5130_v2  ;;  %vm5573_vm10 = vweird.f32 %v5130_v2 }
 0x72c   : > { %v5580_v7 = vor.u32 1.1754944e-38, %v5579_v19  ;;  %vm5578_vm0 = vcmp.eq.f32.partialorder %v5577_v3, 8.507059e+37 }
 0x72f   : > { %v5682_v63 = vpop.permute.xlu0 %5681 }
 0x730   : > { %v6771_v30 = vpop.eup %6770 }
 0x731   : > { %v5569_v5 = vmul.f32 %v6771_v30, %v5130_v2  ;;  %vm5574_vm5 = vweird.f32 %v6771_v30 }
 0x732   : > { %vm5575_vm15 = vmor %vm5573_vm10, %vm5574_vm5 }
 0x733   : > { %v5570_v62 = vsub.f32 1.0, %v5569_v5  ;;  %vm11187_vm5 = vmmov %vm11180_vm1 }
 0x734   : > { %vm11188_vm10 = vmmov %vm11180_vm1 }
 0x735   : > { %v5571_v10 = vmul.f32 %v6771_v30, %v5570_v62  ;;  %v5707_v62 = vpop.permute.xlu1 %5706 }
 0x737   : > { %v5572_v36 = vadd.f32 %v6771_v30, %v5571_v10  ;;  %v10422_v24 = vpop.permute.xlu0 %5696 }
 0x739   : > { %v5576_v29 = vsel %vm5575_vm15, %v6771_v30, %v5572_v36  ;;  %v5702_v36 = vpop.permute.xlu2 %5701  ;;  %vm11189_vm15 = vmmov %vm11180_vm1 }
 0x73a   : > { %v5581_v20 = vsel %vm5578_vm0, %v5580_v7, %v5576_v29  ;;  %vm11190_vm0 = vmmov %vm11180_vm1 }
 0x73b   : > { %5761 = vperm.xlu2 %6503, %v5581_v20  }
 0x73c   : > { %v4821_v23 = vpop.f32.mrf.mxu0 }
 0x73d   : > { %v4822_v41 = vadd.f32 %v4821_v23, %v4701_v60 }
 0x73f   : > { %v6359_v49 = vmul.f32 -1.442695, %v4822_v41  ;;  %v5712_v7 = vpop.permute.xlu0 %5711 }
 0x741   : > { %6772 = vpow2.f32 %v6359_v49 }
 0x747   : > { %v6773_v58 = vpop.eup %6772 }
 0x748   : > { %v4827_v0 = vadd.f32 1.0, %v6773_v58  ;;  %v5722_v58 = vpop.permute.xlu1 %5721 }
 0x74a   : > { %6774 = vrcp.f32 %v4827_v0  ;;  %v4839_v38 = vand.u32 2147483648, %v4827_v0  ;;  %v4837_v2 = vand.u32 2147483647, %v4827_v0  ;;  %vm4833_vm12 = vweird.f32 %v4827_v0 }
 0x74c   : > { %v4840_v5 = vor.u32 1.1754944e-38, %v4839_v38  ;;  %vm4838_vm8 = vcmp.eq.f32.partialorder %v4837_v2, 8.507059e+37 }
 0x750   : > { %v6775_v28 = vpop.eup %6774 }
 0x751   : > { %v4829_v53 = vmul.f32 %v6775_v28, %v4827_v0  ;;  %vm4834_vm11 = vweird.f32 %v6775_v28 }
 0x752   : > { %vm4835_vm4 = vmor %vm4833_vm12, %vm4834_vm11 }
 0x753   : > { %v4830_v25 = vsub.f32 1.0, %v4829_v53  ;;  %vm11191_vm11 = vmmov %vm11190_vm0 }
 0x754   : > { %vm11192_vm12 = vmmov %vm11190_vm0 }
 0x755   : > { %v4831_v17 = vmul.f32 %v6775_v28, %v4830_v25 }
 0x757   : > { %v4832_v30 = vadd.f32 %v6775_v28, %v4831_v17 }
 0x759   : > { %v4836_v19 = vsel %vm4835_vm4, %v6775_v28, %v4832_v30  ;;  %vm11193_vm4 = vmmov %vm11190_vm0 }
 0x75a   : > { %v4841_v10 = vsel %vm4838_vm8, %v4840_v5, %v4836_v19  ;;  %vm11194_vm8 = vmmov %vm11190_vm0 }
 0x75b   : > { %v10424_v3 = vperm.slane %v4841_v10, 0 }
 0x75d   : > { %v5774_v29 = vadd.f32 %v10133_v21, %v10424_v3  ;;  %v5775_v20 = vadd.f32 %v10149_v22, %v10424_v3  ;;  %v5776_v60 = vadd.f32 %v10227_v37, %v10424_v3  ;;  %v5777_v23 = vadd.f32 %v10218_v9, %v10424_v3 }
 0x75e   : > { %v5778_v41 = vadd.f32 %v10267_v43, %v10424_v3  ;;  %v5793_v49 = vadd.f32 %v5712_v7, %v10424_v3  ;;  %v5779_v0 = vadd.f32 %v10270_v15, %v10424_v3  ;;  %v5780_v22 = vadd.f32 %v10297_v47, %v10424_v3  ;;  %v5727_v47 = vpop.permute.xlu0 %5726 }
 0x75f   : > { %v5806_v21 = vmul.f32 %v5774_v29, %v9629_v55  ;;  %v5807_v28 = vmul.f32 %v5775_v20, %v9650_v8  ;;  %v5808_v9 = vmul.f32 %v5776_v60, %v9637_v40  ;;  %v5809_v53 = vmul.f32 %v5777_v23, %v9656_v16  ;;  %v5717_v55 = vpop.permute.xlu2 %5716  ;;  %v11203_v60 = vld [vmem:[#allocation15_spill] sm:$0xff] }
 0x760   : > { %v5825_v37 = vmul.f32 %v5793_v49, %v9825_v14  ;;  %v5781_v8 = vadd.f32 %v10400_v6, %v10424_v3  ;;  %v5810_v40 = vmul.f32 %v5778_v41, %v9667_v52  ;;  %v5782_v16 = vadd.f32 %v10405_v1, %v10424_v3  ;;  %v11205_v41 = vld [vmem:[#allocation21_spill] sm:$0xff] }
 0x761   : > { %5838 = vst.msk [vmem:[%s10448_s19] sm:$0xff] %vm11179_vm9, %v5806_v21  ;;  %v5811_v14 = vmul.f32 %v5779_v0, %v9670_v45  ;;  %v5783_v43 = vadd.f32 %v10409_v48, %v10424_v3  ;;  %v5812_v15 = vmul.f32 %v5780_v22, %v9685_v59  ;;  %v5784_v52 = vadd.f32 %v10414_v34, %v10424_v3  ;;  %v5737_v59 = vpop.permute.xlu1 %5736  ;;  %vm11195_vm9 = vmmov %vm11190_vm0  ;;  %v11208_v0 = vld [vmem:[#allocation13_spill] sm:$0xff] }
 0x762   : > { %5857 = vst.msk [vmem:[%s10448_s19 + $0x98] sm:$0xff] %vm11180_vm1, %v5825_v37  ;;  %v5796_v6 = vadd.f32 %v5727_v47, %v10424_v3  ;;  %v5785_v45 = vadd.f32 %v5672_v31, %v10424_v3  ;;  %v5813_v1 = vmul.f32 %v5781_v8, %v9696_v13  ;;  %v5786_v48 = vadd.f32 %v5677_v51, %v10424_v3  ;;  %vm11196_vm1 = vmmov %vm11190_vm0  ;;  %v11210_v22 = vld [vmem:[#allocation17_spill] sm:$0xff] }
 0x763   : > { %5839 = vst.msk [vmem:[%s10448_s19 + $0x8] sm:$0xff] %vm11181_vm3, %v5807_v28  ;;  %v5814_v25 = vmul.f32 %v5782_v16, %v9703_v18  ;;  %v5787_v38 = vadd.f32 %v5682_v63, %v10424_v3  ;;  %v5815_v31 = vmul.f32 %v5783_v43, %v9710_v32  ;;  %v5788_v13 = vadd.f32 %v5687_v54, %v10424_v3  ;;  %vm11197_vm3 = vmmov %vm11190_vm0 }
 0x764   : > { %5840 = vst.msk [vmem:[%s10448_s19 + $0x10] sm:$0xff] %vm11182_vm6, %v5808_v9  ;;  %v5828_v34 = vmul.f32 %v5796_v6, %v9904_v56  ;;  %v5816_v17 = vmul.f32 %v5784_v52, %v9717_v26  ;;  %v5789_v56 = vadd.f32 %v10420_v50, %v10424_v3  ;;  %v5817_v51 = vmul.f32 %v5785_v45, %v9731_v46  ;;  %vm11198_vm6 = vmmov %vm11190_vm0 }
 0x765   : > { %5841 = vst.msk [vmem:[%s10448_s19 + $0x18] sm:$0xff] %vm11183_vm2, %v5809_v53  ;;  %v5790_v32 = vadd.f32 %v10422_v24, %v10424_v3  ;;  %v5818_v63 = vmul.f32 %v5786_v48, %v9742_v42  ;;  %v5791_v26 = vadd.f32 %v5702_v36, %v10424_v3  ;;  %v5819_v54 = vmul.f32 %v5787_v38, %v9753_v11  ;;  %vm11199_vm2 = vmmov %vm11190_vm0 }
 0x766   : > { %5842 = vst.msk [vmem:[%s10448_s19 + $0x20] sm:$0xff] %vm11184_vm7, %v5810_v40  ;;  %v5792_v46 = vadd.f32 %v5707_v62, %v10424_v3  ;;  %v5820_v50 = vmul.f32 %v5788_v13, %v9764_v27  ;;  %v5794_v24 = vadd.f32 %v5717_v55, %v10424_v3  ;;  %v5821_v42 = vmul.f32 %v5789_v56, %v9775_v12  ;;  %vm11200_vm7 = vmmov %vm11190_vm0  ;;  %v11213_v55 = vld [vmem:[#allocation18_spill] sm:$0xff] }
 0x767   : > { %5843 = vst.msk [vmem:[%s10448_s19 + $0x28] sm:$0xff] %vm11185_vm14, %v5811_v14  ;;  %v5732_v18 = vpop.permute.xlu2 %5731  ;;  %v5795_v2 = vadd.f32 %v5722_v58, %v10424_v3  ;;  %v5822_v11 = vmul.f32 %v5790_v32, %v9786_v61  ;;  %v5823_v5 = vmul.f32 %v5791_v26, %v9797_v44  ;;  %v5798_v12 = vadd.f32 %v5737_v59, %v10424_v3  ;;  %v5742_v61 = vpop.permute.xlu0 %5741  ;;  %vm11202_vm14 = vmmov %vm11190_vm0  ;;  %v11215_v14 = vld [vmem:[#allocation23_spill] sm:$0xff] }
 0x768   : > { %5844 = vst.msk [vmem:[%s10448_s19 + $0x30] sm:$0xff] %vm11186_vm13, %v5812_v15  ;;  %v5797_v27 = vadd.f32 %v5732_v18, %v10424_v3  ;;  %v5824_v62 = vmul.f32 %v5792_v46, %v9808_v39  ;;  %v5826_v19 = vmul.f32 %v5794_v24, %v9855_v33  ;;  %v5799_v10 = vadd.f32 %v5742_v61, %v10424_v3  ;;  %vm11204_vm13 = vmmov %vm11190_vm0 }
 0x769   : > { %5860 = vst.msk [vmem:[%s10448_s19 + $0xb0] sm:$0xff] %vm11187_vm5, %v5828_v34  ;;  %v5827_v36 = vmul.f32 %v5795_v2, %v9877_v4  ;;  %v5830_v29 = vmul.f32 %v5798_v12, %v10044_v57  ;;  %v11201_v4 = vld [vmem:[#allocation14_spill] sm:$0xff]  ;;  %vm11206_vm5 = vmmov %vm11190_vm0 }
 0x76a   : > { %5845 = vst.msk [vmem:[%s10448_s19 + $0x38] sm:$0xff] %vm11188_vm10, %v5813_v1  ;;  %v5829_v39 = vmul.f32 %v5797_v27, %v10035_v35  ;;  %v5831_v20 = vmul.f32 %v5799_v10, %v11201_v4  ;;  %vm11207_vm10 = vmmov %vm11190_vm0 }
 0x76b   : > { %5846 = vst.msk [vmem:[%s10448_s19 + $0x40] sm:$0xff] %vm11189_vm15, %v5814_v25  ;;  %vm11209_vm15 = vmmov %vm11190_vm0 }
 0x76c   : > { %5847 = vst.msk [vmem:[%s10448_s19 + $0x48] sm:$0xff] %vm11190_vm0, %v5815_v31 }
 0x76d   : > { %5848 = vst.msk [vmem:[%s10448_s19 + $0x50] sm:$0xff] %vm11191_vm11, %v5816_v17  ;;  %vm11211_vm11 = vmmov %vm11190_vm0 }
 0x76e   : > { %5849 = vst.msk [vmem:[%s10448_s19 + $0x58] sm:$0xff] %vm11192_vm12, %v5817_v51  ;;  %vm11212_vm12 = vmmov %vm11190_vm0 }
 0x76f   : > { %5850 = vst.msk [vmem:[%s10448_s19 + $0x60] sm:$0xff] %vm11193_vm4, %v5818_v63  ;;  %v5747_v44 = vpop.permute.xlu2 %5746  ;;  %vm11214_vm4 = vmmov %vm11190_vm0 }
 0x770   : > { %5851 = vst.msk [vmem:[%s10448_s19 + $0x68] sm:$0xff] %vm11194_vm8, %v5819_v54  ;;  %v5800_v7 = vadd.f32 %v5747_v44, %v10424_v3  ;;  %vm11216_vm8 = vmmov %vm11190_vm0 }
 0x771   : > { %5852 = vst.msk [vmem:[%s10448_s19 + $0x70] sm:$0xff] %vm11195_vm9, %v5820_v50 }
 0x772   : > { %5853 = vst.msk [vmem:[%s10448_s19 + $0x78] sm:$0xff] %vm11196_vm1, %v5821_v42  ;;  %v5832_v35 = vmul.f32 %v5800_v7, %v11203_v60 }
 0x773   : > { %v5752_v30 = vpop.permute.xlu1 %5751  ;;  %5854 = vst.msk [vmem:[%s10448_s19 + $0x80] sm:$0xff] %vm11197_vm3, %v5822_v11 }
 0x774   : > { %5855 = vst.msk [vmem:[%s10448_s19 + $0x88] sm:$0xff] %vm11198_vm6, %v5823_v5  ;;  %v5801_v33 = vadd.f32 %v5752_v30, %v10424_v3 }
 0x775   : > { %5856 = vst.msk [vmem:[%s10448_s19 + $0x90] sm:$0xff] %vm11199_vm2, %v5824_v62 }
 0x776   : > { %5858 = vst.msk [vmem:[%s10448_s19 + $0xa0] sm:$0xff] %vm11200_vm7, %v5826_v19  ;;  %v5833_v49 = vmul.f32 %v5801_v33, %v11205_v41 }
 0x777   : > { %5859 = vst.msk [vmem:[%s10448_s19 + $0xa8] sm:$0xff] %vm11202_vm14, %v5827_v36 }
 0x778   : > { %5861 = vst.msk [vmem:[%s10448_s19 + $0xb8] sm:$0xff] %vm11204_vm13, %v5829_v39 }
 0x779   : > { %5862 = vst.msk [vmem:[%s10448_s19 + $0xc0] sm:$0xff] %vm11206_vm5, %v5830_v29 }
 0x77a   : > { %5863 = vst.msk [vmem:[%s10448_s19 + $0xc8] sm:$0xff] %vm11207_vm10, %v5831_v20 }
 0x77b   : > { %v5767_v23 = vpop.permute.xlu1 %5766  ;;  %5864 = vst.msk [vmem:[%s10448_s19 + $0xd0] sm:$0xff] %vm11209_vm15, %v5832_v35 }
 0x77c   : > { %v5804_v57 = vadd.f32 %v5767_v23, %v10424_v3  ;;  %5865 = vst.msk [vmem:[%s10448_s19 + $0xd8] sm:$0xff] %vm11190_vm0, %v5833_v49 }
 0x77d   : > { %v5757_v58 = vpop.permute.xlu0 %5756 }
 0x77e   : > { %v5836_v21 = vmul.f32 %v5804_v57, %v11208_v0  ;;  %v5802_v28 = vadd.f32 %v5757_v58, %v10424_v3 }
 0x780   : > { %v5834_v37 = vmul.f32 %v5802_v28, %v11210_v22  ;;  %5868 = vst.msk [vmem:[%s10448_s19 + $0xf0] sm:$0xff] %vm11211_vm11, %v5836_v21 }
 0x782   : > { %5866 = vst.msk [vmem:[%s10448_s19 + $0xe0] sm:$0xff] %vm11212_vm12, %v5834_v37 }
 0x785   : > { %v5772_v9 = vpop.permute.xlu0 %5771 }
 0x786   : > { %v5805_v53 = vadd.f32 %v5772_v9, %v10424_v3 }
 0x788   : > { %v5837_v8 = vmul.f32 %v5805_v53, %v11213_v55 }
 0x78a   : > { %5869 = vst.msk [vmem:[%s10448_s19 + $0xf8] sm:$0xff] %vm11214_vm4, %v5837_v8 }
 0x795   : > { %v5762_v40 = vpop.permute.xlu2 %5761 }
 0x796   : > { %v5803_v16 = vadd.f32 %v5762_v40, %v10424_v3 }
 0x798   : > { %v5835_v43 = vmul.f32 %v5803_v16, %v11215_v14 }
 0x79a   : > { %5867 = vst.msk [vmem:[%s10448_s19 + $0xe8] sm:$0xff] %vm11216_vm8, %v5835_v43 }
 0x79b   : > { %6884 = shalt.err (!%p6881_p4)
}
 0x79c   : > { %s6931_s22 = smov 128   ;;  %s6932_s19 = smov 8  }
 0x79d   : > { %6449 = dma.vmem_to_hbm [thread:$0]  (%p7043_p11), %s5884_s25, 4096, %s5886_s28, %s5871_s14, %s6931_s22, %s6931_s22, %s6932_s19  }
 0x79e PF: > { %s11217_s17 = sld [smem:[#allocation8_spill]]  ;;  %p11219_p7 = scmp.ge.s32.totalorder %s6923_s20, 2 }
 0x7a0   : > { %p6456_p5 = pnand %p11219_p7, %p7047_p12 }
 0x7a2   : > { %p6457_p8 = pneg %p6456_p5 }
 0x7a4   : > { %s5900_s13 = sand.u32 1, %s11217_s17  }
 0x7a5   : > { %s5901_s26 = scalar_lea.sflag [#allocation4], %s5900_s13 }
 0x7a6   : > { %6906 = dma.done.wait (%p6457_p8), %s5901_s26, 4096  }
 0x7a7   : > { %6908 = vsyncadd (%p6457_p8), %s5901_s26, 4294963200  ;;  %s11220_s20 = sld [smem:[#allocation10_spill]]  ;;  %s11223_s17 = smov %s6915_s18 }
 0x7a8   : > { %s11221_s16 = sld [smem:[#allocation9_spill]] }
 0x7a9   : > { %s11222_s19 = sld [smem:[#allocation11_spill]] }
 0x7ad   : > { %p24_p10 = scmp.ge.s32.totalorder %s11220_s20, 4  }
 0x7ae   : > { %s11224_s18 = smov %s11221_s16 }
 0x7af   :  { %26 = sbr.rel (!%p24_p10) target bundleno = 5 (0x5), region = 113 }
 0x7b4   :  { %5907 = vsyncpa [#allocation3], 1 }
 0x7b5   :  { %5909 = vsyncpa [#allocation3 + $0x1], 1 }
 0x7b6   :  { %5910 = vsyncpa [#allocation4], 1 }
 0x7b7   :  { %5912 = vsyncpa [#allocation4 + $0x1], 1 }

</bundles_post_ra>
